<compile_context>
chip_gen: v7x
topology: tpu7x:2x2x1
jax: 0.10.0
libtpu: 0.0.40
codegen_flags: <defaults>
</compile_context>

<pallas_src>
import functools

import jax
import jax.numpy as jnp
import numpy as np
from jax import lax
from jax.experimental import pallas as pl
from jax.experimental.pallas import tpu as pltpu

# ---------------- module constants ----------------
M = 100                     # max_size (table_mesh=False)
M_PAD = 128                 # padded node count -> (8,128)-aligned tiles
IN_DIM = 7                  # first 3 channels are positions
IN_PAD = 8                  # feature pad 7 -> 8
INNER = 256                 # inner_dim
LATENT = 32
OUT_PAD = 128               # lane-dense padded layer-4 / output width
EXT = INNER + 128           # GAT layers 1-3 extended weight width (att_dst column block)
DIST_THRESH_SQ = 0.03 ** 2
NEG_INF = -1e30

# ---------------- small demo sizes ----------------
B = 2


# =====================================================================
# Fused GeomEncoder kernel: G graphs per grid program.
# =====================================================================
def _geom_encoder_kernel(x_ref, tri_ref, vec_ref,
                         wr_ref, w1_ref, w2_ref, w3_ref, w4_ref,
                         out_ref, *, G):
    # vec rows: 0 br | 1 a1s | 2 b1 | 3 a2s | 4 b2 | 5 a3s | 6 b3 | 7 a4s | 8 b4
    vec = vec_ref[...]                                                # (16, 256) f32
    tri = tri_ref[...]                                                # (128,128) additive mask
    xg = x_ref[...]                                                   # (G, 128, 8) f32

    # ---- per-graph additive attention mask: distance test + static structure ----
    masks = []
    for g in range(G):
        pos = xg[g, :, :3]                                            # (128, 3)
        sq = pos * pos
        sq_col = jnp.sum(sq, axis=1, keepdims=True)                   # (128, 1)
        sq_row = lax.dot_general(jnp.ones((1, 3), jnp.float32), sq,
                                 (((1,), (1,)), ((), ())),
                                 preferred_element_type=jnp.float32)  # (1, 128)
        gram = lax.dot_general(pos, pos, (((1,), (1,)), ((), ())),
                               preferred_element_type=jnp.float32)    # (128, 128)
        d2 = sq_col + sq_row - 2.0 * gram                             # ||pos_t - pos_s||^2
        masks.append(jnp.where(d2 < DIST_THRESH_SQ, tri, NEG_INF))    # 0 on edges, -1e30 off

    # ---- remap + ReLU (graphs stacked on the sublane axis, bf16 MXU, f32 acc) ----
    x2 = xg.reshape(G * M_PAD, IN_PAD)
    h = jnp.dot(x2.astype(jnp.bfloat16), wr_ref[...],
                preferred_element_type=jnp.float32) + vec[0:1, :]
    h = jnp.maximum(h, 0.0)                                           # (G*128, 256) f32

    def gat(h_in, w_ref, a_src, bias, out_cols, dst_col):
        # w_ref packs [W | W @ att_dst^T | 0-pad]: s_dst rides the main matmul.
        hp_ext = jnp.dot(h_in.astype(jnp.bfloat16), w_ref[...],
                         preferred_element_type=jnp.float32)          # (G*128, EXT) f32
        outs = []
        for g in range(G):
            blk = hp_ext[g * M_PAD:(g + 1) * M_PAD]
            hp = blk[:, :out_cols]                                    # (128, out_cols)
            s_dst = blk[:, dst_col:dst_col + 1]                       # (128, 1)
            s_src = lax.dot_general(a_src, hp, (((1,), (1,)), ((), ())),
                                    preferred_element_type=jnp.float32)  # (1, 128)
            e = s_dst + s_src                                         # e[target, source]
            e = jnp.where(e > 0, e, 0.2 * e) + masks[g]               # LeakyReLU(0.2) + mask
            e = e - jnp.max(e, axis=1, keepdims=True)                 # softmax over sources
            p = jnp.exp(e)
            p = p * pl.reciprocal(jnp.sum(p, axis=1, keepdims=True), approx=True)
            outs.append(jnp.dot(p.astype(jnp.bfloat16), hp.astype(jnp.bfloat16),
                                preferred_element_type=jnp.float32))
        out = outs[0] if G == 1 else jnp.concatenate(outs, axis=0)
        return out + bias

    # x = relu(conv(x) + x) on the first three layers, plain conv4 at the end.
    h = jnp.maximum(gat(h, w1_ref, vec[1:2, :], vec[2:3, :], INNER, INNER) + h, 0.0)
    h = jnp.maximum(gat(h, w2_ref, vec[3:4, :], vec[4:5, :], INNER, INNER) + h, 0.0)
    h = jnp.maximum(gat(h, w3_ref, vec[5:6, :], vec[6:7, :], INNER, INNER) + h, 0.0)
    out = gat(h, w4_ref, vec[7:8, :OUT_PAD], vec[8:9, :OUT_PAD], OUT_PAD, LATENT)

    for g in range(G):
        out_ref[g] = out[g * M_PAD:(g + 1) * M_PAD]                   # (128, 128) lane-dense


# =====================================================================
# Wrapper
# =====================================================================
def _whole_spec(shape):
    nd = len(shape)
    return pl.BlockSpec(shape, lambda i, _nd=nd: (0,) * _nd)          # revisited every step


def _default_graphs_per_program(batch):
    # Multi-TensorCore parts (v7x, and v3/v4/v5p megacore): keep one graph per
    # program so the "parallel" batch axis is split across cores.  Single-TC
    # chips (v5e / v6e) run the grid serially -> collapse the batch into one
    # program (saves per-step overhead, stacks matmuls to 256 rows).
    try:
        kind = jax.devices()[0].device_kind.lower()
    except Exception:
        kind = ""
    multi_core = any(tag in kind for tag in ("v7", "v4", "v5p", "v3"))
    return 1 if multi_core else batch


def geom_encoder_forward(params, x, *, graphs_per_program=None):
    batch = x.shape[0]
    G = graphs_per_program if graphs_per_program is not None else _default_graphs_per_program(batch)
    assert batch % G == 0
    n_prog = batch // G

    # zero-pad nodes 100 -> 128 and features 7 -> 8
    x_pad = jnp.pad(x, ((0, 0), (0, M_PAD - M), (0, IN_PAD - IN_DIM)))

    tri, vec = params["tri"], params["vec"]
    weights = (params["wr"], params["w1"], params["w2"], params["w3"], params["w4"])

    in_specs = [pl.BlockSpec((G, M_PAD, IN_PAD), lambda i: (i, 0, 0)),
                _whole_spec(tri.shape),
                _whole_spec(vec.shape)]
    in_specs += [_whole_spec(w.shape) for w in weights]

    flops = 2 * batch * (M_PAD * IN_PAD * INNER
                         + 3 * (M_PAD * INNER * EXT + M_PAD * M_PAD * INNER)
                         + (M_PAD * INNER * OUT_PAD + M_PAD * M_PAD * OUT_PAD)
                         + M_PAD * 3 * M_PAD)
    transcendentals = batch * 4 * M_PAD * M_PAD
    bytes_accessed = (x_pad.size * 4 + tri.size * 4 + vec.size * 4
                      + sum(int(w.size) * 2 for w in weights)
                      + batch * M_PAD * OUT_PAD * 4)

    out = pl.pallas_call(
        functools.partial(_geom_encoder_kernel, G=G),
        out_shape=jax.ShapeDtypeStruct((batch, M_PAD, OUT_PAD), jnp.float32),
        grid=(n_prog,),
        in_specs=in_specs,
        out_specs=pl.BlockSpec((G, M_PAD, OUT_PAD), lambda i: (i, 0, 0)),
        compiler_params=pltpu.CompilerParams(
            dimension_semantics=("parallel",)),
        cost_estimate=pl.CostEstimate(flops=flops,
                                      transcendentals=transcendentals,
                                      bytes_accessed=bytes_accessed),
    )(x_pad, tri, vec, *weights)

    return out[:, :M, :LATENT]                                        # drop node / lane padding


# =====================================================================
# Parameter init: PyTorch (out, in) weights -> (in, out) with the att_dst
# column folded in; small vectors packed into one (16, 256) f32 operand.
# =====================================================================
def init_params(key):
    ks = jax.random.split(key, 5)
    scale = 0.1
    p = {}

    # remap: nn.Linear(in_dim, inner)
    kw, kb = jax.random.split(ks[0])
    w_remap = scale * jax.random.normal(kw, (INNER, IN_DIM), jnp.float32)   # torch (out, in)
    b_remap = scale * jax.random.normal(kb, (INNER,), jnp.float32)
    p["wr"] = jnp.pad(w_remap.T, ((0, IN_PAD - IN_DIM), (0, 0))).astype(jnp.bfloat16)

    def gat_layer(k, out_dim, ext_dim, dst_col):
        kw_, ks_, kd_, kb_ = jax.random.split(k, 4)
        w = scale * jax.random.normal(kw_, (out_dim, INNER), jnp.float32)   # lin (no bias)
        a_src = scale * jax.random.normal(ks_, (1, out_dim), jnp.float32)
        a_dst = scale * jax.random.normal(kd_, (1, out_dim), jnp.float32)
        bias = scale * jax.random.normal(kb_, (1, out_dim), jnp.float32)
        wt = w.T                                                            # (INNER, out)
        w_ext = jnp.zeros((INNER, ext_dim), jnp.float32)
        w_ext = w_ext.at[:, :out_dim].set(wt)
        w_ext = w_ext.at[:, dst_col:dst_col + 1].set(wt @ a_dst.T)          # fold att_dst
        a_row = jnp.zeros((1, INNER), jnp.float32).at[:, :out_dim].set(a_src)
        b_row = jnp.zeros((1, INNER), jnp.float32).at[:, :out_dim].set(bias)
        return w_ext.astype(jnp.bfloat16), a_row, b_row

    p["w1"], a1, b1 = gat_layer(ks[1], INNER, EXT, INNER)
    p["w2"], a2, b2 = gat_layer(ks[2], INNER, EXT, INNER)
    p["w3"], a3, b3 = gat_layer(ks[3], INNER, EXT, INNER)
    p["w4"], a4, b4 = gat_layer(ks[4], LATENT, OUT_PAD, LATENT)

    rows = [b_remap.reshape(1, INNER), a1, b1, a2, b2, a3, b3, a4, b4]
    vec = jnp.zeros((16, INNER), jnp.float32)
    for i, r in enumerate(rows):
        vec = vec.at[i, :].set(r[0])
    p["vec"] = vec

    # static structural mask: 0 where source <= target (strict lower tri + diag self loops)
    idx = np.arange(M_PAD)
    p["tri"] = jnp.asarray(
        np.where(idx[None, :] <= idx[:, None], 0.0, NEG_INF).astype(np.float32))
    return p


if __name__ == "__main__":
    key = jax.random.PRNGKey(0)
    kp, kx = jax.random.split(key)

    params = init_params(kp)

    x = jax.random.normal(kx, (B, M, IN_DIM), jnp.float32)
    # scale positions so the dist < 0.03 edge mask is non-trivial
    x = x.at[:, :, :3].multiply(0.02)

    fwd = jax.jit(geom_encoder_forward)
    out = fwd(params, x)
    jax.block_until_ready(out)

    assert out.shape == (B, M, LATENT)
    assert bool(jnp.all(jnp.isfinite(out)))
    print("KERNEL_OK")
</pallas_src>

<mosaic_0001>
module attributes {stable_mosaic.version = 11 : i64} {
  func.func @_geom_encoder_kernel(%arg0: i32, %arg1: memref<2x128x8xf32, #tpu.memory_space<vmem>>, %arg2: memref<128x128xf32, #tpu.memory_space<vmem>>, %arg3: memref<16x256xf32, #tpu.memory_space<vmem>>, %arg4: memref<8x256xbf16, #tpu.memory_space<vmem>>, %arg5: memref<256x384xbf16, #tpu.memory_space<vmem>>, %arg6: memref<256x384xbf16, #tpu.memory_space<vmem>>, %arg7: memref<256x384xbf16, #tpu.memory_space<vmem>>, %arg8: memref<256x128xbf16, #tpu.memory_space<vmem>>, %arg9: memref<2x128x128xf32, #tpu.memory_space<vmem>>) attributes {dimension_semantics = [#tpu.dimension_semantics<parallel>], iteration_bounds = array<i64: 1>, scalar_prefetch = 0 : i64, scratch_operands = 0 : i64, tpu.core_type = #tpu.core_type<tc>, window_params = [{transform_indices = @transform_0, window_bounds = array<i64: 2, 128, 8>}, {pipeline_mode = #tpu.pipeline_mode<synchronous>, transform_indices = @transform_1, window_bounds = array<i64: 128, 128>}, {pipeline_mode = #tpu.pipeline_mode<synchronous>, transform_indices = @transform_2, window_bounds = array<i64: 16, 256>}, {pipeline_mode = #tpu.pipeline_mode<synchronous>, transform_indices = @transform_3, window_bounds = array<i64: 8, 256>}, {pipeline_mode = #tpu.pipeline_mode<synchronous>, transform_indices = @transform_4, window_bounds = array<i64: 256, 384>}, {pipeline_mode = #tpu.pipeline_mode<synchronous>, transform_indices = @transform_5, window_bounds = array<i64: 256, 384>}, {pipeline_mode = #tpu.pipeline_mode<synchronous>, transform_indices = @transform_6, window_bounds = array<i64: 256, 384>}, {pipeline_mode = #tpu.pipeline_mode<synchronous>, transform_indices = @transform_7, window_bounds = array<i64: 256, 128>}, {transform_indices = @transform_8, window_bounds = array<i64: 2, 128, 128>}]} {
    %c0 = arith.constant 0 : index
    %c0_0 = arith.constant 0 : index
    %0 = vector.load %arg3[%c0, %c0_0] : memref<16x256xf32, #tpu.memory_space<vmem>>, vector<16x256xf32>
    %c0_1 = arith.constant 0 : index
    %c0_2 = arith.constant 0 : index
    %1 = vector.load %arg2[%c0_1, %c0_2] : memref<128x128xf32, #tpu.memory_space<vmem>>, vector<128x128xf32>
    %c0_3 = arith.constant 0 : index
    %c0_4 = arith.constant 0 : index
    %c0_5 = arith.constant 0 : index
    %2 = vector.load %arg1[%c0_3, %c0_4, %c0_5] : memref<2x128x8xf32, #tpu.memory_space<vmem>>, vector<2x128x8xf32>
    %3 = vector.extract_strided_slice %2 {offsets = [0, 0, 0], sizes = [1, 128, 3], strides = [1, 1, 1]} : vector<2x128x8xf32> to vector<1x128x3xf32>
    %4 = vector.shape_cast %3 : vector<1x128x3xf32> to vector<128x3xf32>
    %5 = arith.mulf %4, %4 : vector<128x3xf32>
    %cst = arith.constant dense<0.000000e+00> : vector<128xf32>
    %6 = vector.multi_reduction <add>, %5, %cst [1] : vector<128x3xf32> to vector<128xf32>
    %7 = vector.shape_cast %6 : vector<128xf32> to vector<128x1xf32>
    %cst_6 = arith.constant 1.000000e+00 : f32
    %8 = vector.broadcast %cst_6 : f32 to vector<1x3xf32>
    %cst_7 = arith.constant dense<0.000000e+00> : vector<1x128xf32>
    %9 = tpu.matmul %8, %5, %cst_7 {dimension_numbers = #tpu.dot_dimension_numbers<[1], [1], [0], [0], [0, 0, 1, 0], [], []>} : vector<1x3xf32>, vector<128x3xf32>, vector<1x128xf32> -> vector<1x128xf32>
    %cst_8 = arith.constant dense<0.000000e+00> : vector<128x128xf32>
    %10 = tpu.matmul %4, %4, %cst_8 {dimension_numbers = #tpu.dot_dimension_numbers<[1], [1], [0], [0], [0, 0, 1, 0], [], []>} : vector<128x3xf32>, vector<128x3xf32>, vector<128x128xf32> -> vector<128x128xf32>
    %11 = vector.broadcast %7 : vector<128x1xf32> to vector<128x128xf32>
    %12 = vector.broadcast %9 : vector<1x128xf32> to vector<128x128xf32>
    %13 = arith.addf %11, %12 : vector<128x128xf32>
    %cst_9 = arith.constant 2.000000e+00 : f32
    %14 = vector.broadcast %cst_9 : f32 to vector<128x128xf32>
    %15 = arith.mulf %14, %10 : vector<128x128xf32>
    %16 = arith.subf %13, %15 : vector<128x128xf32>
    %cst_10 = arith.constant 8.99999984E-4 : f32
    %17 = vector.broadcast %cst_10 : f32 to vector<128x128xf32>
    %18 = arith.cmpf olt, %16, %17 : vector<128x128xf32>
    %cst_11 = arith.constant -1.000000e+30 : f32
    %19 = vector.broadcast %cst_11 : f32 to vector<128x128xf32>
    %20 = arith.select %18, %1, %19 : vector<128x128xi1>, vector<128x128xf32>
    %21 = vector.extract_strided_slice %2 {offsets = [1, 0, 0], sizes = [1, 128, 3], strides = [1, 1, 1]} : vector<2x128x8xf32> to vector<1x128x3xf32>
    %22 = vector.shape_cast %21 : vector<1x128x3xf32> to vector<128x3xf32>
    %23 = arith.mulf %22, %22 : vector<128x3xf32>
    %cst_12 = arith.constant dense<0.000000e+00> : vector<128xf32>
    %24 = vector.multi_reduction <add>, %23, %cst_12 [1] : vector<128x3xf32> to vector<128xf32>
    %25 = vector.shape_cast %24 : vector<128xf32> to vector<128x1xf32>
    %cst_13 = arith.constant 1.000000e+00 : f32
    %26 = vector.broadcast %cst_13 : f32 to vector<1x3xf32>
    %cst_14 = arith.constant dense<0.000000e+00> : vector<1x128xf32>
    %27 = tpu.matmul %26, %23, %cst_14 {dimension_numbers = #tpu.dot_dimension_numbers<[1], [1], [0], [0], [0, 0, 1, 0], [], []>} : vector<1x3xf32>, vector<128x3xf32>, vector<1x128xf32> -> vector<1x128xf32>
    %cst_15 = arith.constant dense<0.000000e+00> : vector<128x128xf32>
    %28 = tpu.matmul %22, %22, %cst_15 {dimension_numbers = #tpu.dot_dimension_numbers<[1], [1], [0], [0], [0, 0, 1, 0], [], []>} : vector<128x3xf32>, vector<128x3xf32>, vector<128x128xf32> -> vector<128x128xf32>
    %29 = vector.broadcast %25 : vector<128x1xf32> to vector<128x128xf32>
    %30 = vector.broadcast %27 : vector<1x128xf32> to vector<128x128xf32>
    %31 = arith.addf %29, %30 : vector<128x128xf32>
    %cst_16 = arith.constant 2.000000e+00 : f32
    %32 = vector.broadcast %cst_16 : f32 to vector<128x128xf32>
    %33 = arith.mulf %32, %28 : vector<128x128xf32>
    %34 = arith.subf %31, %33 : vector<128x128xf32>
    %cst_17 = arith.constant 8.99999984E-4 : f32
    %35 = vector.broadcast %cst_17 : f32 to vector<128x128xf32>
    %36 = arith.cmpf olt, %34, %35 : vector<128x128xf32>
    %cst_18 = arith.constant -1.000000e+30 : f32
    %37 = vector.broadcast %cst_18 : f32 to vector<128x128xf32>
    %38 = arith.select %36, %1, %37 : vector<128x128xi1>, vector<128x128xf32>
    %39 = vector.shape_cast %2 : vector<2x128x8xf32> to vector<256x8xf32>
    %40 = arith.truncf %39 : vector<256x8xf32> to vector<256x8xbf16>
    %c0_19 = arith.constant 0 : index
    %c0_20 = arith.constant 0 : index
    %41 = vector.load %arg4[%c0_19, %c0_20] : memref<8x256xbf16, #tpu.memory_space<vmem>>, vector<8x256xbf16>
    %cst_21 = arith.constant dense<0.000000e+00> : vector<256x256xf32>
    %42 = tpu.matmul %40, %41, %cst_21 {dimension_numbers = #tpu.dot_dimension_numbers<[1], [0], [0], [1], [0, 0, 1, 1], [], []>} : vector<256x8xbf16>, vector<8x256xbf16>, vector<256x256xf32> -> vector<256x256xf32>
    %43 = vector.extract_strided_slice %0 {offsets = [0, 0], sizes = [1, 256], strides = [1, 1]} : vector<16x256xf32> to vector<1x256xf32>
    %44 = vector.broadcast %43 : vector<1x256xf32> to vector<256x256xf32>
    %45 = arith.addf %42, %44 : vector<256x256xf32>
    %cst_22 = arith.constant 0.000000e+00 : f32
    %46 = vector.broadcast %cst_22 : f32 to vector<256x256xf32>
    %47 = arith.maximumf %45, %46 : vector<256x256xf32>
    %48 = vector.extract_strided_slice %0 {offsets = [1, 0], sizes = [1, 256], strides = [1, 1]} : vector<16x256xf32> to vector<1x256xf32>
    %49 = vector.extract_strided_slice %0 {offsets = [2, 0], sizes = [1, 256], strides = [1, 1]} : vector<16x256xf32> to vector<1x256xf32>
    %50 = arith.truncf %47 : vector<256x256xf32> to vector<256x256xbf16>
    %c0_23 = arith.constant 0 : index
    %c0_24 = arith.constant 0 : index
    %51 = vector.load %arg5[%c0_23, %c0_24] : memref<256x384xbf16, #tpu.memory_space<vmem>>, vector<256x384xbf16>
    %cst_25 = arith.constant dense<0.000000e+00> : vector<256x384xf32>
    %52 = tpu.matmul %50, %51, %cst_25 {dimension_numbers = #tpu.dot_dimension_numbers<[1], [0], [0], [1], [0, 0, 1, 1], [], []>} : vector<256x256xbf16>, vector<256x384xbf16>, vector<256x384xf32> -> vector<256x384xf32>
    %53 = vector.extract_strided_slice %52 {offsets = [0, 0], sizes = [128, 384], strides = [1, 1]} : vector<256x384xf32> to vector<128x384xf32>
    %54 = vector.extract_strided_slice %53 {offsets = [0, 0], sizes = [128, 256], strides = [1, 1]} : vector<128x384xf32> to vector<128x256xf32>
    %55 = vector.extract_strided_slice %53 {offsets = [0, 256], sizes = [128, 1], strides = [1, 1]} : vector<128x384xf32> to vector<128x1xf32>
    %cst_26 = arith.constant dense<0.000000e+00> : vector<1x128xf32>
    %56 = tpu.matmul %48, %54, %cst_26 {dimension_numbers = #tpu.dot_dimension_numbers<[1], [1], [0], [0], [0, 0, 1, 0], [], []>} : vector<1x256xf32>, vector<128x256xf32>, vector<1x128xf32> -> vector<1x128xf32>
    %57 = vector.broadcast %55 : vector<128x1xf32> to vector<128x128xf32>
    %58 = vector.broadcast %56 : vector<1x128xf32> to vector<128x128xf32>
    %59 = arith.addf %57, %58 : vector<128x128xf32>
    %cst_27 = arith.constant 0.000000e+00 : f32
    %60 = vector.broadcast %cst_27 : f32 to vector<128x128xf32>
    %61 = arith.cmpf ogt, %59, %60 : vector<128x128xf32>
    %cst_28 = arith.constant 2.000000e-01 : f32
    %62 = vector.broadcast %cst_28 : f32 to vector<128x128xf32>
    %63 = arith.mulf %62, %59 : vector<128x128xf32>
    %64 = arith.select %61, %59, %63 : vector<128x128xi1>, vector<128x128xf32>
    %65 = arith.addf %64, %20 : vector<128x128xf32>
    %cst_29 = arith.constant dense<0xFF800000> : vector<128xf32>
    %66 = vector.multi_reduction <maximumf>, %65, %cst_29 [1] : vector<128x128xf32> to vector<128xf32>
    %67 = vector.shape_cast %66 : vector<128xf32> to vector<128x1xf32>
    %68 = vector.broadcast %67 : vector<128x1xf32> to vector<128x128xf32>
    %69 = arith.subf %65, %68 : vector<128x128xf32>
    %70 = math.exp %69 : vector<128x128xf32>
    %cst_30 = arith.constant dense<0.000000e+00> : vector<128xf32>
    %71 = vector.multi_reduction <add>, %70, %cst_30 [1] : vector<128x128xf32> to vector<128xf32>
    %72 = vector.shape_cast %71 : vector<128xf32> to vector<128x1xf32>
    %73 = tpu.reciprocal %72 {approx = true} : vector<128x1xf32> -> vector<128x1xf32>
    %74 = vector.broadcast %73 : vector<128x1xf32> to vector<128x128xf32>
    %75 = arith.mulf %70, %74 : vector<128x128xf32>
    %76 = arith.truncf %75 : vector<128x128xf32> to vector<128x128xbf16>
    %77 = arith.truncf %54 : vector<128x256xf32> to vector<128x256xbf16>
    %cst_31 = arith.constant dense<0.000000e+00> : vector<128x256xf32>
    %78 = tpu.matmul %76, %77, %cst_31 {dimension_numbers = #tpu.dot_dimension_numbers<[1], [0], [0], [1], [0, 0, 1, 1], [], []>} : vector<128x128xbf16>, vector<128x256xbf16>, vector<128x256xf32> -> vector<128x256xf32>
    %79 = vector.extract_strided_slice %52 {offsets = [128, 0], sizes = [128, 384], strides = [1, 1]} : vector<256x384xf32> to vector<128x384xf32>
    %80 = vector.extract_strided_slice %79 {offsets = [0, 0], sizes = [128, 256], strides = [1, 1]} : vector<128x384xf32> to vector<128x256xf32>
    %81 = vector.extract_strided_slice %79 {offsets = [0, 256], sizes = [128, 1], strides = [1, 1]} : vector<128x384xf32> to vector<128x1xf32>
    %cst_32 = arith.constant dense<0.000000e+00> : vector<1x128xf32>
    %82 = tpu.matmul %48, %80, %cst_32 {dimension_numbers = #tpu.dot_dimension_numbers<[1], [1], [0], [0], [0, 0, 1, 0], [], []>} : vector<1x256xf32>, vector<128x256xf32>, vector<1x128xf32> -> vector<1x128xf32>
    %83 = vector.broadcast %81 : vector<128x1xf32> to vector<128x128xf32>
    %84 = vector.broadcast %82 : vector<1x128xf32> to vector<128x128xf32>
    %85 = arith.addf %83, %84 : vector<128x128xf32>
    %cst_33 = arith.constant 0.000000e+00 : f32
    %86 = vector.broadcast %cst_33 : f32 to vector<128x128xf32>
    %87 = arith.cmpf ogt, %85, %86 : vector<128x128xf32>
    %cst_34 = arith.constant 2.000000e-01 : f32
    %88 = vector.broadcast %cst_34 : f32 to vector<128x128xf32>
    %89 = arith.mulf %88, %85 : vector<128x128xf32>
    %90 = arith.select %87, %85, %89 : vector<128x128xi1>, vector<128x128xf32>
    %91 = arith.addf %90, %38 : vector<128x128xf32>
    %cst_35 = arith.constant dense<0xFF800000> : vector<128xf32>
    %92 = vector.multi_reduction <maximumf>, %91, %cst_35 [1] : vector<128x128xf32> to vector<128xf32>
    %93 = vector.shape_cast %92 : vector<128xf32> to vector<128x1xf32>
    %94 = vector.broadcast %93 : vector<128x1xf32> to vector<128x128xf32>
    %95 = arith.subf %91, %94 : vector<128x128xf32>
    %96 = math.exp %95 : vector<128x128xf32>
    %cst_36 = arith.constant dense<0.000000e+00> : vector<128xf32>
    %97 = vector.multi_reduction <add>, %96, %cst_36 [1] : vector<128x128xf32> to vector<128xf32>
    %98 = vector.shape_cast %97 : vector<128xf32> to vector<128x1xf32>
    %99 = tpu.reciprocal %98 {approx = true} : vector<128x1xf32> -> vector<128x1xf32>
    %100 = vector.broadcast %99 : vector<128x1xf32> to vector<128x128xf32>
    %101 = arith.mulf %96, %100 : vector<128x128xf32>
    %102 = arith.truncf %101 : vector<128x128xf32> to vector<128x128xbf16>
    %103 = arith.truncf %80 : vector<128x256xf32> to vector<128x256xbf16>
    %cst_37 = arith.constant dense<0.000000e+00> : vector<128x256xf32>
    %104 = tpu.matmul %102, %103, %cst_37 {dimension_numbers = #tpu.dot_dimension_numbers<[1], [0], [0], [1], [0, 0, 1, 1], [], []>} : vector<128x128xbf16>, vector<128x256xbf16>, vector<128x256xf32> -> vector<128x256xf32>
    %105 = tpu.concatenate %78, %104 in 0 : vector<128x256xf32>, vector<128x256xf32> -> vector<256x256xf32>
    %106 = vector.broadcast %49 : vector<1x256xf32> to vector<256x256xf32>
    %107 = arith.addf %105, %106 : vector<256x256xf32>
    %108 = arith.addf %107, %47 : vector<256x256xf32>
    %cst_38 = arith.constant 0.000000e+00 : f32
    %109 = vector.broadcast %cst_38 : f32 to vector<256x256xf32>
    %110 = arith.maximumf %108, %109 : vector<256x256xf32>
    %111 = vector.extract_strided_slice %0 {offsets = [3, 0], sizes = [1, 256], strides = [1, 1]} : vector<16x256xf32> to vector<1x256xf32>
    %112 = vector.extract_strided_slice %0 {offsets = [4, 0], sizes = [1, 256], strides = [1, 1]} : vector<16x256xf32> to vector<1x256xf32>
    %113 = arith.truncf %110 : vector<256x256xf32> to vector<256x256xbf16>
    %c0_39 = arith.constant 0 : index
    %c0_40 = arith.constant 0 : index
    %114 = vector.load %arg6[%c0_39, %c0_40] : memref<256x384xbf16, #tpu.memory_space<vmem>>, vector<256x384xbf16>
    %cst_41 = arith.constant dense<0.000000e+00> : vector<256x384xf32>
    %115 = tpu.matmul %113, %114, %cst_41 {dimension_numbers = #tpu.dot_dimension_numbers<[1], [0], [0], [1], [0, 0, 1, 1], [], []>} : vector<256x256xbf16>, vector<256x384xbf16>, vector<256x384xf32> -> vector<256x384xf32>
    %116 = vector.extract_strided_slice %115 {offsets = [0, 0], sizes = [128, 384], strides = [1, 1]} : vector<256x384xf32> to vector<128x384xf32>
    %117 = vector.extract_strided_slice %116 {offsets = [0, 0], sizes = [128, 256], strides = [1, 1]} : vector<128x384xf32> to vector<128x256xf32>
    %118 = vector.extract_strided_slice %116 {offsets = [0, 256], sizes = [128, 1], strides = [1, 1]} : vector<128x384xf32> to vector<128x1xf32>
    %cst_42 = arith.constant dense<0.000000e+00> : vector<1x128xf32>
    %119 = tpu.matmul %111, %117, %cst_42 {dimension_numbers = #tpu.dot_dimension_numbers<[1], [1], [0], [0], [0, 0, 1, 0], [], []>} : vector<1x256xf32>, vector<128x256xf32>, vector<1x128xf32> -> vector<1x128xf32>
    %120 = vector.broadcast %118 : vector<128x1xf32> to vector<128x128xf32>
    %121 = vector.broadcast %119 : vector<1x128xf32> to vector<128x128xf32>
    %122 = arith.addf %120, %121 : vector<128x128xf32>
    %cst_43 = arith.constant 0.000000e+00 : f32
    %123 = vector.broadcast %cst_43 : f32 to vector<128x128xf32>
    %124 = arith.cmpf ogt, %122, %123 : vector<128x128xf32>
    %cst_44 = arith.constant 2.000000e-01 : f32
    %125 = vector.broadcast %cst_44 : f32 to vector<128x128xf32>
    %126 = arith.mulf %125, %122 : vector<128x128xf32>
    %127 = arith.select %124, %122, %126 : vector<128x128xi1>, vector<128x128xf32>
    %128 = arith.addf %127, %20 : vector<128x128xf32>
    %cst_45 = arith.constant dense<0xFF800000> : vector<128xf32>
    %129 = vector.multi_reduction <maximumf>, %128, %cst_45 [1] : vector<128x128xf32> to vector<128xf32>
    %130 = vector.shape_cast %129 : vector<128xf32> to vector<128x1xf32>
    %131 = vector.broadcast %130 : vector<128x1xf32> to vector<128x128xf32>
    %132 = arith.subf %128, %131 : vector<128x128xf32>
    %133 = math.exp %132 : vector<128x128xf32>
    %cst_46 = arith.constant dense<0.000000e+00> : vector<128xf32>
    %134 = vector.multi_reduction <add>, %133, %cst_46 [1] : vector<128x128xf32> to vector<128xf32>
    %135 = vector.shape_cast %134 : vector<128xf32> to vector<128x1xf32>
    %136 = tpu.reciprocal %135 {approx = true} : vector<128x1xf32> -> vector<128x1xf32>
    %137 = vector.broadcast %136 : vector<128x1xf32> to vector<128x128xf32>
    %138 = arith.mulf %133, %137 : vector<128x128xf32>
    %139 = arith.truncf %138 : vector<128x128xf32> to vector<128x128xbf16>
    %140 = arith.truncf %117 : vector<128x256xf32> to vector<128x256xbf16>
    %cst_47 = arith.constant dense<0.000000e+00> : vector<128x256xf32>
    %141 = tpu.matmul %139, %140, %cst_47 {dimension_numbers = #tpu.dot_dimension_numbers<[1], [0], [0], [1], [0, 0, 1, 1], [], []>} : vector<128x128xbf16>, vector<128x256xbf16>, vector<128x256xf32> -> vector<128x256xf32>
    %142 = vector.extract_strided_slice %115 {offsets = [128, 0], sizes = [128, 384], strides = [1, 1]} : vector<256x384xf32> to vector<128x384xf32>
    %143 = vector.extract_strided_slice %142 {offsets = [0, 0], sizes = [128, 256], strides = [1, 1]} : vector<128x384xf32> to vector<128x256xf32>
    %144 = vector.extract_strided_slice %142 {offsets = [0, 256], sizes = [128, 1], strides = [1, 1]} : vector<128x384xf32> to vector<128x1xf32>
    %cst_48 = arith.constant dense<0.000000e+00> : vector<1x128xf32>
    %145 = tpu.matmul %111, %143, %cst_48 {dimension_numbers = #tpu.dot_dimension_numbers<[1], [1], [0], [0], [0, 0, 1, 0], [], []>} : vector<1x256xf32>, vector<128x256xf32>, vector<1x128xf32> -> vector<1x128xf32>
    %146 = vector.broadcast %144 : vector<128x1xf32> to vector<128x128xf32>
    %147 = vector.broadcast %145 : vector<1x128xf32> to vector<128x128xf32>
    %148 = arith.addf %146, %147 : vector<128x128xf32>
    %cst_49 = arith.constant 0.000000e+00 : f32
    %149 = vector.broadcast %cst_49 : f32 to vector<128x128xf32>
    %150 = arith.cmpf ogt, %148, %149 : vector<128x128xf32>
    %cst_50 = arith.constant 2.000000e-01 : f32
    %151 = vector.broadcast %cst_50 : f32 to vector<128x128xf32>
    %152 = arith.mulf %151, %148 : vector<128x128xf32>
    %153 = arith.select %150, %148, %152 : vector<128x128xi1>, vector<128x128xf32>
    %154 = arith.addf %153, %38 : vector<128x128xf32>
    %cst_51 = arith.constant dense<0xFF800000> : vector<128xf32>
    %155 = vector.multi_reduction <maximumf>, %154, %cst_51 [1] : vector<128x128xf32> to vector<128xf32>
    %156 = vector.shape_cast %155 : vector<128xf32> to vector<128x1xf32>
    %157 = vector.broadcast %156 : vector<128x1xf32> to vector<128x128xf32>
    %158 = arith.subf %154, %157 : vector<128x128xf32>
    %159 = math.exp %158 : vector<128x128xf32>
    %cst_52 = arith.constant dense<0.000000e+00> : vector<128xf32>
    %160 = vector.multi_reduction <add>, %159, %cst_52 [1] : vector<128x128xf32> to vector<128xf32>
    %161 = vector.shape_cast %160 : vector<128xf32> to vector<128x1xf32>
    %162 = tpu.reciprocal %161 {approx = true} : vector<128x1xf32> -> vector<128x1xf32>
    %163 = vector.broadcast %162 : vector<128x1xf32> to vector<128x128xf32>
    %164 = arith.mulf %159, %163 : vector<128x128xf32>
    %165 = arith.truncf %164 : vector<128x128xf32> to vector<128x128xbf16>
    %166 = arith.truncf %143 : vector<128x256xf32> to vector<128x256xbf16>
    %cst_53 = arith.constant dense<0.000000e+00> : vector<128x256xf32>
    %167 = tpu.matmul %165, %166, %cst_53 {dimension_numbers = #tpu.dot_dimension_numbers<[1], [0], [0], [1], [0, 0, 1, 1], [], []>} : vector<128x128xbf16>, vector<128x256xbf16>, vector<128x256xf32> -> vector<128x256xf32>
    %168 = tpu.concatenate %141, %167 in 0 : vector<128x256xf32>, vector<128x256xf32> -> vector<256x256xf32>
    %169 = vector.broadcast %112 : vector<1x256xf32> to vector<256x256xf32>
    %170 = arith.addf %168, %169 : vector<256x256xf32>
    %171 = arith.addf %170, %110 : vector<256x256xf32>
    %cst_54 = arith.constant 0.000000e+00 : f32
    %172 = vector.broadcast %cst_54 : f32 to vector<256x256xf32>
    %173 = arith.maximumf %171, %172 : vector<256x256xf32>
    %174 = vector.extract_strided_slice %0 {offsets = [5, 0], sizes = [1, 256], strides = [1, 1]} : vector<16x256xf32> to vector<1x256xf32>
    %175 = vector.extract_strided_slice %0 {offsets = [6, 0], sizes = [1, 256], strides = [1, 1]} : vector<16x256xf32> to vector<1x256xf32>
    %176 = arith.truncf %173 : vector<256x256xf32> to vector<256x256xbf16>
    %c0_55 = arith.constant 0 : index
    %c0_56 = arith.constant 0 : index
    %177 = vector.load %arg7[%c0_55, %c0_56] : memref<256x384xbf16, #tpu.memory_space<vmem>>, vector<256x384xbf16>
    %cst_57 = arith.constant dense<0.000000e+00> : vector<256x384xf32>
    %178 = tpu.matmul %176, %177, %cst_57 {dimension_numbers = #tpu.dot_dimension_numbers<[1], [0], [0], [1], [0, 0, 1, 1], [], []>} : vector<256x256xbf16>, vector<256x384xbf16>, vector<256x384xf32> -> vector<256x384xf32>
    %179 = vector.extract_strided_slice %178 {offsets = [0, 0], sizes = [128, 384], strides = [1, 1]} : vector<256x384xf32> to vector<128x384xf32>
    %180 = vector.extract_strided_slice %179 {offsets = [0, 0], sizes = [128, 256], strides = [1, 1]} : vector<128x384xf32> to vector<128x256xf32>
    %181 = vector.extract_strided_slice %179 {offsets = [0, 256], sizes = [128, 1], strides = [1, 1]} : vector<128x384xf32> to vector<128x1xf32>
    %cst_58 = arith.constant dense<0.000000e+00> : vector<1x128xf32>
    %182 = tpu.matmul %174, %180, %cst_58 {dimension_numbers = #tpu.dot_dimension_numbers<[1], [1], [0], [0], [0, 0, 1, 0], [], []>} : vector<1x256xf32>, vector<128x256xf32>, vector<1x128xf32> -> vector<1x128xf32>
    %183 = vector.broadcast %181 : vector<128x1xf32> to vector<128x128xf32>
    %184 = vector.broadcast %182 : vector<1x128xf32> to vector<128x128xf32>
    %185 = arith.addf %183, %184 : vector<128x128xf32>
    %cst_59 = arith.constant 0.000000e+00 : f32
    %186 = vector.broadcast %cst_59 : f32 to vector<128x128xf32>
    %187 = arith.cmpf ogt, %185, %186 : vector<128x128xf32>
    %cst_60 = arith.constant 2.000000e-01 : f32
    %188 = vector.broadcast %cst_60 : f32 to vector<128x128xf32>
    %189 = arith.mulf %188, %185 : vector<128x128xf32>
    %190 = arith.select %187, %185, %189 : vector<128x128xi1>, vector<128x128xf32>
    %191 = arith.addf %190, %20 : vector<128x128xf32>
    %cst_61 = arith.constant dense<0xFF800000> : vector<128xf32>
    %192 = vector.multi_reduction <maximumf>, %191, %cst_61 [1] : vector<128x128xf32> to vector<128xf32>
    %193 = vector.shape_cast %192 : vector<128xf32> to vector<128x1xf32>
    %194 = vector.broadcast %193 : vector<128x1xf32> to vector<128x128xf32>
    %195 = arith.subf %191, %194 : vector<128x128xf32>
    %196 = math.exp %195 : vector<128x128xf32>
    %cst_62 = arith.constant dense<0.000000e+00> : vector<128xf32>
    %197 = vector.multi_reduction <add>, %196, %cst_62 [1] : vector<128x128xf32> to vector<128xf32>
    %198 = vector.shape_cast %197 : vector<128xf32> to vector<128x1xf32>
    %199 = tpu.reciprocal %198 {approx = true} : vector<128x1xf32> -> vector<128x1xf32>
    %200 = vector.broadcast %199 : vector<128x1xf32> to vector<128x128xf32>
    %201 = arith.mulf %196, %200 : vector<128x128xf32>
    %202 = arith.truncf %201 : vector<128x128xf32> to vector<128x128xbf16>
    %203 = arith.truncf %180 : vector<128x256xf32> to vector<128x256xbf16>
    %cst_63 = arith.constant dense<0.000000e+00> : vector<128x256xf32>
    %204 = tpu.matmul %202, %203, %cst_63 {dimension_numbers = #tpu.dot_dimension_numbers<[1], [0], [0], [1], [0, 0, 1, 1], [], []>} : vector<128x128xbf16>, vector<128x256xbf16>, vector<128x256xf32> -> vector<128x256xf32>
    %205 = vector.extract_strided_slice %178 {offsets = [128, 0], sizes = [128, 384], strides = [1, 1]} : vector<256x384xf32> to vector<128x384xf32>
    %206 = vector.extract_strided_slice %205 {offsets = [0, 0], sizes = [128, 256], strides = [1, 1]} : vector<128x384xf32> to vector<128x256xf32>
    %207 = vector.extract_strided_slice %205 {offsets = [0, 256], sizes = [128, 1], strides = [1, 1]} : vector<128x384xf32> to vector<128x1xf32>
    %cst_64 = arith.constant dense<0.000000e+00> : vector<1x128xf32>
    %208 = tpu.matmul %174, %206, %cst_64 {dimension_numbers = #tpu.dot_dimension_numbers<[1], [1], [0], [0], [0, 0, 1, 0], [], []>} : vector<1x256xf32>, vector<128x256xf32>, vector<1x128xf32> -> vector<1x128xf32>
    %209 = vector.broadcast %207 : vector<128x1xf32> to vector<128x128xf32>
    %210 = vector.broadcast %208 : vector<1x128xf32> to vector<128x128xf32>
    %211 = arith.addf %209, %210 : vector<128x128xf32>
    %cst_65 = arith.constant 0.000000e+00 : f32
    %212 = vector.broadcast %cst_65 : f32 to vector<128x128xf32>
    %213 = arith.cmpf ogt, %211, %212 : vector<128x128xf32>
    %cst_66 = arith.constant 2.000000e-01 : f32
    %214 = vector.broadcast %cst_66 : f32 to vector<128x128xf32>
    %215 = arith.mulf %214, %211 : vector<128x128xf32>
    %216 = arith.select %213, %211, %215 : vector<128x128xi1>, vector<128x128xf32>
    %217 = arith.addf %216, %38 : vector<128x128xf32>
    %cst_67 = arith.constant dense<0xFF800000> : vector<128xf32>
    %218 = vector.multi_reduction <maximumf>, %217, %cst_67 [1] : vector<128x128xf32> to vector<128xf32>
    %219 = vector.shape_cast %218 : vector<128xf32> to vector<128x1xf32>
    %220 = vector.broadcast %219 : vector<128x1xf32> to vector<128x128xf32>
    %221 = arith.subf %217, %220 : vector<128x128xf32>
    %222 = math.exp %221 : vector<128x128xf32>
    %cst_68 = arith.constant dense<0.000000e+00> : vector<128xf32>
    %223 = vector.multi_reduction <add>, %222, %cst_68 [1] : vector<128x128xf32> to vector<128xf32>
    %224 = vector.shape_cast %223 : vector<128xf32> to vector<128x1xf32>
    %225 = tpu.reciprocal %224 {approx = true} : vector<128x1xf32> -> vector<128x1xf32>
    %226 = vector.broadcast %225 : vector<128x1xf32> to vector<128x128xf32>
    %227 = arith.mulf %222, %226 : vector<128x128xf32>
    %228 = arith.truncf %227 : vector<128x128xf32> to vector<128x128xbf16>
    %229 = arith.truncf %206 : vector<128x256xf32> to vector<128x256xbf16>
    %cst_69 = arith.constant dense<0.000000e+00> : vector<128x256xf32>
    %230 = tpu.matmul %228, %229, %cst_69 {dimension_numbers = #tpu.dot_dimension_numbers<[1], [0], [0], [1], [0, 0, 1, 1], [], []>} : vector<128x128xbf16>, vector<128x256xbf16>, vector<128x256xf32> -> vector<128x256xf32>
    %231 = tpu.concatenate %204, %230 in 0 : vector<128x256xf32>, vector<128x256xf32> -> vector<256x256xf32>
    %232 = vector.broadcast %175 : vector<1x256xf32> to vector<256x256xf32>
    %233 = arith.addf %231, %232 : vector<256x256xf32>
    %234 = arith.addf %233, %173 : vector<256x256xf32>
    %cst_70 = arith.constant 0.000000e+00 : f32
    %235 = vector.broadcast %cst_70 : f32 to vector<256x256xf32>
    %236 = arith.maximumf %234, %235 : vector<256x256xf32>
    %237 = vector.extract_strided_slice %0 {offsets = [7, 0], sizes = [1, 128], strides = [1, 1]} : vector<16x256xf32> to vector<1x128xf32>
    %238 = vector.extract_strided_slice %0 {offsets = [8, 0], sizes = [1, 128], strides = [1, 1]} : vector<16x256xf32> to vector<1x128xf32>
    %239 = arith.truncf %236 : vector<256x256xf32> to vector<256x256xbf16>
    %c0_71 = arith.constant 0 : index
    %c0_72 = arith.constant 0 : index
    %240 = vector.load %arg8[%c0_71, %c0_72] : memref<256x128xbf16, #tpu.memory_space<vmem>>, vector<256x128xbf16>
    %cst_73 = arith.constant dense<0.000000e+00> : vector<256x128xf32>
    %241 = tpu.matmul %239, %240, %cst_73 {dimension_numbers = #tpu.dot_dimension_numbers<[1], [0], [0], [1], [0, 0, 1, 1], [], []>} : vector<256x256xbf16>, vector<256x128xbf16>, vector<256x128xf32> -> vector<256x128xf32>
    %242 = vector.extract_strided_slice %241 {offsets = [0, 0], sizes = [128, 128], strides = [1, 1]} : vector<256x128xf32> to vector<128x128xf32>
    %243 = vector.extract_strided_slice %242 {offsets = [0, 32], sizes = [128, 1], strides = [1, 1]} : vector<128x128xf32> to vector<128x1xf32>
    %cst_74 = arith.constant dense<0.000000e+00> : vector<1x128xf32>
    %244 = tpu.matmul %237, %242, %cst_74 {dimension_numbers = #tpu.dot_dimension_numbers<[1], [1], [0], [0], [0, 0, 1, 0], [], []>} : vector<1x128xf32>, vector<128x128xf32>, vector<1x128xf32> -> vector<1x128xf32>
    %245 = vector.broadcast %243 : vector<128x1xf32> to vector<128x128xf32>
    %246 = vector.broadcast %244 : vector<1x128xf32> to vector<128x128xf32>
    %247 = arith.addf %245, %246 : vector<128x128xf32>
    %cst_75 = arith.constant 0.000000e+00 : f32
    %248 = vector.broadcast %cst_75 : f32 to vector<128x128xf32>
    %249 = arith.cmpf ogt, %247, %248 : vector<128x128xf32>
    %cst_76 = arith.constant 2.000000e-01 : f32
    %250 = vector.broadcast %cst_76 : f32 to vector<128x128xf32>
    %251 = arith.mulf %250, %247 : vector<128x128xf32>
    %252 = arith.select %249, %247, %251 : vector<128x128xi1>, vector<128x128xf32>
    %253 = arith.addf %252, %20 : vector<128x128xf32>
    %cst_77 = arith.constant dense<0xFF800000> : vector<128xf32>
    %254 = vector.multi_reduction <maximumf>, %253, %cst_77 [1] : vector<128x128xf32> to vector<128xf32>
    %255 = vector.shape_cast %254 : vector<128xf32> to vector<128x1xf32>
    %256 = vector.broadcast %255 : vector<128x1xf32> to vector<128x128xf32>
    %257 = arith.subf %253, %256 : vector<128x128xf32>
    %258 = math.exp %257 : vector<128x128xf32>
    %cst_78 = arith.constant dense<0.000000e+00> : vector<128xf32>
    %259 = vector.multi_reduction <add>, %258, %cst_78 [1] : vector<128x128xf32> to vector<128xf32>
    %260 = vector.shape_cast %259 : vector<128xf32> to vector<128x1xf32>
    %261 = tpu.reciprocal %260 {approx = true} : vector<128x1xf32> -> vector<128x1xf32>
    %262 = vector.broadcast %261 : vector<128x1xf32> to vector<128x128xf32>
    %263 = arith.mulf %258, %262 : vector<128x128xf32>
    %264 = arith.truncf %263 : vector<128x128xf32> to vector<128x128xbf16>
    %265 = arith.truncf %242 : vector<128x128xf32> to vector<128x128xbf16>
    %cst_79 = arith.constant dense<0.000000e+00> : vector<128x128xf32>
    %266 = tpu.matmul %264, %265, %cst_79 {dimension_numbers = #tpu.dot_dimension_numbers<[1], [0], [0], [1], [0, 0, 1, 1], [], []>} : vector<128x128xbf16>, vector<128x128xbf16>, vector<128x128xf32> -> vector<128x128xf32>
    %267 = vector.extract_strided_slice %241 {offsets = [128, 0], sizes = [128, 128], strides = [1, 1]} : vector<256x128xf32> to vector<128x128xf32>
    %268 = vector.extract_strided_slice %267 {offsets = [0, 32], sizes = [128, 1], strides = [1, 1]} : vector<128x128xf32> to vector<128x1xf32>
    %cst_80 = arith.constant dense<0.000000e+00> : vector<1x128xf32>
    %269 = tpu.matmul %237, %267, %cst_80 {dimension_numbers = #tpu.dot_dimension_numbers<[1], [1], [0], [0], [0, 0, 1, 0], [], []>} : vector<1x128xf32>, vector<128x128xf32>, vector<1x128xf32> -> vector<1x128xf32>
    %270 = vector.broadcast %268 : vector<128x1xf32> to vector<128x128xf32>
    %271 = vector.broadcast %269 : vector<1x128xf32> to vector<128x128xf32>
    %272 = arith.addf %270, %271 : vector<128x128xf32>
    %cst_81 = arith.constant 0.000000e+00 : f32
    %273 = vector.broadcast %cst_81 : f32 to vector<128x128xf32>
    %274 = arith.cmpf ogt, %272, %273 : vector<128x128xf32>
    %cst_82 = arith.constant 2.000000e-01 : f32
    %275 = vector.broadcast %cst_82 : f32 to vector<128x128xf32>
    %276 = arith.mulf %275, %272 : vector<128x128xf32>
    %277 = arith.select %274, %272, %276 : vector<128x128xi1>, vector<128x128xf32>
    %278 = arith.addf %277, %38 : vector<128x128xf32>
    %cst_83 = arith.constant dense<0xFF800000> : vector<128xf32>
    %279 = vector.multi_reduction <maximumf>, %278, %cst_83 [1] : vector<128x128xf32> to vector<128xf32>
    %280 = vector.shape_cast %279 : vector<128xf32> to vector<128x1xf32>
    %281 = vector.broadcast %280 : vector<128x1xf32> to vector<128x128xf32>
    %282 = arith.subf %278, %281 : vector<128x128xf32>
    %283 = math.exp %282 : vector<128x128xf32>
    %cst_84 = arith.constant dense<0.000000e+00> : vector<128xf32>
    %284 = vector.multi_reduction <add>, %283, %cst_84 [1] : vector<128x128xf32> to vector<128xf32>
    %285 = vector.shape_cast %284 : vector<128xf32> to vector<128x1xf32>
    %286 = tpu.reciprocal %285 {approx = true} : vector<128x1xf32> -> vector<128x1xf32>
    %287 = vector.broadcast %286 : vector<128x1xf32> to vector<128x128xf32>
    %288 = arith.mulf %283, %287 : vector<128x128xf32>
    %289 = arith.truncf %288 : vector<128x128xf32> to vector<128x128xbf16>
    %290 = arith.truncf %267 : vector<128x128xf32> to vector<128x128xbf16>
    %cst_85 = arith.constant dense<0.000000e+00> : vector<128x128xf32>
    %291 = tpu.matmul %289, %290, %cst_85 {dimension_numbers = #tpu.dot_dimension_numbers<[1], [0], [0], [1], [0, 0, 1, 1], [], []>} : vector<128x128xbf16>, vector<128x128xbf16>, vector<128x128xf32> -> vector<128x128xf32>
    %292 = tpu.concatenate %266, %291 in 0 : vector<128x128xf32>, vector<128x128xf32> -> vector<256x128xf32>
    %293 = vector.broadcast %238 : vector<1x128xf32> to vector<256x128xf32>
    %294 = arith.addf %292, %293 : vector<256x128xf32>
    %295 = vector.extract_strided_slice %294 {offsets = [0, 0], sizes = [128, 128], strides = [1, 1]} : vector<256x128xf32> to vector<128x128xf32>
    %c0_86 = arith.constant 0 : index
    %c0_87 = arith.constant 0 : index
    %c0_88 = arith.constant 0 : index
    %296 = vector.load %arg9[%c0_86, %c0_87, %c0_88] : memref<2x128x128xf32, #tpu.memory_space<vmem>>, vector<1x128x128xf32>
    %297 = vector.shape_cast %296 : vector<1x128x128xf32> to vector<128x128xf32>
    %298 = vector.shape_cast %295 : vector<128x128xf32> to vector<1x128x128xf32>
    tpu.vector_store %arg9[%c0_86, %c0_87, %c0_88], %298 {strides = array<i32>} : memref<2x128x128xf32, #tpu.memory_space<vmem>>, vector<1x128x128xf32>,
    %299 = vector.extract_strided_slice %294 {offsets = [128, 0], sizes = [128, 128], strides = [1, 1]} : vector<256x128xf32> to vector<128x128xf32>
    %c1 = arith.constant 1 : index
    %c0_89 = arith.constant 0 : index
    %c0_90 = arith.constant 0 : index
    %300 = vector.load %arg9[%c1, %c0_89, %c0_90] : memref<2x128x128xf32, #tpu.memory_space<vmem>>, vector<1x128x128xf32>
    %301 = vector.shape_cast %300 : vector<1x128x128xf32> to vector<128x128xf32>
    %302 = vector.shape_cast %299 : vector<128x128xf32> to vector<1x128x128xf32>
    tpu.vector_store %arg9[%c1, %c0_89, %c0_90], %302 {strides = array<i32>} : memref<2x128x128xf32, #tpu.memory_space<vmem>>, vector<1x128x128xf32>,
    return
  }
  func.func @transform_0(%arg0: i32) -> (i32, i32, i32) {
    %c0_i32 = arith.constant 0 : i32
    %c0_i32_0 = arith.constant 0 : i32
    %c0_i32_1 = arith.constant 0 : i32
    return %arg0, %c0_i32, %c0_i32_0 : i32, i32, i32
  }
  func.func @transform_1(%arg0: i32) -> (i32, i32) {
    %c0_i32 = arith.constant 0 : i32
    %c0_i32_0 = arith.constant 0 : i32
    %c0_i32_1 = arith.constant 0 : i32
    return %c0_i32, %c0_i32_0 : i32, i32
  }
  func.func @transform_2(%arg0: i32) -> (i32, i32) {
    %c0_i32 = arith.constant 0 : i32
    %c0_i32_0 = arith.constant 0 : i32
    %c0_i32_1 = arith.constant 0 : i32
    return %c0_i32, %c0_i32_0 : i32, i32
  }
  func.func @transform_3(%arg0: i32) -> (i32, i32) {
    %c0_i32 = arith.constant 0 : i32
    %c0_i32_0 = arith.constant 0 : i32
    %c0_i32_1 = arith.constant 0 : i32
    return %c0_i32, %c0_i32_0 : i32, i32
  }
  func.func @transform_4(%arg0: i32) -> (i32, i32) {
    %c0_i32 = arith.constant 0 : i32
    %c0_i32_0 = arith.constant 0 : i32
    %c0_i32_1 = arith.constant 0 : i32
    return %c0_i32, %c0_i32_0 : i32, i32
  }
  func.func @transform_5(%arg0: i32) -> (i32, i32) {
    %c0_i32 = arith.constant 0 : i32
    %c0_i32_0 = arith.constant 0 : i32
    %c0_i32_1 = arith.constant 0 : i32
    return %c0_i32, %c0_i32_0 : i32, i32
  }
  func.func @transform_6(%arg0: i32) -> (i32, i32) {
    %c0_i32 = arith.constant 0 : i32
    %c0_i32_0 = arith.constant 0 : i32
    %c0_i32_1 = arith.constant 0 : i32
    return %c0_i32, %c0_i32_0 : i32, i32
  }
  func.func @transform_7(%arg0: i32) -> (i32, i32) {
    %c0_i32 = arith.constant 0 : i32
    %c0_i32_0 = arith.constant 0 : i32
    %c0_i32_1 = arith.constant 0 : i32
    return %c0_i32, %c0_i32_0 : i32, i32
  }
  func.func @transform_8(%arg0: i32) -> (i32, i32, i32) {
    %c0_i32 = arith.constant 0 : i32
    %c0_i32_0 = arith.constant 0 : i32
    %c0_i32_1 = arith.constant 0 : i32
    return %arg0, %c0_i32, %c0_i32_0 : i32, i32, i32
  }
}

</mosaic_0001>

<bundles_post_ra>
// kernel: geom_encoder_forward.1
= control target key start
LH: loop header
LB: loop body
LE: loop exit
PB: predicated region body
PF: predicated region fallthrough
CT: control target
= control target key end

     0   :  { %13 = vsyncpa [#allocation3], 0  ;;  %s15921_s0 = inlined_call_operand.vmem [shape: f32[2,128,8], index: 0, kind: input, shape index: {}]   ;;  %s15922_s1 = inlined_call_operand.vmem [shape: f32[128,128], index: 1, kind: input, shape index: {}]   ;;  %s15923_s2 = inlined_call_operand.vmem [shape: f32[16,256], index: 2, kind: input, shape index: {}]   ;;  %s15924_s3 = inlined_call_operand.vmem [shape: bf16[8,256], index: 3, kind: input, shape index: {}]   ;;  %s15925_s4 = inlined_call_operand.vmem [shape: bf16[256,384], index: 4, kind: input, shape index: {}]   ;;  %s15926_s5 = inlined_call_operand.hbm [shape: bf16[256,384], index: 5, kind: input, shape index: {}]   ;;  %s15927_s6 = inlined_call_operand.hbm [shape: bf16[256,384], index: 6, kind: input, shape index: {}]   ;;  %s15928_s7 = inlined_call_operand.vmem [shape: bf16[256,128], index: 7, kind: input, shape index: {}]   ;;  %s15929_s8 = inlined_call_operand.vmem [shape: f32[2,128,128], index: 8, kind: output, shape index: {}]  }
   0x1   :  { %14 = vsyncpa [#allocation5], 0  ;;  %s10996_s27 = smov [#allocation2]   ;;  %s10948_s9 = scalar_lea.hbm %s15926_s5, 6144 }
   0x2   :  { %s30_s28 = sshll.u32 %s10996_s27, 4  ;;  %p10949_p0 = scmp.ne.s32.totalorder %s15926_s5, %s10948_s9  ;;  %s31_s28 = int_to_ptr.vmem [resolvable:$true] %s30_s28 }
   0x3   :  { %p10952_p1 = scmp.lt.u32.totalorder %s10948_s9, %s15926_s5 }
   0x5   :  { %p10954_p2 = pnand %p10952_p1, %p10949_p0 }
   0x7   :  { %10957 = shalt.err (!%p10954_p2)
}
   0x8   :  { %s10958_s14 = scalar_lea.vmem %s31_s28, 6144  ;;  %p10963_p4 = scmp.lt.s32.totalorder %s31_s28, %s31_s28 }
   0x9   :  { %p10959_p3 = scmp.ne.s32.totalorder %s31_s28, %s10958_s14  ;;  %p10964_p5 = scmp.lt.s32.totalorder %s10958_s14, %s10958_s14 }
   0xb   :  { %p10965_p6 = por %p10964_p5, %p10963_p4 }
   0xd   :  { %p10966_p7 = pnand %p10965_p6, %p10959_p3 }
   0xf   :  { %10969 = shalt.err (!%p10966_p7)
}
  0x10   :  { %s10997_s15 = smov 192   ;;  %s10998_s16 = smov 12  }
  0x11   :  { %36 = dma.hbm_to_vmem [thread:$0]  %s15926_s5, 6144, %s31_s28, [#allocation3], %s10997_s15, %s10997_s15, %s10998_s16  }
  0x12   :  { %s10999_s19 = smov [#allocation4]   ;;  %s10970_s23 = scalar_lea.hbm %s15927_s6, 6144 }
  0x13   :  { %s42_s20 = sshll.u32 %s10999_s19, 4  ;;  %p10971_p8 = scmp.ne.s32.totalorder %s15927_s6, %s10970_s23  ;;  %s43_s20 = int_to_ptr.vmem [resolvable:$true] %s42_s20 }
  0x14   :  { %p10974_p9 = scmp.lt.u32.totalorder %s10970_s23, %s15927_s6 }
  0x16   :  { %p10976_p10 = pnand %p10974_p9, %p10971_p8 }
  0x18   :  { %10979 = shalt.err (!%p10976_p10)
}
  0x19   :  { %s10980_s29 = scalar_lea.vmem %s43_s20, 6144  ;;  %p10985_p12 = scmp.lt.s32.totalorder %s43_s20, %s43_s20 }
  0x1a   :  { %p10981_p11 = scmp.ne.s32.totalorder %s43_s20, %s10980_s29  ;;  %p10986_p13 = scmp.lt.s32.totalorder %s10980_s29, %s10980_s29 }
  0x1c   :  { %p10987_p0 = por %p10986_p13, %p10985_p12 }
  0x1e   :  { %p10988_p1 = pnand %p10987_p0, %p10981_p11 }
  0x20   :  { %10991 = shalt.err (!%p10988_p1)
}
  0x21   :  { %48 = dma.hbm_to_vmem [thread:$0]  %s15927_s6, 6144, %s43_s20, [#allocation5], %s10997_s15, %s10997_s15, %s10998_s16  }
  0x22   :  { %10992 = dma.done.wait [#allocation3], 6144  }
  0x23   :  { %10993 = vsyncadd [#allocation3], 4294961152 }
  0x24   :  { %10994 = dma.done.wait [#allocation5], 6144  }
  0x25   :  { %10995 = vsyncadd [#allocation5], 4294961152  ;;  %v15932_v0 = vmov 0.0|0.0   ;;  %vm11001_vm0 = vmmov 0   ;;  %v15930_v1 = vmov 0.0   ;;  %vm125_vm1 = vcmask 23552  }
  0x26   :  { %9797 = vmatprep.subr.bf16.mxu0 %v15932_v0  ;;  %9513 = vmatprep.mubr.msk.f32.mxu0 %vm11001_vm0, %v15930_v1  ;;  %vm11080_vm2 = vmpackc.low %vm125_vm1, %vm125_vm1  ;;  %v77_v3 = vld [vmem:[%s15921_s0] sm:$0xff]  ;;  %v11090_v4 = vld [vmem:[%s15921_s0 + $0x8] sm:$0xff]  ;;  %v15934_v36 = vmov 0   ;;  %vm1110_vm3 = vcmask 1043456   ;;  %vm1061_vm4 = vcmask 64512  }
  0x27   :  { %v11095_v5 = vld [vmem:[%s15921_s0 + $0x10] sm:$0xff]  ;;  %v11098_v6 = vpack.c.bf16 %v11090_v4, %v77_v3  ;;  %v109_v7 = vmul.f32 %v77_v3, %v77_v3  ;;  %v110_v8 = vmul.f32 %v11090_v4, %v11090_v4  ;;  %v11105_v9 = vld [vmem:[%s15921_s0 + $0x18] sm:$0xff]  ;;  %9548 = vmatprep.mubr.msk.f32.mxu1 %vm125_vm1, %v77_v3  ;;  %v11132_v15 = vld [vmem:[%s15921_s0 + $0x20] sm:$0xff]  ;;  %10208 = vset.pattern.permute.xlu1 %v15934_v36 }
  0x28   :  { %v11110_v10 = vpack.c.bf16 %v11105_v9, %v11095_v5  ;;  %v111_v12 = vmul.f32 %v11095_v5, %v11095_v5  ;;  %v112_v13 = vmul.f32 %v11105_v9, %v11105_v9  ;;  %v11137_v16 = vld [vmem:[%s15921_s0 + $0x28] sm:$0xff]  ;;  %v11149_v19 = vld [vmem:[%s15921_s0 + $0x30] sm:$0xff]  ;;  %v11154_v20 = vld [vmem:[%s15921_s0 + $0x38] sm:$0xff]  ;;  %v113_v21 = vmul.f32 %v11132_v15, %v11132_v15  ;;  %10207 = vset.pattern.permute.xlu0 %v15934_v36 }
  0x29   :  { %9831 = vmatprep.subr.msk.bf16.mxu1 %vm11080_vm2, %v11098_v6  ;;  %v9798_v11 = vpack.c.bf16 %v110_v8, %v109_v7  ;;  %v11141_v18 = vpack.c.bf16 %v11137_v16, %v11132_v15  ;;  %v114_v22 = vmul.f32 %v11137_v16, %v11137_v16  ;;  %v126_v23 = vsel %vm125_vm1, %v109_v7, 0.0  ;;  %v11190_v32 = vld [vmem:[%s15921_s0 + $0x40] sm:$0xff]  ;;  %v11195_v33 = vld [vmem:[%s15921_s0 + $0x48] sm:$0xff]  ;;  %v11202_v35 = vld [vmem:[%s15921_s0 + $0x50] sm:$0xff] }
  0x2a   :  { %9834 = vmatpush3.bf16.xpose.msk.msra.mxu1 %vm11080_vm2, %v11098_v6  ;;  %v132_v14 = vsel %vm125_vm1, %v111_v12, 0.0  ;;  %v9802_v17 = vpack.c.bf16 %v112_v13, %v111_v12  ;;  %127 = vadd.xlane.f32.xlu0 %v126_v23  ;;  %v135_v24 = vsel %vm125_vm1, %v112_v13, 0.0  ;;  %v129_v25 = vsel %vm125_vm1, %v110_v8, 0.0  ;;  %v11216_v41 = vld [vmem:[%s15921_s0 + $0x58] sm:$0xff]  ;;  %v11229_v45 = vld [vmem:[%s15921_s0 + $0x68] sm:$0xff]  ;;  %v11240_v47 = vld [vmem:[%s15921_s0 + $0x60] sm:$0xff] }
  0x2b   :  { %9800 = vmatpush3.bf16.xpose.msk.msra.mxu0 %vm11080_vm2, %v9798_v11  ;;  %9837 = vmatprep.subr.msk.bf16.mxu1 %vm11080_vm2, %v11110_v10  ;;  %v9806_v26 = vpack.c.bf16 %v114_v22, %v113_v21  ;;  %v11171_v27 = vpack.c.bf16 %v11154_v20, %v11149_v19  ;;  %v138_v28 = vsel %vm125_vm1, %v113_v21, 0.0  ;;  %v115_v29 = vmul.f32 %v11149_v19, %v11149_v19  ;;  %v11249_v50 = vld [vmem:[%s15921_s0 + $0x70] sm:$0xff]  ;;  %v11254_v51 = vld [vmem:[%s15921_s0 + $0x78] sm:$0xff]  ;;  %v11272_v58 = vld [vmem:[%s15921_s0 + $0x88] sm:$0xff] }
  0x2c   :  { %9801 = vmatprep.subr.bf16.mxu0 %v15932_v0  ;;  %133 = vadd.xlane.f32.xlu1 %v132_v14  ;;  %v141_v30 = vsel %vm125_vm1, %v114_v22, 0.0  ;;  %v116_v31 = vmul.f32 %v11154_v20, %v11154_v20  ;;  %v118_v37 = vmul.f32 %v11195_v33, %v11195_v33  ;;  %v11211_v40 = vpack.c.bf16 %v11195_v33, %v11190_v32  ;;  %v11290_v3 = vld [vmem:[%s15921_s0 + $0x80] sm:$0xff]  ;;  %v11303_v12 = vld [vmem:[%s15921_s0 + $0x90] sm:$0xff]  ;;  %v11308_v13 = vld [vmem:[%s15921_s0 + $0x98] sm:$0xff] }
  0x2d   :  { %v144_v34 = vsel %vm125_vm1, %v115_v29, 0.0  ;;  %v117_v42 = vmul.f32 %v11190_v32, %v11190_v32  ;;  %v119_v44 = vmul.f32 %v11202_v35, %v11202_v35  ;;  %v120_v48 = vmul.f32 %v11216_v41, %v11216_v41  ;;  %v10215_v2 = vld [vmem:[%s15925_s4 + $0x4] ss:$12 sps:$4 sm:$0xff]  }
  0x2e   :  { %130 = vadd.xlane.f32.xlu0 %v129_v25  ;;  %v147_v38 = vsel %vm125_vm1, %v116_v31, 0.0  ;;  %v9810_v39 = vpack.c.bf16 %v116_v31, %v115_v29  ;;  %v153_v43 = vsel %vm125_vm1, %v118_v37, 0.0  ;;  %v11259_v54 = vpack.c.bf16 %v11216_v41, %v11202_v35  ;;  %v11343_v25 = vld [vmem:[%s15921_s0 + $0xa0] sm:$0xff]  ;;  %v11358_v31 = vld [vmem:[%s15921_s0 + $0xb0] sm:$0xff] }
  0x2f   :  { %v150_v46 = vsel %vm125_vm1, %v117_v42, 0.0  ;;  %v156_v49 = vsel %vm125_vm1, %v119_v44, 0.0  ;;  %v159_v52 = vsel %vm125_vm1, %v120_v48, 0.0  ;;  %v9814_v53 = vpack.c.bf16 %v118_v37, %v117_v42  ;;  %v11365_v37 = vld [vmem:[%s15921_s0 + $0xb8] sm:$0xff] }
  0x30   :  { %136 = vadd.xlane.f32.xlu1 %v135_v24  ;;  %v122_v55 = vmul.f32 %v11229_v45, %v11229_v45  ;;  %v121_v56 = vmul.f32 %v11240_v47, %v11240_v47  ;;  %v123_v60 = vmul.f32 %v11249_v50, %v11249_v50  ;;  %v124_v61 = vmul.f32 %v11254_v51, %v11254_v51 }
  0x31   :  { %v9818_v7 = vpack.c.bf16 %v120_v48, %v119_v44  ;;  %v11294_v8 = vpack.c.bf16 %v11229_v45, %v11240_v47  ;;  %v11298_v11 = vmul.f32 %v11272_v58, %v11272_v58  ;;  %v11327_v21 = vmul.f32 %v11290_v3, %v11290_v3  ;;  %v11400_v48 = vld [vmem:[%s15921_s0 + $0xc8] sm:$0xff] }
  0x32   :  { %9840 = vmatpush3.bf16.xpose.msk.msra.mxu1 %vm11080_vm2, %v11110_v10  ;;  %142 = vadd.xlane.f32.xlu0 %v141_v30  ;;  %v165_v57 = vsel %vm125_vm1, %v122_v55, 0.0  ;;  %v162_v59 = vsel %vm125_vm1, %v121_v56, 0.0  ;;  %v168_v62 = vsel %vm125_vm1, %v123_v60, 0.0  ;;  %v171_v63 = vsel %vm125_vm1, %v124_v61, 0.0 }
  0x33   :  { %9804 = vmatpush3.bf16.xpose.msk.msra.mxu0 %vm11080_vm2, %v9802_v17  ;;  %9843 = vmatprep.subr.msk.bf16.mxu1 %vm11080_vm2, %v11141_v18  ;;  %v591_v14 = vsel %vm125_vm1, %v11298_v11, 0.0  ;;  %v11318_v17 = vld [vmem:[%s15921_s0 + $0xa8] sm:$0xff]  ;;  %v11332_v22 = vmul.f32 %v11303_v12, %v11303_v12  ;;  %v11336_v23 = vmul.f32 %v11308_v13, %v11308_v13  ;;  %v588_v24 = vsel %vm125_vm1, %v11327_v21, 0.0 }
  0x34   :  { %9805 = vmatprep.subr.bf16.mxu0 %v15932_v0  ;;  %139 = vadd.xlane.f32.xlu1 %v138_v28  ;;  %v9822_v28 = vpack.c.bf16 %v122_v55, %v121_v56  ;;  %v11349_v29 = vpack.c.bf16 %v11254_v51, %v11249_v50  ;;  %v11353_v30 = vmul.f32 %v11318_v17, %v11318_v17  ;;  %v11415_v56 = vld [vmem:[%s15921_s0 + $0xd0] sm:$0xff] }
  0x35   :  { %v11384_v42 = vmul.f32 %v11343_v25, %v11343_v25  ;;  %v11393_v44 = vmul.f32 %v11365_v37, %v11365_v37 }
  0x36   :  { %148 = vadd.xlane.f32.xlu0 %v147_v38  ;;  %v603_v38 = vsel %vm125_vm1, %v11353_v30, 0.0 }
  0x38   :  { %145 = vadd.xlane.f32.xlu1 %v144_v34  ;;  %v597_v34 = vsel %vm125_vm1, %v11336_v23, 0.0 }
  0x3a   :  { %9846 = vmatpush3.bf16.xpose.msk.msra.mxu1 %vm11080_vm2, %v11141_v18  ;;  %151 = vadd.xlane.f32.xlu0 %v150_v46  ;;  %v600_v46 = vsel %vm125_vm1, %v11384_v42, 0.0 }
  0x3b   :  { %9808 = vmatpush3.bf16.xpose.msk.msra.mxu0 %vm11080_vm2, %v9806_v26  ;;  %9849 = vmatprep.subr.msk.bf16.mxu1 %vm11080_vm2, %v11171_v27  ;;  %v594_v26 = vsel %vm125_vm1, %v11332_v22, 0.0 }
  0x3c   :  { %9809 = vmatprep.subr.bf16.mxu0 %v15932_v0  ;;  %154 = vadd.xlane.f32.xlu1 %v153_v43  ;;  %v11389_v43 = vmul.f32 %v11358_v31, %v11358_v31 }
  0x3e   :  { %160 = vadd.xlane.f32.xlu0 %v159_v52  ;;  %v9826_v52 = vpack.c.bf16 %v124_v61, %v123_v60  ;;  %v11431_v60 = vmul.f32 %v11400_v48, %v11400_v48  ;;  %v11437_v61 = vld [vmem:[%s15921_s0 + $0xd8] sm:$0xff] }
  0x40   :  { %157 = vadd.xlane.f32.xlu1 %v156_v49  ;;  %v606_v49 = vsel %vm125_vm1, %v11389_v43, 0.0 }
  0x42   :  { %9852 = vmatpush3.bf16.xpose.msk.msra.mxu1 %vm11080_vm2, %v11171_v27  ;;  %163 = vadd.xlane.f32.xlu0 %v162_v59 }
  0x43   :  { %9812 = vmatpush3.bf16.xpose.msk.msra.mxu0 %vm11080_vm2, %v9810_v39  ;;  %9855 = vmatprep.subr.msk.bf16.mxu1 %vm11080_vm2, %v11211_v40  ;;  %v11375_v39 = vld [vmem:[%s15921_s0 + $0xc0] sm:$0xff] }
  0x44   :  { %9813 = vmatprep.subr.bf16.mxu0 %v15932_v0  ;;  %166 = vadd.xlane.f32.xlu1 %v165_v57  ;;  %v11410_v55 = vmul.f32 %v11375_v39, %v11375_v39  ;;  %v609_v57 = vsel %vm125_vm1, %v11393_v44, 0.0 }
  0x46   :  { %172 = vadd.xlane.f32.xlu0 %v171_v63  ;;  %v612_v59 = vsel %vm125_vm1, %v11410_v55, 0.0  ;;  %v615_v63 = vsel %vm125_vm1, %v11431_v60, 0.0 }
  0x48   :  { %169 = vadd.xlane.f32.xlu1 %v168_v62  ;;  %v11441_v62 = vmul.f32 %v11415_v56, %v11415_v56 }
  0x4a   :  { %9858 = vmatpush3.bf16.xpose.msk.msra.mxu1 %vm11080_vm2, %v11211_v40  ;;  %589 = vadd.xlane.f32.xlu0 %v588_v24  ;;  %v9878_v24 = vpack.c.bf16 %v11298_v11, %v11327_v21  ;;  %v11004_v21 = vmov 1.0  }
  0x4b   :  { %9816 = vmatpush3.bf16.xpose.msk.msra.mxu0 %vm11080_vm2, %v9814_v53  ;;  %9861 = vmatprep.subr.msk.bf16.mxu1 %vm11080_vm2, %v11259_v54  ;;  %v11406_v53 = vpack.c.bf16 %v11272_v58, %v11290_v3 }
  0x4c   :  { %9817 = vmatprep.subr.bf16.mxu0 %v15932_v0  ;;  %592 = vadd.xlane.f32.xlu1 %v591_v14  ;;  %v618_v14 = vsel %vm125_vm1, %v11441_v62, 0.0 }
  0x4e   :  { %598 = vadd.xlane.f32.xlu0 %v597_v34  ;;  %v11467_v34 = vld [vmem:[%s15921_s0 + $0xe8] sm:$0xff] }
  0x50   :  { %595 = vadd.xlane.f32.xlu1 %v594_v26  ;;  %v11456_v26 = vpack.c.bf16 %v11308_v13, %v11303_v12 }
  0x52   :  { %9864 = vmatpush3.bf16.xpose.msk.msra.mxu1 %vm11080_vm2, %v11259_v54  ;;  %601 = vadd.xlane.f32.xlu0 %v600_v46 }
  0x53   :  { %9820 = vmatpush3.bf16.xpose.msk.msra.mxu0 %vm11080_vm2, %v9818_v7  ;;  %9867 = vmatprep.subr.msk.bf16.mxu1 %vm11080_vm2, %v11294_v8  ;;  %v11448_v7 = vld [vmem:[%s15921_s0 + $0xe0] sm:$0xff] }
  0x54   :  { %9821 = vmatprep.subr.bf16.mxu0 %v15932_v0  ;;  %604 = vadd.xlane.f32.xlu1 %v603_v38  ;;  %v11471_v11 = vmul.f32 %v11448_v7, %v11448_v7  ;;  %v11490_v38 = vld [vmem:[%s15921_s0 + $0xf8] sm:$0xff] }
  0x56   :  { %610 = vadd.xlane.f32.xlu0 %v609_v57  ;;  %v11512_v57 = vpack.c.bf16 %v11318_v17, %v11343_v25 }
  0x58   :  { %607 = vadd.xlane.f32.xlu1 %v606_v49  ;;  %v624_v49 = vsel %vm125_vm1, %v11471_v11, 0.0 }
  0x5a   :  { %9870 = vmatpush3.bf16.xpose.msk.msra.mxu1 %vm11080_vm2, %v11294_v8  ;;  %616 = vadd.xlane.f32.xlu0 %v615_v63 }
  0x5b   :  { %9824 = vmatpush3.bf16.xpose.msk.msra.mxu0 %vm11080_vm2, %v9822_v28  ;;  %9873 = vmatprep.subr.msk.bf16.mxu1 %vm11080_vm2, %v11349_v29  ;;  %v11462_v28 = vmul.f32 %v11437_v61, %v11437_v61 }
  0x5c   :  { %9825 = vmatprep.subr.bf16.mxu0 %v15932_v0  ;;  %613 = vadd.xlane.f32.xlu1 %v612_v59  ;;  %v587_v59 = vmul.f32 %v11490_v38, %v11490_v38 }
  0x5d   :  { %v621_v46 = vsel %vm125_vm1, %v11462_v28, 0.0 }
  0x5e   :  { %622 = vadd.xlane.f32.xlu0 %v621_v46  ;;  %v10264_v46 = vld [vmem:[%s15925_s4 + $0x13c] ss:$12 sps:$4 sm:$0xff]  }
  0x60   :  { %619 = vadd.xlane.f32.xlu1 %v618_v14  ;;  %v10237_v14 = vld [vmem:[%s15925_s4 + $0xc0] ss:$12 sps:$4 sm:$0xff]  }
  0x62   :  { %9876 = vmatpush3.bf16.xpose.msk.msra.mxu1 %vm11080_vm2, %v11349_v29 }
  0x63   :  { %9828 = vmatpush3.bf16.xpose.msk.msra.mxu0 %vm11080_vm2, %v9826_v52  ;;  %9911 = vmatprep.subr.msk.bf16.mxu1 %vm11080_vm2, %v11406_v53  ;;  %v9882_v52 = vpack.c.bf16 %v11336_v23, %v11332_v22  ;;  %v633_v22 = vsel %vm125_vm1, %v587_v59, 0.0 }
  0x64   :  { %9877 = vmatprep.subr.bf16.mxu0 %v15932_v0  ;;  %625 = vadd.xlane.f32.xlu1 %v624_v49  ;;  %v10265_v49 = vld [vmem:[%s15925_s4 + $0x140] ss:$12 sps:$4 sm:$0xff]  }
  0x69   :  { %9549 = vmatmul.mubr.msk.f32.vlgmr.msra.gmra.mrb[0].mxu1 %vm125_vm1, %v11090_v4  ;;  %v11481_v4 = vld [vmem:[%s15921_s0 + $0xf0] sm:$0xff] }
  0x6a   :  { %9514 = vmatmul.mubr.msk.f32.vlgmr.msra.gmra.mrb[0].mxu0 %vm125_vm1, %v11004_v21  ;;  %9914 = vmatpush3.bf16.xpose.msk.msra.mxu1 %vm11080_vm2, %v11406_v53 }
  0x6b   :  { %9880 = vmatpush3.bf16.xpose.msk.msra.mxu0 %vm11080_vm2, %v9878_v24  ;;  %9551 = vmatprep.mubr.msk.f32.mxu1 %vm125_vm1, %v11095_v5  ;;  %v585_v5 = vmul.f32 %v11467_v34, %v11467_v34  ;;  %v10244_v24 = vld [vmem:[%s15925_s4 + $0xdc] ss:$12 sps:$4 sm:$0xff]  }
  0x6c   :  { %9917 = vmatprep.subr.msk.bf16.mxu1 %vm11080_vm2, %v11456_v26  ;;  %9881 = vmatprep.subr.bf16.mxu0 %v15932_v0 }
  0x6d   :  { %9552 = vmatmul.mubr.msk.f32.gmra.mrb[2].mxu1 %vm125_vm1, %v11105_v9  ;;  %9604 = vmatprep.mubr.msk.f32.mxu0 %vm11001_vm0, %v15930_v1  ;;  %v586_v9 = vmul.f32 %v11481_v4, %v11481_v4 }
  0x6e   :  { %9554 = vmatprep.mubr.msk.f32.mxu1 %vm125_vm1, %v11132_v15  ;;  %v627_v15 = vsel %vm125_vm1, %v585_v5, 0.0 }
  0x6f   :  { %v630_v63 = vsel %vm125_vm1, %v586_v9, 0.0  ;;  %628 = vadd.xlane.f32.xlu0 %v627_v15  ;;  %v10271_v15 = vld [vmem:[%s15925_s4 + $0x98] ss:$12 sps:$4 sm:$0xff]  }
  0x70   :  { %631 = vadd.xlane.f32.xlu1 %v630_v63  ;;  %v10274_v63 = vld [vmem:[%s15925_s4 + $0x16c] ss:$12 sps:$4 sm:$0xff]  }
  0x71   :  { %9555 = vmatmul.mubr.msk.f32.gmra.mrb[4].mxu1 %vm125_vm1, %v11137_v16  ;;  %v9886_v16 = vpack.c.bf16 %v11353_v30, %v11384_v42 }
  0x72   :  { %9920 = vmatpush3.bf16.xpose.msk.msra.mxu1 %vm11080_vm2, %v11456_v26  ;;  %9557 = vmatprep.mubr.msk.f32.mxu1 %vm125_vm1, %v11149_v19  ;;  %v11542_v19 = vpack.c.bf16 %v11365_v37, %v11358_v31 }
  0x73   :  { %9884 = vmatpush3.bf16.xpose.msk.msra.mxu0 %vm11080_vm2, %v9882_v52  ;;  %9923 = vmatprep.subr.msk.bf16.mxu1 %vm11080_vm2, %v11512_v57  ;;  %v10266_v52 = vld [vmem:[%s15925_s4 + $0x80] ss:$12 sps:$4 sm:$0xff]  }
  0x74   :  { %9885 = vmatprep.subr.bf16.mxu0 %v15932_v0  ;;  %634 = vadd.xlane.f32.xlu0 %v633_v22  ;;  %v10275_v22 = vld [vmem:[%s15925_s4 + $0x170] ss:$12 sps:$4 sm:$0xff]  }
  0x75   :  { %9558 = vmatmul.mubr.msk.f32.gmra.mrb[6].mxu1 %vm125_vm1, %v11154_v20  ;;  %v9890_v20 = vpack.c.bf16 %v11393_v44, %v11389_v43  ;;  %v10246_v43 = vld [vmem:[%s15925_s4 + $0x20] ss:$12 sps:$4 sm:$0xff]   ;;  %v10250_v44 = vld [vmem:[%s15925_s4 + $0xf8] ss:$12 sps:$4 sm:$0xff]  }
  0x76   :  { %9560 = vmatprep.mubr.msk.f32.mxu1 %vm125_vm1, %v11190_v32  ;;  %v11565_v32 = vpack.c.bf16 %v11400_v48, %v11375_v39 }
  0x79   :  { %9561 = vmatmul.mubr.msk.f32.gmra.mrb[8].mxu1 %vm125_vm1, %v11195_v33  ;;  %v9894_v33 = vpack.c.bf16 %v11431_v60, %v11410_v55  ;;  %v10236_v55 = vld [vmem:[%s15925_s4 + $0xac] ss:$12 sps:$4 sm:$0xff]   ;;  %v10234_v60 = vld [vmem:[%s15925_s4 + $0xa8] ss:$12 sps:$4 sm:$0xff]  }
  0x7a   :  { %9926 = vmatpush3.bf16.xpose.msk.msra.mxu1 %vm11080_vm2, %v11512_v57  ;;  %9563 = vmatprep.mubr.msk.f32.mxu1 %vm125_vm1, %v11202_v35  ;;  %v11588_v35 = vpack.c.bf16 %v11437_v61, %v11415_v56 }
  0x7b   :  { %9888 = vmatpush3.bf16.xpose.msk.msra.mxu0 %vm11080_vm2, %v9886_v16  ;;  %9929 = vmatprep.subr.msk.bf16.mxu1 %vm11080_vm2, %v11542_v19  ;;  %v10272_v16 = vld [vmem:[%s15925_s4 + $0x168] ss:$12 sps:$4 sm:$0xff]  }
  0x7c   :  { %9889 = vmatprep.subr.bf16.mxu0 %v15932_v0 }
  0x7d   :  { %9564 = vmatmul.mubr.msk.f32.gmra.mrb[10].mxu1 %vm125_vm1, %v11216_v41  ;;  %v9898_v41 = vpack.c.bf16 %v11462_v28, %v11441_v62  ;;  %v10256_v62 = vld [vmem:[%s15925_s4 + $0x50] ss:$12 sps:$4 sm:$0xff]   ;;  %v10242_v28 = vld [vmem:[%s15925_s4 + $0xd8] ss:$12 sps:$4 sm:$0xff]  }
  0x7e   :  { %9566 = vmatprep.mubr.msk.f32.mxu1 %vm125_vm1, %v11240_v47  ;;  %v9902_v47 = vpack.c.bf16 %v585_v5, %v11471_v11  ;;  %v10254_v11 = vld [vmem:[%s15925_s4 + $0x10c] ss:$12 sps:$4 sm:$0xff]  }
  0x7f   :  { %v10262_v5 = vld [vmem:[%s15925_s4 + $0x138] ss:$12 sps:$4 sm:$0xff]  }
  0x81   :  { %9567 = vmatmul.mubr.msk.f32.gmra.mrb[12].mxu1 %vm125_vm1, %v11229_v45  ;;  %v11603_v45 = vpack.c.bf16 %v11467_v34, %v11448_v7 }
  0x82   :  { %9932 = vmatpush3.bf16.xpose.msk.msra.mxu1 %vm11080_vm2, %v11542_v19  ;;  %9569 = vmatprep.mubr.msk.f32.mxu1 %vm125_vm1, %v11249_v50  ;;  %v11617_v50 = vpack.c.bf16 %v11490_v38, %v11481_v4 }
  0x83   :  { %9892 = vmatpush3.bf16.xpose.msk.msra.mxu0 %vm11080_vm2, %v9890_v20  ;;  %9935 = vmatprep.subr.msk.bf16.mxu1 %vm11080_vm2, %v11565_v32 }
  0x84   :  { %9893 = vmatprep.subr.bf16.mxu0 %v15932_v0 }
  0x85   :  { %9570 = vmatmul.mubr.msk.f32.gmra.mrb[14].mxu1 %vm125_vm1, %v11254_v51  ;;  %v1047_v51 = vld [vmem:[%s15924_s3] sm:$0xff] }
  0x86   :  { %9639 = vmatprep.mubr.msk.f32.mxu1 %vm125_vm1, %v11290_v3  ;;  %v9906_v3 = vpack.c.bf16 %v587_v59, %v586_v9  ;;  %v8675_v23 = vcombine.high %v1047_v51, %v1047_v51  ;;  %v8674_v30 = vcombine.low %v1047_v51, %v1047_v51  ;;  %v10270_v9 = vld [vmem:[%s15925_s4 + $0x158] ss:$12 sps:$4 sm:$0xff]   ;;  %v10267_v59 = vld [vmem:[%s15925_s4 + $0x150] ss:$12 sps:$4 sm:$0xff]  }
  0x88   :  { %v1112_v42 = vsel %vm1110_vm3, %v8674_v30, 0 }
  0x8a   :  { %9938 = vmatpush3.bf16.xpose.msk.msra.mxu1 %vm11080_vm2, %v11565_v32 }
  0x8b   :  { %9896 = vmatpush3.bf16.xpose.msk.msra.mxu0 %vm11080_vm2, %v9894_v33  ;;  %9941 = vmatprep.subr.msk.bf16.mxu1 %vm11080_vm2, %v11588_v35 }
  0x8c   :  { %9897 = vmatprep.subr.bf16.mxu0 %v15932_v0 }
  0x92   :  { %9944 = vmatpush3.bf16.xpose.msk.msra.mxu1 %vm11080_vm2, %v11588_v35 }
  0x93   :  { %9900 = vmatpush3.bf16.xpose.msk.msra.mxu0 %vm11080_vm2, %v9898_v41  ;;  %9947 = vmatprep.subr.msk.bf16.mxu1 %vm11080_vm2, %v11603_v45  ;;  %v488_v41 = vlaneseq }
  0x94   :  { %9901 = vmatprep.subr.bf16.mxu0 %v15932_v0 }
  0x95   :  { %v11860_v51 = vshrl.u32 %v488_v41, 7 }
  0x97   :  { %16411 = vst [vmem:[#allocation8_spill] sm:$0xff] %v11860_v51 }
  0x9a   :  { %9950 = vmatpush3.bf16.xpose.msk.msra.mxu1 %vm11080_vm2, %v11603_v45 }
  0x9b   :  { %9904 = vmatpush3.bf16.xpose.msk.msra.mxu0 %vm11080_vm2, %v9902_v47  ;;  %9953 = vmatprep.subr.msk.bf16.mxu1 %vm11080_vm2, %v11617_v50 }
  0x9c   :  { %9905 = vmatprep.subr.bf16.mxu0 %v15932_v0 }
  0xa2   :  { %9956 = vmatpush3.bf16.xpose.msk.msra.mxu1 %vm11080_vm2, %v11617_v50 }
  0xa3   :  { %9908 = vmatpush3.bf16.xpose.msk.msra.mxu0 %vm11080_vm2, %v9906_v3  ;;  %1726 = vmatprep.subr.bf16.mxu1 %v10215_v2 }
  0xa4   :  { %8676 = vmatprep.subr.msk.bf16.mxu0 %vm1110_vm3, %v8675_v23 }
  0xa9   :  { %9640 = vmatmul.mubr.msk.f32.vlgmr.msra.gmra.mrb[16].mxu1 %vm125_vm1, %v11272_v58  ;;  %v10224_v58 = vld [vmem:[%s15925_s4 + $0x4c] ss:$12 sps:$4 sm:$0xff]  }
  0xaa   :  { %9605 = vmatmul.mubr.msk.f32.vlgmr.msra.gmra.mrb[2].mxu0 %vm125_vm1, %v11004_v21  ;;  %9642 = vmatprep.mubr.msk.f32.mxu1 %vm125_vm1, %v11303_v12  ;;  %v10225_v12 = vld [vmem:[%s15925_s4 + $0x60] ss:$12 sps:$4 sm:$0xff]   ;;  %v10252_v21 = vld [vmem:[%s15925_s4 + $0x108] ss:$12 sps:$4 sm:$0xff]  }
  0xab   :  { %1118 = vmatpush1.bf16.msra.mxu0 %v1112_v42  ;;  %1149 = vmatprep.mubr.bf16.mxu0 %v15934_v36 }
  0xad   :  { %9643 = vmatmul.mubr.msk.f32.gmra.mrb[18].mxu1 %vm125_vm1, %v11308_v13  ;;  %v10227_v13 = vld [vmem:[%s15925_s4 + $0x64] ss:$12 sps:$4 sm:$0xff]  }
  0xae   :  { %8677 = vmatmul.mubr.msk.bf16.vlgmr.msra.gmra.mrb[4].mxu0 %vm1061_vm4, %v11098_v6  ;;  %9645 = vmatprep.mubr.msk.f32.mxu1 %vm125_vm1, %v11343_v25  ;;  %v10213_v6 = vld [vmem:[%s15925_s4] ss:$12 sps:$4 sm:$0xff]   ;;  %v10241_v25 = vld [vmem:[%s15925_s4 + $0x8] ss:$12 sps:$4 sm:$0xff]  }
  0xaf   :  { %1159 = vmatprep.mubr.bf16.mxu0 %v15934_v36  ;;  %1727 = vmatpush1.bf16.msra.mxu1 %v10213_v6 }
  0xb1   :  { %9646 = vmatmul.mubr.msk.f32.gmra.mrb[20].mxu1 %vm125_vm1, %v11318_v17  ;;  %v10230_v17 = vld [vmem:[%s15925_s4 + $0x7c] ss:$12 sps:$4 sm:$0xff]  }
  0xb2   :  { %9648 = vmatprep.mubr.msk.f32.mxu1 %vm125_vm1, %v11358_v31  ;;  %v10228_v31 = vld [vmem:[%s15925_s4 + $0x78] ss:$12 sps:$4 sm:$0xff]  }
  0xb5   :  { %9649 = vmatmul.mubr.msk.f32.gmra.mrb[22].mxu1 %vm125_vm1, %v11365_v37  ;;  %v10245_v37 = vld [vmem:[%s15925_s4 + $0xe0] ss:$12 sps:$4 sm:$0xff]  }
  0xb6   :  { %8678 = vmatmul.mubr.msk.bf16.gmra.mrb[8].mxu0 %vm1061_vm4, %v11110_v10  ;;  %9651 = vmatprep.mubr.msk.f32.mxu1 %vm125_vm1, %v11375_v39  ;;  %v10218_v10 = vld [vmem:[%s15925_s4 + $0x1c] ss:$12 sps:$4 sm:$0xff]   ;;  %v10233_v39 = vld [vmem:[%s15925_s4 + $0x94] ss:$12 sps:$4 sm:$0xff]  }
  0xb7   :  { %1169 = vmatprep.mubr.bf16.mxu0 %v15934_v36  ;;  %1728 = vmatprep.subr.bf16.mxu1 %v10218_v10  ;;  %v128_v20 = vpop.xlane.xlu0 %127 }
  0xb9   :  { %9652 = vmatmul.mubr.msk.f32.gmra.mrb[24].mxu1 %vm125_vm1, %v11400_v48  ;;  %v10231_v48 = vld [vmem:[%s15925_s4 + $0x90] ss:$12 sps:$4 sm:$0xff]   ;;  %v134_v33 = vpop.xlane.xlu1 %133 }
  0xba   :  { %9654 = vmatprep.mubr.msk.f32.mxu1 %vm125_vm1, %v11415_v56  ;;  %v10251_v56 = vld [vmem:[%s15925_s4 + $0x38] ss:$12 sps:$4 sm:$0xff]  }
  0xbd   :  { %9655 = vmatmul.mubr.msk.f32.gmra.mrb[26].mxu1 %vm125_vm1, %v11437_v61  ;;  %v10239_v61 = vld [vmem:[%s15925_s4 + $0xc4] ss:$12 sps:$4 sm:$0xff]   ;;  %v137_v47 = vpop.xlane.xlu1 %136 }
  0xbe   :  { %8679 = vmatmul.mubr.msk.bf16.gmra.mrb[12].mxu0 %vm1061_vm4, %v11141_v18  ;;  %9657 = vmatprep.mubr.msk.f32.mxu1 %vm125_vm1, %v11448_v7  ;;  %v10216_v18 = vld [vmem:[%s15925_s4 + $0x18] ss:$12 sps:$4 sm:$0xff]   ;;  %v10260_v7 = vld [vmem:[%s15925_s4 + $0x128] ss:$12 sps:$4 sm:$0xff]  }
  0xbf   :  { %1179 = vmatprep.mubr.bf16.mxu0 %v15934_v36  ;;  %1729 = vmatpush1.bf16.msra.mxu1 %v10216_v18 }
  0xc1   :  { %9658 = vmatmul.mubr.msk.f32.gmra.mrb[28].mxu1 %vm125_vm1, %v11467_v34  ;;  %v10247_v34 = vld [vmem:[%s15925_s4 + $0xf0] ss:$12 sps:$4 sm:$0xff]   ;;  %v140_v23 = vpop.xlane.xlu1 %139 }
  0xc2   :  { %9660 = vmatprep.mubr.msk.f32.mxu1 %vm125_vm1, %v11481_v4  ;;  %v10257_v4 = vld [vmem:[%s15925_s4 + $0x120] ss:$12 sps:$4 sm:$0xff]  }
  0xc5   :  { %9661 = vmatmul.mubr.msk.f32.gmra.mrb[30].mxu1 %vm125_vm1, %v11490_v38  ;;  %v10261_v38 = vld [vmem:[%s15925_s4 + $0x68] ss:$12 sps:$4 sm:$0xff]  }
  0xc6   :  { %8680 = vmatmul.mubr.msk.bf16.gmra.mrb[16].mxu0 %vm1061_vm4, %v11171_v27  ;;  %v10221_v27 = vld [vmem:[%s15925_s4 + $0x34] ss:$12 sps:$4 sm:$0xff]  }
  0xc7   :  { %1189 = vmatprep.mubr.bf16.mxu0 %v15934_v36  ;;  %1730 = vmatprep.subr.bf16.mxu1 %v10221_v27  ;;  %v146_v27 = vpop.xlane.xlu1 %145 }
  0xce   :  { %8681 = vmatmul.mubr.msk.bf16.gmra.mrb[20].mxu0 %vm1061_vm4, %v11211_v40  ;;  %v10219_v40 = vld [vmem:[%s15925_s4 + $0x30] ss:$12 sps:$4 sm:$0xff]  }
  0xcf   :  { %1199 = vmatprep.mubr.bf16.mxu0 %v15934_v36  ;;  %1731 = vmatpush1.bf16.msra.mxu1 %v10219_v40 }
  0xd0   :  { %1732 = vmatprep.subr.bf16.mxu1 %v10224_v58 }
  0xd6   :  { %8682 = vmatmul.mubr.msk.bf16.gmra.mrb[24].mxu0 %vm1061_vm4, %v11259_v54  ;;  %v10222_v54 = vld [vmem:[%s15925_s4 + $0x48] ss:$12 sps:$4 sm:$0xff]  }
  0xd7   :  { %1209 = vmatprep.mubr.bf16.mxu0 %v15934_v36  ;;  %1733 = vmatpush1.bf16.msra.mxu1 %v10222_v54 }
  0xd8   :  { %1734 = vmatprep.subr.bf16.mxu1 %v10227_v13 }
  0xdb   :  { %1735 = vmatpush1.bf16.msra.mxu1 %v10225_v12 }
  0xdc   :  { %1736 = vmatprep.subr.bf16.mxu1 %v10230_v17 }
  0xde   :  { %8683 = vmatmul.mubr.msk.bf16.gmra.mrb[28].mxu0 %vm1061_vm4, %v11294_v8  ;;  %v10240_v8 = vld [vmem:[%s15925_s4 + $0xc8] ss:$12 sps:$4 sm:$0xff]  }
  0xdf   :  { %1219 = vmatprep.mubr.bf16.mxu0 %v15934_v36  ;;  %8967 = vmatprep.subr.bf16.mxu0 %v10240_v8 }
  0xe0   :  { %8968 = vmatpush3.bf16.msra.mxu0 %v10241_v25  ;;  %1737 = vmatpush1.bf16.msra.mxu1 %v10228_v31 }
  0xe1   :  { %8969 = vmatprep.subr.bf16.mxu0 %v10245_v37  ;;  %1738 = vmatprep.subr.bf16.mxu1 %v10233_v39 }
  0xe4   :  { %8970 = vmatpush3.bf16.msra.mxu0 %v10246_v43  ;;  %1739 = vmatpush1.bf16.msra.mxu1 %v10231_v48 }
  0xe5   :  { %8971 = vmatprep.subr.bf16.mxu0 %v10250_v44  ;;  %1740 = vmatprep.subr.bf16.mxu1 %v10236_v55  ;;  %v155_v55 = vpop.xlane.xlu1 %154 }
  0xe6   :  { %8684 = vmatmul.mubr.msk.bf16.gmra.mrb[32].mxu0 %vm1061_vm4, %v11349_v29  ;;  %v10255_v29 = vld [vmem:[%s15925_s4 + $0x110] ss:$12 sps:$4 sm:$0xff]  }
  0xe7   :  { %1229 = vmatprep.mubr.bf16.mxu0 %v15934_v36 }
  0xe8   :  { %8972 = vmatpush3.bf16.msra.mxu0 %v10251_v56  ;;  %1741 = vmatpush1.bf16.msra.mxu1 %v10234_v60 }
  0xe9   :  { %8973 = vmatprep.subr.bf16.mxu0 %v10255_v29  ;;  %1742 = vmatprep.subr.bf16.mxu1 %v10239_v61 }
  0xec   :  { %8974 = vmatpush3.bf16.msra.mxu0 %v10256_v62  ;;  %1743 = vmatpush1.bf16.msra.mxu1 %v10237_v14 }
  0xed   :  { %8975 = vmatprep.subr.bf16.mxu0 %v10260_v7  ;;  %1744 = vmatprep.subr.bf16.mxu1 %v10244_v24 }
  0xee   :  { %8685 = vmatmul.mubr.msk.bf16.gmra.mrb[36].mxu0 %vm1061_vm4, %v11406_v53  ;;  %v10249_v53 = vld [vmem:[%s15925_s4 + $0xf4] ss:$12 sps:$4 sm:$0xff]  }
  0xef   :  { %1239 = vmatprep.mubr.bf16.mxu0 %v15934_v36 }
  0xf0   :  { %1745 = vmatpush1.bf16.msra.mxu1 %v10242_v28  ;;  %8976 = vmatpush3.bf16.msra.mxu0 %v10261_v38 }
  0xf1   :  { %1746 = vmatprep.subr.bf16.mxu1 %v10249_v53  ;;  %8977 = vmatprep.subr.bf16.mxu0 %v10265_v49 }
  0xf4   :  { %1747 = vmatpush1.bf16.msra.mxu1 %v10247_v34  ;;  %8978 = vmatpush3.bf16.msra.mxu0 %v10266_v52 }
  0xf5   :  { %1748 = vmatprep.subr.bf16.mxu1 %v10254_v11  ;;  %8979 = vmatprep.subr.bf16.mxu0 %v10270_v9 }
  0xf6   :  { %8686 = vmatmul.mubr.msk.bf16.gmra.mrb[40].mxu0 %vm1061_vm4, %v11456_v26  ;;  %v10259_v26 = vld [vmem:[%s15925_s4 + $0x124] ss:$12 sps:$4 sm:$0xff]  }
  0xf7   :  { %1249 = vmatprep.mubr.bf16.mxu0 %v15934_v36 }
  0xf8   :  { %1749 = vmatpush1.bf16.msra.mxu1 %v10252_v21  ;;  %8980 = vmatpush3.bf16.msra.mxu0 %v10271_v15 }
  0xf9   :  { %1750 = vmatprep.subr.bf16.mxu1 %v10259_v26  ;;  %8981 = vmatprep.subr.bf16.mxu0 %v10275_v22 }
  0xfc   :  { %1751 = vmatpush1.bf16.msra.mxu1 %v10257_v4  ;;  %v158_v4 = vpop.xlane.xlu1 %157 }
  0xfd   :  { %1752 = vmatprep.subr.bf16.mxu1 %v10264_v46 }
  0xfe   :  { %8687 = vmatmul.mubr.msk.bf16.gmra.mrb[44].mxu0 %vm1061_vm4, %v11512_v57  ;;  %v10269_v57 = vld [vmem:[%s15925_s4 + $0x154] ss:$12 sps:$4 sm:$0xff]  }
  0xff   :  { %1259 = vmatprep.mubr.bf16.mxu0 %v15934_v36 }
 0x100   :  { %1753 = vmatpush1.bf16.msra.mxu1 %v10262_v5 }
 0x101   :  { %1754 = vmatprep.subr.bf16.mxu1 %v10269_v57 }
 0x104   :  { %1755 = vmatpush1.bf16.msra.mxu1 %v10267_v59 }
 0x105   :  { %1756 = vmatprep.subr.bf16.mxu1 %v10274_v63 }
 0x106   :  { %8688 = vmatmul.mubr.msk.bf16.gmra.mrb[48].mxu0 %vm1061_vm4, %v11542_v19  ;;  %v10276_v19 = vld [vmem:[%s15925_s4 + $0xb0] ss:$12 sps:$4 sm:$0xff]  }
 0x107   :  { %1269 = vmatprep.mubr.bf16.mxu0 %v15934_v36  ;;  %8982 = vmatpush3.bf16.msra.mxu0 %v10276_v19  ;;  %v167_v19 = vpop.xlane.xlu1 %166 }
 0x108   :  { %1757 = vmatpush1.bf16.msra.mxu1 %v10272_v16 }
 0x10e   :  { %8689 = vmatmul.mubr.msk.bf16.gmra.mrb[52].mxu0 %vm1061_vm4, %v11565_v32  ;;  %v131_v32 = vpop.xlane.xlu0 %130 }
 0x10f   :  { %1279 = vmatprep.mubr.bf16.mxu0 %v15934_v36 }
 0x112   :  { %v143_v3 = vpop.xlane.xlu0 %142 }
 0x116   :  { %8690 = vmatmul.mubr.msk.bf16.gmra.mrb[56].mxu0 %vm1061_vm4, %v11588_v35  ;;  %v11863_v35 = vsub.s32 0, %v11860_v51  ;;  %v149_v2 = vpop.xlane.xlu0 %148 }
 0x117   :  { %1289 = vmatprep.mubr.bf16.mxu0 %v15934_v36 }
 0x118   :  { %16412 = vst [vmem:[#allocation9_spill] sm:$0xff] %v11863_v35 }
 0x11a   :  { %v152_v43 = vpop.xlane.xlu0 %151 }
 0x11e   :  { %8691 = vmatmul.mubr.msk.bf16.gmra.mrb[60].mxu0 %vm1061_vm4, %v11603_v45  ;;  %v161_v11 = vpop.xlane.xlu0 %160 }
 0x11f   :  { %1299 = vmatprep.mubr.bf16.mxu0 %v15934_v36 }
 0x122   :  { %v164_v63 = vpop.xlane.xlu0 %163 }
 0x126   :  { %8692 = vmatmul.mubr.msk.bf16.gmra.mrb[64].mxu0 %vm1061_vm4, %v11617_v50 }
 0x13c   :  { %v9550_v30 = vpop.f32.mrb[0].mxu1 }
 0x13d   :  { %v291_v42 = vpop.f32.mrb[0].mxu0  ;;  %v409_v45 = vpop.f32.mrb[1].mxu1  ;;  %v11868_v10 = vmul.f32 2.0, %v9550_v30 }
 0x13e   :  { %v11866_v6 = vrot.slane %v291_v42, %v11863_v35  ;;  %v9515_v50 = vpop.f32.mrb[1].mxu0  ;;  %v11870_v18 = vmul.f32 2.0, %v409_v45 }
 0x13f   :  { %v173_v50 = vpop.xlane.xlu0 %172 }
 0x140   :  { %v11873_v40 = vadd.f32 %v11866_v6, %v131_v32  ;;  %v11876_v58 = vadd.f32 %v11866_v6, %v128_v20  ;;  %v9553_v54 = vpop.f32.mrb[2].mxu1  ;;  %v11879_v12 = vadd.f32 %v11866_v6, %v137_v47  ;;  %v11884_v8 = vadd.f32 %v11866_v6, %v134_v33 }
 0x141   :  { %v11881_v13 = vmul.f32 2.0, %v9553_v54  ;;  %v419_v17 = vpop.f32.mrb[3].mxu1  ;;  %v11897_v56 = vadd.f32 %v11866_v6, %v143_v3  ;;  %v11902_v61 = vadd.f32 %v11866_v6, %v140_v23  ;;  %v11911_v28 = vadd.f32 %v11866_v6, %v149_v2  ;;  %v58_v3 = vld [vmem:[%s15923_s2] sm:$0xff] }
 0x142   :  { %v11890_v37 = vmul.f32 2.0, %v419_v17  ;;  %v11916_v21 = vadd.f32 %v11866_v6, %v146_v27  ;;  %v11925_v5 = vadd.f32 %v11866_v6, %v155_v55  ;;  %v11930_v9 = vadd.f32 %v11866_v6, %v152_v43  ;;  %v170_v17 = vpop.xlane.xlu1 %169 }
 0x143   :  { %v11939_v20 = vadd.f32 %v11866_v6, %v161_v11  ;;  %v11944_v41 = vadd.f32 %v11866_v6, %v158_v4  ;;  %v11953_v42 = vadd.f32 %v11866_v6, %v167_v19  ;;  %v11958_v27 = vadd.f32 %v11866_v6, %v164_v63  ;;  %v590_v63 = vpop.xlane.xlu0 %589 }
 0x144   :  { %v9556_v48 = vpop.f32.mrb[4].mxu1  ;;  %v11972_v11 = vadd.f32 %v11866_v6, %v170_v17  ;;  %v12011_v14 = vrot.slane %v58_v3, %v11863_v35 }
 0x145   :  { %v11899_v29 = vmul.f32 2.0, %v9556_v48  ;;  %v429_v60 = vpop.f32.mrb[5].mxu1 }
 0x146   :  { %v11904_v62 = vmul.f32 2.0, %v429_v60  ;;  %v11967_v60 = vadd.f32 %v11866_v6, %v173_v50  ;;  %16413 = vst [vmem:[#allocation10_spill] sm:$0xff] %v11972_v11  ;;  %v11983_v6 = vld [vmem:[%s15923_s2 + $0x8] sm:$0xff] }
 0x147   :  { %v599_v19 = vpop.xlane.xlu0 %598 }
 0x148   :  { %v9559_v24 = vpop.f32.mrb[6].mxu1 }
 0x149   :  { %v11913_v53 = vmul.f32 2.0, %v9559_v24  ;;  %v439_v34 = vpop.f32.mrb[7].mxu1 }
 0x14a   :  { %v11918_v26 = vmul.f32 2.0, %v439_v34 }
 0x14c   :  { %v9562_v49 = vpop.f32.mrb[8].mxu1 }
 0x14d   :  { %v11927_v52 = vmul.f32 2.0, %v9562_v49  ;;  %v449_v57 = vpop.f32.mrb[9].mxu1 }
 0x14e   :  { %v11932_v59 = vmul.f32 2.0, %v449_v57 }
 0x150   :  { %v9565_v16 = vpop.f32.mrb[10].mxu1 }
 0x151   :  { %v11941_v33 = vmul.f32 2.0, %v9565_v16  ;;  %v459_v32 = vpop.f32.mrb[11].mxu1  ;;  %v593_v16 = vpop.xlane.xlu1 %592 }
 0x152   :  { %v11946_v47 = vmul.f32 2.0, %v459_v32 }
 0x154   :  { %v9568_v30 = vpop.f32.mrb[12].mxu1 }
 0x155   :  { %v11955_v45 = vmul.f32 2.0, %v9568_v30  ;;  %v469_v2 = vpop.f32.mrb[13].mxu1  ;;  %v596_v32 = vpop.xlane.xlu1 %595 }
 0x156   :  { %v11960_v54 = vmul.f32 2.0, %v469_v2  ;;  %v602_v30 = vpop.xlane.xlu0 %601 }
 0x158   :  { %v9571_v55 = vpop.f32.mrb[14].mxu1 }
 0x159   :  { %v11969_v24 = vmul.f32 2.0, %v9571_v55  ;;  %v479_v34 = vpop.f32.mrb[15].mxu1  ;;  %v605_v2 = vpop.xlane.xlu1 %604 }
 0x15a   :  { %v11974_v4 = vmul.f32 2.0, %v479_v34  ;;  %v611_v50 = vpop.xlane.xlu0 %610 }
 0x15c   :  { %16414 = vst [vmem:[#allocation11_spill] sm:$0xff] %v11974_v4 }
 0x15d   :  { %v608_v17 = vpop.xlane.xlu1 %607 }
 0x161   :  { %v614_v3 = vpop.xlane.xlu1 %613 }
 0x165   :  { %v620_v4 = vpop.xlane.xlu1 %619 }
 0x17c   :  { %v9641_v55 = vpop.f32.mrb[16].mxu1 }
 0x17d   :  { %v750_v1 = vpop.f32.mrb[2].mxu0  ;;  %v868_v0 = vpop.f32.mrb[17].mxu1  ;;  %v11988_v49 = vmul.f32 2.0, %v9641_v55 }
 0x17e   :  { %v11986_v34 = vrot.slane %v750_v1, %v11863_v35  ;;  %v9606_v57 = vpop.f32.mrb[3].mxu0  ;;  %v11990_v48 = vmul.f32 2.0, %v868_v0  ;;  %v12003_v1 = vrot.slane %v11983_v6, %v11863_v35 }
 0x17f   :  { %16415 = vst [vmem:[#allocation12_spill] sm:$0xff] %v11988_v49 }
 0x180   :  { %v11996_v15 = vadd.f32 %v11986_v34, %v593_v16  ;;  %v11999_v38 = vadd.f32 %v11986_v34, %v590_v63  ;;  %v9644_v7 = vpop.f32.mrb[18].mxu1  ;;  %v12006_v57 = vadd.f32 %v11986_v34, %v599_v19  ;;  %v617_v16 = vpop.xlane.xlu0 %616  ;;  %v12018_v23 = vadd.f32 %v11986_v34, %v596_v32 }
 0x181   :  { %v12008_v0 = vmul.f32 2.0, %v9644_v7  ;;  %v878_v55 = vpop.f32.mrb[19].mxu1  ;;  %v1151_v43 = vpop.f32.mrb[4].mxu0 }
 0x182   :  { %16416 = vst [vmem:[#allocation13_spill] sm:$0xff] %v11996_v15  ;;  %16417 = vst [vmem:[#allocation14_spill] sm:$0xff] %v12006_v57  ;;  %v12020_v44 = vmul.f32 2.0, %v878_v55  ;;  %v1153_v19 = vpop.f32.mrb[5].mxu0  ;;  %v12030_v39 = vadd.f32 %v1151_v43, %v12011_v14  ;;  %v12036_v55 = vadd.f32 %v11986_v34, %v605_v2 }
 0x183   :  { %16418 = vst [vmem:[#allocation15_spill] sm:$0xff] %v12008_v0  ;;  %v1155_v22 = vpop.f32.mrb[6].mxu0  ;;  %v12027_v25 = vadd.f32 %v1153_v19, %v12003_v1  ;;  %v12044_v19 = vadd.f32 %v11986_v34, %v602_v30  ;;  %v12057_v30 = vadd.f32 %v11986_v34, %v611_v50 }
 0x184   :  { %16419 = vst [vmem:[#allocation16_spill] sm:$0xff] %v12020_v44  ;;  %v9647_v63 = vpop.f32.mrb[20].mxu1  ;;  %16421 = vst [vmem:[#allocation18_spill] sm:$0xff] %v12030_v39  ;;  %v12033_v32 = vadd.f32 %v1155_v22, %v12011_v14  ;;  %v1157_v7 = vpop.f32.mrb[7].mxu0  ;;  %v15949_v49 = vmax.f32 %v12030_v39, 0.0  ;;  %v12062_v22 = vadd.f32 %v11986_v34, %v608_v17 }
 0x185   :  { %16420 = vst [vmem:[#allocation17_spill] sm:$0xff] %v12027_v25  ;;  %16423 = vst [vmem:[#allocation20_spill] sm:$0xff] %v12036_v55  ;;  %v12038_v31 = vmul.f32 2.0, %v9647_v63  ;;  %v888_v36 = vpop.f32.mrb[21].mxu1  ;;  %v12041_v51 = vadd.f32 %v1157_v7, %v12003_v1  ;;  %v623_v0 = vpop.xlane.xlu0 %622 }
 0x186   :  { %16422 = vst [vmem:[#allocation19_spill] sm:$0xff] %v12033_v32  ;;  %16426 = vst [vmem:[#allocation23_spill] sm:$0xff] %v12044_v19  ;;  %v12046_v46 = vmul.f32 2.0, %v888_v36  ;;  %v16434_v50 = vmax.f32 %v12033_v32, 0.0 }
 0x187   :  { %16424 = vst [vmem:[#allocation21_spill] sm:$0xff] %v12038_v31  ;;  %16425 = vst [vmem:[#allocation22_spill] sm:$0xff] %v12041_v51  ;;  %v16432_v31 = vmax.f32 %v12027_v25, 0.0  ;;  %v16433_v57 = vmax.f32 %v12041_v51, 0.0 }
 0x188   :  { %16427 = vst [vmem:[#allocation24_spill] sm:$0xff] %v12046_v46  ;;  %v9650_v7 = vpop.f32.mrb[22].mxu1  ;;  %16428 = vst [vmem:[#allocation25_spill] sm:$0xff] %v12057_v30  ;;  %v626_v30 = vpop.xlane.xlu1 %625 }
 0x189   :  { %v12059_v36 = vmul.f32 2.0, %v9650_v7  ;;  %v898_v43 = vpop.f32.mrb[23].mxu1  ;;  %v1161_v15 = vpop.f32.mrb[8].mxu0  ;;  %16430 = vst [vmem:[#allocation27_spill] sm:$0xff] %v12062_v22  ;;  %v1375_v55 = vpack.c.bf16 %v16433_v57, %v16432_v31  ;;  %v1374_v7 = vpack.c.bf16 %v16434_v50, %v15949_v49  ;;  %v960_v50 = vadd.f32 %v11986_v34, %v617_v16 }
 0x18a   :  { %v12064_v2 = vmul.f32 2.0, %v898_v43  ;;  %v1163_v63 = vpop.f32.mrb[9].mxu0  ;;  %v12085_v51 = vadd.f32 %v1161_v15, %v12011_v14  ;;  %v959_v43 = vadd.f32 %v11986_v34, %v614_v3  ;;  %v629_v32 = vpop.xlane.xlu0 %628 }
 0x18b   :  { %16429 = vst [vmem:[#allocation26_spill] sm:$0xff] %v12059_v36  ;;  %v12077_v46 = vadd.f32 %v1163_v63, %v12003_v1  ;;  %v1165_v17 = vpop.f32.mrb[10].mxu0  ;;  %1758 = vmatprep.mubr.bf16.mxu1 %v1375_v55  ;;  %1951 = vmatprep.mubr.bf16.mxu0 %v1375_v55 }
 0x18c   :  { %16431 = vst [vmem:[#allocation28_spill] sm:$0xff] %v12064_v2  ;;  %v12082_v25 = vadd.f32 %v1165_v17, %v12011_v14  ;;  %v9653_v31 = vpop.f32.mrb[24].mxu1  ;;  %v1167_v57 = vpop.f32.mrb[11].mxu0  ;;  %16437 = vst [vmem:[#allocation31_spill] sm:$0xff] %v12085_v51  ;;  %1759 = vmatmul.mubr.bf16.vlgmr.msra.gmra.mrb[32].mxu1 %v1374_v7  ;;  %1952 = vmatmul.mubr.bf16.vlgmr.msra.gmra.mrb[68].mxu0 %v1374_v7  ;;  %v69_v7 = vld [vmem:[%s15922_s1 + $0x40] sm:$0xff]  ;;  %v15961_v3 = vmax.f32 %v12085_v51, 0.0 }
 0x18d   :  { %16435 = vst [vmem:[#allocation29_spill] sm:$0xff] %v12077_v46  ;;  %v976_v49 = vmul.f32 2.0, %v9653_v31  ;;  %v12089_v63 = vadd.f32 %v1167_v57, %v12003_v1  ;;  %v908_v11 = vpop.f32.mrb[25].mxu1  ;;  %v15960_v55 = vmax.f32 %v12077_v46, 0.0  ;;  %v962_v57 = vadd.f32 %v11986_v34, %v623_v0 }
 0x18e   :  { %16436 = vst [vmem:[#allocation30_spill] sm:$0xff] %v12082_v25  ;;  %v975_v17 = vmul.f32 2.0, %v908_v11  ;;  %v70_v11 = vld [vmem:[%s15922_s1 + $0x48] sm:$0xff]  ;;  %v961_v0 = vadd.f32 %v11986_v34, %v620_v4 }
 0x18f   :  { %16438 = vst [vmem:[#allocation32_spill] sm:$0xff] %v12089_v63  ;;  %v992_v36 = vsub.f32 %v960_v50, %v976_v49  ;;  %v15959_v15 = vmax.f32 %v12089_v63, 0.0 }
 0x190   :  { %v991_v16 = vsub.f32 %v959_v43, %v975_v17  ;;  %v9656_v31 = vpop.f32.mrb[26].mxu1 }
 0x191   :  { %vm1008_vm5 = vcmp.lt.f32.partialorder %v992_v36, 0.0009  ;;  %v978_v39 = vmul.f32 2.0, %v9656_v31  ;;  %v918_v49 = vpop.f32.mrb[27].mxu1  ;;  %v1171_v50 = vpop.f32.mrb[12].mxu0  ;;  %v1377_v43 = vpack.c.bf16 %v15959_v15, %v15960_v55  ;;  %v16441_v31 = vmax.f32 %v12082_v25, 0.0 }
 0x192   :  { %vm1007_vm6 = vcmp.lt.f32.partialorder %v991_v16, 0.0009  ;;  %v977_v17 = vmul.f32 2.0, %v918_v49  ;;  %v1173_v2 = vpop.f32.mrb[13].mxu0  ;;  %v12108_v22 = vsel %vm1008_vm5, %v70_v11, -1e+30  ;;  %v635_v49 = vpop.xlane.xlu0 %634 }
 0x193   :  { %16439 = vst [vmem:[#allocation33_spill] sm:$0xff] %v12108_v22  ;;  %v994_v19 = vsub.f32 %v962_v57, %v978_v39  ;;  %v12111_v44 = vadd.f32 %v1173_v2, %v12003_v1  ;;  %v1175_v36 = vpop.f32.mrb[14].mxu0  ;;  %1768 = vmatprep.mubr.bf16.mxu1 %v1377_v43  ;;  %1959 = vmatprep.mubr.bf16.mxu0 %v1377_v43  ;;  %v12117_v15 = vsel %vm1007_vm6, %v69_v7, -1e+30 }
 0x194   :  { %v1376_v63 = vpack.c.bf16 %v16441_v31, %v15961_v3  ;;  %16442 = vst [vmem:[#allocation35_spill] sm:$0xff] %v12117_v15  ;;  %v993_v16 = vsub.f32 %v961_v0, %v977_v17  ;;  %v12120_v4 = vadd.f32 %v1175_v36, %v12011_v14  ;;  %v9659_v11 = vpop.f32.mrb[28].mxu1  ;;  %v964_v39 = vadd.f32 %v11986_v34, %v629_v32  ;;  %v1177_v57 = vpop.f32.mrb[15].mxu0  ;;  %v71_v0 = vld [vmem:[%s15922_s1 + $0x50] sm:$0xff]  ;;  %v72_v32 = vld [vmem:[%s15922_s1 + $0x58] sm:$0xff] }
 0x195   :  { %16440 = vst [vmem:[#allocation34_spill] sm:$0xff] %v12111_v44  ;;  %v963_v2 = vadd.f32 %v11986_v34, %v626_v30  ;;  %vm1010_vm7 = vcmp.lt.f32.partialorder %v994_v19, 0.0009  ;;  %v12125_v43 = vadd.f32 %v1171_v50, %v12011_v14  ;;  %v980_v55 = vmul.f32 2.0, %v9659_v11  ;;  %v928_v7 = vpop.f32.mrb[29].mxu1  ;;  %v632_v17 = vpop.xlane.xlu1 %631 }
 0x196   :  { %16443 = vst [vmem:[#allocation36_spill] sm:$0xff] %v12120_v4  ;;  %v12128_v31 = vadd.f32 %v1177_v57, %v12003_v1  ;;  %1769 = vmatmul.mubr.bf16.gmra.mrb[36].mxu1 %v1376_v63  ;;  %1960 = vmatmul.mubr.bf16.gmra.mrb[72].mxu0 %v1376_v63  ;;  %vm1009_vm8 = vcmp.lt.f32.partialorder %v993_v16, 0.0009  ;;  %v15972_v19 = vmax.f32 %v12111_v44, 0.0  ;;  %v979_v30 = vmul.f32 2.0, %v928_v7  ;;  %v74_v16 = vld [vmem:[%s15922_s1 + $0x68] sm:$0xff] }
 0x197   :  { %16444 = vst [vmem:[#allocation37_spill] sm:$0xff] %v12125_v43  ;;  %v12137_v50 = vsel %vm1010_vm7, %v72_v32, -1e+30  ;;  %v996_v11 = vsub.f32 %v964_v39, %v980_v55  ;;  %v12141_v57 = vsel %vm1009_vm8, %v71_v0, -1e+30  ;;  %v966_v3 = vadd.f32 %v11986_v34, %v635_v49  ;;  %v73_v7 = vld [vmem:[%s15922_s1 + $0x60] sm:$0xff] }
 0x198   :  { %16445 = vst [vmem:[#allocation38_spill] sm:$0xff] %v12128_v31  ;;  %16446 = vst [vmem:[#allocation39_spill] sm:$0xff] %v12137_v50  ;;  %v15968_v63 = vmax.f32 %v12128_v31, 0.0  ;;  %v995_v25 = vsub.f32 %v963_v2, %v979_v30  ;;  %v9662_v51 = vpop.f32.mrb[30].mxu1  ;;  %v15969_v32 = vmax.f32 %v12125_v43, 0.0  ;;  %v965_v49 = vadd.f32 %v11986_v34, %v632_v17 }
 0x199   :  { %16447 = vst [vmem:[#allocation40_spill] sm:$0xff] %v12141_v57  ;;  %vm1012_vm9 = vcmp.lt.f32.partialorder %v996_v11, 0.0009  ;;  %v982_v55 = vmul.f32 2.0, %v9662_v51  ;;  %v938_v39 = vpop.f32.mrb[31].mxu1  ;;  %v1181_v36 = vpop.f32.mrb[16].mxu0 }
 0x19a   :  { %v1379_v2 = vpack.c.bf16 %v15968_v63, %v15972_v19  ;;  %vm1011_vm10 = vcmp.lt.f32.partialorder %v995_v25, 0.0009  ;;  %v981_v0 = vmul.f32 2.0, %v938_v39  ;;  %v1183_v30 = vpop.f32.mrb[17].mxu0  ;;  %v12156_v46 = vsel %vm1012_vm9, %v74_v16, -1e+30 }
 0x19b   :  { %16448 = vst [vmem:[#allocation41_spill] sm:$0xff] %v12156_v46  ;;  %v998_v50 = vsub.f32 %v966_v3, %v982_v55  ;;  %v12159_v57 = vadd.f32 %v1183_v30, %v12003_v1  ;;  %v1185_v11 = vpop.f32.mrb[18].mxu0  ;;  %v16450_v51 = vmax.f32 %v12120_v4, 0.0  ;;  %v12165_v63 = vsel %vm1011_vm10, %v73_v7, -1e+30  ;;  %v76_v55 = vld [vmem:[%s15922_s1 + $0x78] sm:$0xff] }
 0x19c   :  { %1778 = vmatprep.mubr.bf16.mxu1 %v1379_v2  ;;  %1967 = vmatprep.mubr.bf16.mxu0 %v1379_v2  ;;  %16451 = vst [vmem:[#allocation43_spill] sm:$0xff] %v12165_v63  ;;  %v997_v34 = vsub.f32 %v965_v49, %v981_v0  ;;  %v12168_v25 = vadd.f32 %v1185_v11, %v12011_v14  ;;  %v1187_v17 = vpop.f32.mrb[19].mxu0  ;;  %v75_v39 = vld [vmem:[%s15922_s1 + $0x70] sm:$0xff] }
 0x19d   :  { %16449 = vst [vmem:[#allocation42_spill] sm:$0xff] %v12159_v57  ;;  %v1378_v44 = vpack.c.bf16 %v16450_v51, %v15969_v32  ;;  %vm1014_vm11 = vcmp.lt.f32.partialorder %v998_v50, 0.0009  ;;  %v12171_v3 = vadd.f32 %v1181_v36, %v12011_v14  ;;  %v12174_v16 = vadd.f32 %v1187_v17, %v12003_v1 }
 0x19e   :  { %16452 = vst [vmem:[#allocation44_spill] sm:$0xff] %v12168_v25  ;;  %vm1013_vm12 = vcmp.lt.f32.partialorder %v997_v34, 0.0009  ;;  %v12179_v7 = vsel %vm1014_vm11, %v76_v55, -1e+30  ;;  %v15971_v50 = vmax.f32 %v12159_v57, 0.0 }
 0x19f   :  { %16453 = vst [vmem:[#allocation45_spill] sm:$0xff] %v12171_v3  ;;  %16454 = vst [vmem:[#allocation46_spill] sm:$0xff] %v12174_v16  ;;  %1779 = vmatmul.mubr.bf16.gmra.mrb[40].mxu1 %v1378_v44  ;;  %1968 = vmatmul.mubr.bf16.gmra.mrb[76].mxu0 %v1378_v44  ;;  %v15973_v36 = vmax.f32 %v12168_v25, 0.0  ;;  %v15970_v2 = vmax.f32 %v12174_v16, 0.0  ;;  %v12187_v49 = vsel %vm1013_vm12, %v75_v39, -1e+30 }
 0x1a0   :  { %16455 = vst [vmem:[#allocation47_spill] sm:$0xff] %v12179_v7  ;;  %16456 = vst [vmem:[#allocation48_spill] sm:$0xff] %v12187_v49  ;;  %v15974_v44 = vmax.f32 %v12171_v3, 0.0 }
 0x1a1   :  { %v1191_v0 = vpop.f32.mrb[20].mxu0  ;;  %v1381_v30 = vpack.c.bf16 %v15970_v2, %v15971_v50 }
 0x1a2   :  { %v1193_v11 = vpop.f32.mrb[21].mxu0  ;;  %v1380_v17 = vpack.c.bf16 %v15973_v36, %v15974_v44  ;;  %v12205_v32 = vadd.f32 %v1191_v0, %v12011_v14 }
 0x1a3   :  { %v12195_v51 = vadd.f32 %v1193_v11, %v12003_v1  ;;  %v1195_v34 = vpop.f32.mrb[22].mxu0  ;;  %1788 = vmatprep.mubr.bf16.mxu1 %v1381_v30  ;;  %1975 = vmatprep.mubr.bf16.mxu0 %v1381_v30 }
 0x1a4   :  { %v12202_v55 = vadd.f32 %v1195_v34, %v12011_v14  ;;  %v1197_v39 = vpop.f32.mrb[23].mxu0  ;;  %16459 = vst [vmem:[#allocation51_spill] sm:$0xff] %v12205_v32  ;;  %v15982_v30 = vmax.f32 %v12205_v32, 0.0 }
 0x1a5   :  { %16457 = vst [vmem:[#allocation49_spill] sm:$0xff] %v12195_v51  ;;  %v12208_v2 = vadd.f32 %v1197_v39, %v12003_v1  ;;  %v15979_v11 = vmax.f32 %v12195_v51, 0.0 }
 0x1a6   :  { %16458 = vst [vmem:[#allocation50_spill] sm:$0xff] %v12202_v55  ;;  %v15981_v50 = vmax.f32 %v12202_v55, 0.0 }
 0x1a7   :  { %16460 = vst [vmem:[#allocation52_spill] sm:$0xff] %v12208_v2  ;;  %1789 = vmatmul.mubr.bf16.gmra.mrb[44].mxu1 %v1380_v17  ;;  %1976 = vmatmul.mubr.bf16.gmra.mrb[80].mxu0 %v1380_v17  ;;  %v15978_v19 = vmax.f32 %v12208_v2, 0.0 }
 0x1a8   :  { %v1382_v17 = vpack.c.bf16 %v15981_v50, %v15982_v30 }
 0x1a9   :  { %v1201_v36 = vpop.f32.mrb[24].mxu0  ;;  %v1383_v0 = vpack.c.bf16 %v15978_v19, %v15979_v11 }
 0x1aa   :  { %v1203_v34 = vpop.f32.mrb[25].mxu0  ;;  %v12229_v51 = vadd.f32 %v1201_v36, %v12011_v14 }
 0x1ab   :  { %v12219_v39 = vadd.f32 %v1203_v34, %v12003_v1  ;;  %v1205_v44 = vpop.f32.mrb[26].mxu0  ;;  %1798 = vmatprep.mubr.bf16.mxu1 %v1383_v0  ;;  %1983 = vmatprep.mubr.bf16.mxu0 %v1383_v0 }
 0x1ac   :  { %v12226_v16 = vadd.f32 %v1205_v44, %v12011_v14  ;;  %v1207_v25 = vpop.f32.mrb[27].mxu0  ;;  %16463 = vst [vmem:[#allocation55_spill] sm:$0xff] %v12229_v51  ;;  %v15990_v0 = vmax.f32 %v12229_v51, 0.0 }
 0x1ad   :  { %16461 = vst [vmem:[#allocation53_spill] sm:$0xff] %v12219_v39  ;;  %v12232_v19 = vadd.f32 %v1207_v25, %v12003_v1  ;;  %v15987_v34 = vmax.f32 %v12219_v39, 0.0 }
 0x1ae   :  { %16462 = vst [vmem:[#allocation54_spill] sm:$0xff] %v12226_v16  ;;  %v15989_v11 = vmax.f32 %v12226_v16, 0.0 }
 0x1af   :  { %16464 = vst [vmem:[#allocation56_spill] sm:$0xff] %v12232_v19  ;;  %1799 = vmatmul.mubr.bf16.gmra.mrb[48].mxu1 %v1382_v17  ;;  %1984 = vmatmul.mubr.bf16.gmra.mrb[84].mxu0 %v1382_v17  ;;  %v15986_v2 = vmax.f32 %v12232_v19, 0.0 }
 0x1b0   :  { %v1384_v17 = vpack.c.bf16 %v15989_v11, %v15990_v0 }
 0x1b1   :  { %v1211_v50 = vpop.f32.mrb[28].mxu0  ;;  %v1385_v36 = vpack.c.bf16 %v15986_v2, %v15987_v34 }
 0x1b2   :  { %v1213_v44 = vpop.f32.mrb[29].mxu0  ;;  %v12253_v39 = vadd.f32 %v1211_v50, %v12011_v14 }
 0x1b3   :  { %v12243_v25 = vadd.f32 %v1213_v44, %v12003_v1  ;;  %v1215_v30 = vpop.f32.mrb[30].mxu0  ;;  %1808 = vmatprep.mubr.bf16.mxu1 %v1385_v36  ;;  %1991 = vmatprep.mubr.bf16.mxu0 %v1385_v36 }
 0x1b4   :  { %v12250_v55 = vadd.f32 %v1215_v30, %v12011_v14  ;;  %v1217_v32 = vpop.f32.mrb[31].mxu0  ;;  %16467 = vst [vmem:[#allocation59_spill] sm:$0xff] %v12253_v39  ;;  %v15998_v36 = vmax.f32 %v12253_v39, 0.0 }
 0x1b5   :  { %16465 = vst [vmem:[#allocation57_spill] sm:$0xff] %v12243_v25  ;;  %v12256_v2 = vadd.f32 %v1217_v32, %v12003_v1  ;;  %v15995_v44 = vmax.f32 %v12243_v25, 0.0 }
 0x1b6   :  { %16466 = vst [vmem:[#allocation58_spill] sm:$0xff] %v12250_v55  ;;  %v15997_v34 = vmax.f32 %v12250_v55, 0.0 }
 0x1b7   :  { %16468 = vst [vmem:[#allocation60_spill] sm:$0xff] %v12256_v2  ;;  %1809 = vmatmul.mubr.bf16.gmra.mrb[52].mxu1 %v1384_v17  ;;  %1992 = vmatmul.mubr.bf16.gmra.mrb[88].mxu0 %v1384_v17  ;;  %v15994_v19 = vmax.f32 %v12256_v2, 0.0 }
 0x1b8   :  { %v1386_v17 = vpack.c.bf16 %v15997_v34, %v15998_v36 }
 0x1b9   :  { %v1221_v11 = vpop.f32.mrb[32].mxu0  ;;  %v1387_v50 = vpack.c.bf16 %v15994_v19, %v15995_v44 }
 0x1ba   :  { %v1223_v30 = vpop.f32.mrb[33].mxu0  ;;  %v12277_v25 = vadd.f32 %v1221_v11, %v12011_v14 }
 0x1bb   :  { %v12267_v32 = vadd.f32 %v1223_v30, %v12003_v1  ;;  %v1225_v0 = vpop.f32.mrb[34].mxu0  ;;  %1818 = vmatprep.mubr.bf16.mxu1 %v1387_v50  ;;  %1999 = vmatprep.mubr.bf16.mxu0 %v1387_v50 }
 0x1bc   :  { %v12274_v16 = vadd.f32 %v1225_v0, %v12011_v14  ;;  %v1227_v51 = vpop.f32.mrb[35].mxu0  ;;  %16471 = vst [vmem:[#allocation63_spill] sm:$0xff] %v12277_v25  ;;  %v16007_v50 = vmax.f32 %v12277_v25, 0.0 }
 0x1bd   :  { %16469 = vst [vmem:[#allocation61_spill] sm:$0xff] %v12267_v32  ;;  %v12280_v19 = vadd.f32 %v1227_v51, %v12003_v1  ;;  %v16003_v30 = vmax.f32 %v12267_v32, 0.0 }
 0x1be   :  { %16470 = vst [vmem:[#allocation62_spill] sm:$0xff] %v12274_v16  ;;  %v16006_v44 = vmax.f32 %v12274_v16, 0.0 }
 0x1bf   :  { %16472 = vst [vmem:[#allocation64_spill] sm:$0xff] %v12280_v19  ;;  %1819 = vmatmul.mubr.bf16.gmra.mrb[56].mxu1 %v1386_v17  ;;  %2000 = vmatmul.mubr.bf16.gmra.mrb[92].mxu0 %v1386_v17  ;;  %v16002_v2 = vmax.f32 %v12280_v19, 0.0 }
 0x1c0   :  { %v1388_v55 = vpack.c.bf16 %v16006_v44, %v16007_v50 }
 0x1c1   :  { %v1231_v34 = vpop.f32.mrb[36].mxu0  ;;  %v1389_v11 = vpack.c.bf16 %v16002_v2, %v16003_v30 }
 0x1c2   :  { %v12291_v0 = vadd.f32 %v1231_v34, %v12011_v14  ;;  %v1233_v51 = vpop.f32.mrb[37].mxu0 }
 0x1c3   :  { %v12294_v17 = vadd.f32 %v1233_v51, %v12003_v1  ;;  %v1235_v36 = vpop.f32.mrb[38].mxu0  ;;  %1828 = vmatprep.mubr.bf16.mxu1 %v1389_v11  ;;  %2007 = vmatprep.mubr.bf16.mxu0 %v1389_v11 }
 0x1c4   :  { %16473 = vst [vmem:[#allocation65_spill] sm:$0xff] %v12291_v0  ;;  %v12301_v32 = vadd.f32 %v1235_v36, %v12011_v14  ;;  %v1237_v19 = vpop.f32.mrb[39].mxu0  ;;  %v16013_v2 = vmax.f32 %v12291_v0, 0.0 }
 0x1c5   :  { %16474 = vst [vmem:[#allocation66_spill] sm:$0xff] %v12294_v17  ;;  %v16011_v34 = vmax.f32 %v12294_v17, 0.0  ;;  %v12306_v30 = vadd.f32 %v1237_v19, %v12003_v1 }
 0x1c6   :  { %16475 = vst [vmem:[#allocation67_spill] sm:$0xff] %v12301_v32  ;;  %v16012_v51 = vmax.f32 %v12301_v32, 0.0 }
 0x1c7   :  { %16476 = vst [vmem:[#allocation68_spill] sm:$0xff] %v12306_v30  ;;  %1829 = vmatmul.mubr.bf16.gmra.mrb[60].mxu1 %v1388_v55  ;;  %2008 = vmatmul.mubr.bf16.gmra.mrb[96].mxu0 %v1388_v55  ;;  %v16010_v25 = vmax.f32 %v12306_v30, 0.0 }
 0x1c8   :  { %v1390_v11 = vpack.c.bf16 %v16012_v51, %v16013_v2 }
 0x1c9   :  { %v1241_v16 = vpop.f32.mrb[40].mxu0  ;;  %v1391_v36 = vpack.c.bf16 %v16010_v25, %v16011_v34 }
 0x1ca   :  { %v12319_v19 = vadd.f32 %v1241_v16, %v12011_v14  ;;  %v1243_v44 = vpop.f32.mrb[41].mxu0 }
 0x1cb   :  { %v12322_v55 = vadd.f32 %v1243_v44, %v12003_v1  ;;  %v1245_v50 = vpop.f32.mrb[42].mxu0  ;;  %1838 = vmatprep.mubr.bf16.mxu1 %v1391_v36  ;;  %2015 = vmatprep.mubr.bf16.mxu0 %v1391_v36 }
 0x1cc   :  { %16477 = vst [vmem:[#allocation69_spill] sm:$0xff] %v12319_v19  ;;  %v12325_v17 = vadd.f32 %v1245_v50, %v12011_v14  ;;  %v1247_v30 = vpop.f32.mrb[43].mxu0  ;;  %v16021_v25 = vmax.f32 %v12319_v19, 0.0 }
 0x1cd   :  { %16478 = vst [vmem:[#allocation70_spill] sm:$0xff] %v12322_v55  ;;  %v16019_v34 = vmax.f32 %v12322_v55, 0.0  ;;  %v12330_v51 = vadd.f32 %v1247_v30, %v12003_v1 }
 0x1ce   :  { %16479 = vst [vmem:[#allocation71_spill] sm:$0xff] %v12325_v17  ;;  %v16020_v16 = vmax.f32 %v12325_v17, 0.0 }
 0x1cf   :  { %16480 = vst [vmem:[#allocation72_spill] sm:$0xff] %v12330_v51  ;;  %1839 = vmatmul.mubr.bf16.gmra.mrb[64].mxu1 %v1390_v11  ;;  %2016 = vmatmul.mubr.bf16.gmra.mrb[100].mxu0 %v1390_v11  ;;  %v16018_v44 = vmax.f32 %v12330_v51, 0.0 }
 0x1d0   :  { %v1392_v36 = vpack.c.bf16 %v16020_v16, %v16021_v25 }
 0x1d1   :  { %v1251_v2 = vpop.f32.mrb[44].mxu0  ;;  %v1393_v50 = vpack.c.bf16 %v16018_v44, %v16019_v34 }
 0x1d2   :  { %v12343_v30 = vadd.f32 %v1251_v2, %v12011_v14  ;;  %v1253_v32 = vpop.f32.mrb[45].mxu0 }
 0x1d3   :  { %v12346_v11 = vadd.f32 %v1253_v32, %v12003_v1  ;;  %v1255_v0 = vpop.f32.mrb[46].mxu0  ;;  %1848 = vmatprep.mubr.bf16.mxu1 %v1393_v50  ;;  %2023 = vmatprep.mubr.bf16.mxu0 %v1393_v50 }
 0x1d4   :  { %16481 = vst [vmem:[#allocation73_spill] sm:$0xff] %v12343_v30  ;;  %v12349_v55 = vadd.f32 %v1255_v0, %v12011_v14  ;;  %v1257_v51 = vpop.f32.mrb[47].mxu0  ;;  %v16029_v44 = vmax.f32 %v12343_v30, 0.0 }
 0x1d5   :  { %16482 = vst [vmem:[#allocation74_spill] sm:$0xff] %v12346_v11  ;;  %v16027_v34 = vmax.f32 %v12346_v11, 0.0  ;;  %v12354_v16 = vadd.f32 %v1257_v51, %v12003_v1 }
 0x1d6   :  { %16483 = vst [vmem:[#allocation75_spill] sm:$0xff] %v12349_v55  ;;  %v16028_v2 = vmax.f32 %v12349_v55, 0.0 }
 0x1d7   :  { %16484 = vst [vmem:[#allocation76_spill] sm:$0xff] %v12354_v16  ;;  %1849 = vmatmul.mubr.bf16.gmra.mrb[68].mxu1 %v1392_v36  ;;  %2024 = vmatmul.mubr.bf16.gmra.mrb[104].mxu0 %v1392_v36  ;;  %v16026_v32 = vmax.f32 %v12354_v16, 0.0 }
 0x1d8   :  { %v1394_v50 = vpack.c.bf16 %v16028_v2, %v16029_v44 }
 0x1d9   :  { %v1261_v25 = vpop.f32.mrb[48].mxu0  ;;  %v1395_v0 = vpack.c.bf16 %v16026_v32, %v16027_v34 }
 0x1da   :  { %v12367_v51 = vadd.f32 %v1261_v25, %v12011_v14  ;;  %v1263_v17 = vpop.f32.mrb[49].mxu0 }
 0x1db   :  { %v12370_v36 = vadd.f32 %v1263_v17, %v12003_v1  ;;  %v1265_v19 = vpop.f32.mrb[50].mxu0  ;;  %1858 = vmatprep.mubr.bf16.mxu1 %v1395_v0  ;;  %2031 = vmatprep.mubr.bf16.mxu0 %v1395_v0 }
 0x1dc   :  { %16485 = vst [vmem:[#allocation77_spill] sm:$0xff] %v12367_v51  ;;  %v12373_v11 = vadd.f32 %v1265_v19, %v12011_v14  ;;  %v1267_v16 = vpop.f32.mrb[51].mxu0  ;;  %v16037_v32 = vmax.f32 %v12367_v51, 0.0 }
 0x1dd   :  { %16486 = vst [vmem:[#allocation78_spill] sm:$0xff] %v12370_v36  ;;  %v16035_v34 = vmax.f32 %v12370_v36, 0.0  ;;  %v12378_v2 = vadd.f32 %v1267_v16, %v12003_v1 }
 0x1de   :  { %16487 = vst [vmem:[#allocation79_spill] sm:$0xff] %v12373_v11  ;;  %v16036_v25 = vmax.f32 %v12373_v11, 0.0 }
 0x1df   :  { %16488 = vst [vmem:[#allocation80_spill] sm:$0xff] %v12378_v2  ;;  %1859 = vmatmul.mubr.bf16.gmra.mrb[72].mxu1 %v1394_v50  ;;  %2032 = vmatmul.mubr.bf16.gmra.mrb[108].mxu0 %v1394_v50  ;;  %v16034_v17 = vmax.f32 %v12378_v2, 0.0 }
 0x1e0   :  { %v1396_v0 = vpack.c.bf16 %v16036_v25, %v16037_v32 }
 0x1e1   :  { %v1271_v44 = vpop.f32.mrb[52].mxu0  ;;  %v1397_v19 = vpack.c.bf16 %v16034_v17, %v16035_v34 }
 0x1e2   :  { %v12391_v16 = vadd.f32 %v1271_v44, %v12011_v14  ;;  %v1273_v55 = vpop.f32.mrb[53].mxu0 }
 0x1e3   :  { %v12394_v50 = vadd.f32 %v1273_v55, %v12003_v1  ;;  %v1275_v30 = vpop.f32.mrb[54].mxu0  ;;  %1868 = vmatprep.mubr.bf16.mxu1 %v1397_v19  ;;  %2039 = vmatprep.mubr.bf16.mxu0 %v1397_v19 }
 0x1e4   :  { %16489 = vst [vmem:[#allocation81_spill] sm:$0xff] %v12391_v16  ;;  %v12397_v36 = vadd.f32 %v1275_v30, %v12011_v14  ;;  %v1277_v2 = vpop.f32.mrb[55].mxu0  ;;  %v16045_v17 = vmax.f32 %v12391_v16, 0.0 }
 0x1e5   :  { %16490 = vst [vmem:[#allocation82_spill] sm:$0xff] %v12394_v50  ;;  %v16043_v34 = vmax.f32 %v12394_v50, 0.0  ;;  %v12402_v25 = vadd.f32 %v1277_v2, %v12003_v1 }
 0x1e6   :  { %16491 = vst [vmem:[#allocation83_spill] sm:$0xff] %v12397_v36  ;;  %v16044_v44 = vmax.f32 %v12397_v36, 0.0 }
 0x1e7   :  { %16492 = vst [vmem:[#allocation84_spill] sm:$0xff] %v12402_v25  ;;  %1869 = vmatmul.mubr.bf16.gmra.mrb[76].mxu1 %v1396_v0  ;;  %2040 = vmatmul.mubr.bf16.gmra.mrb[112].mxu0 %v1396_v0  ;;  %v16042_v55 = vmax.f32 %v12402_v25, 0.0 }
 0x1e8   :  { %v1398_v19 = vpack.c.bf16 %v16044_v44, %v16045_v17 }
 0x1e9   :  { %v1281_v32 = vpop.f32.mrb[56].mxu0  ;;  %v1399_v30 = vpack.c.bf16 %v16042_v55, %v16043_v34 }
 0x1ea   :  { %v12415_v2 = vadd.f32 %v1281_v32, %v12011_v14  ;;  %v1283_v11 = vpop.f32.mrb[57].mxu0 }
 0x1eb   :  { %v12418_v0 = vadd.f32 %v1283_v11, %v12003_v1  ;;  %v1285_v51 = vpop.f32.mrb[58].mxu0  ;;  %1878 = vmatprep.mubr.bf16.mxu1 %v1399_v30  ;;  %2047 = vmatprep.mubr.bf16.mxu0 %v1399_v30 }
 0x1ec   :  { %16493 = vst [vmem:[#allocation85_spill] sm:$0xff] %v12415_v2  ;;  %v12421_v50 = vadd.f32 %v1285_v51, %v12011_v14  ;;  %v1287_v25 = vpop.f32.mrb[59].mxu0  ;;  %v16053_v55 = vmax.f32 %v12415_v2, 0.0 }
 0x1ed   :  { %16494 = vst [vmem:[#allocation86_spill] sm:$0xff] %v12418_v0  ;;  %v16051_v34 = vmax.f32 %v12418_v0, 0.0  ;;  %v12426_v44 = vadd.f32 %v1287_v25, %v12003_v1 }
 0x1ee   :  { %16495 = vst [vmem:[#allocation87_spill] sm:$0xff] %v12421_v50  ;;  %v16052_v32 = vmax.f32 %v12421_v50, 0.0 }
 0x1ef   :  { %16496 = vst [vmem:[#allocation88_spill] sm:$0xff] %v12426_v44  ;;  %1879 = vmatmul.mubr.bf16.gmra.mrb[80].mxu1 %v1398_v19  ;;  %2048 = vmatmul.mubr.bf16.gmra.mrb[116].mxu0 %v1398_v19  ;;  %v16050_v11 = vmax.f32 %v12426_v44, 0.0 }
 0x1f0   :  { %v1400_v30 = vpack.c.bf16 %v16052_v32, %v16053_v55 }
 0x1f1   :  { %v1291_v17 = vpop.f32.mrb[60].mxu0  ;;  %v1401_v51 = vpack.c.bf16 %v16050_v11, %v16051_v34 }
 0x1f2   :  { %v12439_v25 = vadd.f32 %v1291_v17, %v12011_v14  ;;  %v1293_v36 = vpop.f32.mrb[61].mxu0 }
 0x1f3   :  { %v12442_v19 = vadd.f32 %v1293_v36, %v12003_v1  ;;  %v1295_v16 = vpop.f32.mrb[62].mxu0  ;;  %1888 = vmatprep.mubr.bf16.mxu1 %v1401_v51  ;;  %2055 = vmatprep.mubr.bf16.mxu0 %v1401_v51 }
 0x1f4   :  { %16497 = vst [vmem:[#allocation89_spill] sm:$0xff] %v12439_v25  ;;  %v12445_v0 = vadd.f32 %v1295_v16, %v12011_v14  ;;  %v1297_v44 = vpop.f32.mrb[63].mxu0  ;;  %v16061_v11 = vmax.f32 %v12439_v25, 0.0 }
 0x1f5   :  { %16498 = vst [vmem:[#allocation90_spill] sm:$0xff] %v12442_v19  ;;  %v16059_v34 = vmax.f32 %v12442_v19, 0.0  ;;  %v12450_v32 = vadd.f32 %v1297_v44, %v12003_v1 }
 0x1f6   :  { %16499 = vst [vmem:[#allocation91_spill] sm:$0xff] %v12445_v0  ;;  %v16060_v17 = vmax.f32 %v12445_v0, 0.0 }
 0x1f7   :  { %16500 = vst [vmem:[#allocation92_spill] sm:$0xff] %v12450_v32  ;;  %1889 = vmatmul.mubr.bf16.gmra.mrb[84].mxu1 %v1400_v30  ;;  %2056 = vmatmul.mubr.bf16.gmra.mrb[120].mxu0 %v1400_v30  ;;  %v16058_v36 = vmax.f32 %v12450_v32, 0.0 }
 0x1f8   :  { %v1402_v51 = vpack.c.bf16 %v16060_v17, %v16061_v11 }
 0x1f9   :  { %v1301_v55 = vpop.f32.mrb[64].mxu0  ;;  %v1403_v16 = vpack.c.bf16 %v16058_v36, %v16059_v34 }
 0x1fa   :  { %v12463_v44 = vadd.f32 %v1301_v55, %v12011_v14  ;;  %v1303_v50 = vpop.f32.mrb[65].mxu0 }
 0x1fb   :  { %v12466_v30 = vadd.f32 %v1303_v50, %v12003_v1  ;;  %v1305_v2 = vpop.f32.mrb[66].mxu0  ;;  %1898 = vmatprep.mubr.bf16.mxu1 %v1403_v16  ;;  %2063 = vmatprep.mubr.bf16.mxu0 %v1403_v16 }
 0x1fc   :  { %16501 = vst [vmem:[#allocation93_spill] sm:$0xff] %v12463_v44  ;;  %v12469_v19 = vadd.f32 %v1305_v2, %v12011_v14  ;;  %v1307_v32 = vpop.f32.mrb[67].mxu0  ;;  %v16069_v36 = vmax.f32 %v12463_v44, 0.0 }
 0x1fd   :  { %16502 = vst [vmem:[#allocation94_spill] sm:$0xff] %v12466_v30  ;;  %v16065_v34 = vmax.f32 %v12466_v30, 0.0  ;;  %v12474_v17 = vadd.f32 %v1307_v32, %v12003_v1  ;;  %v2083_v1 = vrot.slane %v11983_v6, 1 }
 0x1fe   :  { %16503 = vst [vmem:[#allocation95_spill] sm:$0xff] %v12469_v19  ;;  %v16068_v55 = vmax.f32 %v12469_v19, 0.0 }
 0x1ff   :  { %16504 = vst [vmem:[#allocation96_spill] sm:$0xff] %v12474_v17  ;;  %1899 = vmatmul.mubr.bf16.gmra.mrb[88].mxu1 %v1402_v51  ;;  %2064 = vmatmul.mubr.bf16.gmra.mrb[124].mxu0 %v1402_v51  ;;  %v16064_v50 = vmax.f32 %v12474_v17, 0.0 }
 0x200   :  { %v1404_v2 = vpack.c.bf16 %v16068_v55, %v16069_v36 }
 0x201   :  { %v1405_v14 = vpack.c.bf16 %v16064_v50, %v16065_v34 }
 0x203   :  { %1908 = vmatprep.mubr.bf16.mxu1 %v1405_v14  ;;  %2071 = vmatprep.mubr.bf16.mxu0 %v1405_v14 }
 0x207   :  { %1909 = vmatmul.mubr.bf16.gmra.mrb[92].mxu1 %v1404_v2  ;;  %2072 = vmatmul.mubr.bf16.gmra.mrb[128].mxu0 %v1404_v2 }
 0x208   :  { %2150 = vmatprep.mubr.f32.mxu1 %v2083_v1  ;;  %2665 = vmatprep.mubr.f32.mxu0 %v2083_v1 }
 0x25f   :  { %v1760_v32 = vpop.f32.mrb[32].mxu1  ;;  %v8983_v16 = vpop.f32.mrb[68].mxu0 }
 0x260   :  { %v1762_v51 = vpop.f32.mrb[33].mxu1  ;;  %v8984_v11 = vpop.f32.mrb[69].mxu0 }
 0x261   :  { %v8985_v30 = vadd.f32 %v8984_v11, %v8983_v16  ;;  %v1764_v17 = vpop.f32.mrb[34].mxu1  ;;  %v8986_v50 = vpop.f32.mrb[70].mxu0 }
 0x262   :  { %v12487_v34 = vpack.c.bf16 %v1764_v17, %v1760_v32  ;;  %v1766_v44 = vpop.f32.mrb[35].mxu1  ;;  %v8987_v19 = vpop.f32.mrb[71].mxu0 }
 0x263   :  { %v12489_v55 = vpack.c.bf16 %v1766_v44, %v1762_v51  ;;  %v8988_v14 = vadd.f32 %v8987_v19, %v8986_v50  ;;  %2158 = vperm.xlu0 %10207, %v8985_v30  }
 0x265   :  { %2163 = vperm.xlu1 %10208, %v8988_v14   ;;  %9958 = vmatprep.subr.bf16.mxu1 %v12489_v55 }
 0x266   :  { %9960 = vmatpush1.bf16.xpose.msra.mxu1 %v12487_v34 }
 0x269   :  { %v1770_v6 = vpop.f32.mrb[36].mxu1  ;;  %v8989_v2 = vpop.f32.mrb[72].mxu0 }
 0x26a   :  { %v1772_v1 = vpop.f32.mrb[37].mxu1  ;;  %v8990_v36 = vpop.f32.mrb[73].mxu0 }
 0x26b   :  { %v8991_v11 = vadd.f32 %v8990_v36, %v8989_v2  ;;  %v1774_v16 = vpop.f32.mrb[38].mxu1  ;;  %v8992_v0 = vpop.f32.mrb[74].mxu0 }
 0x26c   :  { %v12493_v17 = vpack.c.bf16 %v1774_v16, %v1770_v6  ;;  %v1776_v32 = vpop.f32.mrb[39].mxu1  ;;  %v8993_v25 = vpop.f32.mrb[75].mxu0 }
 0x26d   :  { %v12495_v44 = vpack.c.bf16 %v1776_v32, %v1772_v1  ;;  %v8994_v19 = vadd.f32 %v8993_v25, %v8992_v0  ;;  %2168 = vperm.xlu1 %10208, %v8991_v11  }
 0x26f   :  { %9962 = vmatprep.subr.bf16.mxu1 %v12495_v44 }
 0x270   :  { %9964 = vmatpush1.bf16.xpose.msra.mxu1 %v12493_v17 }
 0x271   :  { %2173 = vperm.xlu1 %10208, %v8994_v19  }
 0x272   :  { %v1780_v30 = vpop.f32.mrb[40].mxu1  ;;  %v8995_v50 = vpop.f32.mrb[76].mxu0 }
 0x273   :  { %v1782_v51 = vpop.f32.mrb[41].mxu1  ;;  %v8996_v14 = vpop.f32.mrb[77].mxu0 }
 0x274   :  { %v1784_v36 = vpop.f32.mrb[42].mxu1  ;;  %v8997_v2 = vadd.f32 %v8996_v14, %v8995_v50  ;;  %v8998_v39 = vpop.f32.mrb[78].mxu0 }
 0x275   :  { %v12499_v6 = vpack.c.bf16 %v1784_v36, %v1780_v30  ;;  %v1786_v16 = vpop.f32.mrb[43].mxu1  ;;  %v8999_v3 = vpop.f32.mrb[79].mxu0 }
 0x276   :  { %v12501_v1 = vpack.c.bf16 %v1786_v16, %v1782_v51  ;;  %2178 = vperm.xlu0 %10207, %v8997_v2   ;;  %v9000_v0 = vadd.f32 %v8999_v3, %v8998_v39 }
 0x278   :  { %9966 = vmatprep.subr.bf16.mxu1 %v12501_v1 }
 0x279   :  { %9968 = vmatpush1.bf16.xpose.msra.mxu1 %v12499_v6 }
 0x27a   :  { %v1790_v25 = vpop.f32.mrb[44].mxu1  ;;  %2183 = vperm.xlu0 %10207, %v9000_v0   ;;  %v9001_v11 = vpop.f32.mrb[80].mxu0 }
 0x27b   :  { %v1792_v32 = vpop.f32.mrb[45].mxu1  ;;  %v9002_v19 = vpop.f32.mrb[81].mxu0 }
 0x27c   :  { %v1794_v57 = vpop.f32.mrb[46].mxu1  ;;  %v9003_v50 = vadd.f32 %v9002_v19, %v9001_v11  ;;  %v9004_v14 = vpop.f32.mrb[82].mxu0 }
 0x27d   :  { %v12505_v30 = vpack.c.bf16 %v1794_v57, %v1790_v25  ;;  %v1796_v36 = vpop.f32.mrb[47].mxu1  ;;  %v9005_v31 = vpop.f32.mrb[83].mxu0 }
 0x27e   :  { %v12507_v51 = vpack.c.bf16 %v1796_v36, %v1792_v32  ;;  %2188 = vperm.xlu1 %10208, %v9003_v50   ;;  %v9006_v3 = vadd.f32 %v9005_v31, %v9004_v14 }
 0x280   :  { %9970 = vmatprep.subr.bf16.mxu1 %v12507_v51 }
 0x281   :  { %9972 = vmatpush1.bf16.xpose.msra.mxu1 %v12505_v30 }
 0x282   :  { %v1800_v39 = vpop.f32.mrb[48].mxu1  ;;  %v9007_v2 = vpop.f32.mrb[84].mxu0  ;;  %2193 = vperm.xlu1 %10208, %v9006_v3  }
 0x283   :  { %v1802_v16 = vpop.f32.mrb[49].mxu1  ;;  %v9008_v0 = vpop.f32.mrb[85].mxu0 }
 0x284   :  { %v1804_v4 = vpop.f32.mrb[50].mxu1  ;;  %v9009_v11 = vadd.f32 %v9008_v0, %v9007_v2  ;;  %v9010_v19 = vpop.f32.mrb[86].mxu0 }
 0x285   :  { %v12511_v57 = vpack.c.bf16 %v1804_v4, %v1800_v39  ;;  %v1806_v25 = vpop.f32.mrb[51].mxu1  ;;  %v9011_v43 = vpop.f32.mrb[87].mxu0 }
 0x286   :  { %v12513_v32 = vpack.c.bf16 %v1806_v25, %v1802_v16  ;;  %2198 = vperm.xlu0 %10207, %v9009_v11   ;;  %v9012_v31 = vadd.f32 %v9011_v43, %v9010_v19 }
 0x288   :  { %9974 = vmatprep.subr.bf16.mxu1 %v12513_v32 }
 0x289   :  { %9976 = vmatpush1.bf16.xpose.msra.mxu1 %v12511_v57 }
 0x28a   :  { %v1810_v50 = vpop.f32.mrb[52].mxu1  ;;  %v9013_v14 = vpop.f32.mrb[88].mxu0  ;;  %2203 = vperm.xlu0 %10207, %v9012_v31  }
 0x28b   :  { %v1812_v36 = vpop.f32.mrb[53].mxu1  ;;  %v9014_v3 = vpop.f32.mrb[89].mxu0 }
 0x28c   :  { %v1814_v7 = vpop.f32.mrb[54].mxu1  ;;  %v9015_v2 = vadd.f32 %v9014_v3, %v9013_v14  ;;  %v9016_v0 = vpop.f32.mrb[90].mxu0 }
 0x28d   :  { %v12517_v4 = vpack.c.bf16 %v1814_v7, %v1810_v50  ;;  %v1816_v39 = vpop.f32.mrb[55].mxu1  ;;  %v9017_v49 = vpop.f32.mrb[91].mxu0 }
 0x28e   :  { %v12519_v16 = vpack.c.bf16 %v1816_v39, %v1812_v36  ;;  %2208 = vperm.xlu1 %10208, %v9015_v2   ;;  %v9018_v43 = vadd.f32 %v9017_v49, %v9016_v0 }
 0x290   :  { %9978 = vmatprep.subr.bf16.mxu1 %v12519_v16 }
 0x291   :  { %9980 = vmatpush1.bf16.xpose.msra.mxu1 %v12517_v4 }
 0x292   :  { %v1820_v11 = vpop.f32.mrb[56].mxu1  ;;  %v9019_v19 = vpop.f32.mrb[92].mxu0  ;;  %2213 = vperm.xlu1 %10208, %v9018_v43  }
 0x293   :  { %v1822_v25 = vpop.f32.mrb[57].mxu1  ;;  %v9020_v31 = vpop.f32.mrb[93].mxu0 }
 0x294   :  { %v1824_v46 = vpop.f32.mrb[58].mxu1  ;;  %v9021_v14 = vadd.f32 %v9020_v31, %v9019_v19  ;;  %v9022_v3 = vpop.f32.mrb[94].mxu0 }
 0x295   :  { %v12523_v7 = vpack.c.bf16 %v1824_v46, %v1820_v11  ;;  %v1826_v50 = vpop.f32.mrb[59].mxu1  ;;  %v9023_v63 = vpop.f32.mrb[95].mxu0 }
 0x296   :  { %v12525_v36 = vpack.c.bf16 %v1826_v50, %v1822_v25  ;;  %2218 = vperm.xlu0 %10207, %v9021_v14   ;;  %v9024_v49 = vadd.f32 %v9023_v63, %v9022_v3 }
 0x298   :  { %9982 = vmatprep.subr.bf16.mxu1 %v12525_v36 }
 0x299   :  { %9984 = vmatpush1.bf16.xpose.msra.mxu1 %v12523_v7 }
 0x29a   :  { %v1830_v2 = vpop.f32.mrb[60].mxu1  ;;  %v9025_v0 = vpop.f32.mrb[96].mxu0  ;;  %2223 = vperm.xlu0 %10207, %v9024_v49  }
 0x29b   :  { %v1832_v39 = vpop.f32.mrb[61].mxu1  ;;  %v9026_v43 = vpop.f32.mrb[97].mxu0 }
 0x29c   :  { %v1834_v22 = vpop.f32.mrb[62].mxu1  ;;  %v9027_v19 = vadd.f32 %v9026_v43, %v9025_v0  ;;  %v9028_v31 = vpop.f32.mrb[98].mxu0 }
 0x29d   :  { %v12529_v46 = vpack.c.bf16 %v1834_v22, %v1830_v2  ;;  %v1836_v11 = vpop.f32.mrb[63].mxu1  ;;  %v9029_v15 = vpop.f32.mrb[99].mxu0  ;;  %v12539_v22 = vld [vmem:[%s15923_s2] sm:$0xff] }
 0x29e   :  { %v12531_v25 = vpack.c.bf16 %v1836_v11, %v1832_v39  ;;  %2228 = vperm.xlu1 %10208, %v9027_v19   ;;  %v9030_v63 = vadd.f32 %v9029_v15, %v9028_v31  ;;  %v16084_v2 = vrot.slane %v12539_v22, 1 }
 0x2a0   :  { %9986 = vmatprep.subr.bf16.mxu1 %v12531_v25 }
 0x2a1   :  { %9988 = vmatpush1.bf16.xpose.msra.mxu1 %v12529_v46 }
 0x2a2   :  { %v1840_v14 = vpop.f32.mrb[64].mxu1  ;;  %2488 = vmatprep.subr.bf16.mxu1 %v12489_v55  ;;  %2233 = vperm.xlu1 %10208, %v9030_v63   ;;  %v9031_v3 = vpop.f32.mrb[100].mxu0 }
 0x2a3   :  { %v1842_v50 = vpop.f32.mrb[65].mxu1  ;;  %v9032_v49 = vpop.f32.mrb[101].mxu0 }
 0x2a4   :  { %v1844_v0 = vpop.f32.mrb[66].mxu1  ;;  %v9033_v15 = vadd.f32 %v9032_v49, %v9031_v3  ;;  %v9034_v39 = vpop.f32.mrb[102].mxu0 }
 0x2a5   :  { %v12542_v43 = vpack.c.bf16 %v1844_v0, %v1840_v14  ;;  %v1846_v19 = vpop.f32.mrb[67].mxu1  ;;  %v9035_v31 = vpop.f32.mrb[103].mxu0 }
 0x2a6   :  { %v12544_v11 = vpack.c.bf16 %v1846_v19, %v1842_v50  ;;  %2673 = vperm.xlu0 %10207, %v9033_v15   ;;  %v9036_v55 = vadd.f32 %v9035_v31, %v9034_v39  ;;  %v16505_v50 = vmov 0  }
 0x2a8   :  { %2151 = vmatmul.mubr.f32.vlgmr.msra.gmra.mrb[96].mxu1 %v16084_v2  ;;  %9990 = vmatprep.subr.bf16.mxu0 %v12544_v11 }
 0x2a9   :  { %2489 = vmatpush1.bf16.msra.mxu1 %v12487_v34  ;;  %9992 = vmatpush1.bf16.xpose.msra.mxu0 %v12542_v43 }
 0x2aa   :  { %v1850_v63 = vpop.f32.mrb[68].mxu1  ;;  %2490 = vmatprep.subr.bf16.mxu1 %v12495_v44  ;;  %v9037_v14 = vpop.f32.mrb[104].mxu0  ;;  %2678 = vperm.xlu0 %10207, %v9036_v55  }
 0x2ab   :  { %v1852_v3 = vpop.f32.mrb[69].mxu1  ;;  %v9038_v49 = vpop.f32.mrb[105].mxu0  ;;  %2520 = vmatprep.mubr.bf16.mxu1 %v16505_v50 }
 0x2ac   :  { %v1854_v0 = vpop.f32.mrb[70].mxu1  ;;  %v9039_v15 = vadd.f32 %v9038_v49, %v9037_v14  ;;  %v9040_v39 = vpop.f32.mrb[106].mxu0 }
 0x2ad   :  { %v12553_v19 = vpack.c.bf16 %v1854_v0, %v1850_v63  ;;  %v1856_v31 = vpop.f32.mrb[71].mxu1  ;;  %2491 = vmatpush1.bf16.msra.mxu1 %v12493_v17  ;;  %v9041_v34 = vpop.f32.mrb[107].mxu0 }
 0x2ae   :  { %v12556_v2 = vpack.c.bf16 %v1856_v31, %v1852_v3  ;;  %2492 = vmatprep.subr.bf16.mxu1 %v12501_v1  ;;  %v9042_v44 = vadd.f32 %v9041_v34, %v9040_v39  ;;  %2683 = vperm.xlu1 %10208, %v9039_v15  }
 0x2af   :  { %16506 = vst [vmem:[#allocation97_spill] sm:$0xff] %v12553_v19 }
 0x2b0   :  { %9994 = vmatprep.subr.bf16.mxu0 %v12556_v2  ;;  %2688 = vperm.xlu0 %10207, %v9042_v44  }
 0x2b1   :  { %2493 = vmatpush1.bf16.msra.mxu1 %v12499_v6  ;;  %9996 = vmatpush1.bf16.xpose.msra.mxu0 %v12553_v19 }
 0x2b2   :  { %v1860_v55 = vpop.f32.mrb[72].mxu1  ;;  %2494 = vmatprep.subr.bf16.mxu1 %v12507_v51  ;;  %v9043_v63 = vpop.f32.mrb[108].mxu0 }
 0x2b3   :  { %v1862_v14 = vpop.f32.mrb[73].mxu1  ;;  %v9044_v17 = vpop.f32.mrb[109].mxu0 }
 0x2b4   :  { %v1864_v49 = vpop.f32.mrb[74].mxu1  ;;  %v9045_v3 = vadd.f32 %v9044_v17, %v9043_v63  ;;  %v9046_v0 = vpop.f32.mrb[110].mxu0 }
 0x2b5   :  { %v12563_v31 = vpack.c.bf16 %v1864_v49, %v1860_v55  ;;  %v1866_v1 = vpop.f32.mrb[75].mxu1  ;;  %2495 = vmatpush1.bf16.msra.mxu1 %v12505_v30  ;;  %v9047_v15 = vpop.f32.mrb[111].mxu0 }
 0x2b6   :  { %v12566_v39 = vpack.c.bf16 %v1866_v1, %v1862_v14  ;;  %2496 = vmatprep.subr.bf16.mxu1 %v12513_v32  ;;  %v9048_v6 = vadd.f32 %v9047_v15, %v9046_v0  ;;  %2693 = vperm.xlu1 %10208, %v9045_v3  }
 0x2b7   :  { %16507 = vst [vmem:[#allocation98_spill] sm:$0xff] %v12563_v31 }
 0x2b8   :  { %16508 = vst [vmem:[#allocation99_spill] sm:$0xff] %v12566_v39  ;;  %9998 = vmatprep.subr.bf16.mxu0 %v12566_v39  ;;  %2698 = vperm.xlu0 %10207, %v9048_v6  }
 0x2b9   :  { %2497 = vmatpush1.bf16.msra.mxu1 %v12511_v57  ;;  %10000 = vmatpush1.bf16.xpose.msra.mxu0 %v12563_v31 }
 0x2ba   :  { %v1870_v51 = vpop.f32.mrb[76].mxu1  ;;  %2498 = vmatprep.subr.bf16.mxu1 %v12519_v16  ;;  %v9049_v34 = vpop.f32.mrb[112].mxu0 }
 0x2bb   :  { %v1872_v44 = vpop.f32.mrb[77].mxu1  ;;  %v9050_v30 = vpop.f32.mrb[113].mxu0 }
 0x2bc   :  { %v1874_v55 = vpop.f32.mrb[78].mxu1  ;;  %v9051_v63 = vadd.f32 %v9050_v30, %v9049_v34  ;;  %v9052_v14 = vpop.f32.mrb[114].mxu0 }
 0x2bd   :  { %v12573_v17 = vpack.c.bf16 %v1874_v55, %v1870_v51  ;;  %v1876_v32 = vpop.f32.mrb[79].mxu1  ;;  %2499 = vmatpush1.bf16.msra.mxu1 %v12517_v4  ;;  %v9053_v49 = vpop.f32.mrb[115].mxu0 }
 0x2be   :  { %v12576_v3 = vpack.c.bf16 %v1876_v32, %v1872_v44  ;;  %2500 = vmatprep.subr.bf16.mxu1 %v12525_v36  ;;  %v9054_v57 = vadd.f32 %v9053_v49, %v9052_v14  ;;  %2703 = vperm.xlu0 %10207, %v9051_v63  }
 0x2bf   :  { %16509 = vst [vmem:[#allocation100_spill] sm:$0xff] %v12573_v17 }
 0x2c0   :  { %16510 = vst [vmem:[#allocation101_spill] sm:$0xff] %v12576_v3  ;;  %10002 = vmatprep.subr.bf16.mxu0 %v12576_v3  ;;  %2708 = vperm.xlu1 %10208, %v9054_v57  }
 0x2c1   :  { %2501 = vmatpush1.bf16.msra.mxu1 %v12523_v7  ;;  %10004 = vmatpush1.bf16.xpose.msra.mxu0 %v12573_v17 }
 0x2c2   :  { %v1880_v16 = vpop.f32.mrb[80].mxu1  ;;  %2502 = vmatprep.subr.bf16.mxu1 %v12531_v25  ;;  %v9055_v0 = vpop.f32.mrb[116].mxu0 }
 0x2c3   :  { %v1882_v1 = vpop.f32.mrb[81].mxu1  ;;  %v9056_v4 = vpop.f32.mrb[117].mxu0 }
 0x2c4   :  { %v1884_v15 = vpop.f32.mrb[82].mxu1  ;;  %v9057_v6 = vadd.f32 %v9056_v4, %v9055_v0  ;;  %v9058_v51 = vpop.f32.mrb[118].mxu0 }
 0x2c5   :  { %v12583_v34 = vpack.c.bf16 %v1884_v15, %v1880_v16  ;;  %v1886_v36 = vpop.f32.mrb[83].mxu1  ;;  %2503 = vmatpush1.bf16.msra.mxu1 %v12529_v46  ;;  %v9059_v44 = vpop.f32.mrb[119].mxu0 }
 0x2c6   :  { %v12586_v30 = vpack.c.bf16 %v1886_v36, %v1882_v1  ;;  %v9060_v7 = vadd.f32 %v9059_v44, %v9058_v51  ;;  %2713 = vperm.xlu0 %10207, %v9057_v6   ;;  %3003 = vmatprep.subr.bf16.mxu1 %v12544_v11 }
 0x2c7   :  { %16511 = vst [vmem:[#allocation102_spill] sm:$0xff] %v12583_v34 }
 0x2c8   :  { %16512 = vst [vmem:[#allocation103_spill] sm:$0xff] %v12586_v30  ;;  %10006 = vmatprep.subr.bf16.mxu0 %v12586_v30  ;;  %2718 = vperm.xlu1 %10208, %v9060_v7   ;;  %v16524_v30 = vsub.f32 %v11916_v21, %v11918_v26  ;;  %v16526_v26 = vsub.f32 %v11930_v9, %v11932_v59  ;;  %v12679_v9 = vld [vmem:[%s15922_s1 + $0x8] sm:$0xff] }
 0x2c9   :  { %10008 = vmatpush1.bf16.xpose.msra.mxu0 %v12583_v34 }
 0x2ca   :  { %v1890_v25 = vpop.f32.mrb[84].mxu1  ;;  %v9061_v55 = vpop.f32.mrb[120].mxu0  ;;  %vm546_vm15 = vcmp.lt.f32.partialorder %v16524_v30, 0.0009  ;;  %vm12663_vm5 = vcmp.lt.f32.partialorder %v16526_v26, 0.0009 }
 0x2cb   :  { %v1892_v63 = vpop.f32.mrb[85].mxu1  ;;  %v9062_v14 = vpop.f32.mrb[121].mxu0 }
 0x2cc   :  { %v1894_v32 = vpop.f32.mrb[86].mxu1  ;;  %v9063_v49 = vadd.f32 %v9062_v14, %v9061_v55  ;;  %v9064_v57 = vpop.f32.mrb[122].mxu0 }
 0x2cd   :  { %v12591_v46 = vpack.c.bf16 %v1894_v32, %v1890_v25  ;;  %v1896_v16 = vpop.f32.mrb[87].mxu1  ;;  %v9065_v0 = vpop.f32.mrb[123].mxu0 }
 0x2ce   :  { %v12593_v1 = vpack.c.bf16 %v1896_v16, %v1892_v63  ;;  %v9066_v4 = vadd.f32 %v9065_v0, %v9064_v57  ;;  %2723 = vperm.xlu0 %10207, %v9063_v49  }
 0x2cf   :  { %16513 = vst [vmem:[#allocation104_spill] sm:$0xff] %v12591_v46 }
 0x2d0   :  { %16514 = vst [vmem:[#allocation105_spill] sm:$0xff] %v12593_v1  ;;  %10010 = vmatprep.subr.bf16.mxu0 %v12593_v1  ;;  %2728 = vperm.xlu1 %10208, %v9066_v4  }
 0x2d1   :  { %10012 = vmatpush1.bf16.xpose.msra.mxu0 %v12591_v46  ;;  %v16521_v46 = vsub.f32 %v11873_v40, %v11868_v10  ;;  %v12653_v10 = vld [vmem:[%s15922_s1 + $0x30] sm:$0xff] }
 0x2d2   :  { %v1900_v11 = vpop.f32.mrb[88].mxu1  ;;  %v9067_v15 = vpop.f32.mrb[124].mxu0 }
 0x2d3   :  { %v1902_v6 = vpop.f32.mrb[89].mxu1  ;;  %v9068_v51 = vpop.f32.mrb[125].mxu0  ;;  %vm12639_vm14 = vcmp.lt.f32.partialorder %v16521_v46, 0.0009 }
 0x2d4   :  { %v1904_v36 = vpop.f32.mrb[90].mxu1  ;;  %v9069_v44 = vadd.f32 %v9068_v51, %v9067_v15  ;;  %v9070_v7 = vpop.f32.mrb[126].mxu0 }
 0x2d5   :  { %v12597_v25 = vpack.c.bf16 %v1904_v36, %v1900_v11  ;;  %v1906_v55 = vpop.f32.mrb[91].mxu1  ;;  %v9071_v14 = vpop.f32.mrb[127].mxu0 }
 0x2d6   :  { %v12599_v63 = vpack.c.bf16 %v1906_v55, %v1902_v6  ;;  %2733 = vperm.xlu0 %10207, %v9069_v44   ;;  %v9072_v32 = vadd.f32 %v9071_v14, %v9070_v7  ;;  %v16519_v7 = vrot.slane %v12539_v22, 1 }
 0x2d7   :  { %16515 = vst [vmem:[#allocation106_spill] sm:$0xff] %v12597_v25 }
 0x2d8   :  { %16516 = vst [vmem:[#allocation107_spill] sm:$0xff] %v12599_v63  ;;  %10014 = vmatprep.subr.bf16.mxu0 %v12599_v63  ;;  %2738 = vperm.xlu1 %10208, %v9072_v32  }
 0x2d9   :  { %10016 = vmatpush1.bf16.xpose.msra.mxu0 %v12597_v25 }
 0x2da   :  { %v1910_v49 = vpop.f32.mrb[92].mxu1  ;;  %v9073_v57 = vpop.f32.mrb[128].mxu0 }
 0x2db   :  { %v1912_v16 = vpop.f32.mrb[93].mxu1  ;;  %v9074_v0 = vpop.f32.mrb[129].mxu0 }
 0x2dc   :  { %v1914_v4 = vpop.f32.mrb[94].mxu1  ;;  %v12603_v15 = vadd.f32 %v9074_v0, %v9073_v57  ;;  %v9076_v11 = vpop.f32.mrb[130].mxu0 }
 0x2dd   :  { %v12605_v51 = vpack.c.bf16 %v1914_v4, %v1910_v49  ;;  %v1916_v36 = vpop.f32.mrb[95].mxu1  ;;  %v9077_v6 = vpop.f32.mrb[131].mxu0 }
 0x2de   :  { %v12607_v55 = vpack.c.bf16 %v1916_v36, %v1912_v16  ;;  %v12609_v44 = vadd.f32 %v9077_v6, %v9076_v11 }
 0x2df   :  { %16517 = vst [vmem:[#allocation108_spill] sm:$0xff] %v12605_v51 }
 0x2e0   :  { %16518 = vst [vmem:[#allocation109_spill] sm:$0xff] %v12607_v55  ;;  %10018 = vmatprep.subr.bf16.mxu0 %v12607_v55  ;;  %v12634_v55 = vld [vmem:[%s15922_s1] sm:$0xff] }
 0x2e1   :  { %10020 = vmatpush1.bf16.xpose.msra.mxu0 %v12605_v51  ;;  %v16520_v51 = vsub.f32 %v11876_v58, %v11870_v18 }
 0x2e2   :  { %v2159_v14 = vpop.permute.xlu0 %2158 }
 0x2e3   :  { %vm540_vm13 = vcmp.lt.f32.partialorder %v16520_v51, 0.0009 }
 0x2e4   :  { %v2164_v32 = vpop.permute.xlu1 %2163  ;;  %v12656_v40 = vsel %vm540_vm13, %v12634_v55, -1e+30 }
 0x2e5   :  { %16525 = vst [vmem:[#allocation110_spill] sm:$0xff] %v12656_v40 }
 0x2e8   :  { %2666 = vmatmul.mubr.f32.vlgmr.msra.gmra.mrb[132].mxu0 %v16519_v7 }
 0x2ec   :  { %v2169_v0 = vpop.permute.xlu1 %2168 }
 0x2f0   :  { %v2174_v4 = vpop.permute.xlu1 %2173 }
 0x2f5   :  { %v12615_v57 = vpop.permute.xlu0 %2178 }
 0x2f9   :  { %v12617_v49 = vpop.permute.xlu0 %2183 }
 0x2fd   :  { %v2189_v16 = vpop.permute.xlu1 %2188 }
 0x301   :  { %v12621_v11 = vpop.permute.xlu1 %2193 }
 0x305   :  { %v2199_v25 = vpop.permute.xlu0 %2198 }
 0x309   :  { %v12619_v36 = vpop.permute.xlu0 %2203 }
 0x30d   :  { %v2209_v18 = vpop.permute.xlu1 %2208 }
 0x315   :  { %v12626_v22 = vpop.permute.xlu0 %2218 }
 0x37b   :  { %v2152_v6 = vpop.f32.mrb[96].mxu1 }
 0x37c   :  { %v12629_v7 = vrot.slane %v2152_v6, %v11863_v35  ;;  %v2154_v63 = vpop.f32.mrb[97].mxu1 }
 0x37e   :  { %v2246_v58 = vadd.f32 %v12629_v7, %v2189_v16  ;;  %v2240_v51 = vadd.f32 %v12629_v7, %v2159_v14  ;;  %v2248_v6 = vadd.f32 %v12629_v7, %v2199_v25  ;;  %v2241_v34 = vadd.f32 %v12629_v7, %v2164_v32  ;;  %v2224_v16 = vpop.permute.xlu0 %2223 }
 0x37f   :  { %v2250_v46 = vadd.f32 %v12629_v7, %v2209_v18  ;;  %v2242_v63 = vadd.f32 %v12629_v7, %v2169_v0  ;;  %v12668_v18 = vsel %vm546_vm15, %v12653_v10, -1e+30  ;;  %v2253_v26 = vadd.f32 %v12629_v7, %v2224_v16 }
 0x380   :  { %vm2262_vm1 = vcmp.gt.f32.partialorder %v2246_v58, 0.0  ;;  %v2278_v25 = vmul.f32 0.2, %v2246_v58  ;;  %vm2256_vm2 = vcmp.gt.f32.partialorder %v2240_v51, 0.0  ;;  %v2272_v14 = vmul.f32 0.2, %v2240_v51 }
 0x381   :  { %vm2264_vm3 = vcmp.gt.f32.partialorder %v2248_v6, 0.0  ;;  %v2280_v32 = vmul.f32 0.2, %v2248_v6  ;;  %vm2257_vm4 = vcmp.gt.f32.partialorder %v2241_v34, 0.0  ;;  %v2273_v21 = vmul.f32 0.2, %v2241_v34 }
 0x382   :  { %16529 = vst [vmem:[#allocation111_spill] sm:$0xff] %v12668_v18  ;;  %v2294_v0 = vsel %vm2262_vm1, %v2246_v58, %v2278_v25  ;;  %v2288_v17 = vsel %vm2256_vm2, %v2240_v51, %v2272_v14  ;;  %v2282_v59 = vmul.f32 0.2, %v2250_v46  ;;  %vm2266_vm6 = vcmp.gt.f32.partialorder %v2250_v46, 0.0 }
 0x383   :  { %v12671_v3 = vadd.f32 %v2294_v0, %v12668_v18  ;;  %v12674_v31 = vadd.f32 %v2288_v17, %v12656_v40  ;;  %v2296_v39 = vsel %vm2264_vm3, %v2248_v6, %v2280_v32  ;;  %v2289_v19 = vsel %vm2257_vm4, %v2241_v34, %v2273_v21  ;;  %v10934_v34 = vld [vmem:[%s15922_s1 + $0x40] sm:$0xff]  ;;  %v12716_v21 = vld [vmem:[%s15922_s1 + $0x10] sm:$0xff] }
 0x384   :  { %v2243_v58 = vadd.f32 %v12629_v7, %v2174_v4  ;;  %vm2258_vm7 = vcmp.gt.f32.partialorder %v2242_v63, 0.0  ;;  %v2274_v17 = vmul.f32 0.2, %v2242_v63  ;;  %v16530_v51 = vsub.f32 %v11884_v8, %v11890_v37 }
 0x385   :  { %2332 = vmax.xlane.f32.xlu0 %v12671_v3  ;;  %2320 = vmax.xlane.f32.xlu1 %v12674_v31  ;;  %v12697_v4 = vsel %vm12663_vm5, %v10934_v34, -1e+30  ;;  %v12702_v6 = vsel %vm12639_vm14, %v12679_v9, -1e+30  ;;  %v16535_v8 = vsub.f32 %v11944_v41, %v11946_v47  ;;  %v2298_v32 = vsel %vm2266_vm6, %v2250_v46, %v2282_v59  ;;  %v10935_v41 = vld [vmem:[%s15922_s1 + $0x50] sm:$0xff]  ;;  %v12747_v59 = vld [vmem:[%s15922_s1 + $0x18] sm:$0xff] }
 0x386   :  { %vm12688_vm8 = vcmp.lt.f32.partialorder %v16530_v51, 0.0009  ;;  %16533 = vst [vmem:[#allocation112_spill] sm:$0xff] %v12697_v4  ;;  %16534 = vst [vmem:[#allocation113_spill] sm:$0xff] %v12702_v6  ;;  %v12708_v37 = vadd.f32 %v2296_v39, %v12697_v4  ;;  %v12711_v14 = vadd.f32 %v2289_v19, %v12702_v6  ;;  %v2290_v30 = vsel %vm2258_vm7, %v2242_v63, %v2274_v17  ;;  %v12773_v34 = vld [vmem:[%s15922_s1 + $0x20] sm:$0xff] }
 0x387   :  { %vm550_vm9 = vcmp.lt.f32.partialorder %v16535_v8, 0.0009  ;;  %v2285_v1 = vmul.f32 0.2, %v2253_v26  ;;  %v2275_v16 = vmul.f32 0.2, %v2243_v58  ;;  %v2244_v0 = vadd.f32 %v12629_v7, %v12615_v57 }
 0x388   :  { %vm2269_vm10 = vcmp.gt.f32.partialorder %v2253_v26, 0.0  ;;  %vm2259_vm11 = vcmp.gt.f32.partialorder %v2243_v58, 0.0  ;;  %v12725_v47 = vsel %vm550_vm9, %v10935_v41, -1e+30  ;;  %v12730_v19 = vsel %vm12688_vm8, %v12716_v21, -1e+30 }
 0x389   :  { %2336 = vmax.xlane.f32.xlu0 %v12708_v37  ;;  %2322 = vmax.xlane.f32.xlu1 %v12711_v14  ;;  %16536 = vst [vmem:[#allocation114_spill] sm:$0xff] %v12725_v47  ;;  %16537 = vst [vmem:[#allocation115_spill] sm:$0xff] %v12730_v19  ;;  %v16538_v39 = vsub.f32 %v11879_v12, %v11881_v13  ;;  %v16539_v57 = vsub.f32 %v11953_v42, %v11955_v45  ;;  %v2276_v25 = vmul.f32 0.2, %v2244_v0  ;;  %v10936_v13 = vld [vmem:[%s15922_s1 + $0x68] sm:$0xff] }
 0x38a   :  { %v12739_v46 = vadd.f32 %v2298_v32, %v12725_v47  ;;  %v12742_v63 = vadd.f32 %v2290_v30, %v12730_v19  ;;  %v2301_v17 = vsel %vm2269_vm10, %v2253_v26, %v2285_v1  ;;  %v2291_v51 = vsel %vm2259_vm11, %v2243_v58, %v2275_v16  ;;  %v12791_v16 = vld [vmem:[%s15922_s1 + $0x28] sm:$0xff] }
 0x38b   :  { %vm543_vm12 = vcmp.lt.f32.partialorder %v16538_v39, 0.0009  ;;  %vm553_vm13 = vcmp.lt.f32.partialorder %v16539_v57, 0.0009  ;;  %v2245_v12 = vadd.f32 %v12629_v7, %v12617_v49  ;;  %vm2260_vm14 = vcmp.gt.f32.partialorder %v2244_v0, 0.0 }
 0x38c   :  { %v12756_v42 = vsel %vm553_vm13, %v10936_v13, -1e+30  ;;  %v12759_v45 = vsel %vm543_vm12, %v12747_v59, -1e+30  ;;  %v16542_v26 = vsub.f32 %v11902_v61, %v11904_v62  ;;  %v2292_v8 = vsel %vm2260_vm14, %v2244_v0, %v2276_v25 }
 0x38d   :  { %2340 = vmax.xlane.f32.xlu0 %v12739_v46  ;;  %2324 = vmax.xlane.f32.xlu1 %v12742_v63  ;;  %16540 = vst [vmem:[#allocation116_spill] sm:$0xff] %v12756_v42  ;;  %16541 = vst [vmem:[#allocation117_spill] sm:$0xff] %v12759_v45  ;;  %v12765_v49 = vadd.f32 %v2301_v17, %v12756_v42  ;;  %v12768_v58 = vadd.f32 %v2291_v51, %v12759_v45  ;;  %v2277_v32 = vmul.f32 0.2, %v2245_v12  ;;  %v12808_v17 = vld [vmem:[%s15922_s1 + $0x38] sm:$0xff] }
 0x38e   :  { %vm544_vm15 = vcmp.lt.f32.partialorder %v16542_v26, 0.0009  ;;  %v2247_v30 = vadd.f32 %v12629_v7, %v12621_v11  ;;  %vm2261_vm1 = vcmp.gt.f32.partialorder %v2245_v12, 0.0  ;;  %v16544_v62 = vsub.f32 %v11897_v56, %v11899_v29  ;;  %v2214_v29 = vpop.permute.xlu1 %2213 }
 0x38f   :  { %v12780_v61 = vsel %vm544_vm15, %v12773_v34, -1e+30  ;;  %v2293_v11 = vsel %vm2261_vm1, %v2245_v12, %v2277_v32  ;;  %v2249_v41 = vadd.f32 %v12629_v7, %v12619_v36  ;;  %v16546_v56 = vsub.f32 %v11911_v28, %v11913_v53  ;;  %v10937_v32 = vld [vmem:[%s15922_s1 + $0x48] sm:$0xff] }
 0x390   :  { %16543 = vst [vmem:[#allocation118_spill] sm:$0xff] %v12780_v61  ;;  %vm545_vm2 = vcmp.lt.f32.partialorder %v16544_v62, 0.0009  ;;  %v12786_v1 = vadd.f32 %v2292_v8, %v12780_v61  ;;  %v2279_v0 = vmul.f32 0.2, %v2247_v30  ;;  %vm2263_vm3 = vcmp.gt.f32.partialorder %v2247_v30, 0.0 }
 0x391   :  { %2346 = vmax.xlane.f32.xlu0 %v12765_v49  ;;  %2326 = vmax.xlane.f32.xlu1 %v12768_v58  ;;  %v12797_v39 = vsel %vm545_vm2, %v12791_v16, -1e+30  ;;  %vm547_vm4 = vcmp.lt.f32.partialorder %v16546_v56, 0.0009  ;;  %v2281_v51 = vmul.f32 0.2, %v2249_v41  ;;  %v2251_v25 = vadd.f32 %v12629_v7, %v2214_v29 }
 0x392   :  { %16545 = vst [vmem:[#allocation119_spill] sm:$0xff] %v12797_v39  ;;  %v12803_v57 = vadd.f32 %v2293_v11, %v12797_v39  ;;  %v2295_v36 = vsel %vm2263_vm3, %v2247_v30, %v2279_v0  ;;  %vm2265_vm5 = vcmp.gt.f32.partialorder %v2249_v41, 0.0  ;;  %v12813_v12 = vsel %vm547_vm4, %v12808_v17, -1e+30  ;;  %v10939_v56 = vld [vmem:[%s15922_s1 + $0x60] sm:$0xff] }
 0x393   :  { %16547 = vst [vmem:[#allocation120_spill] sm:$0xff] %v12813_v12  ;;  %v16548_v28 = vsub.f32 %v11925_v5, %v11927_v52  ;;  %v12819_v53 = vadd.f32 %v2295_v36, %v12813_v12  ;;  %v2297_v13 = vsel %vm2265_vm5, %v2249_v41, %v2281_v51  ;;  %v2283_v26 = vmul.f32 0.2, %v2251_v25 }
 0x394   :  { %v2252_v8 = vadd.f32 %v12629_v7, %v12626_v22  ;;  %vm2267_vm7 = vcmp.gt.f32.partialorder %v2251_v25, 0.0  ;;  %v16550_v5 = vsub.f32 %v11939_v20, %v11941_v33  ;;  %v10938_v22 = vld [vmem:[%s15922_s1 + $0x58] sm:$0xff]  ;;  %v16552_v41 = vsub.f32 %v11958_v27, %v11960_v54  ;;  %v2229_v27 = vpop.permute.xlu1 %2228 }
 0x395   :  { %2328 = vmax.xlane.f32.xlu1 %v12786_v1  ;;  %vm549_vm6 = vcmp.lt.f32.partialorder %v16548_v28, 0.0009  ;;  %v2299_v62 = vsel %vm2267_vm7, %v2251_v25, %v2283_v26  ;;  %v2674_v26 = vpop.permute.xlu0 %2673 }
 0x396   :  { %v12827_v30 = vsel %vm549_vm6, %v10937_v32, -1e+30  ;;  %vm551_vm8 = vcmp.lt.f32.partialorder %v16550_v5, 0.0009  ;;  %v2284_v11 = vmul.f32 0.2, %v2252_v8  ;;  %v16554_v5 = vsub.f32 %v11967_v60, %v11969_v24 }
 0x397   :  { %16549 = vst [vmem:[#allocation121_spill] sm:$0xff] %v12827_v30  ;;  %v12833_v52 = vadd.f32 %v2297_v13, %v12827_v30  ;;  %vm2268_vm9 = vcmp.gt.f32.partialorder %v2252_v8, 0.0  ;;  %v12839_v0 = vsel %vm551_vm8, %v10938_v22, -1e+30  ;;  %vm552_vm10 = vcmp.lt.f32.partialorder %v16552_v41, 0.0009 }
 0x398   :  { %16551 = vst [vmem:[#allocation122_spill] sm:$0xff] %v12839_v0  ;;  %v12845_v20 = vadd.f32 %v2299_v62, %v12839_v0  ;;  %v2300_v33 = vsel %vm2268_vm9, %v2252_v8, %v2284_v11  ;;  %v12851_v29 = vsel %vm552_vm10, %v10939_v56, -1e+30  ;;  %v2234_v54 = vpop.permute.xlu1 %2233  ;;  %vm555_vm12 = vcmp.lt.f32.partialorder %v16554_v5, 0.0009  ;;  %v16562_v5 = vld [vmem:[#allocation24_spill] sm:$0xff] }
 0x399   :  { %2330 = vmax.xlane.f32.xlu1 %v12803_v57  ;;  %16553 = vst [vmem:[#allocation123_spill] sm:$0xff] %v12851_v29  ;;  %v12855_v36 = vadd.f32 %v2300_v33, %v12851_v29  ;;  %v2255_v51 = vadd.f32 %v12629_v7, %v2234_v54  ;;  %v16556_v33 = vsub.f32 %v11999_v38, %v11990_v48 }
 0x39b   :  { %v2287_v8 = vmul.f32 0.2, %v2255_v51  ;;  %vm2271_vm11 = vcmp.gt.f32.partialorder %v2255_v51, 0.0  ;;  %vm999_vm14 = vcmp.lt.f32.partialorder %v16556_v33, 0.0009 }
 0x39c   :  { %v2684_v32 = vpop.permute.xlu1 %2683 }
 0x39d   :  { %2334 = vmax.xlane.f32.xlu1 %v12819_v53  ;;  %v2303_v62 = vsel %vm2271_vm11, %v2255_v51, %v2287_v8 }
 0x3a0   :  { %v2694_v56 = vpop.permute.xlu1 %2693 }
 0x3a1   :  { %2338 = vmax.xlane.f32.xlu1 %v12833_v52 }
 0x3a5   :  { %2342 = vmax.xlane.f32.xlu1 %v12845_v20 }
 0x3a7   :  { %2743 = vperm.xlu0 %10207, %v12603_v15  }
 0x3a9   :  { %2344 = vmax.xlane.f32.xlu1 %v12855_v36 }
 0x3ba   :  { %2748 = vperm.xlu1 %10208, %v12609_v44   ;;  %v10940_v44 = vld [vmem:[%s15922_s1 + $0x78] sm:$0xff] }
 0x3bb   :  { %v2667_v25 = vpop.f32.mrb[132].mxu0  ;;  %v12871_v41 = vsel %vm555_vm12, %v10940_v44, -1e+30 }
 0x3bc   :  { %v12861_v28 = vrot.slane %v2667_v25, %v11863_v35  ;;  %v2669_v13 = vpop.f32.mrb[133].mxu0  ;;  %16555 = vst [vmem:[#allocation124_spill] sm:$0xff] %v12871_v41  ;;  %v12877_v54 = vadd.f32 %v2303_v62, %v12871_v41  ;;  %v12882_v25 = vsel %vm999_vm14, %v12634_v55, -1e+30 }
 0x3bd   :  { %16557 = vst [vmem:[#allocation125_spill] sm:$0xff] %v12882_v25  ;;  %v16558_v13 = vld [vmem:[#allocation16_spill] sm:$0xff] }
 0x3be   :  { %v2755_v15 = vadd.f32 %v12861_v28, %v2674_v26  ;;  %v2757_v22 = vadd.f32 %v12861_v28, %v2684_v32  ;;  %v2759_v51 = vadd.f32 %v12861_v28, %v2694_v56  ;;  %v16559_v26 = vsub.f32 %v12018_v23, %v16558_v13 }
 0x3c0   :  { %v2787_v11 = vmul.f32 0.2, %v2755_v15  ;;  %vm2771_vm13 = vcmp.gt.f32.partialorder %v2755_v15, 0.0  ;;  %v2789_v24 = vmul.f32 0.2, %v2757_v22  ;;  %vm2773_vm15 = vcmp.gt.f32.partialorder %v2757_v22, 0.0 }
 0x3c1   :  { %vm1001_vm1 = vcmp.lt.f32.partialorder %v16559_v26, 0.0009  ;;  %v2791_v8 = vmul.f32 0.2, %v2759_v51  ;;  %vm2775_vm2 = vcmp.gt.f32.partialorder %v2759_v51, 0.0 }
 0x3c2   :  { %v2803_v60 = vsel %vm2771_vm13, %v2755_v15, %v2787_v11  ;;  %v2805_v48 = vsel %vm2773_vm15, %v2757_v22, %v2789_v24  ;;  %v12892_v32 = vsel %vm1001_vm1, %v12716_v21, -1e+30  ;;  %v16561_v15 = vld [vmem:[#allocation23_spill] sm:$0xff]  ;;  %v2679_v22 = vpop.permute.xlu0 %2678  ;;  %v2254_v21 = vadd.f32 %v12629_v7, %v2229_v27  ;;  %v16565_v24 = vld [vmem:[#allocation10_spill] sm:$0xff] }
 0x3c3   :  { %v12888_v38 = vadd.f32 %v2803_v60, %v12882_v25  ;;  %16560 = vst [vmem:[#allocation16_spill] sm:$0xff] %v12892_v32  ;;  %v16563_v62 = vsub.f32 %v16561_v15, %v16562_v5  ;;  %v12898_v55 = vadd.f32 %v2805_v48, %v12892_v32  ;;  %v2807_v23 = vsel %vm2775_vm2, %v2759_v51, %v2791_v8  ;;  %v16566_v51 = vld [vmem:[#allocation11_spill] sm:$0xff]  ;;  %v10941_v7 = vld [vmem:[%s15922_s1 + $0x70] sm:$0xff]  ;;  %v16569_v8 = vld [vmem:[#allocation13_spill] sm:$0xff] }
 0x3c4   :  { %v2286_v33 = vmul.f32 0.2, %v2254_v21  ;;  %v2756_v56 = vadd.f32 %v12861_v28, %v2679_v22  ;;  %vm2270_vm4 = vcmp.gt.f32.partialorder %v2254_v21, 0.0  ;;  %v16567_v13 = vsub.f32 %v16565_v24, %v16566_v51  ;;  %v16570_v15 = vld [vmem:[#allocation12_spill] sm:$0xff]  ;;  %v16573_v24 = vld [vmem:[#allocation14_spill] sm:$0xff]  ;;  %v16574_v51 = vld [vmem:[#allocation15_spill] sm:$0xff] }
 0x3c5   :  { %vm1003_vm3 = vcmp.lt.f32.partialorder %v16563_v62, 0.0009  ;;  %v16571_v5 = vsub.f32 %v16569_v8, %v16570_v15  ;;  %v16578_v15 = vld [vmem:[#allocation21_spill] sm:$0xff] }
 0x3c6   :  { %2350 = vmax.xlane.f32.xlu0 %v12877_v54  ;;  %v12902_v11 = vsel %vm1003_vm3, %v12773_v34, -1e+30  ;;  %v2689_v60 = vpop.permute.xlu0 %2688  ;;  %vm554_vm5 = vcmp.lt.f32.partialorder %v16567_v13, 0.0009  ;;  %v2302_v26 = vsel %vm2270_vm4, %v2254_v21, %v2286_v33  ;;  %v2788_v34 = vmul.f32 0.2, %v2756_v56 }
 0x3c7   :  { %16564 = vst [vmem:[#allocation23_spill] sm:$0xff] %v12902_v11  ;;  %v12905_v44 = vadd.f32 %v2807_v23, %v12902_v11  ;;  %v2758_v48 = vadd.f32 %v12861_v28, %v2689_v60  ;;  %vm2772_vm6 = vcmp.gt.f32.partialorder %v2756_v56, 0.0  ;;  %v12917_v27 = vsel %vm554_vm5, %v10941_v7, -1e+30 }
 0x3c8   :  { %16568 = vst [vmem:[#allocation24_spill] sm:$0xff] %v12917_v27  ;;  %vm1000_vm7 = vcmp.lt.f32.partialorder %v16571_v5, 0.0009  ;;  %v12923_v23 = vadd.f32 %v2302_v26, %v12917_v27  ;;  %v2804_v22 = vsel %vm2772_vm6, %v2756_v56, %v2788_v34  ;;  %v16575_v13 = vsub.f32 %v16573_v24, %v16574_v51  ;;  %v16577_v34 = vld [vmem:[#allocation20_spill] sm:$0xff] }
 0x3c9   :  { %v2790_v21 = vmul.f32 0.2, %v2758_v48  ;;  %vm2774_vm8 = vcmp.gt.f32.partialorder %v2758_v48, 0.0  ;;  %v12928_v60 = vsel %vm1000_vm7, %v12679_v9, -1e+30  ;;  %v16579_v5 = vsub.f32 %v16577_v34, %v16578_v15 }
 0x3ca   :  { %2835 = vmax.xlane.f32.xlu0 %v12888_v38  ;;  %v2699_v62 = vpop.permute.xlu0 %2698  ;;  %16572 = vst [vmem:[#allocation10_spill] sm:$0xff] %v12928_v60  ;;  %vm1002_vm9 = vcmp.lt.f32.partialorder %v16575_v13, 0.0009  ;;  %v12934_v7 = vadd.f32 %v2804_v22, %v12928_v60 }
 0x3cb   :  { %v2760_v33 = vadd.f32 %v12861_v28, %v2699_v62  ;;  %v2806_v8 = vsel %vm2774_vm8, %v2758_v48, %v2790_v21  ;;  %v12938_v56 = vsel %vm1002_vm9, %v12747_v59, -1e+30  ;;  %vm1004_vm11 = vcmp.lt.f32.partialorder %v16579_v5, 0.0009  ;;  %v2709_v59 = vpop.permute.xlu1 %2708 }
 0x3cc   :  { %16576 = vst [vmem:[#allocation11_spill] sm:$0xff] %v12938_v56  ;;  %v12944_v9 = vadd.f32 %v2806_v8, %v12938_v56  ;;  %v12948_v22 = vsel %vm1004_vm11, %v12791_v16, -1e+30 }
 0x3cd   :  { %v2792_v26 = vmul.f32 0.2, %v2760_v33  ;;  %vm2776_vm10 = vcmp.gt.f32.partialorder %v2760_v33, 0.0  ;;  %16580 = vst [vmem:[#allocation13_spill] sm:$0xff] %v12948_v22 }
 0x3ce   :  { %2839 = vmax.xlane.f32.xlu0 %v12898_v55  ;;  %v2704_v51 = vpop.permute.xlu0 %2703 }
 0x3cf   :  { %v2808_v62 = vsel %vm2776_vm10, %v2760_v33, %v2792_v26  ;;  %v2719_v21 = vpop.permute.xlu1 %2718 }
 0x3d0   :  { %v12951_v48 = vadd.f32 %v2808_v62, %v12948_v22  ;;  %v2761_v22 = vadd.f32 %v12861_v28, %v2704_v51 }
 0x3d2   :  { %2843 = vmax.xlane.f32.xlu0 %v12905_v44  ;;  %v2714_v8 = vpop.permute.xlu0 %2713  ;;  %v2793_v27 = vmul.f32 0.2, %v2761_v22  ;;  %vm2777_vm12 = vcmp.gt.f32.partialorder %v2761_v22, 0.0 }
 0x3d3   :  { %v12954_v24 = vpop.permute.xlu1 %2728 }
 0x3d6   :  { %v2724_v16 = vpop.permute.xlu0 %2723 }
 0x3d7   :  { %v12956_v13 = vpop.permute.xlu1 %2738 }
 0x3da   :  { %v12962_v56 = vpop.permute.xlu0 %2733 }
 0x3de   :  { %2348 = vmax.xlane.f32.xlu1 %v12923_v23 }
 0x3e2   :  { %2837 = vmax.xlane.f32.xlu1 %v12934_v7 }
 0x3e6   :  { %2841 = vmax.xlane.f32.xlu1 %v12944_v9 }
 0x3ea   :  { %2845 = vmax.xlane.f32.xlu1 %v12951_v48 }
 0x412   :  { %v2321_v34 = vpop.xlane.xlu1 %2320 }
 0x413   :  { %v2352_v33 = vsub.f32 %v12674_v31, %v2321_v34  ;;  %v2762_v31 = vadd.f32 %v12861_v28, %v2709_v59 }
 0x415   :  { %v2368_v26 = vmul.f32 1.442695, %v2352_v33  ;;  %v16582_v33 = vld [vmem:[#allocation28_spill] sm:$0xff]  ;;  %vm2778_vm14 = vcmp.gt.f32.partialorder %v2762_v31, 0.0 }
 0x416   :  { %v2323_v15 = vpop.xlane.xlu1 %2322 }
 0x417   :  { %v2353_v5 = vsub.f32 %v12711_v14, %v2323_v15  ;;  %10421 = vpow2.f32 %v2368_v26  ;;  %v16581_v14 = vld [vmem:[#allocation27_spill] sm:$0xff]  ;;  %v2333_v15 = vpop.xlane.xlu0 %2332 }
 0x418   :  { %v16583_v26 = vsub.f32 %v16581_v14, %v16582_v33 }
 0x419   :  { %v2370_v62 = vmul.f32 1.442695, %v2353_v5 }
 0x41a   :  { %v2325_v11 = vpop.xlane.xlu1 %2324  ;;  %vm1005_vm13 = vcmp.lt.f32.partialorder %v16583_v26, 0.0009 }
 0x41b   :  { %v2354_v32 = vsub.f32 %v12742_v63, %v2325_v11  ;;  %10423 = vpow2.f32 %v2370_v62  ;;  %v2809_v11 = vsel %vm2777_vm12, %v2761_v22, %v2793_v27  ;;  %v2794_v62 = vmul.f32 0.2, %v2762_v31 }
 0x41d   :  { %v2372_v25 = vmul.f32 1.442695, %v2354_v32  ;;  %v2763_v32 = vadd.f32 %v12861_v28, %v2714_v8  ;;  %v2810_v8 = vsel %vm2778_vm14, %v2762_v31, %v2794_v62 }
 0x41e   :  { %v2327_v60 = vpop.xlane.xlu1 %2326 }
 0x41f   :  { %v2355_v34 = vsub.f32 %v12768_v58, %v2327_v60  ;;  %10425 = vpow2.f32 %v2372_v25  ;;  %v12975_v58 = vsel %vm1005_vm13, %v12653_v10, -1e+30  ;;  %v16585_v25 = vld [vmem:[#allocation25_spill] sm:$0xff]  ;;  %v16586_v60 = vld [vmem:[#allocation26_spill] sm:$0xff]  ;;  %v2795_v26 = vmul.f32 0.2, %v2763_v32 }
 0x420   :  { %16584 = vst [vmem:[#allocation12_spill] sm:$0xff] %v12975_v58  ;;  %v16587_v14 = vsub.f32 %v16585_v25, %v16586_v60  ;;  %v12981_v33 = vadd.f32 %v2809_v11, %v12975_v58  ;;  %vm2779_vm1 = vcmp.gt.f32.partialorder %v2763_v32, 0.0 }
 0x421   :  { %v2374_v51 = vmul.f32 1.442695, %v2355_v34  ;;  %v12969_v5 = vpop.eup %10421  ;;  %v2811_v25 = vsel %vm2779_vm1, %v2763_v32, %v2795_v26 }
 0x422   :  { %v2329_v63 = vpop.xlane.xlu1 %2328  ;;  %2400 = vadd.xlane.f32.xlu0 %v12969_v5  ;;  %vm1006_vm15 = vcmp.lt.f32.partialorder %v16587_v14, 0.0009  ;;  %v2765_v14 = vadd.f32 %v12861_v28, %v2724_v16  ;;  %v2766_v16 = vadd.f32 %v12861_v28, %v12954_v24  ;;  %v2767_v24 = vadd.f32 %v12861_v28, %v12962_v56 }
 0x423   :  { %v2356_v59 = vsub.f32 %v12786_v1, %v2329_v63  ;;  %10427 = vpow2.f32 %v2374_v51  ;;  %v2764_v1 = vadd.f32 %v12861_v28, %v2719_v21  ;;  %v2337_v63 = vpop.xlane.xlu0 %2336  ;;  %v2358_v51 = vsub.f32 %v12671_v3, %v2333_v15  ;;  %v16589_v15 = vld [vmem:[#allocation35_spill] sm:$0xff] }
 0x424   :  { %v12991_v11 = vsel %vm1006_vm15, %v12808_v17, -1e+30  ;;  %v2797_v26 = vmul.f32 0.2, %v2765_v14  ;;  %vm2781_vm3 = vcmp.gt.f32.partialorder %v2765_v14, 0.0  ;;  %vm2782_vm4 = vcmp.gt.f32.partialorder %v2766_v16, 0.0 }
 0x425   :  { %v2376_v34 = vmul.f32 1.442695, %v2356_v59  ;;  %v12983_v27 = vpop.eup %10423  ;;  %16588 = vst [vmem:[#allocation14_spill] sm:$0xff] %v12991_v11  ;;  %v12994_v31 = vadd.f32 %v2810_v8, %v12991_v11  ;;  %v2796_v60 = vmul.f32 0.2, %v2764_v1  ;;  %vm2780_vm2 = vcmp.gt.f32.partialorder %v2764_v1, 0.0 }
 0x426   :  { %v2331_v22 = vpop.xlane.xlu1 %2330  ;;  %2847 = vmax.xlane.f32.xlu0 %v12981_v33  ;;  %2402 = vadd.xlane.f32.xlu1 %v12983_v27  ;;  %v2380_v3 = vmul.f32 1.442695, %v2358_v51  ;;  %v2768_v56 = vadd.f32 %v12861_v28, %v12956_v13  ;;  %vm2783_vm5 = vcmp.gt.f32.partialorder %v2767_v24, 0.0 }
 0x427   :  { %10429 = vpow2.f32 %v2376_v34  ;;  %v2357_v10 = vsub.f32 %v12803_v57, %v2331_v22  ;;  %v2341_v17 = vpop.xlane.xlu0 %2340  ;;  %v13003_v34 = vadd.f32 %v2811_v25, %v16589_v15  ;;  %v2812_v32 = vsel %vm2780_vm2, %v2764_v1, %v2796_v60 }
 0x428   :  { %v2813_v1 = vsel %vm2781_vm3, %v2765_v14, %v2797_v26  ;;  %v2798_v60 = vmul.f32 0.2, %v2766_v16  ;;  %vm2784_vm6 = vcmp.gt.f32.partialorder %v2768_v56, 0.0 }
 0x429   :  { %v2378_v59 = vmul.f32 1.442695, %v2357_v10  ;;  %v12996_v62 = vpop.eup %10425 }
 0x42a   :  { %v2335_v21 = vpop.xlane.xlu1 %2334  ;;  %2849 = vmax.xlane.f32.xlu1 %v12994_v31  ;;  %2404 = vadd.xlane.f32.xlu0 %v12996_v62  ;;  %v2814_v26 = vsel %vm2782_vm4, %v2766_v16, %v2798_v60 }
 0x42b   :  { %10431 = vpow2.f32 %v2378_v59  ;;  %v2359_v57 = vsub.f32 %v12819_v53, %v2335_v21  ;;  %v2360_v53 = vsub.f32 %v12708_v37, %v2337_v63  ;;  %v16590_v59 = vld [vmem:[#allocation33_spill] sm:$0xff]  ;;  %v2347_v15 = vpop.xlane.xlu0 %2346 }
 0x42c   :  { %10433 = vpow2.f32 %v2380_v3  ;;  %v13015_v21 = vadd.f32 %v2812_v32, %v16590_v59  ;;  %v2799_v59 = vmul.f32 0.2, %v2767_v24 }
 0x42d   :  { %v13005_v22 = vpop.eup %10427  ;;  %v2382_v10 = vmul.f32 1.442695, %v2359_v57  ;;  %v2384_v3 = vmul.f32 1.442695, %v2360_v53  ;;  %v16591_v57 = vld [vmem:[#allocation40_spill] sm:$0xff]  ;;  %v16592_v53 = vld [vmem:[#allocation39_spill] sm:$0xff] }
 0x42e   :  { %v2339_v8 = vpop.xlane.xlu1 %2338  ;;  %2851 = vmax.xlane.f32.xlu0 %v13003_v34  ;;  %2406 = vadd.xlane.f32.xlu1 %v13005_v22  ;;  %v13025_v32 = vadd.f32 %v2813_v1, %v16591_v57  ;;  %v2815_v60 = vsel %vm2783_vm5, %v2767_v24, %v2799_v59  ;;  %v2800_v57 = vmul.f32 0.2, %v2768_v56 }
 0x42f   :  { %10435 = vpow2.f32 %v2382_v10  ;;  %v2361_v37 = vsub.f32 %v12833_v52, %v2339_v8  ;;  %v2744_v58 = vpop.permute.xlu0 %2743  ;;  %v2362_v52 = vsub.f32 %v12739_v46, %v2341_v17  ;;  %v13033_v10 = vadd.f32 %v2814_v26, %v16592_v53  ;;  %v16593_v17 = vld [vmem:[#allocation43_spill] sm:$0xff] }
 0x430   :  { %10437 = vpow2.f32 %v2384_v3  ;;  %v2769_v16 = vadd.f32 %v12861_v28, %v2744_v58  ;;  %v2816_v24 = vsel %vm2784_vm6, %v2768_v56, %v2800_v57  ;;  %v16596_v56 = vld [vmem:[#allocation47_spill] sm:$0xff] }
 0x431   :  { %v13012_v51 = vpop.eup %10429  ;;  %v2386_v8 = vmul.f32 1.442695, %v2361_v37  ;;  %v2388_v3 = vmul.f32 1.442695, %v2362_v52  ;;  %v13043_v37 = vadd.f32 %v2815_v60, %v16593_v17 }
 0x432   :  { %v2343_v25 = vpop.xlane.xlu1 %2342  ;;  %2853 = vmax.xlane.f32.xlu1 %v13015_v21  ;;  %2408 = vadd.xlane.f32.xlu0 %v13012_v51  ;;  %v2801_v58 = vmul.f32 0.2, %v2769_v16  ;;  %vm2785_vm7 = vcmp.gt.f32.partialorder %v2769_v16, 0.0 }
 0x433   :  { %v2363_v13 = vsub.f32 %v12845_v20, %v2343_v25  ;;  %10439 = vpow2.f32 %v2386_v8  ;;  %v2365_v25 = vsub.f32 %v12765_v49, %v2347_v15 }
 0x434   :  { %10441 = vpow2.f32 %v2388_v3  ;;  %v2817_v17 = vsel %vm2785_vm7, %v2769_v16, %v2801_v58 }
 0x435   :  { %v13022_v63 = vpop.eup %10431  ;;  %v2390_v20 = vmul.f32 1.442695, %v2363_v13 }
 0x436   :  { %v2345_v14 = vpop.xlane.xlu1 %2344  ;;  %2855 = vmax.xlane.f32.xlu0 %v13025_v32  ;;  %2410 = vadd.xlane.f32.xlu1 %v13022_v63  ;;  %v13035_v1 = vpop.eup %10433 }
 0x437   :  { %v2364_v46 = vsub.f32 %v12855_v36, %v2345_v14  ;;  %v16594_v36 = vld [vmem:[#allocation41_spill] sm:$0xff]  ;;  %10443 = vpow2.f32 %v2390_v20 }
 0x438   :  { %v13052_v14 = vadd.f32 %v2816_v24, %v16594_v36 }
 0x439   :  { %v13045_v26 = vpop.eup %10435  ;;  %v2392_v52 = vmul.f32 1.442695, %v2364_v46 }
 0x43a   :  { %2412 = vadd.xlane.f32.xlu0 %v13035_v1  ;;  %2857 = vmax.xlane.f32.xlu1 %v13033_v10  ;;  %v2749_v11 = vpop.permute.xlu1 %2748  ;;  %v13054_v8 = vpop.eup %10437 }
 0x43b   :  { %v2770_v59 = vadd.f32 %v12861_v28, %v2749_v11  ;;  %v2394_v28 = vmul.f32 1.442695, %v2365_v25  ;;  %10445 = vpow2.f32 %v2392_v52  ;;  %v16595_v11 = vld [vmem:[#allocation48_spill] sm:$0xff] }
 0x43c   :  { %v13059_v57 = vadd.f32 %v2817_v17, %v16595_v11 }
 0x43d   :  { %v2802_v60 = vmul.f32 0.2, %v2770_v59  ;;  %vm2786_vm8 = vcmp.gt.f32.partialorder %v2770_v59, 0.0  ;;  %v13061_v49 = vpop.eup %10439  ;;  %10447 = vpow2.f32 %v2394_v28 }
 0x43e   :  { %2859 = vmax.xlane.f32.xlu0 %v13043_v37  ;;  %2414 = vadd.xlane.f32.xlu1 %v13045_v26  ;;  %v13068_v13 = vpop.eup %10441 }
 0x43f   :  { %v2818_v15 = vsel %vm2786_vm8, %v2770_v59, %v2802_v60 }
 0x440   :  { %v13066_v16 = vadd.f32 %v2818_v15, %v16596_v56 }
 0x441   :  { %v13072_v3 = vpop.eup %10443 }
 0x442   :  { %2416 = vadd.xlane.f32.xlu0 %v13054_v8  ;;  %2861 = vmax.xlane.f32.xlu1 %v13052_v14 }
 0x445   :  { %v13074_v46 = vpop.eup %10445 }
 0x446   :  { %2863 = vmax.xlane.f32.xlu0 %v13059_v57  ;;  %2418 = vadd.xlane.f32.xlu1 %v13061_v49 }
 0x447   :  { %v13078_v17 = vpop.eup %10447 }
 0x44a   :  { %2420 = vadd.xlane.f32.xlu0 %v13068_v13  ;;  %2865 = vmax.xlane.f32.xlu1 %v13066_v16 }
 0x44e   :  { %2424 = vadd.xlane.f32.xlu0 %v13074_v46  ;;  %2422 = vadd.xlane.f32.xlu1 %v13072_v3 }
 0x452   :  { %2426 = vadd.xlane.f32.xlu1 %v13078_v17 }
 0x453   :  { %v2351_v58 = vpop.xlane.xlu0 %2350 }
 0x454   :  { %v2367_v59 = vsub.f32 %v12877_v54, %v2351_v58 }
 0x456   :  { %v2398_v24 = vmul.f32 1.442695, %v2367_v59 }
 0x457   :  { %v2836_v25 = vpop.xlane.xlu0 %2835 }
 0x458   :  { %10449 = vpow2.f32 %v2398_v24  ;;  %v2867_v60 = vsub.f32 %v12888_v38, %v2836_v25 }
 0x45a   :  { %v2883_v56 = vmul.f32 1.442695, %v2867_v60 }
 0x45b   :  { %v2840_v52 = vpop.xlane.xlu0 %2839 }
 0x45c   :  { %v2869_v36 = vsub.f32 %v12898_v55, %v2840_v52 }
 0x45e   :  { %v2887_v59 = vmul.f32 1.442695, %v2869_v36 }
 0x45f   :  { %v2844_v41 = vpop.xlane.xlu0 %2843 }
 0x460   :  { %v2871_v24 = vsub.f32 %v12905_v44, %v2844_v41 }
 0x462   :  { %v13082_v20 = vpop.eup %10449 }
 0x463   :  { %2430 = vadd.xlane.f32.xlu1 %v13082_v20 }
 0x46b   :  { %v2349_v28 = vpop.xlane.xlu1 %2348 }
 0x46c   :  { %v2366_v15 = vsub.f32 %v12923_v23, %v2349_v28  ;;  %v2891_v23 = vmul.f32 1.442695, %v2871_v24 }
 0x46e   :  { %v2396_v11 = vmul.f32 1.442695, %v2366_v15 }
 0x46f   :  { %v2838_v53 = vpop.xlane.xlu1 %2837 }
 0x470   :  { %10451 = vpow2.f32 %v2396_v11  ;;  %v2868_v54 = vsub.f32 %v12934_v7, %v2838_v53 }
 0x471   :  { %10453 = vpow2.f32 %v2883_v56 }
 0x472   :  { %v2885_v58 = vmul.f32 1.442695, %v2868_v54 }
 0x473   :  { %v2842_v29 = vpop.xlane.xlu1 %2841 }
 0x474   :  { %10455 = vpow2.f32 %v2885_v58  ;;  %v2870_v38 = vsub.f32 %v12944_v9, %v2842_v29 }
 0x475   :  { %10457 = vpow2.f32 %v2887_v59 }
 0x476   :  { %v2889_v25 = vmul.f32 1.442695, %v2870_v38 }
 0x477   :  { %v2846_v60 = vpop.xlane.xlu1 %2845 }
 0x478   :  { %10459 = vpow2.f32 %v2889_v25  ;;  %v2872_v55 = vsub.f32 %v12951_v48, %v2846_v60 }
 0x479   :  { %10461 = vpow2.f32 %v2891_v23 }
 0x47a   :  { %v13092_v52 = vpop.eup %10451  ;;  %v2893_v11 = vmul.f32 1.442695, %v2872_v55 }
 0x47b   :  { %2428 = vadd.xlane.f32.xlu0 %v13092_v52  ;;  %v13095_v7 = vpop.eup %10453 }
 0x47c   :  { %10463 = vpow2.f32 %v2893_v11 }
 0x47e   :  { %v13097_v41 = vpop.eup %10455 }
 0x47f   :  { %2915 = vadd.xlane.f32.xlu0 %v13095_v7  ;;  %2917 = vadd.xlane.f32.xlu1 %v13097_v41  ;;  %v13101_v29 = vpop.eup %10457 }
 0x482   :  { %v13103_v44 = vpop.eup %10459 }
 0x483   :  { %2919 = vadd.xlane.f32.xlu0 %v13101_v29  ;;  %2921 = vadd.xlane.f32.xlu1 %v13103_v44  ;;  %v13107_v9 = vpop.eup %10461 }
 0x486   :  { %v13109_v48 = vpop.eup %10463 }
 0x487   :  { %2923 = vadd.xlane.f32.xlu0 %v13107_v9  ;;  %2925 = vadd.xlane.f32.xlu1 %v13109_v48 }
 0x4af   :  { %v2401_v53 = vpop.xlane.xlu0 %2400 }
 0x4b0   :  { %10465 = vrcp.f32 %v2401_v53 }
 0x4b3   :  { %v2848_v36 = vpop.xlane.xlu0 %2847  ;;  %v2403_v56 = vpop.xlane.xlu1 %2402 }
 0x4b4   :  { %v2873_v28 = vsub.f32 %v12981_v33, %v2848_v36  ;;  %10467 = vrcp.f32 %v2403_v56 }
 0x4b6   :  { %v2895_v15 = vmul.f32 1.442695, %v2873_v28 }
 0x4b7   :  { %v2405_v54 = vpop.xlane.xlu0 %2404  ;;  %v2850_v58 = vpop.xlane.xlu1 %2849 }
 0x4b8   :  { %10469 = vpow2.f32 %v2895_v15  ;;  %v2874_v59 = vsub.f32 %v12994_v31, %v2850_v58 }
 0x4b9   :  { %10471 = vrcp.f32 %v2405_v54 }
 0x4ba   :  { %v2897_v24 = vmul.f32 1.442695, %v2874_v59  ;;  %v10466_v23 = vpop.eup %10465 }
 0x4bb   :  { %v2852_v38 = vpop.xlane.xlu0 %2851  ;;  %v2407_v25 = vpop.xlane.xlu1 %2406  ;;  %v2448_v36 = vmul.f32 %v10466_v23, %v12969_v5  ;;  %v16597_v23 = vld [vmem:[#allocation97_spill] sm:$0xff] }
 0x4bc   :  { %10473 = vpow2.f32 %v2897_v24  ;;  %v2875_v60 = vsub.f32 %v13003_v34, %v2852_v38 }
 0x4bd   :  { %10475 = vrcp.f32 %v2407_v25 }
 0x4be   :  { %v10468_v55 = vpop.eup %10467  ;;  %v2899_v11 = vmul.f32 1.442695, %v2875_v60 }
 0x4bf   :  { %v2409_v53 = vpop.xlane.xlu0 %2408  ;;  %v2854_v33 = vpop.xlane.xlu1 %2853  ;;  %v2449_v56 = vmul.f32 %v10468_v55, %v12983_v27  ;;  %v16598_v55 = vld [vmem:[#allocation99_spill] sm:$0xff] }
 0x4c0   :  { %10477 = vpow2.f32 %v2899_v11  ;;  %v2876_v31 = vsub.f32 %v13015_v21, %v2854_v33 }
 0x4c1   :  { %v2464_v28 = vpack.c.bf16 %v2449_v56, %v2448_v36  ;;  %10479 = vrcp.f32 %v2409_v53 }
 0x4c2   :  { %v13119_v15 = vpop.eup %10469  ;;  %v2901_v54 = vmul.f32 1.442695, %v2876_v31  ;;  %v16599_v31 = vld [vmem:[#allocation98_spill] sm:$0xff] }
 0x4c3   :  { %v2856_v58 = vpop.xlane.xlu0 %2855  ;;  %2927 = vadd.xlane.f32.xlu0 %v13119_v15  ;;  %2521 = vmatmul.mubr.bf16.vlgmr.msra.gmra.mrb[100].mxu1 %v2464_v28  ;;  %v2411_v34 = vpop.xlane.xlu1 %2410  ;;  %v16600_v28 = vld [vmem:[#allocation101_spill] sm:$0xff] }
 0x4c4   :  { %10481 = vpow2.f32 %v2901_v54  ;;  %v2877_v59 = vsub.f32 %v13025_v32, %v2856_v58  ;;  %3004 = vmatpush1.bf16.msra.mxu1 %v12542_v43  ;;  %2530 = vmatprep.mubr.bf16.mxu1 %v16505_v50  ;;  %v10472_v5 = vpop.eup %10471 }
 0x4c5   :  { %10483 = vrcp.f32 %v2411_v34  ;;  %3005 = vmatprep.subr.bf16.mxu1 %v12556_v2  ;;  %v2450_v43 = vmul.f32 %v10472_v5, %v12996_v62 }
 0x4c6   :  { %v13126_v27 = vpop.eup %10473  ;;  %v2903_v21 = vmul.f32 1.442695, %v2877_v59 }
 0x4c7   :  { %v10476_v24 = vpop.eup %10475  ;;  %v2413_v38 = vpop.xlane.xlu0 %2412  ;;  %2929 = vadd.xlane.f32.xlu1 %v13126_v27 }
 0x4c8   :  { %v2858_v25 = vpop.xlane.xlu1 %2857  ;;  %10485 = vpow2.f32 %v2903_v21  ;;  %3006 = vmatpush1.bf16.msra.mxu1 %v16597_v23  ;;  %v2451_v60 = vmul.f32 %v10476_v24, %v13005_v22  ;;  %v16601_v21 = vld [vmem:[#allocation100_spill] sm:$0xff] }
 0x4c9   :  { %v2878_v32 = vsub.f32 %v13033_v10, %v2858_v25  ;;  %3007 = vmatprep.subr.bf16.mxu1 %v16598_v55  ;;  %10487 = vrcp.f32 %v2413_v38  ;;  %v16602_v25 = vld [vmem:[#allocation103_spill] sm:$0xff] }
 0x4ca   :  { %v13134_v2 = vpop.eup %10477  ;;  %v2465_v53 = vpack.c.bf16 %v2451_v60, %v2450_v43  ;;  %v16603_v60 = vld [vmem:[#allocation102_spill] sm:$0xff] }
 0x4cb   :  { %v2905_v11 = vmul.f32 1.442695, %v2878_v32  ;;  %v2860_v33 = vpop.xlane.xlu0 %2859  ;;  %2931 = vadd.xlane.f32.xlu0 %v13134_v2  ;;  %v10480_v10 = vpop.eup %10479 }
 0x4cc   :  { %v2415_v36 = vpop.xlane.xlu1 %2414  ;;  %v2879_v56 = vsub.f32 %v13043_v37, %v2860_v33  ;;  %2531 = vmatmul.mubr.bf16.gmra.mrb[104].mxu1 %v2465_v53  ;;  %v2452_v59 = vmul.f32 %v10480_v10, %v13012_v51 }
 0x4cd   :  { %10489 = vpow2.f32 %v2905_v11  ;;  %3008 = vmatpush1.bf16.msra.mxu1 %v16599_v31  ;;  %2540 = vmatprep.mubr.bf16.mxu1 %v16505_v50  ;;  %v16604_v11 = vld [vmem:[#allocation105_spill] sm:$0xff]  ;;  %v16605_v31 = vld [vmem:[#allocation104_spill] sm:$0xff] }
 0x4ce   :  { %10491 = vrcp.f32 %v2415_v36  ;;  %v13140_v62 = vpop.eup %10481  ;;  %v2907_v22 = vmul.f32 1.442695, %v2879_v56  ;;  %3009 = vmatprep.subr.bf16.mxu1 %v16600_v28 }
 0x4cf   :  { %v10484_v54 = vpop.eup %10483  ;;  %v2417_v58 = vpop.xlane.xlu0 %2416  ;;  %2933 = vadd.xlane.f32.xlu1 %v13140_v62 }
 0x4d0   :  { %v2862_v34 = vpop.xlane.xlu1 %2861  ;;  %10493 = vpow2.f32 %v2907_v22  ;;  %v2453_v5 = vmul.f32 %v10484_v54, %v13022_v63  ;;  %v16606_v54 = vld [vmem:[#allocation107_spill] sm:$0xff] }
 0x4d1   :  { %v2880_v37 = vsub.f32 %v13052_v14, %v2862_v34  ;;  %3010 = vmatpush1.bf16.msra.mxu1 %v16601_v21  ;;  %10495 = vrcp.f32 %v2417_v58 }
 0x4d2   :  { %v13148_v24 = vpop.eup %10485  ;;  %3011 = vmatprep.subr.bf16.mxu1 %v16602_v25  ;;  %v2466_v23 = vpack.c.bf16 %v2453_v5, %v2452_v59 }
 0x4d3   :  { %v2909_v38 = vmul.f32 1.442695, %v2880_v37  ;;  %v2864_v32 = vpop.xlane.xlu0 %2863  ;;  %2935 = vadd.xlane.f32.xlu0 %v13148_v24  ;;  %v10488_v51 = vpop.eup %10487 }
 0x4d4   :  { %v2419_v43 = vpop.xlane.xlu1 %2418  ;;  %v2881_v14 = vsub.f32 %v13059_v57, %v2864_v32  ;;  %2541 = vmatmul.mubr.bf16.gmra.mrb[108].mxu1 %v2466_v23  ;;  %v2454_v56 = vmul.f32 %v10488_v51, %v13035_v1  ;;  %v16609_v23 = vld [vmem:[#allocation108_spill] sm:$0xff] }
 0x4d5   :  { %10497 = vpow2.f32 %v2909_v38  ;;  %3012 = vmatpush1.bf16.msra.mxu1 %v16603_v60  ;;  %2550 = vmatprep.mubr.bf16.mxu1 %v16505_v50  ;;  %v10277_v32 = vld [vmem:[#allocation2] ss:$12 sps:$4 sm:$0xff]  }
 0x4d6   :  { %10499 = vrcp.f32 %v2419_v43  ;;  %v2911_v55 = vmul.f32 1.442695, %v2881_v14  ;;  %3013 = vmatprep.subr.bf16.mxu1 %v16604_v11  ;;  %v10279_v43 = vld [vmem:[#allocation2 + $0x4] ss:$12 sps:$4 sm:$0xff]  }
 0x4d7   :  { %v13155_v63 = vpop.eup %10489  ;;  %v2421_v36 = vpop.xlane.xlu0 %2420  ;;  %3668 = vmatprep.subr.bf16.mxu0 %v10279_v43  ;;  %v10308_v43 = vld [vmem:[#allocation2 + $0xdc] ss:$12 sps:$4 sm:$0xff]  }
 0x4d8   :  { %v10492_v53 = vpop.eup %10491  ;;  %2937 = vadd.xlane.f32.xlu1 %v13155_v63  ;;  %v2866_v33 = vpop.xlane.xlu1 %2865  ;;  %10501 = vpow2.f32 %v2911_v55  ;;  %3669 = vmatpush1.bf16.msra.mxu0 %v10277_v32  ;;  %v10306_v32 = vld [vmem:[#allocation2 + $0xd8] ss:$12 sps:$4 sm:$0xff]  }
 0x4d9   :  { %v2882_v57 = vsub.f32 %v13066_v16, %v2866_v33  ;;  %v2455_v10 = vmul.f32 %v10492_v53, %v13045_v26  ;;  %3014 = vmatpush1.bf16.msra.mxu1 %v16605_v31  ;;  %10503 = vrcp.f32 %v2421_v36  ;;  %v16607_v16 = vld [vmem:[#allocation106_spill] sm:$0xff]  ;;  %v16608_v26 = vld [vmem:[#allocation109_spill] sm:$0xff] }
 0x4da   :  { %v13163_v22 = vpop.eup %10493  ;;  %3015 = vmatprep.subr.bf16.mxu1 %v16606_v54  ;;  %v10283_v36 = vld [vmem:[#allocation2 + $0x30] ss:$12 sps:$4 sm:$0xff]   ;;  %v10286_v31 = vld [vmem:[#allocation2 + $0x48] ss:$12 sps:$4 sm:$0xff]  }
 0x4db   :  { %v2913_v28 = vmul.f32 1.442695, %v2882_v57  ;;  %v2467_v58 = vpack.c.bf16 %v2455_v10, %v2454_v56  ;;  %2939 = vadd.xlane.f32.xlu0 %v13163_v22  ;;  %v10496_v37 = vpop.eup %10495  ;;  %v2425_v25 = vpop.xlane.xlu0 %2424  ;;  %v10285_v57 = vld [vmem:[#allocation2 + $0x34] ss:$12 sps:$4 sm:$0xff]  }
 0x4dc   :  { %v2423_v34 = vpop.xlane.xlu1 %2422  ;;  %v2456_v21 = vmul.f32 %v10496_v37, %v13054_v8  ;;  %v10280_v8 = vld [vmem:[#allocation2 + $0x18] ss:$12 sps:$4 sm:$0xff]  }
 0x4dd   :  { %10505 = vpow2.f32 %v2913_v28  ;;  %2551 = vmatmul.mubr.bf16.gmra.mrb[112].mxu1 %v2467_v58  ;;  %v10288_v28 = vld [vmem:[#allocation2 + $0x4c] ss:$12 sps:$4 sm:$0xff]  }
 0x4de   :  { %3016 = vmatpush1.bf16.msra.mxu1 %v16607_v16  ;;  %2560 = vmatprep.mubr.bf16.mxu1 %v16505_v50  ;;  %10507 = vrcp.f32 %v2423_v34  ;;  %v10289_v34 = vld [vmem:[#allocation2 + $0x60] ss:$12 sps:$4 sm:$0xff]   ;;  %v10292_v16 = vld [vmem:[#allocation2 + $0x78] ss:$12 sps:$4 sm:$0xff]  }
 0x4df   :  { %v13169_v1 = vpop.eup %10497  ;;  %3017 = vmatprep.subr.bf16.mxu1 %v16608_v26  ;;  %v10294_v26 = vld [vmem:[#allocation2 + $0x7c] ss:$12 sps:$4 sm:$0xff]  }
 0x4e0   :  { %v10500_v59 = vpop.eup %10499  ;;  %2941 = vadd.xlane.f32.xlu1 %v13169_v1  ;;  %v2427_v5 = vpop.xlane.xlu1 %2426 }
 0x4e1   :  { %v2457_v38 = vmul.f32 %v10500_v59, %v13061_v49  ;;  %10509 = vrcp.f32 %v2427_v5  ;;  %v10282_v49 = vld [vmem:[#allocation2 + $0x1c] ss:$12 sps:$4 sm:$0xff]   ;;  %v10297_v59 = vld [vmem:[#allocation2 + $0x94] ss:$12 sps:$4 sm:$0xff]  }
 0x4e2   :  { %3018 = vmatpush1.bf16.msra.mxu1 %v16609_v23  ;;  %v13176_v14 = vpop.eup %10501  ;;  %10511 = vrcp.f32 %v2425_v25  ;;  %3670 = vmatprep.subr.bf16.mxu0 %v10282_v49  ;;  %v10295_v5 = vld [vmem:[#allocation2 + $0x90] ss:$12 sps:$4 sm:$0xff]   ;;  %v10301_v25 = vld [vmem:[#allocation2 + $0xc0] ss:$12 sps:$4 sm:$0xff]  }
 0x4e3   :  { %v2468_v51 = vpack.c.bf16 %v2457_v38, %v2456_v21  ;;  %2943 = vadd.xlane.f32.xlu0 %v13176_v14  ;;  %v10504_v60 = vpop.eup %10503  ;;  %3671 = vmatpush1.bf16.msra.mxu0 %v10280_v8  ;;  %v10300_v21 = vld [vmem:[#allocation2 + $0xac] ss:$12 sps:$4 sm:$0xff]   ;;  %v10303_v38 = vld [vmem:[#allocation2 + $0xc4] ss:$12 sps:$4 sm:$0xff]  }
 0x4e4   :  { %v2458_v53 = vmul.f32 %v10504_v60, %v13068_v13  ;;  %3672 = vmatprep.subr.bf16.mxu0 %v10285_v57  ;;  %v10311_v8 = vld [vmem:[#allocation2 + $0xf0] ss:$12 sps:$4 sm:$0xff]   ;;  %v10318_v49 = vld [vmem:[#allocation2 + $0x10c] ss:$12 sps:$4 sm:$0xff]  }
 0x4e5   :  { %2561 = vmatmul.mubr.bf16.gmra.mrb[116].mxu1 %v2468_v51  ;;  %v10313_v51 = vld [vmem:[#allocation2 + $0xf4] ss:$12 sps:$4 sm:$0xff]  }
 0x4e6   :  { %2570 = vmatprep.mubr.bf16.mxu1 %v16505_v50 }
 0x4e7   :  { %v13180_v55 = vpop.eup %10505  ;;  %3673 = vmatpush1.bf16.msra.mxu0 %v10283_v36  ;;  %v10323_v36 = vld [vmem:[#allocation2 + $0x124] ss:$12 sps:$4 sm:$0xff]  }
 0x4e8   :  { %2945 = vadd.xlane.f32.xlu1 %v13180_v55  ;;  %v10508_v11 = vpop.eup %10507  ;;  %3674 = vmatprep.subr.bf16.mxu0 %v10288_v28 }
 0x4e9   :  { %v2459_v33 = vmul.f32 %v10508_v11, %v13072_v3  ;;  %v10291_v3 = vld [vmem:[#allocation2 + $0x64] ss:$12 sps:$4 sm:$0xff]  }
 0x4eb   :  { %v2469_v56 = vpack.c.bf16 %v2459_v33, %v2458_v53  ;;  %v10510_v10 = vpop.eup %10509  ;;  %3675 = vmatpush1.bf16.msra.mxu0 %v10286_v31  ;;  %v10316_v33 = vld [vmem:[#allocation2 + $0x108] ss:$12 sps:$4 sm:$0xff]  }
 0x4ec   :  { %v10512_v54 = vpop.eup %10511  ;;  %v2461_v58 = vmul.f32 %v10510_v10, %v13078_v17  ;;  %3676 = vmatprep.subr.bf16.mxu0 %v10291_v3  ;;  %v10298_v17 = vld [vmem:[#allocation2 + $0xa8] ss:$12 sps:$4 sm:$0xff]   ;;  %v10321_v10 = vld [vmem:[#allocation2 + $0x120] ss:$12 sps:$4 sm:$0xff]  }
 0x4ed   :  { %2571 = vmatmul.mubr.bf16.gmra.mrb[120].mxu1 %v2469_v56  ;;  %v2460_v13 = vmul.f32 %v10512_v54, %v13074_v46  ;;  %v10304_v46 = vld [vmem:[#allocation2 + $0xc8] ss:$12 sps:$4 sm:$0xff]  }
 0x4ee   :  { %2580 = vmatprep.mubr.bf16.mxu1 %v16505_v50  ;;  %9079 = vmatprep.subr.bf16.mxu1 %v10304_v46  ;;  %v10333_v46 = vld [vmem:[#allocation2 + $0x154] ss:$12 sps:$4 sm:$0xff]  }
 0x4ef   :  { %v2470_v37 = vpack.c.bf16 %v2461_v58, %v2460_v13  ;;  %3677 = vmatpush1.bf16.msra.mxu0 %v10289_v34 }
 0x4f0   :  { %3678 = vmatprep.subr.bf16.mxu0 %v10294_v26  ;;  %v2431_v23 = vpop.xlane.xlu1 %2430 }
 0x4f1   :  { %10513 = vrcp.f32 %v2431_v23  ;;  %v10331_v23 = vld [vmem:[#allocation2 + $0x150] ss:$12 sps:$4 sm:$0xff]  }
 0x4f3   :  { %3679 = vmatpush1.bf16.msra.mxu0 %v10292_v16 }
 0x4f4   :  { %3680 = vmatprep.subr.bf16.mxu0 %v10297_v59 }
 0x4f5   :  { %2581 = vmatmul.mubr.bf16.gmra.mrb[124].mxu1 %v2470_v37 }
 0x4f6   :  { %2590 = vmatprep.mubr.bf16.mxu1 %v16505_v50 }
 0x4f7   :  { %3681 = vmatpush1.bf16.msra.mxu0 %v10295_v5  ;;  %v10326_v5 = vld [vmem:[#allocation2 + $0x138] ss:$12 sps:$4 sm:$0xff]  }
 0x4f8   :  { %3682 = vmatprep.subr.bf16.mxu0 %v10300_v21 }
 0x4fb   :  { %3683 = vmatpush1.bf16.msra.mxu0 %v10298_v17  ;;  %v10514_v57 = vpop.eup %10513  ;;  %v10328_v17 = vld [vmem:[#allocation2 + $0x13c] ss:$12 sps:$4 sm:$0xff]  }
 0x4fc   :  { %3684 = vmatprep.subr.bf16.mxu0 %v10303_v38  ;;  %v2463_v58 = vmul.f32 %v10514_v57, %v13082_v20  ;;  %v10309_v38 = vld [vmem:[#allocation2 + $0xe0] ss:$12 sps:$4 sm:$0xff]   ;;  %v10324_v57 = vld [vmem:[#allocation2 + $0x128] ss:$12 sps:$4 sm:$0xff]  }
 0x4ff   :  { %3685 = vmatpush1.bf16.msra.mxu0 %v10301_v25 }
 0x500   :  { %3686 = vmatprep.subr.bf16.mxu0 %v10308_v43  ;;  %v10314_v43 = vld [vmem:[#allocation2 + $0xf8] ss:$12 sps:$4 sm:$0xff]  }
 0x503   :  { %3687 = vmatpush1.bf16.msra.mxu0 %v10306_v32 }
 0x504   :  { %3688 = vmatprep.subr.bf16.mxu0 %v10313_v51  ;;  %v10336_v51 = vld [vmem:[#allocation2 + $0x168] ss:$12 sps:$4 sm:$0xff]  }
 0x507   :  { %3689 = vmatpush1.bf16.msra.mxu0 %v10311_v8  ;;  %v10315_v8 = vld [vmem:[#allocation2 + $0x38] ss:$12 sps:$4 sm:$0xff]  }
 0x508   :  { %v2429_v60 = vpop.xlane.xlu0 %2428  ;;  %3690 = vmatprep.subr.bf16.mxu0 %v10318_v49 }
 0x509   :  { %10515 = vrcp.f32 %v2429_v60  ;;  %v10338_v60 = vld [vmem:[#allocation2 + $0x16c] ss:$12 sps:$4 sm:$0xff]  }
 0x50b   :  { %3691 = vmatpush1.bf16.msra.mxu0 %v10316_v33 }
 0x50c   :  { %v2916_v11 = vpop.xlane.xlu0 %2915  ;;  %v2918_v53 = vpop.xlane.xlu1 %2917  ;;  %3692 = vmatprep.subr.bf16.mxu0 %v10323_v36 }
 0x50d   :  { %10517 = vrcp.f32 %v2916_v11 }
 0x50e   :  { %10519 = vrcp.f32 %v2918_v53  ;;  %v10319_v53 = vld [vmem:[#allocation2 + $0x110] ss:$12 sps:$4 sm:$0xff]  }
 0x50f   :  { %3693 = vmatpush1.bf16.msra.mxu0 %v10321_v10 }
 0x510   :  { %v2920_v56 = vpop.xlane.xlu0 %2919  ;;  %v2922_v31 = vpop.xlane.xlu1 %2921  ;;  %3694 = vmatprep.subr.bf16.mxu0 %v10328_v17 }
 0x511   :  { %10521 = vrcp.f32 %v2920_v56  ;;  %v10325_v56 = vld [vmem:[#allocation2 + $0x68] ss:$12 sps:$4 sm:$0xff]  }
 0x512   :  { %10523 = vrcp.f32 %v2922_v31  ;;  %v10329_v31 = vld [vmem:[#allocation2 + $0x140] ss:$12 sps:$4 sm:$0xff]  }
 0x513   :  { %v10516_v28 = vpop.eup %10515  ;;  %3695 = vmatpush1.bf16.msra.mxu0 %v10326_v5 }
 0x514   :  { %v2462_v54 = vmul.f32 %v10516_v28, %v13092_v52  ;;  %v2924_v37 = vpop.xlane.xlu0 %2923  ;;  %v2926_v59 = vpop.xlane.xlu1 %2925  ;;  %v10305_v52 = vld [vmem:[#allocation2 + $0x8] ss:$12 sps:$4 sm:$0xff]   ;;  %3696 = vmatprep.subr.bf16.mxu0 %v10333_v46  ;;  %v10330_v28 = vld [vmem:[#allocation2 + $0x80] ss:$12 sps:$4 sm:$0xff]  }
 0x515   :  { %10525 = vrcp.f32 %v2924_v37 }
 0x516   :  { %v2471_v13 = vpack.c.bf16 %v2463_v58, %v2462_v54  ;;  %10527 = vrcp.f32 %v2926_v59  ;;  %v10334_v54 = vld [vmem:[#allocation2 + $0x158] ss:$12 sps:$4 sm:$0xff]  }
 0x517   :  { %v10518_v34 = vpop.eup %10517  ;;  %3697 = vmatpush1.bf16.msra.mxu0 %v10331_v23  ;;  %v10335_v58 = vld [vmem:[#allocation2 + $0x98] ss:$12 sps:$4 sm:$0xff]  }
 0x518   :  { %v10520_v3 = vpop.eup %10519  ;;  %2591 = vmatmul.mubr.bf16.gmra.mrb[128].mxu1 %v2471_v13  ;;  %v2963_v16 = vmul.f32 %v10518_v34, %v13095_v7  ;;  %v10310_v7 = vld [vmem:[#allocation2 + $0x20] ss:$12 sps:$4 sm:$0xff]   ;;  %3698 = vmatprep.subr.bf16.mxu0 %v10338_v60 }
 0x519   :  { %3035 = vmatprep.mubr.bf16.mxu1 %v16505_v50  ;;  %v2964_v26 = vmul.f32 %v10520_v3, %v13097_v41 }
 0x51b   :  { %v10522_v20 = vpop.eup %10521  ;;  %v2979_v21 = vpack.c.bf16 %v2964_v26, %v2963_v16  ;;  %3699 = vmatpush1.bf16.msra.mxu0 %v10336_v51 }
 0x51c   :  { %v10524_v25 = vpop.eup %10523  ;;  %v2965_v41 = vmul.f32 %v10522_v20, %v13101_v29  ;;  %v10320_v29 = vld [vmem:[#allocation2 + $0x50] ss:$12 sps:$4 sm:$0xff]  }
 0x51d   :  { %v2966_v32 = vmul.f32 %v10524_v25, %v13103_v44 }
 0x51f   :  { %v10526_v49 = vpop.eup %10525  ;;  %v2980_v11 = vpack.c.bf16 %v2966_v32, %v2965_v41 }
 0x520   :  { %3036 = vmatmul.mubr.bf16.vlgmr.msra.gmra.mrb[132].mxu1 %v2979_v21  ;;  %v10528_v33 = vpop.eup %10527  ;;  %v2967_v44 = vmul.f32 %v10526_v49, %v13107_v9  ;;  %v10339_v9 = vld [vmem:[#allocation2 + $0x170] ss:$12 sps:$4 sm:$0xff]  }
 0x521   :  { %3045 = vmatprep.mubr.bf16.mxu1 %v16505_v50  ;;  %9080 = vmatpush3.bf16.msra.mxu1 %v10305_v52  ;;  %v2968_v36 = vmul.f32 %v10528_v33, %v13109_v48  ;;  %v10340_v48 = vld [vmem:[#allocation2 + $0xb0] ss:$12 sps:$4 sm:$0xff]  }
 0x522   :  { %9081 = vmatprep.subr.bf16.mxu1 %v10309_v38 }
 0x523   :  { %v2981_v10 = vpack.c.bf16 %v2968_v36, %v2967_v44  ;;  %v16610_v36 = vld [vmem:[#allocation8_spill] sm:$0xff] }
 0x525   :  { %9082 = vmatpush3.bf16.msra.mxu1 %v10310_v7 }
 0x526   :  { %9083 = vmatprep.subr.bf16.mxu1 %v10314_v43 }
 0x528   :  { %3046 = vmatmul.mubr.bf16.gmra.mrb[136].mxu1 %v2980_v11 }
 0x529   :  { %3055 = vmatprep.mubr.bf16.mxu1 %v16505_v50  ;;  %9084 = vmatpush3.bf16.msra.mxu1 %v10315_v8 }
 0x52a   :  { %9085 = vmatprep.subr.bf16.mxu1 %v10319_v53 }
 0x52d   :  { %9086 = vmatpush3.bf16.msra.mxu1 %v10320_v29 }
 0x52e   :  { %9087 = vmatprep.subr.bf16.mxu1 %v10324_v57  ;;  %v3118_v57 = vsub.s32 2, %v16610_v36 }
 0x530   :  { %3056 = vmatmul.mubr.bf16.gmra.mrb[140].mxu1 %v2981_v10 }
 0x531   :  { %3065 = vmatprep.mubr.bf16.mxu1 %v16505_v50  ;;  %9088 = vmatpush3.bf16.msra.mxu1 %v10325_v56  ;;  %v13227_v56 = vld [vmem:[%s15923_s2 + $0x8] sm:$0xff] }
 0x532   :  { %9089 = vmatprep.subr.bf16.mxu1 %v10329_v31 }
 0x535   :  { %9090 = vmatpush3.bf16.msra.mxu1 %v10330_v28 }
 0x536   :  { %9091 = vmatprep.subr.bf16.mxu1 %v10334_v54 }
 0x539   :  { %9092 = vmatpush3.bf16.msra.mxu1 %v10335_v58 }
 0x53a   :  { %9093 = vmatprep.subr.bf16.mxu1 %v10339_v9 }
 0x53d   :  { %9094 = vmatpush3.bf16.msra.mxu1 %v10340_v48  ;;  %v16611_v48 = vld [vmem:[#allocation17_spill] sm:$0xff] }
 0x550   :  { %v2928_v13 = vpop.xlane.xlu0 %2927 }
 0x551   :  { %10529 = vrcp.f32 %v2928_v13  ;;  %v16612_v13 = vmax.f32 %v16611_v48, 0.0 }
 0x554   :  { %v2930_v34 = vpop.xlane.xlu1 %2929 }
 0x555   :  { %10531 = vrcp.f32 %v2930_v34 }
 0x558   :  { %v2932_v3 = vpop.xlane.xlu0 %2931 }
 0x559   :  { %10533 = vrcp.f32 %v2932_v3 }
 0x55b   :  { %v10530_v16 = vpop.eup %10529 }
 0x55c   :  { %v2934_v37 = vpop.xlane.xlu1 %2933  ;;  %v2969_v5 = vmul.f32 %v10530_v16, %v13119_v15 }
 0x55d   :  { %10535 = vrcp.f32 %v2934_v37  ;;  %v16614_v37 = vld [vmem:[#allocation18_spill] sm:$0xff] }
 0x55e   :  { %v16615_v16 = vmax.f32 %v16614_v37, 0.0 }
 0x55f   :  { %v10532_v26 = vpop.eup %10531 }
 0x560   :  { %v2936_v59 = vpop.xlane.xlu0 %2935  ;;  %v2970_v17 = vmul.f32 %v10532_v26, %v13126_v27 }
 0x561   :  { %10537 = vrcp.f32 %v2936_v59  ;;  %v16617_v59 = vld [vmem:[#allocation19_spill] sm:$0xff] }
 0x562   :  { %v2982_v52 = vpack.c.bf16 %v2970_v17, %v2969_v5  ;;  %v16618_v5 = vmax.f32 %v16617_v59, 0.0 }
 0x563   :  { %v10534_v21 = vpop.eup %10533 }
 0x564   :  { %3066 = vmatmul.mubr.bf16.gmra.mrb[144].mxu1 %v2982_v52  ;;  %v2971_v25 = vmul.f32 %v10534_v21, %v13134_v2  ;;  %v16620_v52 = vld [vmem:[#allocation22_spill] sm:$0xff] }
 0x565   :  { %v2938_v20 = vpop.xlane.xlu1 %2937  ;;  %3075 = vmatprep.mubr.bf16.mxu1 %v16505_v50 }
 0x566   :  { %10539 = vrcp.f32 %v2938_v20  ;;  %v16621_v20 = vmax.f32 %v16620_v52, 0.0 }
 0x567   :  { %v10536_v38 = vpop.eup %10535 }
 0x568   :  { %v2940_v46 = vpop.xlane.xlu0 %2939  ;;  %v2972_v23 = vmul.f32 %v10536_v38, %v13140_v62 }
 0x569   :  { %10541 = vrcp.f32 %v2940_v46 }
 0x56a   :  { %v2983_v7 = vpack.c.bf16 %v2972_v23, %v2971_v25 }
 0x56b   :  { %v10538_v41 = vpop.eup %10537 }
 0x56c   :  { %3076 = vmatmul.mubr.bf16.gmra.mrb[148].mxu1 %v2983_v7  ;;  %v2973_v43 = vmul.f32 %v10538_v41, %v13148_v24 }
 0x56d   :  { %v2942_v15 = vpop.xlane.xlu1 %2941  ;;  %3085 = vmatprep.mubr.bf16.mxu1 %v16505_v50 }
 0x56e   :  { %10543 = vrcp.f32 %v2942_v15 }
 0x570   :  { %v10540_v27 = vpop.eup %10539  ;;  %v2944_v32 = vpop.xlane.xlu0 %2943 }
 0x571   :  { %v2974_v51 = vmul.f32 %v10540_v27, %v13155_v63  ;;  %10545 = vrcp.f32 %v2944_v32 }
 0x573   :  { %v2984_v60 = vpack.c.bf16 %v2974_v51, %v2973_v43  ;;  %v10542_v8 = vpop.eup %10541 }
 0x574   :  { %v2975_v49 = vmul.f32 %v10542_v8, %v13163_v22  ;;  %v13219_v22 = vld [vmem:[%s15923_s2] sm:$0xff]  ;;  %v16623_v8 = vld [vmem:[#allocation29_spill] sm:$0xff] }
 0x575   :  { %3086 = vmatmul.mubr.bf16.gmra.mrb[152].mxu1 %v2984_v60  ;;  %v2946_v2 = vpop.xlane.xlu1 %2945 }
 0x576   :  { %10547 = vrcp.f32 %v2946_v2  ;;  %3095 = vmatprep.mubr.bf16.mxu1 %v16505_v50 }
 0x578   :  { %v10544_v62 = vpop.eup %10543 }
 0x579   :  { %v2976_v11 = vmul.f32 %v10544_v62, %v13169_v1  ;;  %v13222_v1 = vrot.slane %v13219_v22, %v3118_v57  ;;  %v16624_v62 = vmax.f32 %v16623_v8, 0.0  ;;  %v16644_v8 = vld [vmem:[#allocation38_spill] sm:$0xff] }
 0x57b   :  { %v2985_v53 = vpack.c.bf16 %v2976_v11, %v2975_v49  ;;  %v10546_v33 = vpop.eup %10545 }
 0x57c   :  { %v2977_v63 = vmul.f32 %v10546_v33, %v13176_v14  ;;  %v13230_v14 = vrot.slane %v13227_v56, %v3118_v57  ;;  %v16632_v57 = vld [vmem:[#allocation32_spill] sm:$0xff] }
 0x57d   :  { %3096 = vmatmul.mubr.bf16.gmra.mrb[156].mxu1 %v2985_v53  ;;  %v16626_v53 = vld [vmem:[#allocation31_spill] sm:$0xff] }
 0x57e   :  { %3105 = vmatprep.mubr.bf16.mxu1 %v16505_v50  ;;  %v16627_v33 = vmax.f32 %v16626_v53, 0.0 }
 0x580   :  { %v10548_v24 = vpop.eup %10547 }
 0x581   :  { %v2978_v29 = vmul.f32 %v10548_v24, %v13180_v55 }
 0x583   :  { %v2986_v44 = vpack.c.bf16 %v2978_v29, %v2977_v63  ;;  %v16629_v63 = vld [vmem:[#allocation30_spill] sm:$0xff] }
 0x584   :  { %v16630_v29 = vmax.f32 %v16629_v63, 0.0 }
 0x585   :  { %3106 = vmatmul.mubr.bf16.gmra.mrb[160].mxu1 %v2986_v44 }
 0x596   :  { %v2522_v55 = vpop.f32.mrb[100].mxu1 }
 0x597   :  { %v3124_v10 = vadd.f32 %v13222_v1, %v2522_v55  ;;  %v2524_v31 = vpop.f32.mrb[101].mxu1  ;;  %v16633_v55 = vmax.f32 %v16632_v57, 0.0 }
 0x598   :  { %v3125_v28 = vadd.f32 %v13230_v14, %v2524_v31  ;;  %v2526_v54 = vpop.f32.mrb[102].mxu1 }
 0x599   :  { %v3126_v58 = vadd.f32 %v13222_v1, %v2526_v54  ;;  %v2528_v9 = vpop.f32.mrb[103].mxu1  ;;  %v13242_v26 = vadd.f32 %v3124_v10, %v16615_v16 }
 0x59a   :  { %v13237_v34 = vadd.f32 %v3125_v28, %v16612_v13  ;;  %v3127_v3 = vadd.f32 %v13230_v14, %v2528_v9 }
 0x59b   :  { %16616 = vst [vmem:[#allocation20_spill] sm:$0xff] %v13242_v26  ;;  %v13246_v17 = vadd.f32 %v3126_v58, %v16618_v5  ;;  %v16140_v23 = vmax.f32 %v13242_v26, 0.0 }
 0x59c   :  { %16613 = vst [vmem:[#allocation15_spill] sm:$0xff] %v13237_v34  ;;  %v13250_v21 = vadd.f32 %v3127_v3, %v16621_v20  ;;  %v16147_v46 = vmax.f32 %v13237_v34, 0.0  ;;  %v16635_v20 = vld [vmem:[#allocation34_spill] sm:$0xff] }
 0x59d   :  { %16619 = vst [vmem:[#allocation21_spill] sm:$0xff] %v13246_v17  ;;  %v16137_v38 = vmax.f32 %v13246_v17, 0.0 }
 0x59e   :  { %16622 = vst [vmem:[#allocation27_spill] sm:$0xff] %v13250_v21  ;;  %v16136_v25 = vmax.f32 %v13250_v21, 0.0 }
 0x59f   :  { %v2532_v7 = vpop.f32.mrb[104].mxu1  ;;  %v3316_v51 = vpack.c.bf16 %v16137_v38, %v16140_v23  ;;  %v16692_v23 = vld [vmem:[#allocation60_spill] sm:$0xff] }
 0x5a0   :  { %v3128_v15 = vadd.f32 %v13222_v1, %v2532_v7  ;;  %v2534_v41 = vpop.f32.mrb[105].mxu1  ;;  %v3317_v27 = vpack.c.bf16 %v16136_v25, %v16147_v46  ;;  %v16636_v7 = vmax.f32 %v16635_v20, 0.0 }
 0x5a1   :  { %v3129_v32 = vadd.f32 %v13230_v14, %v2534_v41  ;;  %v2536_v43 = vpop.f32.mrb[106].mxu1 }
 0x5a2   :  { %v3130_v60 = vadd.f32 %v13222_v1, %v2536_v43  ;;  %v2538_v2 = vpop.f32.mrb[107].mxu1  ;;  %3700 = vmatprep.mubr.bf16.mxu0 %v3317_v27  ;;  %3893 = vmatprep.mubr.bf16.mxu1 %v3317_v27  ;;  %v13274_v24 = vadd.f32 %v3128_v15, %v16627_v33  ;;  %v16638_v27 = vld [vmem:[#allocation37_spill] sm:$0xff] }
 0x5a3   :  { %v13269_v49 = vadd.f32 %v3129_v32, %v16624_v62  ;;  %v3131_v11 = vadd.f32 %v13230_v14, %v2538_v2  ;;  %3701 = vmatmul.mubr.bf16.vlgmr.msra.gmra.mrb[136].mxu0 %v3316_v51  ;;  %3894 = vmatmul.mubr.bf16.vlgmr.msra.gmra.mrb[164].mxu1 %v3316_v51  ;;  %v16639_v32 = vmax.f32 %v16638_v27, 0.0  ;;  %v16641_v51 = vld [vmem:[#allocation36_spill] sm:$0xff]  ;;  %v16645_v62 = vmax.f32 %v16644_v8, 0.0 }
 0x5a4   :  { %16628 = vst [vmem:[#allocation25_spill] sm:$0xff] %v13274_v24  ;;  %v13278_v44 = vadd.f32 %v3130_v60, %v16630_v29  ;;  %v16134_v13 = vmax.f32 %v13274_v24, 0.0  ;;  %v16642_v60 = vmax.f32 %v16641_v51, 0.0  ;;  %v16653_v51 = vld [vmem:[#allocation44_spill] sm:$0xff] }
 0x5a5   :  { %16625 = vst [vmem:[#allocation28_spill] sm:$0xff] %v13269_v49  ;;  %v13282_v10 = vadd.f32 %v3131_v11, %v16633_v55  ;;  %v16135_v54 = vmax.f32 %v13269_v49, 0.0 }
 0x5a6   :  { %16631 = vst [vmem:[#allocation26_spill] sm:$0xff] %v13278_v44  ;;  %v16131_v31 = vmax.f32 %v13278_v44, 0.0 }
 0x5a7   :  { %16634 = vst [vmem:[#allocation97_spill] sm:$0xff] %v13282_v10  ;;  %v2542_v28 = vpop.f32.mrb[108].mxu1  ;;  %v16130_v58 = vmax.f32 %v13282_v10, 0.0 }
 0x5a8   :  { %v3132_v9 = vadd.f32 %v13222_v1, %v2542_v28  ;;  %v2544_v48 = vpop.f32.mrb[109].mxu1  ;;  %v3318_v52 = vpack.c.bf16 %v16131_v31, %v16134_v13 }
 0x5a9   :  { %v3133_v3 = vadd.f32 %v13230_v14, %v2544_v48  ;;  %v2546_v37 = vpop.f32.mrb[110].mxu1  ;;  %v3319_v16 = vpack.c.bf16 %v16130_v58, %v16135_v54  ;;  %v16677_v58 = vld [vmem:[#allocation54_spill] sm:$0xff]  ;;  %v16686_v54 = vld [vmem:[#allocation59_spill] sm:$0xff] }
 0x5aa   :  { %v3134_v59 = vadd.f32 %v13222_v1, %v2546_v37  ;;  %v2548_v5 = vpop.f32.mrb[111].mxu1  ;;  %v13306_v43 = vadd.f32 %v3132_v9, %v16639_v32  ;;  %v16678_v31 = vmax.f32 %v16677_v58, 0.0  ;;  %v16687_v25 = vmax.f32 %v16686_v54, 0.0 }
 0x5ab   :  { %v13301_v15 = vadd.f32 %v3133_v3, %v16636_v7  ;;  %v3135_v41 = vadd.f32 %v13230_v14, %v2548_v5  ;;  %3710 = vmatprep.mubr.bf16.mxu0 %v3319_v16  ;;  %3901 = vmatprep.mubr.bf16.mxu1 %v3319_v16  ;;  %v16647_v5 = vld [vmem:[#allocation42_spill] sm:$0xff] }
 0x5ac   :  { %16640 = vst [vmem:[#allocation98_spill] sm:$0xff] %v13306_v43  ;;  %v13310_v2 = vadd.f32 %v3134_v59, %v16642_v60  ;;  %3711 = vmatmul.mubr.bf16.gmra.mrb[140].mxu0 %v3318_v52  ;;  %3902 = vmatmul.mubr.bf16.gmra.mrb[168].mxu1 %v3318_v52  ;;  %v16124_v28 = vmax.f32 %v13306_v43, 0.0  ;;  %v16648_v52 = vmax.f32 %v16647_v5, 0.0  ;;  %v16654_v60 = vmax.f32 %v16653_v51, 0.0 }
 0x5ad   :  { %16637 = vst [vmem:[#allocation99_spill] sm:$0xff] %v13301_v15  ;;  %v13314_v11 = vadd.f32 %v3135_v41, %v16645_v62  ;;  %v16127_v63 = vmax.f32 %v13301_v15, 0.0  ;;  %v16650_v41 = vld [vmem:[#allocation45_spill] sm:$0xff]  ;;  %v16656_v62 = vld [vmem:[#allocation46_spill] sm:$0xff] }
 0x5ae   :  { %16643 = vst [vmem:[#allocation101_spill] sm:$0xff] %v13310_v2  ;;  %v16121_v53 = vmax.f32 %v13310_v2, 0.0  ;;  %v16651_v27 = vmax.f32 %v16650_v41, 0.0 }
 0x5af   :  { %16646 = vst [vmem:[#allocation100_spill] sm:$0xff] %v13314_v11  ;;  %v16120_v29 = vmax.f32 %v13314_v11, 0.0 }
 0x5b0   :  { %v2552_v33 = vpop.f32.mrb[112].mxu1  ;;  %v3320_v59 = vpack.c.bf16 %v16121_v53, %v16124_v28  ;;  %v16668_v28 = vld [vmem:[#allocation52_spill] sm:$0xff] }
 0x5b1   :  { %v3136_v57 = vadd.f32 %v13222_v1, %v2552_v33  ;;  %v2554_v55 = vpop.f32.mrb[113].mxu1  ;;  %v3321_v3 = vpack.c.bf16 %v16120_v29, %v16127_v63  ;;  %v16657_v33 = vmax.f32 %v16656_v62, 0.0 }
 0x5b2   :  { %v3137_v9 = vadd.f32 %v13230_v14, %v2554_v55  ;;  %v2556_v48 = vpop.f32.mrb[114].mxu1 }
 0x5b3   :  { %v3138_v37 = vadd.f32 %v13222_v1, %v2556_v48  ;;  %v2558_v16 = vpop.f32.mrb[115].mxu1  ;;  %3720 = vmatprep.mubr.bf16.mxu0 %v3321_v3  ;;  %3909 = vmatprep.mubr.bf16.mxu1 %v3321_v3  ;;  %v13338_v32 = vadd.f32 %v3136_v57, %v16651_v27 }
 0x5b4   :  { %v13333_v20 = vadd.f32 %v3137_v9, %v16648_v52  ;;  %v3139_v7 = vadd.f32 %v13230_v14, %v2558_v16  ;;  %3721 = vmatmul.mubr.bf16.gmra.mrb[144].mxu0 %v3320_v59  ;;  %3910 = vmatmul.mubr.bf16.gmra.mrb[172].mxu1 %v3320_v59 }
 0x5b5   :  { %16652 = vst [vmem:[#allocation102_spill] sm:$0xff] %v13338_v32  ;;  %v13342_v8 = vadd.f32 %v3138_v37, %v16654_v60  ;;  %v16126_v52 = vmax.f32 %v13338_v32, 0.0  ;;  %v16659_v60 = vld [vmem:[#allocation49_spill] sm:$0xff] }
 0x5b6   :  { %16649 = vst [vmem:[#allocation103_spill] sm:$0xff] %v13333_v20  ;;  %v13346_v55 = vadd.f32 %v3139_v7, %v16657_v33  ;;  %v16123_v16 = vmax.f32 %v13333_v20, 0.0  ;;  %v16660_v62 = vmax.f32 %v16659_v60, 0.0 }
 0x5b7   :  { %16655 = vst [vmem:[#allocation105_spill] sm:$0xff] %v13342_v8  ;;  %v16125_v9 = vmax.f32 %v13342_v8, 0.0 }
 0x5b8   :  { %16658 = vst [vmem:[#allocation104_spill] sm:$0xff] %v13346_v55  ;;  %v2562_v48 = vpop.f32.mrb[116].mxu1  ;;  %v16122_v3 = vmax.f32 %v13346_v55, 0.0 }
 0x5b9   :  { %v3140_v57 = vadd.f32 %v13222_v1, %v2562_v48  ;;  %v2564_v5 = vpop.f32.mrb[117].mxu1  ;;  %v3322_v51 = vpack.c.bf16 %v16125_v9, %v16126_v52  ;;  %v16669_v9 = vmax.f32 %v16668_v28, 0.0 }
 0x5ba   :  { %v3141_v37 = vadd.f32 %v13230_v14, %v2564_v5  ;;  %v2566_v41 = vpop.f32.mrb[118].mxu1  ;;  %v3323_v59 = vpack.c.bf16 %v16122_v3, %v16123_v16  ;;  %v16662_v5 = vld [vmem:[#allocation51_spill] sm:$0xff]  ;;  %v16665_v3 = vld [vmem:[#allocation50_spill] sm:$0xff] }
 0x5bb   :  { %v3142_v7 = vadd.f32 %v13222_v1, %v2566_v41  ;;  %v2568_v27 = vpop.f32.mrb[119].mxu1  ;;  %v16663_v29 = vmax.f32 %v16662_v5, 0.0  ;;  %v16666_v41 = vmax.f32 %v16665_v3, 0.0  ;;  %v16671_v5 = vld [vmem:[#allocation53_spill] sm:$0xff] }
 0x5bc   :  { %v13365_v33 = vadd.f32 %v3141_v37, %v16660_v62  ;;  %v3143_v48 = vadd.f32 %v13230_v14, %v2568_v27  ;;  %3730 = vmatprep.mubr.bf16.mxu0 %v3323_v59  ;;  %3917 = vmatprep.mubr.bf16.mxu1 %v3323_v59 }
 0x5bd   :  { %v13370_v53 = vadd.f32 %v3140_v57, %v16663_v29  ;;  %v13374_v16 = vadd.f32 %v3142_v7, %v16666_v41  ;;  %3731 = vmatmul.mubr.bf16.gmra.mrb[148].mxu0 %v3322_v51  ;;  %3918 = vmatmul.mubr.bf16.gmra.mrb[176].mxu1 %v3322_v51  ;;  %v16672_v41 = vmax.f32 %v16671_v5, 0.0 }
 0x5be   :  { %16661 = vst [vmem:[#allocation107_spill] sm:$0xff] %v13365_v33  ;;  %v13378_v52 = vadd.f32 %v3143_v48, %v16669_v9  ;;  %v16129_v27 = vmax.f32 %v13365_v33, 0.0 }
 0x5bf   :  { %16664 = vst [vmem:[#allocation106_spill] sm:$0xff] %v13370_v53  ;;  %16667 = vst [vmem:[#allocation109_spill] sm:$0xff] %v13374_v16  ;;  %v16132_v37 = vmax.f32 %v13374_v16, 0.0  ;;  %v16133_v29 = vmax.f32 %v13370_v53, 0.0 }
 0x5c0   :  { %16670 = vst [vmem:[#allocation108_spill] sm:$0xff] %v13378_v52  ;;  %v16128_v59 = vmax.f32 %v13378_v52, 0.0  ;;  %v2572_v60 = vpop.f32.mrb[120].mxu1 }
 0x5c1   :  { %v3144_v57 = vadd.f32 %v13222_v1, %v2572_v60  ;;  %v2574_v3 = vpop.f32.mrb[121].mxu1  ;;  %v3324_v51 = vpack.c.bf16 %v16132_v37, %v16133_v29 }
 0x5c2   :  { %v3325_v7 = vpack.c.bf16 %v16128_v59, %v16129_v27  ;;  %v3145_v28 = vadd.f32 %v13230_v14, %v2574_v3  ;;  %v2576_v9 = vpop.f32.mrb[122].mxu1  ;;  %v16674_v3 = vld [vmem:[#allocation55_spill] sm:$0xff] }
 0x5c3   :  { %v3146_v62 = vadd.f32 %v13222_v1, %v2576_v9  ;;  %v2578_v48 = vpop.f32.mrb[123].mxu1  ;;  %v16675_v59 = vmax.f32 %v16674_v3, 0.0  ;;  %v16680_v9 = vld [vmem:[#allocation56_spill] sm:$0xff]  ;;  %v16683_v3 = vld [vmem:[#allocation57_spill] sm:$0xff] }
 0x5c4   :  { %3740 = vmatprep.mubr.bf16.mxu0 %v3325_v7  ;;  %3925 = vmatprep.mubr.bf16.mxu1 %v3325_v7  ;;  %v13397_v60 = vadd.f32 %v3145_v28, %v16672_v41  ;;  %v3147_v63 = vadd.f32 %v13230_v14, %v2578_v48  ;;  %v16681_v29 = vmax.f32 %v16680_v9, 0.0  ;;  %v16684_v9 = vmax.f32 %v16683_v3, 0.0 }
 0x5c5   :  { %3741 = vmatmul.mubr.bf16.gmra.mrb[152].mxu0 %v3324_v51  ;;  %3926 = vmatmul.mubr.bf16.gmra.mrb[180].mxu1 %v3324_v51  ;;  %v13402_v27 = vadd.f32 %v3144_v57, %v16675_v59  ;;  %v13406_v37 = vadd.f32 %v3146_v62, %v16678_v31 }
 0x5c6   :  { %16673 = vst [vmem:[#allocation8_spill] sm:$0xff] %v13397_v60  ;;  %v13410_v13 = vadd.f32 %v3147_v63, %v16681_v29  ;;  %v16139_v5 = vmax.f32 %v13397_v60, 0.0 }
 0x5c7   :  { %16676 = vst [vmem:[#allocation17_spill] sm:$0xff] %v13402_v27  ;;  %16679 = vst [vmem:[#allocation18_spill] sm:$0xff] %v13406_v37  ;;  %v16141_v7 = vmax.f32 %v13406_v37, 0.0  ;;  %v16142_v59 = vmax.f32 %v13402_v27, 0.0 }
 0x5c8   :  { %16682 = vst [vmem:[#allocation19_spill] sm:$0xff] %v13410_v13  ;;  %v2582_v28 = vpop.f32.mrb[124].mxu1  ;;  %v16138_v48 = vmax.f32 %v13410_v13, 0.0 }
 0x5c9   :  { %v3148_v51 = vadd.f32 %v13222_v1, %v2582_v28  ;;  %v2584_v41 = vpop.f32.mrb[125].mxu1  ;;  %v3326_v62 = vpack.c.bf16 %v16141_v7, %v16142_v59  ;;  %v16693_v7 = vmax.f32 %v16692_v23, 0.0 }
 0x5ca   :  { %v3149_v58 = vadd.f32 %v13230_v14, %v2584_v41  ;;  %v2586_v31 = vpop.f32.mrb[126].mxu1  ;;  %v3327_v63 = vpack.c.bf16 %v16138_v48, %v16139_v5  ;;  %v16689_v48 = vld [vmem:[#allocation58_spill] sm:$0xff] }
 0x5cb   :  { %v3150_v29 = vadd.f32 %v13222_v1, %v2586_v31  ;;  %v2588_v57 = vpop.f32.mrb[127].mxu1  ;;  %v13434_v38 = vadd.f32 %v3148_v51, %v16687_v25  ;;  %v16690_v31 = vmax.f32 %v16689_v48, 0.0 }
 0x5cc   :  { %v13429_v28 = vadd.f32 %v3149_v58, %v16684_v9  ;;  %v3151_v41 = vadd.f32 %v13230_v14, %v2588_v57  ;;  %3750 = vmatprep.mubr.bf16.mxu0 %v3327_v63  ;;  %3933 = vmatprep.mubr.bf16.mxu1 %v3327_v63 }
 0x5cd   :  { %16688 = vst [vmem:[#allocation29_spill] sm:$0xff] %v13434_v38  ;;  %v13438_v5 = vadd.f32 %v3150_v29, %v16690_v31  ;;  %3751 = vmatmul.mubr.bf16.gmra.mrb[156].mxu0 %v3326_v62  ;;  %3934 = vmatmul.mubr.bf16.gmra.mrb[184].mxu1 %v3326_v62  ;;  %v16145_v54 = vmax.f32 %v13434_v38, 0.0 }
 0x5ce   :  { %16685 = vst [vmem:[#allocation22_spill] sm:$0xff] %v13429_v28  ;;  %v13442_v59 = vadd.f32 %v3151_v41, %v16693_v7  ;;  %v16146_v57 = vmax.f32 %v13429_v28, 0.0  ;;  %v16695_v41 = vld [vmem:[#allocation61_spill] sm:$0xff] }
 0x5cf   :  { %16691 = vst [vmem:[#allocation31_spill] sm:$0xff] %v13438_v5  ;;  %v16144_v58 = vmax.f32 %v13438_v5, 0.0  ;;  %v16696_v31 = vmax.f32 %v16695_v41, 0.0 }
 0x5d0   :  { %16694 = vst [vmem:[#allocation30_spill] sm:$0xff] %v13442_v59  ;;  %v16143_v63 = vmax.f32 %v13442_v59, 0.0  ;;  %v16704_v59 = vld [vmem:[#allocation64_spill] sm:$0xff] }
 0x5d1   :  { %v3328_v23 = vpack.c.bf16 %v16144_v58, %v16145_v54  ;;  %v16698_v54 = vld [vmem:[#allocation63_spill] sm:$0xff] }
 0x5d2   :  { %v3329_v25 = vpack.c.bf16 %v16143_v63, %v16146_v57 }
 0x5d4   :  { %3760 = vmatprep.mubr.bf16.mxu0 %v3329_v25  ;;  %3941 = vmatprep.mubr.bf16.mxu1 %v3329_v25  ;;  %v16699_v25 = vmax.f32 %v16698_v54, 0.0 }
 0x5d5   :  { %3761 = vmatmul.mubr.bf16.gmra.mrb[160].mxu0 %v3328_v23  ;;  %3942 = vmatmul.mubr.bf16.gmra.mrb[188].mxu1 %v3328_v23  ;;  %v16701_v23 = vld [vmem:[#allocation62_spill] sm:$0xff] }
 0x5d6   :  { %v16702_v46 = vmax.f32 %v16701_v23, 0.0 }
 0x5eb   :  { %v2592_v7 = vpop.f32.mrb[128].mxu1 }
 0x5ec   :  { %v3152_v48 = vadd.f32 %v13222_v1, %v2592_v7  ;;  %v2594_v51 = vpop.f32.mrb[129].mxu1 }
 0x5ed   :  { %v3153_v29 = vadd.f32 %v13230_v14, %v2594_v51  ;;  %v2596_v62 = vpop.f32.mrb[130].mxu1  ;;  %v16705_v51 = vmax.f32 %v16704_v59, 0.0 }
 0x5ee   :  { %v3154_v3 = vadd.f32 %v13222_v1, %v2596_v62  ;;  %v2598_v9 = vpop.f32.mrb[131].mxu1  ;;  %v13466_v57 = vadd.f32 %v3152_v48, %v16699_v25 }
 0x5ef   :  { %v13461_v63 = vadd.f32 %v3153_v29, %v16696_v31  ;;  %v3155_v58 = vadd.f32 %v13230_v14, %v2598_v9 }
 0x5f0   :  { %16700 = vst [vmem:[#allocation34_spill] sm:$0xff] %v13466_v57  ;;  %v13470_v7 = vadd.f32 %v3154_v3, %v16702_v46  ;;  %v16158_v48 = vmax.f32 %v13466_v57, 0.0 }
 0x5f1   :  { %16697 = vst [vmem:[#allocation32_spill] sm:$0xff] %v13461_v63  ;;  %v13474_v5 = vadd.f32 %v3155_v58, %v16705_v51  ;;  %v16155_v29 = vmax.f32 %v13461_v63, 0.0  ;;  %v16710_v63 = vld [vmem:[#allocation65_spill] sm:$0xff] }
 0x5f2   :  { %16703 = vst [vmem:[#allocation37_spill] sm:$0xff] %v13470_v7  ;;  %v16157_v62 = vmax.f32 %v13470_v7, 0.0  ;;  %v16711_v28 = vmax.f32 %v16710_v63, 0.0  ;;  %v16716_v7 = vld [vmem:[#allocation68_spill] sm:$0xff] }
 0x5f3   :  { %16706 = vst [vmem:[#allocation36_spill] sm:$0xff] %v13474_v5  ;;  %v3037_v38 = vpop.f32.mrb[132].mxu1  ;;  %v16154_v41 = vmax.f32 %v13474_v5, 0.0 }
 0x5f4   :  { %v3156_v9 = vadd.f32 %v13222_v1, %v3037_v38  ;;  %v3039_v54 = vpop.f32.mrb[133].mxu1  ;;  %v3330_v25 = vpack.c.bf16 %v16157_v62, %v16158_v48  ;;  %v16707_v38 = vld [vmem:[#allocation66_spill] sm:$0xff]  ;;  %v16717_v62 = vmax.f32 %v16716_v7, 0.0 }
 0x5f5   :  { %v3157_v31 = vadd.f32 %v13230_v14, %v3039_v54  ;;  %v3041_v46 = vpop.f32.mrb[134].mxu1  ;;  %v3331_v59 = vpack.c.bf16 %v16154_v41, %v16155_v29  ;;  %v16708_v23 = vmax.f32 %v16707_v38, 0.0  ;;  %v16713_v41 = vld [vmem:[#allocation67_spill] sm:$0xff] }
 0x5f6   :  { %v3158_v58 = vadd.f32 %v13222_v1, %v3041_v46  ;;  %v3043_v3 = vpop.f32.mrb[135].mxu1  ;;  %v13498_v5 = vadd.f32 %v3156_v9, %v16711_v28  ;;  %v16714_v46 = vmax.f32 %v16713_v41, 0.0 }
 0x5f7   :  { %v13493_v51 = vadd.f32 %v3157_v31, %v16708_v23  ;;  %v3159_v54 = vadd.f32 %v13230_v14, %v3043_v3  ;;  %3770 = vmatprep.mubr.bf16.mxu0 %v3331_v59  ;;  %3949 = vmatprep.mubr.bf16.mxu1 %v3331_v59 }
 0x5f8   :  { %16712 = vst [vmem:[#allocation42_spill] sm:$0xff] %v13498_v5  ;;  %v13502_v29 = vadd.f32 %v3158_v58, %v16714_v46  ;;  %3771 = vmatmul.mubr.bf16.gmra.mrb[164].mxu0 %v3330_v25  ;;  %3950 = vmatmul.mubr.bf16.gmra.mrb[192].mxu1 %v3330_v25  ;;  %v16166_v41 = vmax.f32 %v13498_v5, 0.0 }
 0x5f9   :  { %16709 = vst [vmem:[#allocation38_spill] sm:$0xff] %v13493_v51  ;;  %v13506_v48 = vadd.f32 %v3159_v54, %v16717_v62  ;;  %v16163_v3 = vmax.f32 %v13493_v51, 0.0  ;;  %v16719_v54 = vld [vmem:[#allocation70_spill] sm:$0xff]  ;;  %v16722_v51 = vld [vmem:[#allocation69_spill] sm:$0xff] }
 0x5fa   :  { %16715 = vst [vmem:[#allocation45_spill] sm:$0xff] %v13502_v29  ;;  %v16165_v31 = vmax.f32 %v13502_v29, 0.0  ;;  %v16720_v46 = vmax.f32 %v16719_v54, 0.0  ;;  %v16723_v57 = vmax.f32 %v16722_v51, 0.0  ;;  %v16728_v29 = vld [vmem:[#allocation72_spill] sm:$0xff] }
 0x5fb   :  { %16718 = vst [vmem:[#allocation44_spill] sm:$0xff] %v13506_v48  ;;  %v3047_v38 = vpop.f32.mrb[136].mxu1  ;;  %v16162_v59 = vmax.f32 %v13506_v48, 0.0 }
 0x5fc   :  { %v3160_v28 = vadd.f32 %v13222_v1, %v3047_v38  ;;  %v3049_v63 = vpop.f32.mrb[137].mxu1  ;;  %v3332_v23 = vpack.c.bf16 %v16165_v31, %v16166_v41  ;;  %v16729_v31 = vmax.f32 %v16728_v29, 0.0 }
 0x5fd   :  { %v3161_v9 = vadd.f32 %v13230_v14, %v3049_v63  ;;  %v3051_v58 = vpop.f32.mrb[138].mxu1  ;;  %v3333_v7 = vpack.c.bf16 %v16162_v59, %v16163_v3  ;;  %v16725_v59 = vld [vmem:[#allocation71_spill] sm:$0xff] }
 0x5fe   :  { %v3162_v62 = vadd.f32 %v13222_v1, %v3051_v58  ;;  %v3053_v25 = vpop.f32.mrb[139].mxu1  ;;  %v13530_v48 = vadd.f32 %v3160_v28, %v16723_v57  ;;  %v16726_v58 = vmax.f32 %v16725_v59, 0.0 }
 0x5ff   :  { %v13525_v38 = vadd.f32 %v3161_v9, %v16720_v46  ;;  %v3163_v63 = vadd.f32 %v13230_v14, %v3053_v25  ;;  %3780 = vmatprep.mubr.bf16.mxu0 %v3333_v7  ;;  %3957 = vmatprep.mubr.bf16.mxu1 %v3333_v7 }
 0x600   :  { %16724 = vst [vmem:[#allocation49_spill] sm:$0xff] %v13530_v48  ;;  %v13534_v3 = vadd.f32 %v3162_v62, %v16726_v58  ;;  %3781 = vmatmul.mubr.bf16.gmra.mrb[168].mxu0 %v3332_v23  ;;  %3958 = vmatmul.mubr.bf16.gmra.mrb[196].mxu1 %v3332_v23  ;;  %v16174_v59 = vmax.f32 %v13530_v48, 0.0 }
 0x601   :  { %16721 = vst [vmem:[#allocation46_spill] sm:$0xff] %v13525_v38  ;;  %v13538_v41 = vadd.f32 %v3163_v63, %v16729_v31  ;;  %v16171_v25 = vmax.f32 %v13525_v38, 0.0  ;;  %v16731_v63 = vld [vmem:[#allocation74_spill] sm:$0xff]  ;;  %v16734_v38 = vld [vmem:[#allocation73_spill] sm:$0xff] }
 0x602   :  { %16727 = vst [vmem:[#allocation51_spill] sm:$0xff] %v13534_v3  ;;  %v16173_v9 = vmax.f32 %v13534_v3, 0.0  ;;  %v16732_v58 = vmax.f32 %v16731_v63, 0.0  ;;  %v16735_v5 = vmax.f32 %v16734_v38, 0.0  ;;  %v16740_v3 = vld [vmem:[#allocation76_spill] sm:$0xff] }
 0x603   :  { %16730 = vst [vmem:[#allocation50_spill] sm:$0xff] %v13538_v41  ;;  %v3057_v54 = vpop.f32.mrb[140].mxu1  ;;  %v16170_v7 = vmax.f32 %v13538_v41, 0.0 }
 0x604   :  { %v3164_v57 = vadd.f32 %v13222_v1, %v3057_v54  ;;  %v3059_v51 = vpop.f32.mrb[141].mxu1  ;;  %v3334_v46 = vpack.c.bf16 %v16173_v9, %v16174_v59  ;;  %v16741_v9 = vmax.f32 %v16740_v3, 0.0 }
 0x605   :  { %v3165_v28 = vadd.f32 %v13230_v14, %v3059_v51  ;;  %v3061_v62 = vpop.f32.mrb[142].mxu1  ;;  %v3335_v29 = vpack.c.bf16 %v16170_v7, %v16171_v25  ;;  %v16737_v7 = vld [vmem:[#allocation75_spill] sm:$0xff] }
 0x606   :  { %v3166_v31 = vadd.f32 %v13222_v1, %v3061_v62  ;;  %v3063_v23 = vpop.f32.mrb[143].mxu1  ;;  %v13562_v41 = vadd.f32 %v3164_v57, %v16735_v5  ;;  %v16738_v62 = vmax.f32 %v16737_v7, 0.0 }
 0x607   :  { %v13557_v54 = vadd.f32 %v3165_v28, %v16732_v58  ;;  %v3167_v51 = vadd.f32 %v13230_v14, %v3063_v23  ;;  %3790 = vmatprep.mubr.bf16.mxu0 %v3335_v29  ;;  %3965 = vmatprep.mubr.bf16.mxu1 %v3335_v29 }
 0x608   :  { %16736 = vst [vmem:[#allocation53_spill] sm:$0xff] %v13562_v41  ;;  %v13566_v25 = vadd.f32 %v3166_v31, %v16738_v62  ;;  %3791 = vmatmul.mubr.bf16.gmra.mrb[172].mxu0 %v3334_v46  ;;  %3966 = vmatmul.mubr.bf16.gmra.mrb[200].mxu1 %v3334_v46  ;;  %v16177_v38 = vmax.f32 %v13562_v41, 0.0 }
 0x609   :  { %16733 = vst [vmem:[#allocation52_spill] sm:$0xff] %v13557_v54  ;;  %v13570_v59 = vadd.f32 %v3167_v51, %v16741_v9  ;;  %v16178_v23 = vmax.f32 %v13557_v54, 0.0  ;;  %v16743_v51 = vld [vmem:[#allocation78_spill] sm:$0xff] }
 0x60a   :  { %16739 = vst [vmem:[#allocation55_spill] sm:$0xff] %v13566_v25  ;;  %v16176_v28 = vmax.f32 %v13566_v25, 0.0  ;;  %v16744_v62 = vmax.f32 %v16743_v51, 0.0  ;;  %v16752_v25 = vld [vmem:[#allocation80_spill] sm:$0xff] }
 0x60b   :  { %16742 = vst [vmem:[#allocation54_spill] sm:$0xff] %v13570_v59  ;;  %v16175_v29 = vmax.f32 %v13570_v59, 0.0 }
 0x60c   :  { %v3336_v3 = vpack.c.bf16 %v16176_v28, %v16177_v38  ;;  %v16746_v38 = vld [vmem:[#allocation77_spill] sm:$0xff] }
 0x60d   :  { %v3337_v5 = vpack.c.bf16 %v16175_v29, %v16178_v23 }
 0x60f   :  { %3800 = vmatprep.mubr.bf16.mxu0 %v3337_v5  ;;  %3973 = vmatprep.mubr.bf16.mxu1 %v3337_v5  ;;  %v16747_v5 = vmax.f32 %v16746_v38, 0.0 }
 0x610   :  { %3801 = vmatmul.mubr.bf16.gmra.mrb[176].mxu0 %v3336_v3  ;;  %3974 = vmatmul.mubr.bf16.gmra.mrb[204].mxu1 %v3336_v3  ;;  %v16749_v3 = vld [vmem:[#allocation79_spill] sm:$0xff] }
 0x611   :  { %v16750_v59 = vmax.f32 %v16749_v3, 0.0 }
 0x637   :  { %v3067_v9 = vpop.f32.mrb[144].mxu1 }
 0x638   :  { %v3168_v7 = vadd.f32 %v13222_v1, %v3067_v9  ;;  %v3069_v57 = vpop.f32.mrb[145].mxu1 }
 0x639   :  { %v3169_v31 = vadd.f32 %v13230_v14, %v3069_v57  ;;  %v3071_v46 = vpop.f32.mrb[146].mxu1  ;;  %v16753_v57 = vmax.f32 %v16752_v25, 0.0 }
 0x63a   :  { %v3170_v63 = vadd.f32 %v13222_v1, %v3071_v46  ;;  %v3073_v58 = vpop.f32.mrb[147].mxu1  ;;  %v13594_v23 = vadd.f32 %v3168_v7, %v16747_v5 }
 0x63b   :  { %v13589_v29 = vadd.f32 %v3169_v31, %v16744_v62  ;;  %v3171_v28 = vadd.f32 %v13230_v14, %v3073_v58 }
 0x63c   :  { %16748 = vst [vmem:[#allocation57_spill] sm:$0xff] %v13594_v23  ;;  %v13598_v9 = vadd.f32 %v3170_v63, %v16750_v59  ;;  %v16190_v7 = vmax.f32 %v13594_v23, 0.0 }
 0x63d   :  { %16745 = vst [vmem:[#allocation56_spill] sm:$0xff] %v13589_v29  ;;  %v13602_v41 = vadd.f32 %v3171_v28, %v16753_v57  ;;  %v16187_v31 = vmax.f32 %v13589_v29, 0.0  ;;  %v16758_v29 = vld [vmem:[#allocation81_spill] sm:$0xff] }
 0x63e   :  { %16751 = vst [vmem:[#allocation59_spill] sm:$0xff] %v13598_v9  ;;  %v16189_v46 = vmax.f32 %v13598_v9, 0.0  ;;  %v16759_v48 = vmax.f32 %v16758_v29, 0.0  ;;  %v16764_v9 = vld [vmem:[#allocation84_spill] sm:$0xff] }
 0x63f   :  { %16754 = vst [vmem:[#allocation58_spill] sm:$0xff] %v13602_v41  ;;  %v3077_v54 = vpop.f32.mrb[148].mxu1  ;;  %v16186_v51 = vmax.f32 %v13602_v41, 0.0 }
 0x640   :  { %v3172_v58 = vadd.f32 %v13222_v1, %v3077_v54  ;;  %v3079_v38 = vpop.f32.mrb[149].mxu1  ;;  %v3338_v5 = vpack.c.bf16 %v16189_v46, %v16190_v7  ;;  %v16755_v54 = vld [vmem:[#allocation82_spill] sm:$0xff]  ;;  %v16765_v46 = vmax.f32 %v16764_v9, 0.0 }
 0x641   :  { %v3173_v62 = vadd.f32 %v13230_v14, %v3079_v38  ;;  %v3081_v59 = vpop.f32.mrb[150].mxu1  ;;  %v3339_v25 = vpack.c.bf16 %v16186_v51, %v16187_v31  ;;  %v16756_v3 = vmax.f32 %v16755_v54, 0.0  ;;  %v16761_v51 = vld [vmem:[#allocation83_spill] sm:$0xff] }
 0x642   :  { %v3174_v28 = vadd.f32 %v13222_v1, %v3081_v59  ;;  %v3083_v63 = vpop.f32.mrb[151].mxu1  ;;  %v13626_v41 = vadd.f32 %v3172_v58, %v16759_v48  ;;  %v16762_v59 = vmax.f32 %v16761_v51, 0.0 }
 0x643   :  { %v13621_v57 = vadd.f32 %v3173_v62, %v16756_v3  ;;  %v3175_v38 = vadd.f32 %v13230_v14, %v3083_v63  ;;  %3810 = vmatprep.mubr.bf16.mxu0 %v3339_v25  ;;  %3981 = vmatprep.mubr.bf16.mxu1 %v3339_v25 }
 0x644   :  { %16760 = vst [vmem:[#allocation61_spill] sm:$0xff] %v13626_v41  ;;  %v13630_v31 = vadd.f32 %v3174_v28, %v16762_v59  ;;  %3811 = vmatmul.mubr.bf16.gmra.mrb[180].mxu0 %v3338_v5  ;;  %3982 = vmatmul.mubr.bf16.gmra.mrb[208].mxu1 %v3338_v5  ;;  %v16198_v51 = vmax.f32 %v13626_v41, 0.0 }
 0x645   :  { %16757 = vst [vmem:[#allocation60_spill] sm:$0xff] %v13621_v57  ;;  %v13634_v7 = vadd.f32 %v3175_v38, %v16765_v46  ;;  %v16195_v63 = vmax.f32 %v13621_v57, 0.0  ;;  %v16767_v38 = vld [vmem:[#allocation86_spill] sm:$0xff]  ;;  %v16770_v57 = vld [vmem:[#allocation85_spill] sm:$0xff] }
 0x646   :  { %16763 = vst [vmem:[#allocation63_spill] sm:$0xff] %v13630_v31  ;;  %v16197_v62 = vmax.f32 %v13630_v31, 0.0  ;;  %v16768_v59 = vmax.f32 %v16767_v38, 0.0  ;;  %v16771_v23 = vmax.f32 %v16770_v57, 0.0  ;;  %v16776_v31 = vld [vmem:[#allocation88_spill] sm:$0xff] }
 0x647   :  { %16766 = vst [vmem:[#allocation62_spill] sm:$0xff] %v13634_v7  ;;  %v16194_v25 = vmax.f32 %v13634_v7, 0.0 }
 0x648   :  { %v3087_v54 = vpop.f32.mrb[152].mxu1  ;;  %v3340_v3 = vpack.c.bf16 %v16197_v62, %v16198_v51  ;;  %v16777_v62 = vmax.f32 %v16776_v31, 0.0 }
 0x649   :  { %v3176_v48 = vadd.f32 %v13222_v1, %v3087_v54  ;;  %v3089_v29 = vpop.f32.mrb[153].mxu1  ;;  %v3341_v9 = vpack.c.bf16 %v16194_v25, %v16195_v63  ;;  %v16773_v25 = vld [vmem:[#allocation87_spill] sm:$0xff] }
 0x64a   :  { %v3177_v58 = vadd.f32 %v13230_v14, %v3089_v29  ;;  %v3091_v28 = vpop.f32.mrb[154].mxu1 }
 0x64b   :  { %v3178_v46 = vadd.f32 %v13222_v1, %v3091_v28  ;;  %v3093_v5 = vpop.f32.mrb[155].mxu1  ;;  %3820 = vmatprep.mubr.bf16.mxu0 %v3341_v9  ;;  %3989 = vmatprep.mubr.bf16.mxu1 %v3341_v9  ;;  %v13658_v7 = vadd.f32 %v3176_v48, %v16771_v23  ;;  %v16774_v28 = vmax.f32 %v16773_v25, 0.0 }
 0x64c   :  { %v13653_v54 = vadd.f32 %v3177_v58, %v16768_v59  ;;  %v3179_v29 = vadd.f32 %v13230_v14, %v3093_v5  ;;  %3821 = vmatmul.mubr.bf16.gmra.mrb[184].mxu0 %v3340_v3  ;;  %3990 = vmatmul.mubr.bf16.gmra.mrb[212].mxu1 %v3340_v3 }
 0x64d   :  { %16772 = vst [vmem:[#allocation66_spill] sm:$0xff] %v13658_v7  ;;  %v13662_v63 = vadd.f32 %v3178_v46, %v16774_v28  ;;  %v16206_v25 = vmax.f32 %v13658_v7, 0.0 }
 0x64e   :  { %16769 = vst [vmem:[#allocation64_spill] sm:$0xff] %v13653_v54  ;;  %v13666_v51 = vadd.f32 %v3179_v29, %v16777_v62  ;;  %v16203_v5 = vmax.f32 %v13653_v54, 0.0  ;;  %v16779_v29 = vld [vmem:[#allocation90_spill] sm:$0xff]  ;;  %v16782_v54 = vld [vmem:[#allocation89_spill] sm:$0xff] }
 0x64f   :  { %16775 = vst [vmem:[#allocation65_spill] sm:$0xff] %v13662_v63  ;;  %v16205_v58 = vmax.f32 %v13662_v63, 0.0  ;;  %v16780_v28 = vmax.f32 %v16779_v29, 0.0  ;;  %v16783_v41 = vmax.f32 %v16782_v54, 0.0  ;;  %v16788_v63 = vld [vmem:[#allocation92_spill] sm:$0xff] }
 0x650   :  { %16778 = vst [vmem:[#allocation67_spill] sm:$0xff] %v13666_v51  ;;  %v3097_v38 = vpop.f32.mrb[156].mxu1  ;;  %v16202_v9 = vmax.f32 %v13666_v51, 0.0 }
 0x651   :  { %v3180_v23 = vadd.f32 %v13222_v1, %v3097_v38  ;;  %v3099_v57 = vpop.f32.mrb[157].mxu1  ;;  %v3342_v59 = vpack.c.bf16 %v16205_v58, %v16206_v25  ;;  %v16789_v58 = vmax.f32 %v16788_v63, 0.0 }
 0x652   :  { %v3181_v48 = vadd.f32 %v13230_v14, %v3099_v57  ;;  %v3101_v46 = vpop.f32.mrb[158].mxu1  ;;  %v3343_v31 = vpack.c.bf16 %v16202_v9, %v16203_v5  ;;  %v16785_v9 = vld [vmem:[#allocation91_spill] sm:$0xff] }
 0x653   :  { %v3182_v62 = vadd.f32 %v13222_v1, %v3101_v46  ;;  %v3103_v3 = vpop.f32.mrb[159].mxu1  ;;  %v13690_v51 = vadd.f32 %v3180_v23, %v16783_v41  ;;  %v16786_v46 = vmax.f32 %v16785_v9, 0.0 }
 0x654   :  { %v13685_v38 = vadd.f32 %v3181_v48, %v16780_v28  ;;  %v3183_v57 = vadd.f32 %v13230_v14, %v3103_v3  ;;  %3830 = vmatprep.mubr.bf16.mxu0 %v3343_v31  ;;  %3997 = vmatprep.mubr.bf16.mxu1 %v3343_v31 }
 0x655   :  { %16784 = vst [vmem:[#allocation70_spill] sm:$0xff] %v13690_v51  ;;  %v13694_v5 = vadd.f32 %v3182_v62, %v16786_v46  ;;  %3831 = vmatmul.mubr.bf16.gmra.mrb[188].mxu0 %v3342_v59  ;;  %3998 = vmatmul.mubr.bf16.gmra.mrb[216].mxu1 %v3342_v59  ;;  %v16213_v9 = vmax.f32 %v13690_v51, 0.0 }
 0x656   :  { %16781 = vst [vmem:[#allocation68_spill] sm:$0xff] %v13685_v38  ;;  %v13698_v25 = vadd.f32 %v3183_v57, %v16789_v58  ;;  %v16211_v3 = vmax.f32 %v13685_v38, 0.0  ;;  %v16791_v57 = vld [vmem:[#allocation94_spill] sm:$0xff]  ;;  %v16794_v38 = vld [vmem:[#allocation93_spill] sm:$0xff] }
 0x657   :  { %16787 = vst [vmem:[#allocation69_spill] sm:$0xff] %v13694_v5  ;;  %v16212_v48 = vmax.f32 %v13694_v5, 0.0  ;;  %v16792_v46 = vmax.f32 %v16791_v57, 0.0  ;;  %v16795_v7 = vmax.f32 %v16794_v38, 0.0 }
 0x658   :  { %16790 = vst [vmem:[#allocation71_spill] sm:$0xff] %v13698_v25  ;;  %v3107_v29 = vpop.f32.mrb[160].mxu1  ;;  %v16210_v31 = vmax.f32 %v13698_v25, 0.0 }
 0x659   :  { %v3184_v41 = vadd.f32 %v13222_v1, %v3107_v29  ;;  %v3109_v54 = vpop.f32.mrb[161].mxu1  ;;  %v3344_v28 = vpack.c.bf16 %v16212_v48, %v16213_v9 }
 0x65a   :  { %v3185_v23 = vadd.f32 %v13230_v14, %v3109_v54  ;;  %v3111_v62 = vpop.f32.mrb[162].mxu1  ;;  %v3345_v63 = vpack.c.bf16 %v16210_v31, %v16211_v3  ;;  %v16797_v31 = vld [vmem:[#allocation95_spill] sm:$0xff]  ;;  %v16800_v3 = vld [vmem:[#allocation96_spill] sm:$0xff] }
 0x65b   :  { %v3186_v58 = vadd.f32 %v13222_v1, %v3111_v62  ;;  %v3113_v59 = vpop.f32.mrb[163].mxu1  ;;  %v13722_v25 = vadd.f32 %v3184_v41, %v16795_v7  ;;  %v16798_v1 = vmax.f32 %v16797_v31, 0.0  ;;  %v16801_v48 = vmax.f32 %v16800_v3, 0.0 }
 0x65c   :  { %v13717_v29 = vadd.f32 %v3185_v23, %v16792_v46  ;;  %v3187_v54 = vadd.f32 %v13230_v14, %v3113_v59  ;;  %3840 = vmatprep.mubr.bf16.mxu0 %v3345_v63  ;;  %4005 = vmatprep.mubr.bf16.mxu1 %v3345_v63  ;;  %v16218_v31 = vrot.slane %v13227_v56, 3 }
 0x65d   :  { %16796 = vst [vmem:[#allocation74_spill] sm:$0xff] %v13722_v25  ;;  %v13726_v62 = vadd.f32 %v3186_v58, %v16798_v1  ;;  %3841 = vmatmul.mubr.bf16.gmra.mrb[192].mxu0 %v3344_v28  ;;  %4006 = vmatmul.mubr.bf16.gmra.mrb[220].mxu1 %v3344_v28  ;;  %v16216_v38 = vmax.f32 %v13722_v25, 0.0 }
 0x65e   :  { %16793 = vst [vmem:[#allocation72_spill] sm:$0xff] %v13717_v29  ;;  %v13730_v9 = vadd.f32 %v3187_v54, %v16801_v48  ;;  %v16217_v14 = vmax.f32 %v13717_v29, 0.0 }
 0x65f   :  { %16799 = vst [vmem:[#allocation73_spill] sm:$0xff] %v13726_v62  ;;  %v16215_v23 = vmax.f32 %v13726_v62, 0.0 }
 0x660   :  { %16802 = vst [vmem:[#allocation75_spill] sm:$0xff] %v13730_v9  ;;  %v16214_v63 = vmax.f32 %v13730_v9, 0.0 }
 0x661   :  { %v3346_v48 = vpack.c.bf16 %v16215_v23, %v16216_v38 }
 0x662   :  { %v3347_v7 = vpack.c.bf16 %v16214_v63, %v16217_v14 }
 0x664   :  { %3850 = vmatprep.mubr.bf16.mxu0 %v3347_v7  ;;  %4013 = vmatprep.mubr.bf16.mxu1 %v3347_v7 }
 0x665   :  { %3851 = vmatmul.mubr.bf16.gmra.mrb[196].mxu0 %v3346_v48  ;;  %4014 = vmatmul.mubr.bf16.gmra.mrb[224].mxu1 %v3346_v48 }
 0x666   :  { %4090 = vmatprep.mubr.f32.mxu0 %v16218_v31  ;;  %4460 = vmatprep.mubr.bf16.mxu1 %v16505_v50 }
 0x676   :  { %v3702_v3 = vpop.f32.mrb[136].mxu0  ;;  %v9095_v41 = vpop.f32.mrb[164].mxu1 }
 0x677   :  { %v3704_v58 = vpop.f32.mrb[137].mxu0  ;;  %v9096_v59 = vpop.f32.mrb[165].mxu1 }
 0x678   :  { %v9097_v28 = vadd.f32 %v9096_v59, %v9095_v41  ;;  %v3706_v57 = vpop.f32.mrb[138].mxu0  ;;  %v9098_v46 = vpop.f32.mrb[166].mxu1 }
 0x679   :  { %v10023_v54 = vpack.c.bf16 %v3706_v57, %v3702_v3  ;;  %v3708_v1 = vpop.f32.mrb[139].mxu0  ;;  %v9099_v63 = vpop.f32.mrb[167].mxu1 }
 0x67a   :  { %v10021_v23 = vpack.c.bf16 %v3708_v1, %v3704_v58  ;;  %v9100_v38 = vadd.f32 %v9099_v63, %v9098_v46  ;;  %4098 = vperm.xlu0 %10207, %v9097_v28  }
 0x67c   :  { %10022 = vmatprep.subr.bf16.mxu0 %v10021_v23  ;;  %4428 = vmatprep.subr.bf16.mxu1 %v10021_v23 }
 0x67d   :  { %4103 = vperm.xlu1 %10208, %v9100_v38   ;;  %10024 = vmatpush1.bf16.xpose.msra.mxu0 %v10023_v54 }
 0x67e   :  { %4429 = vmatpush1.bf16.msra.mxu1 %v10023_v54 }
 0x67f   :  { %v3712_v7 = vpop.f32.mrb[140].mxu0  ;;  %v9101_v48 = vpop.f32.mrb[168].mxu1 }
 0x680   :  { %v3714_v14 = vpop.f32.mrb[141].mxu0  ;;  %v9102_v31 = vpop.f32.mrb[169].mxu1 }
 0x681   :  { %v9103_v9 = vadd.f32 %v9102_v31, %v9101_v48  ;;  %v3716_v62 = vpop.f32.mrb[142].mxu0  ;;  %v9104_v41 = vpop.f32.mrb[170].mxu1 }
 0x682   :  { %v10027_v59 = vpack.c.bf16 %v3716_v62, %v3712_v7  ;;  %v3718_v25 = vpop.f32.mrb[143].mxu0  ;;  %v9105_v3 = vpop.f32.mrb[171].mxu1 }
 0x683   :  { %v10025_v57 = vpack.c.bf16 %v3718_v25, %v3714_v14  ;;  %v9106_v29 = vadd.f32 %v9105_v3, %v9104_v41  ;;  %4108 = vperm.xlu1 %10208, %v9103_v9  }
 0x685   :  { %10026 = vmatprep.subr.bf16.mxu0 %v10025_v57  ;;  %4430 = vmatprep.subr.bf16.mxu1 %v10025_v57 }
 0x686   :  { %4113 = vperm.xlu0 %10207, %v9106_v29   ;;  %10028 = vmatpush1.bf16.xpose.msra.mxu0 %v10027_v59 }
 0x687   :  { %4431 = vmatpush1.bf16.msra.mxu1 %v10027_v59  ;;  %v3722_v23 = vpop.f32.mrb[144].mxu0  ;;  %v9107_v63 = vpop.f32.mrb[172].mxu1 }
 0x688   :  { %v3724_v38 = vpop.f32.mrb[145].mxu0  ;;  %v9108_v58 = vpop.f32.mrb[173].mxu1 }
 0x689   :  { %v9109_v28 = vadd.f32 %v9108_v58, %v9107_v63  ;;  %v3726_v46 = vpop.f32.mrb[146].mxu0  ;;  %v9110_v31 = vpop.f32.mrb[174].mxu1 }
 0x68a   :  { %v10031_v54 = vpack.c.bf16 %v3726_v46, %v3722_v23  ;;  %v3728_v1 = vpop.f32.mrb[147].mxu0  ;;  %v9111_v62 = vpop.f32.mrb[175].mxu1 }
 0x68b   :  { %v10029_v7 = vpack.c.bf16 %v3728_v1, %v3724_v38  ;;  %v9112_v48 = vadd.f32 %v9111_v62, %v9110_v31  ;;  %4118 = vperm.xlu1 %10208, %v9109_v28  }
 0x68d   :  { %10030 = vmatprep.subr.bf16.mxu0 %v10029_v7  ;;  %4432 = vmatprep.subr.bf16.mxu1 %v10029_v7 }
 0x68e   :  { %4123 = vperm.xlu0 %10207, %v9112_v48   ;;  %10032 = vmatpush1.bf16.xpose.msra.mxu0 %v10031_v54 }
 0x68f   :  { %4433 = vmatpush1.bf16.msra.mxu1 %v10031_v54 }
 0x690   :  { %v3732_v25 = vpop.f32.mrb[148].mxu0  ;;  %v9113_v9 = vpop.f32.mrb[176].mxu1 }
 0x691   :  { %v3734_v29 = vpop.f32.mrb[149].mxu0  ;;  %v9114_v14 = vpop.f32.mrb[177].mxu1 }
 0x692   :  { %v9115_v41 = vadd.f32 %v9114_v14, %v9113_v9  ;;  %v3736_v59 = vpop.f32.mrb[150].mxu0  ;;  %v9116_v3 = vpop.f32.mrb[178].mxu1 }
 0x693   :  { %v10035_v57 = vpack.c.bf16 %v3736_v59, %v3732_v25  ;;  %v3738_v63 = vpop.f32.mrb[151].mxu0  ;;  %v9117_v23 = vpop.f32.mrb[179].mxu1 }
 0x694   :  { %v10033_v58 = vpack.c.bf16 %v3738_v63, %v3734_v29  ;;  %v9118_v46 = vadd.f32 %v9117_v23, %v9116_v3  ;;  %4128 = vperm.xlu1 %10208, %v9115_v41  }
 0x696   :  { %10034 = vmatprep.subr.bf16.mxu0 %v10033_v58  ;;  %4434 = vmatprep.subr.bf16.mxu1 %v10033_v58 }
 0x697   :  { %4133 = vperm.xlu0 %10207, %v9118_v46   ;;  %10036 = vmatpush1.bf16.xpose.msra.mxu0 %v10035_v57 }
 0x698   :  { %4435 = vmatpush1.bf16.msra.mxu1 %v10035_v57  ;;  %v3742_v38 = vpop.f32.mrb[152].mxu0  ;;  %v9119_v28 = vpop.f32.mrb[180].mxu1 }
 0x699   :  { %v3744_v31 = vpop.f32.mrb[153].mxu0  ;;  %v9120_v54 = vpop.f32.mrb[181].mxu1 }
 0x69a   :  { %v9121_v1 = vadd.f32 %v9120_v54, %v9119_v28  ;;  %v3746_v62 = vpop.f32.mrb[154].mxu0  ;;  %v9122_v7 = vpop.f32.mrb[182].mxu1 }
 0x69b   :  { %v10039_v48 = vpack.c.bf16 %v3746_v62, %v3742_v38  ;;  %v3748_v9 = vpop.f32.mrb[155].mxu0  ;;  %v9123_v25 = vpop.f32.mrb[183].mxu1 }
 0x69c   :  { %v10037_v14 = vpack.c.bf16 %v3748_v9, %v3744_v31  ;;  %v9124_v59 = vadd.f32 %v9123_v25, %v9122_v7  ;;  %4138 = vperm.xlu1 %10208, %v9121_v1  }
 0x69e   :  { %10038 = vmatprep.subr.bf16.mxu0 %v10037_v14  ;;  %4436 = vmatprep.subr.bf16.mxu1 %v10037_v14 }
 0x69f   :  { %4143 = vperm.xlu0 %10207, %v9124_v59   ;;  %10040 = vmatpush1.bf16.xpose.msra.mxu0 %v10039_v48 }
 0x6a0   :  { %4437 = vmatpush1.bf16.msra.mxu1 %v10039_v48  ;;  %v3752_v29 = vpop.f32.mrb[156].mxu0  ;;  %v9125_v41 = vpop.f32.mrb[184].mxu1 }
 0x6a1   :  { %v3754_v3 = vpop.f32.mrb[157].mxu0  ;;  %v9126_v57 = vpop.f32.mrb[185].mxu1 }
 0x6a2   :  { %v9127_v63 = vadd.f32 %v9126_v57, %v9125_v41  ;;  %v3756_v23 = vpop.f32.mrb[158].mxu0  ;;  %v9128_v58 = vpop.f32.mrb[186].mxu1 }
 0x6a3   :  { %v10043_v46 = vpack.c.bf16 %v3756_v23, %v3752_v29  ;;  %v3758_v28 = vpop.f32.mrb[159].mxu0  ;;  %v9129_v38 = vpop.f32.mrb[187].mxu1 }
 0x6a4   :  { %v10041_v54 = vpack.c.bf16 %v3758_v28, %v3754_v3  ;;  %v9130_v62 = vadd.f32 %v9129_v38, %v9128_v58  ;;  %4148 = vperm.xlu1 %10208, %v9127_v63  }
 0x6a6   :  { %10042 = vmatprep.subr.bf16.mxu0 %v10041_v54  ;;  %4438 = vmatprep.subr.bf16.mxu1 %v10041_v54 }
 0x6a7   :  { %4153 = vperm.xlu0 %10207, %v9130_v62   ;;  %10044 = vmatpush1.bf16.xpose.msra.mxu0 %v10043_v46 }
 0x6a8   :  { %4439 = vmatpush1.bf16.msra.mxu1 %v10043_v46  ;;  %v3762_v31 = vpop.f32.mrb[160].mxu0  ;;  %v9131_v1 = vpop.f32.mrb[188].mxu1 }
 0x6a9   :  { %v3764_v7 = vpop.f32.mrb[161].mxu0  ;;  %v9132_v48 = vpop.f32.mrb[189].mxu1 }
 0x6aa   :  { %v9133_v9 = vadd.f32 %v9132_v48, %v9131_v1  ;;  %v3766_v25 = vpop.f32.mrb[162].mxu0  ;;  %v9134_v14 = vpop.f32.mrb[190].mxu1 }
 0x6ab   :  { %v10047_v59 = vpack.c.bf16 %v3766_v25, %v3762_v31  ;;  %v3768_v41 = vpop.f32.mrb[163].mxu0  ;;  %v9135_v29 = vpop.f32.mrb[191].mxu1 }
 0x6ac   :  { %v10045_v57 = vpack.c.bf16 %v3768_v41, %v3764_v7  ;;  %v9136_v23 = vadd.f32 %v9135_v29, %v9134_v14  ;;  %4158 = vperm.xlu1 %10208, %v9133_v9  }
 0x6ae   :  { %10046 = vmatprep.subr.bf16.mxu0 %v10045_v57  ;;  %4440 = vmatprep.subr.bf16.mxu1 %v10045_v57 }
 0x6af   :  { %4163 = vperm.xlu0 %10207, %v9136_v23   ;;  %10048 = vmatpush1.bf16.xpose.msra.mxu0 %v10047_v59 }
 0x6b0   :  { %4441 = vmatpush1.bf16.msra.mxu1 %v10047_v59 }
 0x6cb   :  { %v3772_v3 = vpop.f32.mrb[164].mxu0  ;;  %v9137_v63 = vpop.f32.mrb[192].mxu1 }
 0x6cc   :  { %v3774_v58 = vpop.f32.mrb[165].mxu0  ;;  %v9138_v46 = vpop.f32.mrb[193].mxu1 }
 0x6cd   :  { %v9139_v28 = vadd.f32 %v9138_v46, %v9137_v63  ;;  %v3776_v38 = vpop.f32.mrb[166].mxu0  ;;  %v9140_v54 = vpop.f32.mrb[194].mxu1 }
 0x6ce   :  { %v10051_v62 = vpack.c.bf16 %v3776_v38, %v3772_v3  ;;  %v3778_v1 = vpop.f32.mrb[167].mxu0  ;;  %v9141_v31 = vpop.f32.mrb[195].mxu1 }
 0x6cf   :  { %v10049_v48 = vpack.c.bf16 %v3778_v1, %v3774_v58  ;;  %v9142_v25 = vadd.f32 %v9141_v31, %v9140_v54  ;;  %4168 = vperm.xlu1 %10208, %v9139_v28   ;;  %v16223_v58 = vrot.slane %v13219_v22, 3 }
 0x6d1   :  { %10050 = vmatprep.subr.bf16.mxu0 %v10049_v48  ;;  %4442 = vmatprep.subr.bf16.mxu1 %v10049_v48 }
 0x6d2   :  { %4173 = vperm.xlu0 %10207, %v9142_v25   ;;  %10052 = vmatpush1.bf16.xpose.msra.mxu0 %v10051_v62 }
 0x6d3   :  { %4443 = vmatpush1.bf16.msra.mxu1 %v10051_v62  ;;  %v3782_v7 = vpop.f32.mrb[168].mxu0  ;;  %v9143_v9 = vpop.f32.mrb[196].mxu1  ;;  %v16803_v62 = vrot.slane %v13227_v56, 3 }
 0x6d4   :  { %v3784_v14 = vpop.f32.mrb[169].mxu0  ;;  %v9144_v59 = vpop.f32.mrb[197].mxu1 }
 0x6d5   :  { %v9145_v41 = vadd.f32 %v9144_v59, %v9143_v9  ;;  %v3786_v29 = vpop.f32.mrb[170].mxu0  ;;  %v9146_v57 = vpop.f32.mrb[198].mxu1 }
 0x6d6   :  { %v13748_v23 = vpack.c.bf16 %v3786_v29, %v3782_v7  ;;  %v3788_v3 = vpop.f32.mrb[171].mxu0  ;;  %v9147_v63 = vpop.f32.mrb[199].mxu1 }
 0x6d7   :  { %v10053_v46 = vpack.c.bf16 %v3788_v3, %v3784_v14  ;;  %v9148_v28 = vadd.f32 %v9147_v63, %v9146_v57  ;;  %4613 = vperm.xlu1 %10208, %v9145_v41  }
 0x6d9   :  { %10054 = vmatprep.subr.bf16.mxu0 %v10053_v46  ;;  %4943 = vmatprep.subr.bf16.mxu1 %v10053_v46 }
 0x6da   :  { %4618 = vperm.xlu0 %10207, %v9148_v28   ;;  %4091 = vmatmul.mubr.f32.vlgmr.msra.gmra.mrb[134].mxu0 %v16223_v58 }
 0x6db   :  { %10056 = vmatpush1.bf16.xpose.msra.mxu0 %v13748_v23  ;;  %v3792_v38 = vpop.f32.mrb[172].mxu0  ;;  %v9149_v54 = vpop.f32.mrb[200].mxu1  ;;  %4605 = vmatprep.mubr.f32.mxu0 %v16803_v62 }
 0x6dc   :  { %v3794_v1 = vpop.f32.mrb[173].mxu0  ;;  %v9150_v31 = vpop.f32.mrb[201].mxu1 }
 0x6dd   :  { %v9151_v48 = vadd.f32 %v9150_v31, %v9149_v54  ;;  %v3796_v25 = vpop.f32.mrb[174].mxu0  ;;  %v9152_v7 = vpop.f32.mrb[202].mxu1 }
 0x6de   :  { %v13756_v9 = vpack.c.bf16 %v3796_v25, %v3792_v38  ;;  %v3798_v14 = vpop.f32.mrb[175].mxu0  ;;  %v9153_v59 = vpop.f32.mrb[203].mxu1 }
 0x6df   :  { %v13758_v41 = vpack.c.bf16 %v3798_v14, %v3794_v1  ;;  %v9154_v29 = vadd.f32 %v9153_v59, %v9152_v7  ;;  %4623 = vperm.xlu0 %10207, %v9151_v48  }
 0x6e1   :  { %4628 = vperm.xlu1 %10208, %v9154_v29   ;;  %10058 = vmatprep.subr.bf16.mxu0 %v13758_v41 }
 0x6e3   :  { %10060 = vmatpush1.bf16.xpose.msra.mxu0 %v13756_v9  ;;  %v3802_v56 = vpop.f32.mrb[176].mxu0  ;;  %v9155_v57 = vpop.f32.mrb[204].mxu1 }
 0x6e4   :  { %v3804_v3 = vpop.f32.mrb[177].mxu0  ;;  %v9156_v63 = vpop.f32.mrb[205].mxu1 }
 0x6e5   :  { %v9157_v46 = vadd.f32 %v9156_v63, %v9155_v57  ;;  %v3806_v28 = vpop.f32.mrb[178].mxu0  ;;  %v9158_v54 = vpop.f32.mrb[206].mxu1 }
 0x6e6   :  { %v13762_v38 = vpack.c.bf16 %v3806_v28, %v3802_v56  ;;  %v3808_v62 = vpop.f32.mrb[179].mxu0  ;;  %v9159_v31 = vpop.f32.mrb[207].mxu1 }
 0x6e7   :  { %v13764_v1 = vpack.c.bf16 %v3808_v62, %v3804_v3  ;;  %v9160_v25 = vadd.f32 %v9159_v31, %v9158_v54  ;;  %4633 = vperm.xlu0 %10207, %v9157_v46  }
 0x6e9   :  { %4638 = vperm.xlu1 %10208, %v9160_v25   ;;  %10062 = vmatprep.subr.bf16.mxu0 %v13764_v1 }
 0x6eb   :  { %10064 = vmatpush1.bf16.xpose.msra.mxu0 %v13762_v38 }
 0x717   :  { %v3812_v48 = vpop.f32.mrb[180].mxu0  ;;  %v9161_v7 = vpop.f32.mrb[208].mxu1 }
 0x718   :  { %v3814_v14 = vpop.f32.mrb[181].mxu0  ;;  %v9162_v59 = vpop.f32.mrb[209].mxu1 }
 0x719   :  { %v9163_v29 = vadd.f32 %v9162_v59, %v9161_v7  ;;  %v3816_v57 = vpop.f32.mrb[182].mxu0  ;;  %v9164_v63 = vpop.f32.mrb[210].mxu1 }
 0x71a   :  { %v13768_v56 = vpack.c.bf16 %v3816_v57, %v3812_v48  ;;  %v3818_v28 = vpop.f32.mrb[183].mxu0  ;;  %v9165_v3 = vpop.f32.mrb[211].mxu1 }
 0x71b   :  { %v13770_v58 = vpack.c.bf16 %v3818_v28, %v3814_v14  ;;  %4643 = vperm.xlu0 %10207, %v9163_v29   ;;  %v9166_v46 = vadd.f32 %v9165_v3, %v9164_v63 }
 0x71d   :  { %10066 = vmatprep.subr.bf16.mxu0 %v13770_v58  ;;  %4648 = vperm.xlu1 %10208, %v9166_v46  }
 0x71e   :  { %10068 = vmatpush1.bf16.xpose.msra.mxu0 %v13768_v56 }
 0x71f   :  { %v3822_v54 = vpop.f32.mrb[184].mxu0  ;;  %v9167_v62 = vpop.f32.mrb[212].mxu1 }
 0x720   :  { %v3824_v31 = vpop.f32.mrb[185].mxu0  ;;  %v9168_v25 = vpop.f32.mrb[213].mxu1 }
 0x721   :  { %v9169_v7 = vadd.f32 %v9168_v25, %v9167_v62  ;;  %v3826_v59 = vpop.f32.mrb[186].mxu0  ;;  %v9170_v5 = vpop.f32.mrb[214].mxu1 }
 0x722   :  { %v13774_v48 = vpack.c.bf16 %v3826_v59, %v3822_v54  ;;  %v3828_v57 = vpop.f32.mrb[187].mxu0  ;;  %v9171_v14 = vpop.f32.mrb[215].mxu1 }
 0x723   :  { %v13776_v28 = vpack.c.bf16 %v3828_v57, %v3824_v31  ;;  %v9172_v29 = vadd.f32 %v9171_v14, %v9170_v5  ;;  %4653 = vperm.xlu0 %10207, %v9169_v7  }
 0x725   :  { %4658 = vperm.xlu1 %10208, %v9172_v29   ;;  %10070 = vmatprep.subr.bf16.mxu0 %v13776_v28 }
 0x726   :  { %10072 = vmatpush1.bf16.xpose.msra.mxu0 %v13774_v48 }
 0x728   :  { %v3832_v63 = vpop.f32.mrb[188].mxu0  ;;  %v9173_v3 = vpop.f32.mrb[216].mxu1 }
 0x729   :  { %v3834_v46 = vpop.f32.mrb[189].mxu0  ;;  %v9174_v51 = vpop.f32.mrb[217].mxu1 }
 0x72a   :  { %v9175_v62 = vadd.f32 %v9174_v51, %v9173_v3  ;;  %v3836_v25 = vpop.f32.mrb[190].mxu0  ;;  %v9176_v13 = vpop.f32.mrb[218].mxu1 }
 0x72b   :  { %v13780_v54 = vpack.c.bf16 %v3836_v25, %v3832_v63  ;;  %v3838_v59 = vpop.f32.mrb[191].mxu0  ;;  %v9177_v37 = vpop.f32.mrb[219].mxu1 }
 0x72c   :  { %v13782_v31 = vpack.c.bf16 %v3838_v59, %v3834_v46  ;;  %v9178_v5 = vadd.f32 %v9177_v37, %v9176_v13  ;;  %4663 = vperm.xlu0 %10207, %v9175_v62  }
 0x72e   :  { %4668 = vperm.xlu1 %10208, %v9178_v5   ;;  %10074 = vmatprep.subr.bf16.mxu0 %v13782_v31 }
 0x72f   :  { %10076 = vmatpush1.bf16.xpose.msra.mxu0 %v13780_v54 }
 0x730   :  { %v3842_v7 = vpop.f32.mrb[192].mxu0  ;;  %v9179_v57 = vpop.f32.mrb[220].mxu1 }
 0x731   :  { %v3844_v14 = vpop.f32.mrb[193].mxu0  ;;  %v9180_v29 = vpop.f32.mrb[221].mxu1 }
 0x732   :  { %v9181_v51 = vadd.f32 %v9180_v29, %v9179_v57  ;;  %v3846_v3 = vpop.f32.mrb[194].mxu0  ;;  %v9182_v27 = vpop.f32.mrb[222].mxu1 }
 0x733   :  { %v13786_v63 = vpack.c.bf16 %v3846_v3, %v3842_v7  ;;  %v3848_v25 = vpop.f32.mrb[195].mxu0  ;;  %v9183_v60 = vpop.f32.mrb[223].mxu1 }
 0x734   :  { %v13788_v46 = vpack.c.bf16 %v3848_v25, %v3844_v14  ;;  %v9184_v13 = vadd.f32 %v9183_v60, %v9182_v27  ;;  %4673 = vperm.xlu0 %10207, %v9181_v51   ;;  %v16804_v60 = vrot.slane %v13219_v22, 3  ;;  %v4099_v51 = vpop.permute.xlu0 %4098 }
 0x736   :  { %4678 = vperm.xlu1 %10208, %v9184_v13   ;;  %10078 = vmatprep.subr.bf16.mxu0 %v13788_v46  ;;  %v4104_v13 = vpop.permute.xlu1 %4103 }
 0x737   :  { %10080 = vmatpush1.bf16.xpose.msra.mxu0 %v13786_v63 }
 0x738   :  { %v3852_v37 = vpop.f32.mrb[196].mxu0  ;;  %v9185_v62 = vpop.f32.mrb[224].mxu1 }
 0x739   :  { %v3854_v59 = vpop.f32.mrb[197].mxu0  ;;  %v9186_v5 = vpop.f32.mrb[225].mxu1 }
 0x73a   :  { %v13792_v57 = vadd.f32 %v9186_v5, %v9185_v62  ;;  %v3856_v29 = vpop.f32.mrb[198].mxu0  ;;  %v9188_v7 = vpop.f32.mrb[226].mxu1 }
 0x73b   :  { %v13794_v3 = vpack.c.bf16 %v3856_v29, %v3852_v37  ;;  %v3858_v52 = vpop.f32.mrb[199].mxu0  ;;  %v9189_v14 = vpop.f32.mrb[227].mxu1 }
 0x73c   :  { %v13796_v25 = vpack.c.bf16 %v3858_v52, %v3854_v59  ;;  %v13798_v27 = vadd.f32 %v9189_v14, %v9188_v7  ;;  %v4109_v62 = vpop.permute.xlu1 %4108  ;;  %v4114_v5 = vpop.permute.xlu0 %4113 }
 0x73e   :  { %10082 = vmatprep.subr.bf16.mxu0 %v13796_v25 }
 0x73f   :  { %10084 = vmatpush1.bf16.xpose.msra.mxu0 %v13794_v3 }
 0x740   :  { %v4119_v52 = vpop.permute.xlu1 %4118  ;;  %v4124_v59 = vpop.permute.xlu0 %4123 }
 0x744   :  { %v4129_v32 = vpop.permute.xlu1 %4128 }
 0x746   :  { %4606 = vmatmul.mubr.f32.vlgmr.msra.gmra.mrb[200].mxu0 %v16804_v60 }
 0x7ad   :  { %v4092_v16 = vpop.f32.mrb[134].mxu0 }
 0x7ae   :  { %v13805_v37 = vrot.slane %v4092_v16, %v11863_v35  ;;  %v4094_v29 = vpop.f32.mrb[135].mxu0 }
 0x7b0   :  { %v4181_v7 = vadd.f32 %v13805_v37, %v4104_v13  ;;  %v4180_v14 = vadd.f32 %v13805_v37, %v4099_v51  ;;  %v4183_v53 = vadd.f32 %v13805_v37, %v4114_v5  ;;  %v4182_v22 = vadd.f32 %v13805_v37, %v4109_v62  ;;  %v4134_v13 = vpop.permute.xlu0 %4133 }
 0x7b1   :  { %v4185_v60 = vadd.f32 %v13805_v37, %v4124_v59  ;;  %v4184_v33 = vadd.f32 %v13805_v37, %v4119_v52  ;;  %v4187_v52 = vadd.f32 %v13805_v37, %v4134_v13  ;;  %v4186_v43 = vadd.f32 %v13805_v37, %v4129_v32 }
 0x7b2   :  { %vm4197_vm9 = vcmp.gt.f32.partialorder %v4181_v7, 0.0  ;;  %v4213_v55 = vmul.f32 0.2, %v4181_v7  ;;  %vm4196_vm10 = vcmp.gt.f32.partialorder %v4180_v14, 0.0  ;;  %v4212_v16 = vmul.f32 0.2, %v4180_v14 }
 0x7b3   :  { %vm4199_vm11 = vcmp.gt.f32.partialorder %v4183_v53, 0.0  ;;  %v4215_v29 = vmul.f32 0.2, %v4183_v53  ;;  %vm4198_vm12 = vcmp.gt.f32.partialorder %v4182_v22, 0.0  ;;  %v4214_v8 = vmul.f32 0.2, %v4182_v22 }
 0x7b4   :  { %v4229_v20 = vsel %vm4197_vm9, %v4181_v7, %v4213_v55  ;;  %v4228_v51 = vsel %vm4196_vm10, %v4180_v14, %v4212_v16  ;;  %v4217_v59 = vmul.f32 0.2, %v4185_v60  ;;  %vm4201_vm13 = vcmp.gt.f32.partialorder %v4185_v60, 0.0  ;;  %v4139_v7 = vpop.permute.xlu1 %4138 }
 0x7b5   :  { %v13814_v5 = vadd.f32 %v4229_v20, %v12702_v6  ;;  %v13817_v62 = vadd.f32 %v4228_v51, %v12656_v40  ;;  %v4231_v11 = vsel %vm4199_vm11, %v4183_v53, %v4215_v29  ;;  %v4230_v2 = vsel %vm4198_vm12, %v4182_v22, %v4214_v8  ;;  %v4144_v20 = vpop.permute.xlu0 %4143 }
 0x7b6   :  { %vm4200_vm14 = vcmp.gt.f32.partialorder %v4184_v33, 0.0  ;;  %v4216_v55 = vmul.f32 0.2, %v4184_v33  ;;  %v13824_v14 = vadd.f32 %v4231_v11, %v12759_v45  ;;  %v13827_v16 = vadd.f32 %v4230_v2, %v12730_v19 }
 0x7b7   :  { %4262 = vmax.xlane.f32.xlu0 %v13814_v5  ;;  %4260 = vmax.xlane.f32.xlu1 %v13817_v62  ;;  %v4233_v13 = vsel %vm4201_vm13, %v4185_v60, %v4217_v59  ;;  %v4219_v53 = vmul.f32 0.2, %v4187_v52  ;;  %v4218_v22 = vmul.f32 0.2, %v4186_v43  ;;  %v4189_v32 = vadd.f32 %v13805_v37, %v4144_v20 }
 0x7b8   :  { %v4232_v8 = vsel %vm4200_vm14, %v4184_v33, %v4216_v55  ;;  %v4188_v29 = vadd.f32 %v13805_v37, %v4139_v7  ;;  %vm4203_vm15 = vcmp.gt.f32.partialorder %v4187_v52, 0.0  ;;  %vm4202_vm1 = vcmp.gt.f32.partialorder %v4186_v43, 0.0  ;;  %v4149_v51 = vpop.permute.xlu1 %4148 }
 0x7b9   :  { %v4154_v11 = vpop.permute.xlu0 %4153  ;;  %v13834_v45 = vadd.f32 %v4233_v13, %v12797_v39  ;;  %v13837_v2 = vadd.f32 %v4232_v8, %v12780_v61  ;;  %v4190_v60 = vadd.f32 %v13805_v37, %v4149_v51  ;;  %v4235_v59 = vsel %vm4203_vm15, %v4187_v52, %v4219_v53  ;;  %v16808_v61 = vld [vmem:[#allocation10_spill] sm:$0xff] }
 0x7ba   :  { %v4191_v33 = vadd.f32 %v13805_v37, %v4154_v11  ;;  %v4234_v55 = vsel %vm4202_vm1, %v4186_v43, %v4218_v22  ;;  %v4221_v7 = vmul.f32 0.2, %v4189_v32  ;;  %v4220_v20 = vmul.f32 0.2, %v4188_v29 }
 0x7bb   :  { %4266 = vmax.xlane.f32.xlu0 %v13824_v14  ;;  %4264 = vmax.xlane.f32.xlu1 %v13827_v16  ;;  %vm4205_vm2 = vcmp.gt.f32.partialorder %v4189_v32, 0.0  ;;  %vm4204_vm3 = vcmp.gt.f32.partialorder %v4188_v29, 0.0  ;;  %v13844_v39 = vadd.f32 %v4235_v59, %v12813_v12  ;;  %v13847_v8 = vadd.f32 %v4234_v55, %v12668_v18 }
 0x7bc   :  { %v4159_v19 = vpop.permute.xlu1 %4158  ;;  %v4223_v11 = vmul.f32 0.2, %v4191_v33  ;;  %v4222_v51 = vmul.f32 0.2, %v4190_v60  ;;  %v4237_v52 = vsel %vm4205_vm2, %v4189_v32, %v4221_v7  ;;  %v4236_v43 = vsel %vm4204_vm3, %v4188_v29, %v4220_v20 }
 0x7bd   :  { %v4164_v13 = vpop.permute.xlu0 %4163  ;;  %v4192_v22 = vadd.f32 %v13805_v37, %v4159_v19  ;;  %vm4207_vm4 = vcmp.gt.f32.partialorder %v4191_v33, 0.0  ;;  %vm4206_vm5 = vcmp.gt.f32.partialorder %v4190_v60, 0.0  ;;  %v13854_v59 = vadd.f32 %v4237_v52, %v12827_v30 }
 0x7be   :  { %v4193_v53 = vadd.f32 %v13805_v37, %v4164_v13  ;;  %v13857_v55 = vadd.f32 %v4236_v43, %v12697_v4  ;;  %v4239_v18 = vsel %vm4207_vm4, %v4191_v33, %v4223_v11  ;;  %v4238_v12 = vsel %vm4206_vm5, %v4190_v60, %v4222_v51  ;;  %v16805_v60 = vld [vmem:[#allocation123_spill] sm:$0xff] }
 0x7bf   :  { %4270 = vmax.xlane.f32.xlu0 %v13834_v45  ;;  %4268 = vmax.xlane.f32.xlu1 %v13837_v2  ;;  %v4224_v29 = vmul.f32 0.2, %v4192_v22  ;;  %vm4208_vm7 = vcmp.gt.f32.partialorder %v4192_v22, 0.0  ;;  %v13862_v19 = vadd.f32 %v4239_v18, %v12839_v0  ;;  %v13865_v7 = vadd.f32 %v4238_v12, %v12725_v47 }
 0x7c0   :  { %v4225_v32 = vmul.f32 0.2, %v4193_v53  ;;  %vm4209_vm6 = vcmp.gt.f32.partialorder %v4193_v53, 0.0  ;;  %v4169_v18 = vpop.permute.xlu1 %4168 }
 0x7c1   :  { %v4240_v13 = vsel %vm4208_vm7, %v4192_v22, %v4224_v29  ;;  %v4174_v12 = vpop.permute.xlu0 %4173  ;;  %v4194_v52 = vadd.f32 %v13805_v37, %v4169_v18  ;;  %v16806_v29 = vld [vmem:[#allocation124_spill] sm:$0xff] }
 0x7c2   :  { %v4241_v20 = vsel %vm4209_vm6, %v4193_v53, %v4225_v32  ;;  %v13873_v11 = vadd.f32 %v4240_v13, %v16805_v60  ;;  %v4195_v51 = vadd.f32 %v13805_v37, %v4174_v12  ;;  %v16807_v13 = vld [vmem:[#allocation24_spill] sm:$0xff] }
 0x7c3   :  { %4274 = vmax.xlane.f32.xlu0 %v13844_v39  ;;  %4272 = vmax.xlane.f32.xlu1 %v13847_v8  ;;  %v13870_v33 = vadd.f32 %v4241_v20, %v12756_v42  ;;  %v4226_v53 = vmul.f32 0.2, %v4194_v52  ;;  %vm4210_vm9 = vcmp.gt.f32.partialorder %v4194_v52, 0.0 }
 0x7c4   :  { %v4227_v43 = vmul.f32 0.2, %v4195_v51  ;;  %vm4211_vm8 = vcmp.gt.f32.partialorder %v4195_v51, 0.0 }
 0x7c5   :  { %v4242_v32 = vsel %vm4210_vm9, %v4194_v52, %v4226_v53 }
 0x7c6   :  { %v4243_v22 = vsel %vm4211_vm8, %v4195_v51, %v4227_v43  ;;  %v13885_v60 = vadd.f32 %v4242_v32, %v16807_v13 }
 0x7c7   :  { %4278 = vmax.xlane.f32.xlu0 %v13854_v59  ;;  %4276 = vmax.xlane.f32.xlu1 %v13857_v55  ;;  %v13882_v20 = vadd.f32 %v4243_v22, %v16806_v29 }
 0x7cb   :  { %4282 = vmax.xlane.f32.xlu0 %v13862_v19  ;;  %4280 = vmax.xlane.f32.xlu1 %v13865_v7 }
 0x7cf   :  { %4286 = vmax.xlane.f32.xlu0 %v13870_v33  ;;  %4284 = vmax.xlane.f32.xlu1 %v13873_v11 }
 0x7e0   :  { %4688 = vperm.xlu1 %10208, %v13798_v27   ;;  %v4619_v27 = vpop.permute.xlu0 %4618 }
 0x7e4   :  { %v4624_v12 = vpop.permute.xlu0 %4623 }
 0x7e5   :  { %4683 = vperm.xlu0 %10207, %v13792_v57   ;;  %v4614_v57 = vpop.permute.xlu1 %4613 }
 0x7e8   :  { %v4634_v52 = vpop.permute.xlu0 %4633 }
 0x7e9   :  { %v4629_v37 = vpop.permute.xlu1 %4628 }
 0x7ed   :  { %v4639_v43 = vpop.permute.xlu1 %4638 }
 0x804   :  { %4290 = vmax.xlane.f32.xlu0 %v13882_v20  ;;  %4288 = vmax.xlane.f32.xlu1 %v13885_v60 }
 0x819   :  { %v4607_v18 = vpop.f32.mrb[200].mxu0 }
 0x81a   :  { %v13890_v42 = vrot.slane %v4607_v18, %v11863_v35  ;;  %v4609_v51 = vpop.f32.mrb[201].mxu0  ;;  %v16810_v35 = vld [vmem:[#allocation11_spill] sm:$0xff] }
 0x81c   :  { %v4696_v53 = vadd.f32 %v13890_v42, %v4619_v27  ;;  %v4695_v22 = vadd.f32 %v13890_v42, %v4614_v57  ;;  %v4698_v32 = vadd.f32 %v13890_v42, %v4629_v37  ;;  %v4697_v13 = vadd.f32 %v13890_v42, %v4624_v12  ;;  %v16809_v37 = vld [vmem:[#allocation125_spill] sm:$0xff] }
 0x81d   :  { %v4700_v29 = vadd.f32 %v13890_v42, %v4639_v43  ;;  %v4699_v47 = vadd.f32 %v13890_v42, %v4634_v52 }
 0x81e   :  { %vm4712_vm10 = vcmp.gt.f32.partialorder %v4696_v53, 0.0  ;;  %v4728_v0 = vmul.f32 0.2, %v4696_v53  ;;  %vm4711_vm11 = vcmp.gt.f32.partialorder %v4695_v22, 0.0  ;;  %v4727_v18 = vmul.f32 0.2, %v4695_v22 }
 0x81f   :  { %vm4714_vm12 = vcmp.gt.f32.partialorder %v4698_v32, 0.0  ;;  %v4730_v51 = vmul.f32 0.2, %v4698_v32  ;;  %vm4713_vm13 = vcmp.gt.f32.partialorder %v4697_v13, 0.0  ;;  %v4729_v4 = vmul.f32 0.2, %v4697_v13 }
 0x820   :  { %v4744_v30 = vsel %vm4712_vm10, %v4696_v53, %v4728_v0  ;;  %v4743_v27 = vsel %vm4711_vm11, %v4695_v22, %v4727_v18  ;;  %v4732_v6 = vmul.f32 0.2, %v4700_v29  ;;  %vm4716_vm14 = vcmp.gt.f32.partialorder %v4700_v29, 0.0  ;;  %v16811_v0 = vld [vmem:[#allocation16_spill] sm:$0xff] }
 0x821   :  { %v13899_v57 = vadd.f32 %v4744_v30, %v16808_v61  ;;  %v13902_v40 = vadd.f32 %v4743_v27, %v16809_v37  ;;  %v4746_v12 = vsel %vm4714_vm12, %v4698_v32, %v4730_v51  ;;  %v4745_v43 = vsel %vm4713_vm13, %v4697_v13, %v4729_v4  ;;  %v16812_v4 = vld [vmem:[#allocation13_spill] sm:$0xff]  ;;  %v16813_v32 = vld [vmem:[#allocation23_spill] sm:$0xff]  ;;  %v4644_v51 = vpop.permute.xlu0 %4643  ;;  %v4649_v27 = vpop.permute.xlu1 %4648 }
 0x822   :  { %vm4715_vm15 = vcmp.gt.f32.partialorder %v4699_v47, 0.0  ;;  %v4731_v52 = vmul.f32 0.2, %v4699_v47  ;;  %v13907_v15 = vadd.f32 %v4746_v12, %v16810_v35  ;;  %v13910_v53 = vadd.f32 %v4745_v43, %v16811_v0 }
 0x823   :  { %4777 = vmax.xlane.f32.xlu1 %v13899_v57  ;;  %4775 = vmax.xlane.f32.xlu0 %v13902_v40  ;;  %v4748_v30 = vsel %vm4716_vm14, %v4700_v29, %v4732_v6  ;;  %v4702_v24 = vadd.f32 %v13890_v42, %v4649_v27  ;;  %v4701_v21 = vadd.f32 %v13890_v42, %v4644_v51  ;;  %v16814_v51 = vld [vmem:[#allocation14_spill] sm:$0xff] }
 0x824   :  { %v4747_v22 = vsel %vm4715_vm15, %v4699_v47, %v4731_v52  ;;  %v13915_v13 = vadd.f32 %v4748_v30, %v16812_v4 }
 0x825   :  { %v13918_v18 = vadd.f32 %v4747_v22, %v16813_v32  ;;  %v4654_v12 = vpop.permute.xlu0 %4653  ;;  %v4659_v43 = vpop.permute.xlu1 %4658  ;;  %vm4718_vm1 = vcmp.gt.f32.partialorder %v4702_v24, 0.0  ;;  %vm4717_vm2 = vcmp.gt.f32.partialorder %v4701_v21, 0.0 }
 0x827   :  { %4781 = vmax.xlane.f32.xlu1 %v13907_v15  ;;  %4779 = vmax.xlane.f32.xlu0 %v13910_v53 }
 0x829   :  { %v13922_v6 = vpop.permute.xlu0 %4663  ;;  %v4669_v47 = vpop.permute.xlu1 %4668 }
 0x82b   :  { %4785 = vmax.xlane.f32.xlu1 %v13915_v13  ;;  %4783 = vmax.xlane.f32.xlu0 %v13918_v18 }
 0x82d   :  { %v13924_v29 = vpop.permute.xlu0 %4673  ;;  %v13926_v52 = vpop.permute.xlu1 %4678 }
 0x844   :  { %v4263_v30 = vpop.xlane.xlu0 %4262  ;;  %v4261_v4 = vpop.xlane.xlu1 %4260 }
 0x845   :  { %v4293_v22 = vsub.f32 %v13814_v5, %v4263_v30  ;;  %v4292_v32 = vsub.f32 %v13817_v62, %v4261_v4  ;;  %v4734_v30 = vmul.f32 0.2, %v4702_v24  ;;  %v4733_v4 = vmul.f32 0.2, %v4701_v21 }
 0x847   :  { %v4310_v0 = vmul.f32 1.442695, %v4293_v22  ;;  %v4308_v35 = vmul.f32 1.442695, %v4292_v32  ;;  %v4703_v32 = vadd.f32 %v13890_v42, %v4654_v12 }
 0x848   :  { %v4267_v37 = vpop.xlane.xlu0 %4266  ;;  %v4265_v61 = vpop.xlane.xlu1 %4264 }
 0x849   :  { %10549 = vpow2.f32 %v4310_v0  ;;  %v4295_v10 = vsub.f32 %v13824_v14, %v4267_v37  ;;  %v4294_v44 = vsub.f32 %v13827_v16, %v4265_v61  ;;  %v4750_v16 = vsel %vm4718_vm1, %v4702_v24, %v4734_v30 }
 0x84a   :  { %10551 = vpow2.f32 %v4308_v35  ;;  %v4704_v37 = vadd.f32 %v13890_v42, %v4659_v43  ;;  %v4735_v43 = vmul.f32 0.2, %v4703_v32  ;;  %vm4719_vm4 = vcmp.gt.f32.partialorder %v4703_v32, 0.0 }
 0x84b   :  { %v4314_v17 = vmul.f32 1.442695, %v4295_v10  ;;  %v4312_v5 = vmul.f32 1.442695, %v4294_v44  ;;  %v4749_v44 = vsel %vm4717_vm2, %v4701_v21, %v4733_v4  ;;  %v4706_v4 = vadd.f32 %v13890_v42, %v4669_v47 }
 0x84c   :  { %v4269_v49 = vpop.xlane.xlu1 %4268  ;;  %v4271_v26 = vpop.xlane.xlu0 %4270  ;;  %v4736_v24 = vmul.f32 0.2, %v4704_v37  ;;  %vm4720_vm3 = vcmp.gt.f32.partialorder %v4704_v37, 0.0 }
 0x84d   :  { %10553 = vpow2.f32 %v4314_v17  ;;  %v4297_v0 = vsub.f32 %v13834_v45, %v4271_v26  ;;  %v4296_v35 = vsub.f32 %v13837_v2, %v4269_v49  ;;  %v13945_v49 = vadd.f32 %v4750_v16, %v16814_v51  ;;  %v16815_v2 = vld [vmem:[#allocation12_spill] sm:$0xff] }
 0x84e   :  { %10555 = vpow2.f32 %v4312_v5  ;;  %v13948_v27 = vadd.f32 %v4749_v44, %v16815_v2  ;;  %v4752_v30 = vsel %vm4720_vm3, %v4704_v37, %v4736_v24  ;;  %v4751_v16 = vsel %vm4719_vm4, %v4703_v32, %v4735_v43  ;;  %v16817_v37 = vld [vmem:[#allocation35_spill] sm:$0xff] }
 0x84f   :  { %v4318_v17 = vmul.f32 1.442695, %v4297_v0  ;;  %v4316_v45 = vmul.f32 1.442695, %v4296_v35  ;;  %v4738_v47 = vmul.f32 0.2, %v4706_v4 }
 0x850   :  { %v4273_v62 = vpop.xlane.xlu1 %4272  ;;  %v4275_v14 = vpop.xlane.xlu0 %4274  ;;  %vm4722_vm5 = vcmp.gt.f32.partialorder %v4706_v4, 0.0 }
 0x851   :  { %10557 = vpow2.f32 %v4318_v17  ;;  %v4299_v21 = vsub.f32 %v13844_v39, %v4275_v14  ;;  %v4298_v22 = vsub.f32 %v13847_v8, %v4273_v62  ;;  %v4705_v39 = vadd.f32 %v13890_v42, %v13922_v6  ;;  %v16816_v17 = vld [vmem:[#allocation33_spill] sm:$0xff] }
 0x852   :  { %10559 = vpow2.f32 %v4316_v45  ;;  %v13964_v8 = vadd.f32 %v4752_v30, %v16816_v17  ;;  %v13967_v45 = vadd.f32 %v4751_v16, %v16817_v37  ;;  %v4708_v30 = vadd.f32 %v13890_v42, %v13926_v52 }
 0x853   :  { %v13936_v61 = vpop.eup %10549  ;;  %v4322_v14 = vmul.f32 1.442695, %v4299_v21  ;;  %v4320_v44 = vmul.f32 1.442695, %v4298_v22  ;;  %v4737_v24 = vmul.f32 0.2, %v4705_v39  ;;  %v4754_v22 = vsel %vm4722_vm5, %v4706_v4, %v4738_v47 }
 0x854   :  { %v13939_v10 = vpop.eup %10551  ;;  %4342 = vadd.xlane.f32.xlu1 %v13936_v61  ;;  %v4277_v26 = vpop.xlane.xlu1 %4276  ;;  %vm4721_vm6 = vcmp.gt.f32.partialorder %v4705_v39, 0.0  ;;  %v16819_v4 = vld [vmem:[#allocation40_spill] sm:$0xff]  ;;  %v4740_v52 = vmul.f32 0.2, %v4708_v30  ;;  %vm4724_vm7 = vcmp.gt.f32.partialorder %v4708_v30, 0.0 }
 0x855   :  { %4340 = vadd.xlane.f32.xlu0 %v13939_v10  ;;  %v4279_v12 = vpop.xlane.xlu0 %4278  ;;  %10561 = vpow2.f32 %v4322_v14  ;;  %v4300_v6 = vsub.f32 %v13857_v55, %v4277_v26  ;;  %v4753_v14 = vsel %vm4721_vm6, %v4705_v39, %v4737_v24  ;;  %v16818_v26 = vld [vmem:[#allocation39_spill] sm:$0xff] }
 0x856   :  { %v4301_v32 = vsub.f32 %v13854_v59, %v4279_v12  ;;  %10563 = vpow2.f32 %v4320_v44  ;;  %v4707_v59 = vadd.f32 %v13890_v42, %v13924_v29  ;;  %v13984_v44 = vadd.f32 %v4754_v22, %v16818_v26 }
 0x857   :  { %v13954_v5 = vpop.eup %10553  ;;  %v4324_v55 = vmul.f32 1.442695, %v4300_v6  ;;  %v13987_v47 = vadd.f32 %v4753_v14, %v16819_v4  ;;  %v4756_v14 = vsel %vm4724_vm7, %v4708_v30, %v4740_v52  ;;  %v16821_v30 = vld [vmem:[#allocation43_spill] sm:$0xff] }
 0x858   :  { %4789 = vmax.xlane.f32.xlu1 %v13945_v49  ;;  %v13957_v0 = vpop.eup %10555  ;;  %v4281_v35 = vpop.xlane.xlu1 %4280  ;;  %v4326_v12 = vmul.f32 1.442695, %v4301_v32  ;;  %v4739_v39 = vmul.f32 0.2, %v4707_v59  ;;  %vm4723_vm8 = vcmp.gt.f32.partialorder %v4707_v59, 0.0 }
 0x859   :  { %4787 = vmax.xlane.f32.xlu0 %v13948_v27  ;;  %v4283_v62 = vpop.xlane.xlu0 %4282  ;;  %v4302_v32 = vsub.f32 %v13865_v7, %v4281_v35  ;;  %v16820_v35 = vld [vmem:[#allocation41_spill] sm:$0xff] }
 0x85a   :  { %10565 = vpow2.f32 %v4326_v12  ;;  %v4303_v29 = vsub.f32 %v13862_v19, %v4283_v62  ;;  %v4755_v12 = vsel %vm4723_vm8, %v4707_v59, %v4739_v39  ;;  %v14004_v2 = vadd.f32 %v4756_v14, %v16820_v35 }
 0x85b   :  { %v13973_v21 = vpop.eup %10557  ;;  %10567 = vpow2.f32 %v4324_v55  ;;  %v4328_v55 = vmul.f32 1.442695, %v4302_v32  ;;  %v14007_v52 = vadd.f32 %v4755_v12, %v16821_v30  ;;  %v16823_v32 = vld [vmem:[#allocation48_spill] sm:$0xff] }
 0x85c   :  { %4346 = vadd.xlane.f32.xlu1 %v13954_v5  ;;  %v4285_v43 = vpop.xlane.xlu1 %4284  ;;  %v13977_v16 = vpop.eup %10559  ;;  %v4330_v19 = vmul.f32 1.442695, %v4303_v29  ;;  %v16822_v29 = vld [vmem:[#allocation47_spill] sm:$0xff] }
 0x85d   :  { %4344 = vadd.xlane.f32.xlu0 %v13957_v0  ;;  %v4287_v37 = vpop.xlane.xlu0 %4286  ;;  %v4304_v7 = vsub.f32 %v13873_v11, %v4285_v43 }
 0x85e   :  { %v4305_v62 = vsub.f32 %v13870_v33, %v4287_v37  ;;  %10569 = vpow2.f32 %v4330_v19 }
 0x85f   :  { %v13993_v6 = vpop.eup %10561  ;;  %10571 = vpow2.f32 %v4328_v55  ;;  %v4332_v33 = vmul.f32 1.442695, %v4304_v7 }
 0x860   :  { %4793 = vmax.xlane.f32.xlu1 %v13964_v8  ;;  %v4689_v17 = vpop.permute.xlu1 %4688  ;;  %v13996_v4 = vpop.eup %10563  ;;  %v4334_v59 = vmul.f32 1.442695, %v4305_v62 }
 0x861   :  { %4791 = vmax.xlane.f32.xlu0 %v13967_v45  ;;  %v4710_v22 = vadd.f32 %v13890_v42, %v4689_v17 }
 0x862   :  { %10573 = vpow2.f32 %v4334_v59 }
 0x863   :  { %v4742_v17 = vmul.f32 0.2, %v4710_v22  ;;  %vm4726_vm9 = vcmp.gt.f32.partialorder %v4710_v22, 0.0  ;;  %10575 = vpow2.f32 %v4332_v33 }
 0x864   :  { %4350 = vadd.xlane.f32.xlu1 %v13973_v21  ;;  %v4684_v24 = vpop.permute.xlu0 %4683  ;;  %v14011_v37 = vpop.eup %10565 }
 0x865   :  { %4348 = vadd.xlane.f32.xlu0 %v13977_v16  ;;  %v4709_v26 = vadd.f32 %v13890_v42, %v4684_v24  ;;  %v4758_v11 = vsel %vm4726_vm9, %v4710_v22, %v4742_v17  ;;  %v14013_v43 = vpop.eup %10567 }
 0x866   :  { %v14018_v24 = vadd.f32 %v4758_v11, %v16822_v29 }
 0x867   :  { %v4741_v42 = vmul.f32 0.2, %v4709_v26  ;;  %vm4725_vm10 = vcmp.gt.f32.partialorder %v4709_v26, 0.0 }
 0x868   :  { %4797 = vmax.xlane.f32.xlu1 %v13984_v44  ;;  %v14025_v22 = vpop.eup %10569 }
 0x869   :  { %4795 = vmax.xlane.f32.xlu0 %v13987_v47  ;;  %v4757_v39 = vsel %vm4725_vm10, %v4709_v26, %v4741_v42  ;;  %v14027_v12 = vpop.eup %10571 }
 0x86a   :  { %v14021_v14 = vadd.f32 %v4757_v39, %v16823_v32 }
 0x86c   :  { %4354 = vadd.xlane.f32.xlu1 %v13993_v6  ;;  %v14031_v26 = vpop.eup %10573 }
 0x86d   :  { %4352 = vadd.xlane.f32.xlu0 %v13996_v4  ;;  %v14033_v19 = vpop.eup %10575 }
 0x870   :  { %4801 = vmax.xlane.f32.xlu1 %v14004_v2 }
 0x871   :  { %4799 = vmax.xlane.f32.xlu0 %v14007_v52 }
 0x874   :  { %4358 = vadd.xlane.f32.xlu1 %v14011_v37 }
 0x875   :  { %4356 = vadd.xlane.f32.xlu0 %v14013_v43 }
 0x878   :  { %4805 = vmax.xlane.f32.xlu1 %v14018_v24 }
 0x879   :  { %4803 = vmax.xlane.f32.xlu0 %v14021_v14 }
 0x87c   :  { %4362 = vadd.xlane.f32.xlu1 %v14025_v22 }
 0x87d   :  { %4360 = vadd.xlane.f32.xlu0 %v14027_v12 }
 0x880   :  { %4366 = vadd.xlane.f32.xlu1 %v14031_v26 }
 0x881   :  { %4364 = vadd.xlane.f32.xlu0 %v14033_v19 }
 0x891   :  { %v4291_v62 = vpop.xlane.xlu0 %4290  ;;  %v4289_v55 = vpop.xlane.xlu1 %4288 }
 0x892   :  { %v4307_v7 = vsub.f32 %v13882_v20, %v4291_v62  ;;  %v4306_v17 = vsub.f32 %v13885_v60, %v4289_v55 }
 0x894   :  { %v4338_v42 = vmul.f32 1.442695, %v4307_v7  ;;  %v4336_v59 = vmul.f32 1.442695, %v4306_v17 }
 0x896   :  { %10577 = vpow2.f32 %v4338_v42 }
 0x897   :  { %10579 = vpow2.f32 %v4336_v59 }
 0x8a0   :  { %v14039_v33 = vpop.eup %10577 }
 0x8a1   :  { %v14041_v11 = vpop.eup %10579  ;;  %4370 = vadd.xlane.f32.xlu1 %v14039_v33 }
 0x8a2   :  { %4368 = vadd.xlane.f32.xlu0 %v14041_v11 }
 0x8b0   :  { %v4778_v39 = vpop.xlane.xlu1 %4777  ;;  %v4776_v32 = vpop.xlane.xlu0 %4775 }
 0x8b1   :  { %v4808_v29 = vsub.f32 %v13899_v57, %v4778_v39  ;;  %v4807_v20 = vsub.f32 %v13902_v40, %v4776_v32 }
 0x8b3   :  { %v4825_v62 = vmul.f32 1.442695, %v4808_v29  ;;  %v4823_v60 = vmul.f32 1.442695, %v4807_v20 }
 0x8b4   :  { %v4782_v55 = vpop.xlane.xlu1 %4781  ;;  %v4780_v7 = vpop.xlane.xlu0 %4779 }
 0x8b5   :  { %10581 = vpow2.f32 %v4825_v62  ;;  %v4810_v17 = vsub.f32 %v13907_v15, %v4782_v55  ;;  %v4809_v42 = vsub.f32 %v13910_v53, %v4780_v7 }
 0x8b6   :  { %10583 = vpow2.f32 %v4823_v60 }
 0x8b7   :  { %v4829_v59 = vmul.f32 1.442695, %v4810_v17  ;;  %v4827_v30 = vmul.f32 1.442695, %v4809_v42 }
 0x8b8   :  { %v4786_v35 = vpop.xlane.xlu1 %4785  ;;  %v4784_v51 = vpop.xlane.xlu0 %4783 }
 0x8b9   :  { %10585 = vpow2.f32 %v4829_v59  ;;  %v4812_v34 = vsub.f32 %v13915_v13, %v4786_v35  ;;  %v4811_v57 = vsub.f32 %v13918_v18, %v4784_v51 }
 0x8ba   :  { %10587 = vpow2.f32 %v4827_v30 }
 0x8bb   :  { %v4833_v40 = vmul.f32 1.442695, %v4812_v34  ;;  %v4831_v29 = vmul.f32 1.442695, %v4811_v57 }
 0x8bd   :  { %10589 = vpow2.f32 %v4833_v40 }
 0x8be   :  { %10591 = vpow2.f32 %v4831_v29 }
 0x8bf   :  { %v14051_v32 = vpop.eup %10581 }
 0x8c0   :  { %v14053_v15 = vpop.eup %10583  ;;  %4857 = vadd.xlane.f32.xlu1 %v14051_v32 }
 0x8c1   :  { %4855 = vadd.xlane.f32.xlu0 %v14053_v15 }
 0x8c3   :  { %v14057_v53 = vpop.eup %10585 }
 0x8c4   :  { %v14059_v39 = vpop.eup %10587  ;;  %4861 = vadd.xlane.f32.xlu1 %v14057_v53 }
 0x8c5   :  { %4859 = vadd.xlane.f32.xlu0 %v14059_v39 }
 0x8c7   :  { %v14063_v34 = vpop.eup %10589 }
 0x8c8   :  { %v14065_v13 = vpop.eup %10591  ;;  %4865 = vadd.xlane.f32.xlu1 %v14063_v34 }
 0x8c9   :  { %4863 = vadd.xlane.f32.xlu0 %v14065_v13 }
 0x8e1   :  { %v4343_v18 = vpop.xlane.xlu1 %4342 }
 0x8e2   :  { %10593 = vrcp.f32 %v4343_v18  ;;  %v4341_v51 = vpop.xlane.xlu0 %4340 }
 0x8e3   :  { %10595 = vrcp.f32 %v4341_v51 }
 0x8e5   :  { %v4790_v35 = vpop.xlane.xlu1 %4789 }
 0x8e6   :  { %v4814_v30 = vsub.f32 %v13945_v49, %v4790_v35  ;;  %v4788_v20 = vpop.xlane.xlu0 %4787 }
 0x8e7   :  { %v4813_v62 = vsub.f32 %v13948_v27, %v4788_v20 }
 0x8e8   :  { %v4837_v60 = vmul.f32 1.442695, %v4814_v30 }
 0x8e9   :  { %v4835_v55 = vmul.f32 1.442695, %v4813_v62  ;;  %v4347_v7 = vpop.xlane.xlu1 %4346 }
 0x8ea   :  { %10597 = vpow2.f32 %v4837_v60  ;;  %v4345_v17 = vpop.xlane.xlu0 %4344 }
 0x8eb   :  { %10599 = vpow2.f32 %v4835_v55 }
 0x8ec   :  { %v10594_v42 = vpop.eup %10593  ;;  %10601 = vrcp.f32 %v4347_v7 }
 0x8ed   :  { %v10596_v59 = vpop.eup %10595  ;;  %v4389_v57 = vmul.f32 %v10594_v42, %v13936_v61  ;;  %10603 = vrcp.f32 %v4345_v17  ;;  %v4794_v40 = vpop.xlane.xlu1 %4793 }
 0x8ee   :  { %v4388_v29 = vmul.f32 %v10596_v59, %v13939_v10  ;;  %v4816_v49 = vsub.f32 %v13964_v8, %v4794_v40  ;;  %v4792_v18 = vpop.xlane.xlu0 %4791 }
 0x8ef   :  { %v4815_v27 = vsub.f32 %v13967_v45, %v4792_v18 }
 0x8f0   :  { %v4841_v51 = vmul.f32 1.442695, %v4816_v49  ;;  %v4404_v35 = vpack.c.bf16 %v4389_v57, %v4388_v29 }
 0x8f1   :  { %v4839_v30 = vmul.f32 1.442695, %v4815_v27  ;;  %v4351_v20 = vpop.xlane.xlu1 %4350 }
 0x8f2   :  { %10605 = vpow2.f32 %v4841_v51  ;;  %4461 = vmatmul.mubr.bf16.vlgmr.msra.gmra.mrb[228].mxu1 %v4404_v35  ;;  %v4349_v62 = vpop.xlane.xlu0 %4348 }
 0x8f3   :  { %10607 = vpow2.f32 %v4839_v30  ;;  %4944 = vmatpush1.bf16.msra.mxu1 %v13748_v23  ;;  %4470 = vmatprep.mubr.bf16.mxu1 %v16505_v50 }
 0x8f4   :  { %v14077_v61 = vpop.eup %10597  ;;  %10609 = vrcp.f32 %v4351_v20  ;;  %4945 = vmatprep.subr.bf16.mxu1 %v13758_v41 }
 0x8f5   :  { %v14080_v10 = vpop.eup %10599  ;;  %10611 = vrcp.f32 %v4349_v62  ;;  %4869 = vadd.xlane.f32.xlu1 %v14077_v61  ;;  %v4798_v8 = vpop.xlane.xlu1 %4797 }
 0x8f6   :  { %v10602_v45 = vpop.eup %10601  ;;  %v4818_v60 = vsub.f32 %v13984_v44, %v4798_v8  ;;  %4867 = vadd.xlane.f32.xlu0 %v14080_v10  ;;  %v4796_v55 = vpop.xlane.xlu0 %4795 }
 0x8f7   :  { %v10604_v23 = vpop.eup %10603  ;;  %4946 = vmatpush1.bf16.msra.mxu1 %v13756_v9  ;;  %v4817_v7 = vsub.f32 %v13987_v47, %v4796_v55  ;;  %v4391_v17 = vmul.f32 %v10602_v45, %v13954_v5 }
 0x8f8   :  { %v4845_v41 = vmul.f32 1.442695, %v4818_v60  ;;  %4947 = vmatprep.subr.bf16.mxu1 %v13764_v1  ;;  %v4390_v42 = vmul.f32 %v10604_v23, %v13957_v0 }
 0x8f9   :  { %v4843_v59 = vmul.f32 1.442695, %v4817_v7  ;;  %v4355_v57 = vpop.xlane.xlu1 %4354 }
 0x8fa   :  { %10613 = vpow2.f32 %v4845_v41  ;;  %v4405_v40 = vpack.c.bf16 %v4391_v17, %v4390_v42  ;;  %v4353_v44 = vpop.xlane.xlu0 %4352 }
 0x8fb   :  { %10615 = vpow2.f32 %v4843_v59  ;;  %4948 = vmatpush1.bf16.msra.mxu1 %v13762_v38 }
 0x8fc   :  { %v14091_v29 = vpop.eup %10605  ;;  %10617 = vrcp.f32 %v4355_v57  ;;  %4471 = vmatmul.mubr.bf16.gmra.mrb[232].mxu1 %v4405_v40  ;;  %4949 = vmatprep.subr.bf16.mxu1 %v13770_v58  ;;  %v10343_v40 = vld [vmem:[#allocation4 + $0x4] ss:$12 sps:$4 sm:$0xff]  }
 0x8fd   :  { %v14094_v9 = vpop.eup %10607  ;;  %10619 = vrcp.f32 %v4353_v44  ;;  %4873 = vadd.xlane.f32.xlu1 %v14091_v29  ;;  %v4802_v1 = vpop.xlane.xlu1 %4801  ;;  %4480 = vmatprep.mubr.bf16.mxu1 %v16505_v50 }
 0x8fe   :  { %v10610_v5 = vpop.eup %10609  ;;  %v4820_v0 = vsub.f32 %v14004_v2, %v4802_v1  ;;  %4871 = vadd.xlane.f32.xlu0 %v14094_v9  ;;  %v4800_v38 = vpop.xlane.xlu0 %4799  ;;  %5608 = vmatprep.subr.bf16.mxu0 %v10343_v40  ;;  %v10395_v40 = vld [vmem:[#allocation4 + $0x150] ss:$12 sps:$4 sm:$0xff]  }
 0x8ff   :  { %v10612_v47 = vpop.eup %10611  ;;  %4950 = vmatpush1.bf16.msra.mxu1 %v13768_v56  ;;  %v4819_v49 = vsub.f32 %v14007_v52, %v4800_v38  ;;  %v4393_v58 = vmul.f32 %v10610_v5, %v13973_v21 }
 0x900   :  { %v4849_v18 = vmul.f32 1.442695, %v4820_v0  ;;  %4951 = vmatprep.subr.bf16.mxu1 %v13776_v28  ;;  %v4392_v27 = vmul.f32 %v10612_v47, %v13977_v16  ;;  %v10344_v47 = vld [vmem:[#allocation4 + $0x18] ss:$12 sps:$4 sm:$0xff]  }
 0x901   :  { %v4847_v51 = vmul.f32 1.442695, %v4819_v49  ;;  %v4359_v35 = vpop.xlane.xlu1 %4358  ;;  %v10346_v49 = vld [vmem:[#allocation4 + $0x1c] ss:$12 sps:$4 sm:$0xff]  }
 0x902   :  { %10621 = vpow2.f32 %v4849_v18  ;;  %v4406_v30 = vpack.c.bf16 %v4393_v58, %v4392_v27  ;;  %v4357_v2 = vpop.xlane.xlu0 %4356  ;;  %v10350_v18 = vld [vmem:[#allocation4 + $0x48] ss:$12 sps:$4 sm:$0xff]   ;;  %v10352_v27 = vld [vmem:[#allocation4 + $0x4c] ss:$12 sps:$4 sm:$0xff]  }
 0x903   :  { %10623 = vpow2.f32 %v4847_v51  ;;  %4952 = vmatpush1.bf16.msra.mxu1 %v13774_v48  ;;  %v10355_v51 = vld [vmem:[#allocation4 + $0x64] ss:$12 sps:$4 sm:$0xff]  }
 0x904   :  { %v14106_v20 = vpop.eup %10613  ;;  %10625 = vrcp.f32 %v4359_v35  ;;  %4481 = vmatmul.mubr.bf16.gmra.mrb[236].mxu1 %v4406_v30  ;;  %4953 = vmatprep.subr.bf16.mxu1 %v13782_v31  ;;  %v10356_v30 = vld [vmem:[#allocation4 + $0x78] ss:$12 sps:$4 sm:$0xff]  }
 0x905   :  { %v14109_v56 = vpop.eup %10615  ;;  %10627 = vrcp.f32 %v4357_v2  ;;  %4877 = vadd.xlane.f32.xlu1 %v14106_v20  ;;  %v4806_v28 = vpop.xlane.xlu1 %4805  ;;  %4490 = vmatprep.mubr.bf16.mxu1 %v16505_v50  ;;  %v10358_v2 = vld [vmem:[#allocation4 + $0x7c] ss:$12 sps:$4 sm:$0xff]  }
 0x906   :  { %v10618_v21 = vpop.eup %10617  ;;  %v4822_v16 = vsub.f32 %v14018_v24, %v4806_v28  ;;  %4875 = vadd.xlane.f32.xlu0 %v14109_v56  ;;  %v4804_v48 = vpop.xlane.xlu0 %4803  ;;  %v10361_v28 = vld [vmem:[#allocation4 + $0x94] ss:$12 sps:$4 sm:$0xff]  }
 0x907   :  { %v10620_v52 = vpop.eup %10619  ;;  %4954 = vmatpush1.bf16.msra.mxu1 %v13780_v54  ;;  %v4821_v62 = vsub.f32 %v14021_v14, %v4804_v48  ;;  %v4395_v31 = vmul.f32 %v10618_v21, %v13993_v6  ;;  %v10368_v21 = vld [vmem:[#allocation4 + $0xc8] ss:$12 sps:$4 sm:$0xff]   ;;  %v10364_v48 = vld [vmem:[#allocation4 + $0xac] ss:$12 sps:$4 sm:$0xff]  }
 0x908   :  { %v4853_v8 = vmul.f32 1.442695, %v4822_v16  ;;  %4955 = vmatprep.subr.bf16.mxu1 %v13788_v46  ;;  %v4394_v45 = vmul.f32 %v10620_v52, %v13996_v4  ;;  %v10359_v16 = vld [vmem:[#allocation4 + $0x90] ss:$12 sps:$4 sm:$0xff]   ;;  %v10362_v52 = vld [vmem:[#allocation4 + $0xa8] ss:$12 sps:$4 sm:$0xff]  }
 0x909   :  { %v4851_v60 = vmul.f32 1.442695, %v4821_v62  ;;  %v4363_v55 = vpop.xlane.xlu1 %4362 }
 0x90a   :  { %10629 = vpow2.f32 %v4853_v8  ;;  %v4407_v23 = vpack.c.bf16 %v4395_v31, %v4394_v45  ;;  %v4361_v24 = vpop.xlane.xlu0 %4360  ;;  %v10367_v31 = vld [vmem:[#allocation4 + $0xc4] ss:$12 sps:$4 sm:$0xff]  }
 0x90b   :  { %10631 = vpow2.f32 %v4851_v60  ;;  %4956 = vmatpush1.bf16.msra.mxu1 %v13786_v63 }
 0x90c   :  { %v14121_v7 = vpop.eup %10621  ;;  %10633 = vrcp.f32 %v4363_v55  ;;  %4491 = vmatmul.mubr.bf16.gmra.mrb[240].mxu1 %v4407_v23  ;;  %4957 = vmatprep.subr.bf16.mxu1 %v13796_v25  ;;  %v10365_v55 = vld [vmem:[#allocation4 + $0xc0] ss:$12 sps:$4 sm:$0xff]  }
 0x90d   :  { %v14124_v54 = vpop.eup %10623  ;;  %10635 = vrcp.f32 %v4361_v24  ;;  %4881 = vadd.xlane.f32.xlu1 %v14121_v7  ;;  %v4367_v46 = vpop.xlane.xlu1 %4366  ;;  %4500 = vmatprep.mubr.bf16.mxu1 %v16505_v50  ;;  %v10372_v24 = vld [vmem:[#allocation4 + $0xdc] ss:$12 sps:$4 sm:$0xff]  }
 0x90e   :  { %v10626_v4 = vpop.eup %10625  ;;  %4879 = vadd.xlane.f32.xlu0 %v14124_v54  ;;  %v4365_v6 = vpop.xlane.xlu0 %4364  ;;  %10637 = vrcp.f32 %v4367_v46  ;;  %v10370_v46 = vld [vmem:[#allocation4 + $0xd8] ss:$12 sps:$4 sm:$0xff]  }
 0x90f   :  { %v10628_v14 = vpop.eup %10627  ;;  %4958 = vmatpush1.bf16.msra.mxu1 %v13794_v3  ;;  %v4397_v63 = vmul.f32 %v10626_v4, %v14011_v37  ;;  %10639 = vrcp.f32 %v4365_v6  ;;  %v10377_v4 = vld [vmem:[#allocation4 + $0xf4] ss:$12 sps:$4 sm:$0xff]   ;;  %v10375_v6 = vld [vmem:[#allocation4 + $0xf0] ss:$12 sps:$4 sm:$0xff]  }
 0x910   :  { %v4396_v25 = vmul.f32 %v10628_v14, %v14013_v43  ;;  %v10341_v43 = vld [vmem:[#allocation4] ss:$12 sps:$4 sm:$0xff]   ;;  %9191 = vmatprep.subr.bf16.mxu1 %v10368_v21 }
 0x911   :  { %5609 = vmatpush1.bf16.msra.mxu0 %v10341_v43  ;;  %v10382_v14 = vld [vmem:[#allocation4 + $0x10c] ss:$12 sps:$4 sm:$0xff]  }
 0x912   :  { %v4408_v17 = vpack.c.bf16 %v4397_v63, %v4396_v25  ;;  %5610 = vmatprep.subr.bf16.mxu0 %v10346_v49  ;;  %v10385_v63 = vld [vmem:[#allocation4 + $0x120] ss:$12 sps:$4 sm:$0xff]  }
 0x914   :  { %v14132_v41 = vpop.eup %10629  ;;  %4501 = vmatmul.mubr.bf16.gmra.mrb[244].mxu1 %v4408_v17  ;;  %v10392_v17 = vld [vmem:[#allocation4 + $0x13c] ss:$12 sps:$4 sm:$0xff]  }
 0x915   :  { %v14134_v42 = vpop.eup %10631  ;;  %4885 = vadd.xlane.f32.xlu1 %v14132_v41  ;;  %4510 = vmatprep.mubr.bf16.mxu1 %v16505_v50 }
 0x916   :  { %v10634_v59 = vpop.eup %10633  ;;  %4883 = vadd.xlane.f32.xlu0 %v14134_v42  ;;  %5611 = vmatpush1.bf16.msra.mxu0 %v10344_v47 }
 0x917   :  { %v10636_v3 = vpop.eup %10635  ;;  %v4399_v37 = vmul.f32 %v10634_v59, %v14025_v22  ;;  %v10349_v22 = vld [vmem:[#allocation4 + $0x34] ss:$12 sps:$4 sm:$0xff]  }
 0x918   :  { %v4398_v57 = vmul.f32 %v10636_v3, %v14027_v12  ;;  %v10638_v44 = vpop.eup %10637  ;;  %v10347_v12 = vld [vmem:[#allocation4 + $0x30] ss:$12 sps:$4 sm:$0xff]   ;;  %5612 = vmatprep.subr.bf16.mxu0 %v10349_v22  ;;  %v10390_v3 = vld [vmem:[#allocation4 + $0x138] ss:$12 sps:$4 sm:$0xff]   ;;  %v10369_v22 = vld [vmem:[#allocation4 + $0x8] ss:$12 sps:$4 sm:$0xff]  }
 0x919   :  { %v10640_v5 = vpop.eup %10639  ;;  %v4401_v38 = vmul.f32 %v10638_v44, %v14031_v26  ;;  %v10402_v44 = vld [vmem:[#allocation4 + $0x16c] ss:$12 sps:$4 sm:$0xff]  }
 0x91a   :  { %v4409_v1 = vpack.c.bf16 %v4399_v37, %v4398_v57  ;;  %v4400_v0 = vmul.f32 %v10640_v5, %v14033_v19  ;;  %5613 = vmatpush1.bf16.msra.mxu0 %v10347_v12  ;;  %v10353_v19 = vld [vmem:[#allocation4 + $0x60] ss:$12 sps:$4 sm:$0xff]  }
 0x91b   :  { %5614 = vmatprep.subr.bf16.mxu0 %v10352_v27  ;;  %v10397_v57 = vld [vmem:[#allocation4 + $0x154] ss:$12 sps:$4 sm:$0xff]  }
 0x91c   :  { %4511 = vmatmul.mubr.bf16.gmra.mrb[248].mxu1 %v4409_v1  ;;  %v4410_v58 = vpack.c.bf16 %v4401_v38, %v4400_v0  ;;  %v10400_v38 = vld [vmem:[#allocation4 + $0x168] ss:$12 sps:$4 sm:$0xff]   ;;  %v10373_v27 = vld [vmem:[#allocation4 + $0xe0] ss:$12 sps:$4 sm:$0xff]  }
 0x91d   :  { %4520 = vmatprep.mubr.bf16.mxu1 %v16505_v50 }
 0x91e   :  { %5615 = vmatpush1.bf16.msra.mxu0 %v10350_v18 }
 0x91f   :  { %5616 = vmatprep.subr.bf16.mxu0 %v10355_v51 }
 0x922   :  { %5617 = vmatpush1.bf16.msra.mxu0 %v10353_v19  ;;  %v10374_v19 = vld [vmem:[#allocation4 + $0x20] ss:$12 sps:$4 sm:$0xff]  }
 0x923   :  { %5618 = vmatprep.subr.bf16.mxu0 %v10358_v2 }
 0x924   :  { %4521 = vmatmul.mubr.bf16.gmra.mrb[252].mxu1 %v4410_v58 }
 0x925   :  { %4530 = vmatprep.mubr.bf16.mxu1 %v16505_v50 }
 0x926   :  { %5619 = vmatpush1.bf16.msra.mxu0 %v10356_v30 }
 0x927   :  { %5620 = vmatprep.subr.bf16.mxu0 %v10361_v28  ;;  %v10383_v28 = vld [vmem:[#allocation4 + $0x110] ss:$12 sps:$4 sm:$0xff]  }
 0x92a   :  { %5621 = vmatpush1.bf16.msra.mxu0 %v10359_v16  ;;  %v10384_v16 = vld [vmem:[#allocation4 + $0x50] ss:$12 sps:$4 sm:$0xff]  }
 0x92b   :  { %5622 = vmatprep.subr.bf16.mxu0 %v10364_v48 }
 0x92e   :  { %v4371_v26 = vpop.xlane.xlu1 %4370  ;;  %5623 = vmatpush1.bf16.msra.mxu0 %v10362_v52  ;;  %v10389_v52 = vld [vmem:[#allocation4 + $0x68] ss:$12 sps:$4 sm:$0xff]  }
 0x92f   :  { %10641 = vrcp.f32 %v4371_v26  ;;  %v4369_v35 = vpop.xlane.xlu0 %4368  ;;  %5624 = vmatprep.subr.bf16.mxu0 %v10367_v31  ;;  %v10393_v31 = vld [vmem:[#allocation4 + $0x140] ss:$12 sps:$4 sm:$0xff]  }
 0x930   :  { %10643 = vrcp.f32 %v4369_v35  ;;  %v10378_v35 = vld [vmem:[#allocation4 + $0xf8] ss:$12 sps:$4 sm:$0xff]  }
 0x932   :  { %5625 = vmatpush1.bf16.msra.mxu0 %v10365_v55 }
 0x933   :  { %5626 = vmatprep.subr.bf16.mxu0 %v10372_v24 }
 0x936   :  { %5627 = vmatpush1.bf16.msra.mxu0 %v10370_v46 }
 0x937   :  { %5628 = vmatprep.subr.bf16.mxu0 %v10377_v4 }
 0x939   :  { %v10642_v62 = vpop.eup %10641 }
 0x93a   :  { %v10644_v8 = vpop.eup %10643  ;;  %v4403_v45 = vmul.f32 %v10642_v62, %v14039_v33  ;;  %5629 = vmatpush1.bf16.msra.mxu0 %v10375_v6  ;;  %v10380_v33 = vld [vmem:[#allocation4 + $0x108] ss:$12 sps:$4 sm:$0xff]  }
 0x93b   :  { %v4402_v60 = vmul.f32 %v10644_v8, %v14041_v11  ;;  %5630 = vmatprep.subr.bf16.mxu0 %v10382_v14  ;;  %v10387_v11 = vld [vmem:[#allocation4 + $0x124] ss:$12 sps:$4 sm:$0xff]   ;;  %v10394_v8 = vld [vmem:[#allocation4 + $0x80] ss:$12 sps:$4 sm:$0xff]  }
 0x93d   :  { %v4411_v23 = vpack.c.bf16 %v4403_v45, %v4402_v60  ;;  %v10398_v45 = vld [vmem:[#allocation4 + $0x158] ss:$12 sps:$4 sm:$0xff]  }
 0x93e   :  { %5631 = vmatpush1.bf16.msra.mxu0 %v10380_v33  ;;  %v10399_v60 = vld [vmem:[#allocation4 + $0x98] ss:$12 sps:$4 sm:$0xff]  }
 0x93f   :  { %4531 = vmatmul.mubr.bf16.gmra.mrb[0].mxu1 %v4411_v23  ;;  %5632 = vmatprep.subr.bf16.mxu0 %v10387_v11 }
 0x940   :  { %4975 = vmatprep.mubr.bf16.mxu1 %v16505_v50 }
 0x942   :  { %5633 = vmatpush1.bf16.msra.mxu0 %v10385_v63 }
 0x943   :  { %5634 = vmatprep.subr.bf16.mxu0 %v10392_v17 }
 0x946   :  { %5635 = vmatpush1.bf16.msra.mxu0 %v10390_v3 }
 0x947   :  { %5636 = vmatprep.subr.bf16.mxu0 %v10397_v57 }
 0x94a   :  { %5637 = vmatpush1.bf16.msra.mxu0 %v10395_v40 }
 0x94b   :  { %5638 = vmatprep.subr.bf16.mxu0 %v10402_v44 }
 0x94d   :  { %v4858_v25 = vpop.xlane.xlu1 %4857 }
 0x94e   :  { %10645 = vrcp.f32 %v4858_v25  ;;  %v4856_v59 = vpop.xlane.xlu0 %4855  ;;  %5639 = vmatpush1.bf16.msra.mxu0 %v10400_v38 }
 0x94f   :  { %10647 = vrcp.f32 %v4856_v59 }
 0x951   :  { %v4862_v37 = vpop.xlane.xlu1 %4861 }
 0x952   :  { %10649 = vrcp.f32 %v4862_v37  ;;  %v4860_v43 = vpop.xlane.xlu0 %4859 }
 0x953   :  { %10651 = vrcp.f32 %v4860_v43 }
 0x955   :  { %v4866_v1 = vpop.xlane.xlu1 %4865 }
 0x956   :  { %v4864_v0 = vpop.xlane.xlu0 %4863  ;;  %10653 = vrcp.f32 %v4866_v1 }
 0x957   :  { %10655 = vrcp.f32 %v4864_v0 }
 0x958   :  { %v10646_v5 = vpop.eup %10645 }
 0x959   :  { %v10648_v47 = vpop.eup %10647  ;;  %v4904_v49 = vmul.f32 %v10646_v5, %v14051_v32 }
 0x95a   :  { %v4903_v58 = vmul.f32 %v10648_v47, %v14053_v15  ;;  %v10379_v15 = vld [vmem:[#allocation4 + $0x38] ss:$12 sps:$4 sm:$0xff]  }
 0x95c   :  { %v10650_v12 = vpop.eup %10649  ;;  %v4919_v18 = vpack.c.bf16 %v4904_v49, %v4903_v58 }
 0x95d   :  { %v10652_v51 = vpop.eup %10651  ;;  %v4906_v26 = vmul.f32 %v10650_v12, %v14057_v53 }
 0x95e   :  { %4976 = vmatmul.mubr.bf16.vlgmr.msra.gmra.mrb[4].mxu1 %v4919_v18  ;;  %v4905_v32 = vmul.f32 %v10652_v51, %v14059_v39  ;;  %v10388_v39 = vld [vmem:[#allocation4 + $0x128] ss:$12 sps:$4 sm:$0xff]  }
 0x95f   :  { %4985 = vmatprep.mubr.bf16.mxu1 %v16505_v50  ;;  %9192 = vmatpush3.bf16.msra.mxu1 %v10369_v22  ;;  %v14183_v51 = vld [vmem:[%s15923_s2 + $0x8] sm:$0xff] }
 0x960   :  { %9193 = vmatprep.subr.bf16.mxu1 %v10373_v27  ;;  %v10654_v30 = vpop.eup %10653  ;;  %v4920_v2 = vpack.c.bf16 %v4906_v26, %v4905_v32  ;;  %v5058_v27 = vsub.s32 4, %v16610_v36 }
 0x961   :  { %v10656_v21 = vpop.eup %10655  ;;  %v4908_v48 = vmul.f32 %v10654_v30, %v14063_v34  ;;  %v10403_v34 = vld [vmem:[#allocation4 + $0x170] ss:$12 sps:$4 sm:$0xff]  }
 0x962   :  { %v4907_v53 = vmul.f32 %v10656_v21, %v14065_v13  ;;  %v10404_v13 = vld [vmem:[#allocation4 + $0xb0] ss:$12 sps:$4 sm:$0xff]  }
 0x963   :  { %9194 = vmatpush3.bf16.msra.mxu1 %v10374_v19 }
 0x964   :  { %9195 = vmatprep.subr.bf16.mxu1 %v10378_v35  ;;  %v4921_v62 = vpack.c.bf16 %v4908_v48, %v4907_v53  ;;  %v16827_v48 = vld [vmem:[#allocation20_spill] sm:$0xff] }
 0x965   :  { %v16828_v53 = vmax.f32 %v16827_v48, 0.0 }
 0x966   :  { %4986 = vmatmul.mubr.bf16.gmra.mrb[8].mxu1 %v4920_v2  ;;  %v16824_v2 = vld [vmem:[#allocation15_spill] sm:$0xff] }
 0x967   :  { %4995 = vmatprep.mubr.bf16.mxu1 %v16505_v50  ;;  %9196 = vmatpush3.bf16.msra.mxu1 %v10379_v15 }
 0x968   :  { %9197 = vmatprep.subr.bf16.mxu1 %v10383_v28  ;;  %v16825_v28 = vmax.f32 %v16824_v2, 0.0 }
 0x96b   :  { %9198 = vmatpush3.bf16.msra.mxu1 %v10384_v16 }
 0x96c   :  { %9199 = vmatprep.subr.bf16.mxu1 %v10388_v39 }
 0x96e   :  { %4996 = vmatmul.mubr.bf16.gmra.mrb[12].mxu1 %v4921_v62 }
 0x96f   :  { %5005 = vmatprep.mubr.bf16.mxu1 %v16505_v50  ;;  %9200 = vmatpush3.bf16.msra.mxu1 %v10389_v52  ;;  %v16830_v52 = vld [vmem:[#allocation21_spill] sm:$0xff] }
 0x970   :  { %9201 = vmatprep.subr.bf16.mxu1 %v10393_v31  ;;  %v16831_v62 = vmax.f32 %v16830_v52, 0.0 }
 0x973   :  { %9202 = vmatpush3.bf16.msra.mxu1 %v10394_v8  ;;  %v16833_v8 = vld [vmem:[#allocation27_spill] sm:$0xff] }
 0x974   :  { %9203 = vmatprep.subr.bf16.mxu1 %v10398_v45  ;;  %v16834_v45 = vmax.f32 %v16833_v8, 0.0 }
 0x977   :  { %9204 = vmatpush3.bf16.msra.mxu1 %v10399_v60 }
 0x978   :  { %9205 = vmatprep.subr.bf16.mxu1 %v10403_v34 }
 0x97b   :  { %9206 = vmatpush3.bf16.msra.mxu1 %v10404_v13 }
 0x982   :  { %v4870_v55 = vpop.xlane.xlu1 %4869 }
 0x983   :  { %10657 = vrcp.f32 %v4870_v55  ;;  %v4868_v23 = vpop.xlane.xlu0 %4867 }
 0x984   :  { %10659 = vrcp.f32 %v4868_v23 }
 0x98a   :  { %v4874_v24 = vpop.xlane.xlu1 %4873 }
 0x98b   :  { %10661 = vrcp.f32 %v4874_v24  ;;  %v4872_v46 = vpop.xlane.xlu0 %4871 }
 0x98c   :  { %10663 = vrcp.f32 %v4872_v46 }
 0x98d   :  { %v10658_v4 = vpop.eup %10657 }
 0x98e   :  { %v10660_v6 = vpop.eup %10659  ;;  %v4910_v14 = vmul.f32 %v10658_v4, %v14077_v61 }
 0x98f   :  { %v4909_v33 = vmul.f32 %v10660_v6, %v14080_v10 }
 0x991   :  { %v4922_v11 = vpack.c.bf16 %v4910_v14, %v4909_v33 }
 0x992   :  { %v4878_v63 = vpop.xlane.xlu1 %4877 }
 0x993   :  { %10665 = vrcp.f32 %v4878_v63  ;;  %5006 = vmatmul.mubr.bf16.gmra.mrb[16].mxu1 %v4922_v11  ;;  %v4876_v25 = vpop.xlane.xlu0 %4875 }
 0x994   :  { %10667 = vrcp.f32 %v4876_v25  ;;  %5015 = vmatprep.mubr.bf16.mxu1 %v16505_v50 }
 0x995   :  { %v10662_v17 = vpop.eup %10661 }
 0x996   :  { %v10664_v59 = vpop.eup %10663  ;;  %v4912_v3 = vmul.f32 %v10662_v17, %v14091_v29  ;;  %v16836_v17 = vld [vmem:[#allocation28_spill] sm:$0xff] }
 0x997   :  { %v4911_v37 = vmul.f32 %v10664_v59, %v14094_v9  ;;  %v16837_v59 = vmax.f32 %v16836_v17, 0.0 }
 0x999   :  { %v4923_v57 = vpack.c.bf16 %v4912_v3, %v4911_v37 }
 0x99a   :  { %v4882_v43 = vpop.xlane.xlu1 %4881 }
 0x99b   :  { %10669 = vrcp.f32 %v4882_v43  ;;  %5016 = vmatmul.mubr.bf16.gmra.mrb[20].mxu1 %v4923_v57  ;;  %v4880_v61 = vpop.xlane.xlu0 %4879  ;;  %v16839_v57 = vld [vmem:[#allocation25_spill] sm:$0xff] }
 0x99c   :  { %10671 = vrcp.f32 %v4880_v61  ;;  %5025 = vmatprep.mubr.bf16.mxu1 %v16505_v50  ;;  %v16840_v43 = vmax.f32 %v16839_v57, 0.0 }
 0x99d   :  { %v10666_v10 = vpop.eup %10665 }
 0x99e   :  { %v10668_v40 = vpop.eup %10667  ;;  %v4914_v44 = vmul.f32 %v10666_v10, %v14106_v20  ;;  %v16842_v10 = vld [vmem:[#allocation26_spill] sm:$0xff] }
 0x99f   :  { %v4913_v1 = vmul.f32 %v10668_v40, %v14109_v56  ;;  %v16843_v40 = vmax.f32 %v16842_v10, 0.0 }
 0x9a1   :  { %v4924_v5 = vpack.c.bf16 %v4914_v44, %v4913_v1  ;;  %v16845_v1 = vld [vmem:[#allocation97_spill] sm:$0xff] }
 0x9a2   :  { %v4886_v0 = vpop.xlane.xlu1 %4885 }
 0x9a3   :  { %10673 = vrcp.f32 %v4886_v0  ;;  %5026 = vmatmul.mubr.bf16.gmra.mrb[24].mxu1 %v4924_v5  ;;  %v4884_v29 = vpop.xlane.xlu0 %4883  ;;  %v16846_v5 = vmax.f32 %v16845_v1, 0.0 }
 0x9a4   :  { %10675 = vrcp.f32 %v4884_v29  ;;  %5035 = vmatprep.mubr.bf16.mxu1 %v16505_v50 }
 0x9a5   :  { %v10670_v9 = vpop.eup %10669 }
 0x9a6   :  { %v10672_v38 = vpop.eup %10671  ;;  %v4916_v47 = vmul.f32 %v10670_v9, %v14121_v7  ;;  %v14175_v7 = vld [vmem:[%s15923_s2] sm:$0xff] }
 0x9a7   :  { %v4915_v49 = vmul.f32 %v10672_v38, %v14124_v54  ;;  %v14178_v54 = vrot.slane %v14175_v7, %v5058_v27 }
 0x9a9   :  { %v4925_v58 = vpack.c.bf16 %v4916_v47, %v4915_v49 }
 0x9ab   :  { %5036 = vmatmul.mubr.bf16.gmra.mrb[28].mxu1 %v4925_v58 }
 0x9ac   :  { %5045 = vmatprep.mubr.bf16.mxu1 %v16505_v50 }
 0x9ad   :  { %v10674_v20 = vpop.eup %10673 }
 0x9ae   :  { %v10676_v56 = vpop.eup %10675  ;;  %v4918_v22 = vmul.f32 %v10674_v20, %v14132_v41  ;;  %v14186_v41 = vrot.slane %v14183_v51, %v5058_v27 }
 0x9af   :  { %v4917_v12 = vmul.f32 %v10676_v56, %v14134_v42 }
 0x9b1   :  { %v4926_v18 = vpack.c.bf16 %v4918_v22, %v4917_v12 }
 0x9b3   :  { %5046 = vmatmul.mubr.bf16.gmra.mrb[32].mxu1 %v4926_v18 }
 0x9c5   :  { %v4462_v42 = vpop.f32.mrb[228].mxu1 }
 0x9c6   :  { %v5064_v19 = vadd.f32 %v14178_v54, %v4462_v42  ;;  %v4464_v26 = vpop.f32.mrb[229].mxu1 }
 0x9c7   :  { %v5065_v32 = vadd.f32 %v14186_v41, %v4464_v26  ;;  %v4466_v35 = vpop.f32.mrb[230].mxu1 }
 0x9c8   :  { %v5066_v15 = vadd.f32 %v14178_v54, %v4466_v35  ;;  %v4468_v30 = vpop.f32.mrb[231].mxu1  ;;  %v14198_v39 = vadd.f32 %v5064_v19, %v16828_v53  ;;  %v16848_v19 = vld [vmem:[#allocation99_spill] sm:$0xff]  ;;  %v16857_v53 = vld [vmem:[#allocation100_spill] sm:$0xff] }
 0x9c9   :  { %v14193_v21 = vadd.f32 %v5065_v32, %v16825_v28  ;;  %v5067_v16 = vadd.f32 %v14186_v41, %v4468_v30  ;;  %v16849_v26 = vmax.f32 %v16848_v19, 0.0  ;;  %v16854_v28 = vld [vmem:[#allocation101_spill] sm:$0xff]  ;;  %v16858_v52 = vmax.f32 %v16857_v53, 0.0 }
 0x9ca   :  { %16829 = vst [vmem:[#allocation78_spill] sm:$0xff] %v14198_v39  ;;  %v14202_v31 = vadd.f32 %v5066_v15, %v16831_v62  ;;  %v16313_v23 = vmax.f32 %v14198_v39, 0.0  ;;  %v16851_v15 = vld [vmem:[#allocation98_spill] sm:$0xff] }
 0x9cb   :  { %16826 = vst [vmem:[#allocation76_spill] sm:$0xff] %v14193_v21  ;;  %v14206_v60 = vadd.f32 %v5067_v16, %v16834_v45  ;;  %v16312_v13 = vmax.f32 %v14193_v21, 0.0  ;;  %v16852_v30 = vmax.f32 %v16851_v15, 0.0  ;;  %v16855_v16 = vmax.f32 %v16854_v28, 0.0 }
 0x9cc   :  { %16832 = vst [vmem:[#allocation77_spill] sm:$0xff] %v14202_v31  ;;  %v16311_v34 = vmax.f32 %v14202_v31, 0.0 }
 0x9cd   :  { %16835 = vst [vmem:[#allocation79_spill] sm:$0xff] %v14206_v60  ;;  %v16308_v55 = vmax.f32 %v14206_v60, 0.0 }
 0x9ce   :  { %v5256_v4 = vpack.c.bf16 %v16311_v34, %v16313_v23  ;;  %v16947_v34 = vld [vmem:[#allocation53_spill] sm:$0xff] }
 0x9cf   :  { %v4472_v24 = vpop.f32.mrb[232].mxu1  ;;  %v5257_v46 = vpack.c.bf16 %v16308_v55, %v16312_v13  ;;  %v16941_v55 = vld [vmem:[#allocation50_spill] sm:$0xff]  ;;  %v16948_v13 = vmax.f32 %v16947_v34, 0.0 }
 0x9d0   :  { %v5068_v6 = vadd.f32 %v14178_v54, %v4472_v24  ;;  %v4474_v14 = vpop.f32.mrb[233].mxu1 }
 0x9d1   :  { %v5069_v33 = vadd.f32 %v14186_v41, %v4474_v14  ;;  %v4476_v11 = vpop.f32.mrb[234].mxu1  ;;  %5640 = vmatprep.mubr.bf16.mxu0 %v5257_v46  ;;  %5833 = vmatprep.mubr.bf16.mxu1 %v5257_v46 }
 0x9d2   :  { %v5070_v63 = vadd.f32 %v14178_v54, %v4476_v11  ;;  %v4478_v25 = vpop.f32.mrb[235].mxu1  ;;  %5641 = vmatmul.mubr.bf16.vlgmr.msra.gmra.mrb[204].mxu0 %v5256_v4  ;;  %5834 = vmatmul.mubr.bf16.vlgmr.msra.gmra.mrb[36].mxu1 %v5256_v4  ;;  %v14230_v61 = vadd.f32 %v5068_v6, %v16840_v43 }
 0x9d3   :  { %v14225_v3 = vadd.f32 %v5069_v33, %v16837_v59  ;;  %v5071_v37 = vadd.f32 %v14186_v41, %v4478_v25 }
 0x9d4   :  { %16841 = vst [vmem:[#allocation82_spill] sm:$0xff] %v14230_v61  ;;  %v14234_v44 = vadd.f32 %v5070_v63, %v16843_v40  ;;  %v16305_v49 = vmax.f32 %v14230_v61, 0.0  ;;  %v16863_v40 = vld [vmem:[#allocation102_spill] sm:$0xff] }
 0x9d5   :  { %16838 = vst [vmem:[#allocation80_spill] sm:$0xff] %v14225_v3  ;;  %v14238_v0 = vadd.f32 %v5071_v37, %v16846_v5  ;;  %v16304_v9 = vmax.f32 %v14225_v3, 0.0  ;;  %v16860_v37 = vld [vmem:[#allocation103_spill] sm:$0xff]  ;;  %v16864_v1 = vmax.f32 %v16863_v40, 0.0 }
 0x9d6   :  { %16844 = vst [vmem:[#allocation81_spill] sm:$0xff] %v14234_v44  ;;  %v16303_v29 = vmax.f32 %v14234_v44, 0.0  ;;  %v16861_v57 = vmax.f32 %v16860_v37, 0.0 }
 0x9d7   :  { %16847 = vst [vmem:[#allocation83_spill] sm:$0xff] %v14238_v0  ;;  %v16302_v38 = vmax.f32 %v14238_v0, 0.0  ;;  %v4482_v47 = vpop.f32.mrb[236].mxu1 }
 0x9d8   :  { %v5072_v58 = vadd.f32 %v14178_v54, %v4482_v47  ;;  %v4484_v20 = vpop.f32.mrb[237].mxu1  ;;  %v5258_v42 = vpack.c.bf16 %v16303_v29, %v16305_v49  ;;  %v16866_v47 = vld [vmem:[#allocation105_spill] sm:$0xff] }
 0x9d9   :  { %v5073_v56 = vadd.f32 %v14186_v41, %v4484_v20  ;;  %v4486_v22 = vpop.f32.mrb[238].mxu1  ;;  %v5259_v12 = vpack.c.bf16 %v16302_v38, %v16304_v9  ;;  %v16935_v29 = vld [vmem:[#allocation49_spill] sm:$0xff] }
 0x9da   :  { %v5074_v18 = vadd.f32 %v14178_v54, %v4486_v22  ;;  %v4488_v27 = vpop.f32.mrb[239].mxu1  ;;  %v14262_v2 = vadd.f32 %v5072_v58, %v16852_v30  ;;  %v16867_v58 = vmax.f32 %v16866_v47, 0.0  ;;  %v16936_v9 = vmax.f32 %v16935_v29, 0.0 }
 0x9db   :  { %v14257_v32 = vadd.f32 %v5073_v56, %v16849_v26  ;;  %v5075_v35 = vadd.f32 %v14186_v41, %v4488_v27  ;;  %5650 = vmatprep.mubr.bf16.mxu0 %v5259_v12  ;;  %5841 = vmatprep.mubr.bf16.mxu1 %v5259_v12  ;;  %v16869_v56 = vld [vmem:[#allocation104_spill] sm:$0xff] }
 0x9dc   :  { %16853 = vst [vmem:[#allocation86_spill] sm:$0xff] %v14262_v2  ;;  %v14266_v48 = vadd.f32 %v5074_v18, %v16855_v16  ;;  %5651 = vmatmul.mubr.bf16.gmra.mrb[208].mxu0 %v5258_v42  ;;  %5842 = vmatmul.mubr.bf16.gmra.mrb[40].mxu1 %v5258_v42  ;;  %v16301_v4 = vmax.f32 %v14262_v2, 0.0  ;;  %v16870_v22 = vmax.f32 %v16869_v56, 0.0 }
 0x9dd   :  { %16850 = vst [vmem:[#allocation84_spill] sm:$0xff] %v14257_v32  ;;  %v14270_v62 = vadd.f32 %v5075_v35, %v16858_v52  ;;  %v16300_v45 = vmax.f32 %v14257_v32, 0.0  ;;  %v17037_v32 = vld [vmem:[#allocation11_spill] sm:$0xff] }
 0x9de   :  { %16856 = vst [vmem:[#allocation85_spill] sm:$0xff] %v14266_v48  ;;  %v16299_v8 = vmax.f32 %v14266_v48, 0.0 }
 0x9df   :  { %16859 = vst [vmem:[#allocation87_spill] sm:$0xff] %v14270_v62  ;;  %v16298_v24 = vmax.f32 %v14270_v62, 0.0  ;;  %v4492_v46 = vpop.f32.mrb[240].mxu1 }
 0x9e0   :  { %v5076_v6 = vadd.f32 %v14178_v54, %v4492_v46  ;;  %v4494_v14 = vpop.f32.mrb[241].mxu1  ;;  %v5260_v59 = vpack.c.bf16 %v16299_v8, %v16301_v4 }
 0x9e1   :  { %v5077_v33 = vadd.f32 %v14186_v41, %v4494_v14  ;;  %v4496_v11 = vpop.f32.mrb[242].mxu1  ;;  %v5261_v63 = vpack.c.bf16 %v16298_v24, %v16300_v45  ;;  %v16929_v45 = vld [vmem:[#allocation44_spill] sm:$0xff] }
 0x9e2   :  { %v5078_v25 = vadd.f32 %v14178_v54, %v4496_v11  ;;  %v4498_v17 = vpop.f32.mrb[243].mxu1  ;;  %v14294_v5 = vadd.f32 %v5076_v6, %v16864_v1  ;;  %v16872_v6 = vld [vmem:[#allocation107_spill] sm:$0xff] }
 0x9e3   :  { %v14289_v43 = vadd.f32 %v5077_v33, %v16861_v57  ;;  %v5079_v10 = vadd.f32 %v14186_v41, %v4498_v17  ;;  %5660 = vmatprep.mubr.bf16.mxu0 %v5261_v63  ;;  %5849 = vmatprep.mubr.bf16.mxu1 %v5261_v63  ;;  %v16873_v14 = vmax.f32 %v16872_v6, 0.0  ;;  %v16875_v63 = vld [vmem:[#allocation106_spill] sm:$0xff]  ;;  %v16884_v6 = vld [vmem:[#allocation8_spill] sm:$0xff] }
 0x9e4   :  { %16865 = vst [vmem:[#allocation90_spill] sm:$0xff] %v14294_v5  ;;  %v14298_v20 = vadd.f32 %v5078_v25, %v16867_v58  ;;  %5661 = vmatmul.mubr.bf16.gmra.mrb[212].mxu0 %v5260_v59  ;;  %5850 = vmatmul.mubr.bf16.gmra.mrb[44].mxu1 %v5260_v59  ;;  %v16293_v26 = vmax.f32 %v14294_v5, 0.0  ;;  %v16876_v25 = vmax.f32 %v16875_v63, 0.0  ;;  %v16878_v59 = vld [vmem:[#allocation109_spill] sm:$0xff]  ;;  %v17035_v5 = vld [vmem:[#allocation10_spill] sm:$0xff] }
 0x9e5   :  { %16862 = vst [vmem:[#allocation88_spill] sm:$0xff] %v14289_v43  ;;  %v14302_v12 = vadd.f32 %v5079_v10, %v16870_v22  ;;  %v16292_v27 = vmax.f32 %v14289_v43, 0.0  ;;  %v16879_v37 = vmax.f32 %v16878_v59, 0.0  ;;  %v16881_v10 = vld [vmem:[#allocation108_spill] sm:$0xff] }
 0x9e6   :  { %16868 = vst [vmem:[#allocation89_spill] sm:$0xff] %v14298_v20  ;;  %v16291_v18 = vmax.f32 %v14298_v20, 0.0  ;;  %v16882_v40 = vmax.f32 %v16881_v10, 0.0  ;;  %v16890_v10 = vld [vmem:[#allocation18_spill] sm:$0xff] }
 0x9e7   :  { %16871 = vst [vmem:[#allocation91_spill] sm:$0xff] %v14302_v12  ;;  %v16284_v42 = vmax.f32 %v14302_v12, 0.0  ;;  %v4502_v19 = vpop.f32.mrb[244].mxu1 }
 0x9e8   :  { %v5080_v35 = vadd.f32 %v14178_v54, %v4502_v19  ;;  %v4504_v15 = vpop.f32.mrb[245].mxu1  ;;  %v5262_v46 = vpack.c.bf16 %v16291_v18, %v16293_v26 }
 0x9e9   :  { %v5081_v30 = vadd.f32 %v14186_v41, %v4504_v15  ;;  %v4506_v28 = vpop.f32.mrb[246].mxu1  ;;  %v5263_v16 = vpack.c.bf16 %v16284_v42, %v16292_v27  ;;  %v16905_v42 = vld [vmem:[#allocation30_spill] sm:$0xff]  ;;  %v16917_v27 = vld [vmem:[#allocation36_spill] sm:$0xff] }
 0x9ea   :  { %v5082_v53 = vadd.f32 %v14178_v54, %v4506_v28  ;;  %v4508_v52 = vpop.f32.mrb[247].mxu1  ;;  %v14326_v17 = vadd.f32 %v5080_v35, %v16876_v25  ;;  %v16887_v25 = vld [vmem:[#allocation17_spill] sm:$0xff] }
 0x9eb   :  { %v14321_v33 = vadd.f32 %v5081_v30, %v16873_v14  ;;  %v5083_v11 = vadd.f32 %v14186_v41, %v4508_v52  ;;  %5670 = vmatprep.mubr.bf16.mxu0 %v5263_v16  ;;  %5857 = vmatprep.mubr.bf16.mxu1 %v5263_v16  ;;  %v16885_v14 = vmax.f32 %v16884_v6, 0.0  ;;  %v16888_v59 = vmax.f32 %v16887_v25, 0.0 }
 0x9ec   :  { %16877 = vst [vmem:[#allocation94_spill] sm:$0xff] %v14326_v17  ;;  %v14330_v57 = vadd.f32 %v5082_v53, %v16879_v37  ;;  %5671 = vmatmul.mubr.bf16.gmra.mrb[216].mxu0 %v5262_v46  ;;  %5858 = vmatmul.mubr.bf16.gmra.mrb[48].mxu1 %v5262_v46  ;;  %v16281_v19 = vmax.f32 %v14326_v17, 0.0  ;;  %v17027_v17 = vld [vmem:[#allocation121_spill] sm:$0xff] }
 0x9ed   :  { %16874 = vst [vmem:[#allocation92_spill] sm:$0xff] %v14321_v33  ;;  %v14334_v1 = vadd.f32 %v5083_v11, %v16882_v40  ;;  %v16280_v58 = vmax.f32 %v14321_v33, 0.0  ;;  %v16891_v40 = vmax.f32 %v16890_v10, 0.0 }
 0x9ee   :  { %16880 = vst [vmem:[#allocation93_spill] sm:$0xff] %v14330_v57  ;;  %v16279_v47 = vmax.f32 %v14330_v57, 0.0 }
 0x9ef   :  { %16883 = vst [vmem:[#allocation95_spill] sm:$0xff] %v14334_v1  ;;  %v16278_v56 = vmax.f32 %v14334_v1, 0.0  ;;  %v4512_v22 = vpop.f32.mrb[248].mxu1 }
 0x9f0   :  { %v5084_v35 = vadd.f32 %v14178_v54, %v4512_v22  ;;  %v4514_v15 = vpop.f32.mrb[249].mxu1  ;;  %v5264_v46 = vpack.c.bf16 %v16279_v47, %v16281_v19  ;;  %v16899_v47 = vld [vmem:[#allocation29_spill] sm:$0xff] }
 0x9f1   :  { %v5085_v30 = vadd.f32 %v14186_v41, %v4514_v15  ;;  %v4516_v28 = vpop.f32.mrb[250].mxu1  ;;  %v5265_v16 = vpack.c.bf16 %v16278_v56, %v16280_v58  ;;  %v16893_v15 = vld [vmem:[#allocation19_spill] sm:$0xff]  ;;  %v16900_v58 = vmax.f32 %v16899_v47, 0.0 }
 0x9f2   :  { %v5086_v53 = vadd.f32 %v14178_v54, %v4516_v28  ;;  %v4518_v52 = vpop.f32.mrb[251].mxu1  ;;  %v14358_v37 = vadd.f32 %v5084_v35, %v16888_v59  ;;  %v16894_v28 = vmax.f32 %v16893_v15, 0.0  ;;  %v16896_v15 = vld [vmem:[#allocation22_spill] sm:$0xff] }
 0x9f3   :  { %v14353_v11 = vadd.f32 %v5085_v30, %v16885_v14  ;;  %v5087_v63 = vadd.f32 %v14186_v41, %v4518_v52  ;;  %5680 = vmatprep.mubr.bf16.mxu0 %v5265_v16  ;;  %5865 = vmatprep.mubr.bf16.mxu1 %v5265_v16 }
 0x9f4   :  { %16889 = vst [vmem:[#allocation15_spill] sm:$0xff] %v14358_v37  ;;  %v14362_v22 = vadd.f32 %v5086_v53, %v16891_v40  ;;  %5681 = vmatmul.mubr.bf16.gmra.mrb[220].mxu0 %v5264_v46  ;;  %5866 = vmatmul.mubr.bf16.gmra.mrb[52].mxu1 %v5264_v46  ;;  %v16286_v35 = vmax.f32 %v14358_v37, 0.0 }
 0x9f5   :  { %16886 = vst [vmem:[#allocation96_spill] sm:$0xff] %v14353_v11  ;;  %v14366_v56 = vadd.f32 %v5087_v63, %v16894_v28  ;;  %v16283_v52 = vmax.f32 %v14353_v11, 0.0  ;;  %v16897_v28 = vmax.f32 %v16896_v15, 0.0 }
 0x9f6   :  { %16892 = vst [vmem:[#allocation20_spill] sm:$0xff] %v14362_v22  ;;  %v16285_v30 = vmax.f32 %v14362_v22, 0.0 }
 0x9f7   :  { %16895 = vst [vmem:[#allocation21_spill] sm:$0xff] %v14366_v56  ;;  %v16282_v16 = vmax.f32 %v14366_v56, 0.0  ;;  %v4522_v6 = vpop.f32.mrb[252].mxu1 }
 0x9f8   :  { %v5088_v14 = vadd.f32 %v14178_v54, %v4522_v6  ;;  %v4524_v25 = vpop.f32.mrb[253].mxu1  ;;  %v5266_v40 = vpack.c.bf16 %v16285_v30, %v16286_v35  ;;  %v16906_v30 = vmax.f32 %v16905_v42, 0.0 }
 0x9f9   :  { %v5089_v53 = vadd.f32 %v14186_v41, %v4524_v25  ;;  %v4526_v59 = vpop.f32.mrb[254].mxu1  ;;  %v5267_v46 = vpack.c.bf16 %v16282_v16, %v16283_v52  ;;  %v16902_v16 = vld [vmem:[#allocation31_spill] sm:$0xff] }
 0x9fa   :  { %v5090_v63 = vadd.f32 %v14178_v54, %v4526_v59  ;;  %v4528_v10 = vpop.f32.mrb[255].mxu1  ;;  %v14390_v19 = vadd.f32 %v5088_v14, %v16900_v58  ;;  %v16903_v59 = vmax.f32 %v16902_v16, 0.0 }
 0x9fb   :  { %v14385_v6 = vadd.f32 %v5089_v53, %v16897_v28  ;;  %v5091_v25 = vadd.f32 %v14186_v41, %v4528_v10  ;;  %5690 = vmatprep.mubr.bf16.mxu0 %v5267_v46  ;;  %5873 = vmatprep.mubr.bf16.mxu1 %v5267_v46 }
 0x9fc   :  { %16901 = vst [vmem:[#allocation28_spill] sm:$0xff] %v14390_v19  ;;  %v14394_v52 = vadd.f32 %v5090_v63, %v16903_v59  ;;  %5691 = vmatmul.mubr.bf16.gmra.mrb[224].mxu0 %v5266_v40  ;;  %5874 = vmatmul.mubr.bf16.gmra.mrb[56].mxu1 %v5266_v40  ;;  %v16290_v47 = vmax.f32 %v14390_v19, 0.0  ;;  %v17019_v19 = vld [vmem:[#allocation113_spill] sm:$0xff] }
 0x9fd   :  { %16898 = vst [vmem:[#allocation27_spill] sm:$0xff] %v14385_v6  ;;  %v14398_v35 = vadd.f32 %v5091_v25, %v16906_v30  ;;  %v16289_v10 = vmax.f32 %v14385_v6, 0.0  ;;  %v16908_v25 = vld [vmem:[#allocation32_spill] sm:$0xff] }
 0x9fe   :  { %16904 = vst [vmem:[#allocation25_spill] sm:$0xff] %v14394_v52  ;;  %v16288_v53 = vmax.f32 %v14394_v52, 0.0  ;;  %v16909_v59 = vmax.f32 %v16908_v25, 0.0 }
 0x9ff   :  { %16907 = vst [vmem:[#allocation26_spill] sm:$0xff] %v14398_v35  ;;  %v16287_v46 = vmax.f32 %v14398_v35, 0.0 }
 0xa00   :  { %v5268_v42 = vpack.c.bf16 %v16288_v53, %v16290_v47 }
 0xa01   :  { %v5269_v58 = vpack.c.bf16 %v16287_v46, %v16289_v10  ;;  %v16911_v10 = vld [vmem:[#allocation34_spill] sm:$0xff] }
 0xa03   :  { %5700 = vmatprep.mubr.bf16.mxu0 %v5269_v58  ;;  %5881 = vmatprep.mubr.bf16.mxu1 %v5269_v58  ;;  %v16912_v58 = vmax.f32 %v16911_v10, 0.0 }
 0xa04   :  { %5701 = vmatmul.mubr.bf16.gmra.mrb[228].mxu0 %v5268_v42  ;;  %5882 = vmatmul.mubr.bf16.gmra.mrb[60].mxu1 %v5268_v42  ;;  %v16914_v42 = vld [vmem:[#allocation37_spill] sm:$0xff] }
 0xa05   :  { %v16915_v18 = vmax.f32 %v16914_v42, 0.0 }
 0xa12   :  { %v4532_v30 = vpop.f32.mrb[0].mxu1 }
 0xa13   :  { %v5092_v16 = vadd.f32 %v14178_v54, %v4532_v30  ;;  %v4534_v14 = vpop.f32.mrb[1].mxu1 }
 0xa14   :  { %v5093_v63 = vadd.f32 %v14186_v41, %v4534_v14  ;;  %v4536_v40 = vpop.f32.mrb[2].mxu1  ;;  %v16918_v14 = vmax.f32 %v16917_v27, 0.0 }
 0xa15   :  { %v5094_v15 = vadd.f32 %v14178_v54, %v4536_v40  ;;  %v4538_v28 = vpop.f32.mrb[3].mxu1  ;;  %v14422_v47 = vadd.f32 %v5092_v16, %v16912_v58 }
 0xa16   :  { %v14417_v46 = vadd.f32 %v5093_v63, %v16909_v59  ;;  %v5095_v53 = vadd.f32 %v14186_v41, %v4538_v28 }
 0xa17   :  { %16913 = vst [vmem:[#allocation99_spill] sm:$0xff] %v14422_v47  ;;  %v14426_v30 = vadd.f32 %v5094_v15, %v16915_v18  ;;  %v16297_v28 = vmax.f32 %v14422_v47, 0.0 }
 0xa18   :  { %16910 = vst [vmem:[#allocation97_spill] sm:$0xff] %v14417_v46  ;;  %v14430_v26 = vadd.f32 %v5095_v53, %v16918_v14  ;;  %v16295_v25 = vmax.f32 %v14417_v46, 0.0  ;;  %v16920_v14 = vld [vmem:[#allocation38_spill] sm:$0xff] }
 0xa19   :  { %16916 = vst [vmem:[#allocation98_spill] sm:$0xff] %v14426_v30  ;;  %v16296_v40 = vmax.f32 %v14426_v30, 0.0 }
 0xa1a   :  { %16919 = vst [vmem:[#allocation101_spill] sm:$0xff] %v14430_v26  ;;  %v16294_v63 = vmax.f32 %v14430_v26, 0.0 }
 0xa1b   :  { %v5270_v18 = vpack.c.bf16 %v16296_v40, %v16297_v28  ;;  %v16923_v28 = vld [vmem:[#allocation42_spill] sm:$0xff] }
 0xa1c   :  { %v5271_v10 = vpack.c.bf16 %v16294_v63, %v16295_v25  ;;  %v16921_v63 = vmax.f32 %v16920_v14, 0.0 }
 0xa1e   :  { %5710 = vmatprep.mubr.bf16.mxu0 %v5271_v10  ;;  %5889 = vmatprep.mubr.bf16.mxu1 %v5271_v10  ;;  %v16924_v10 = vmax.f32 %v16923_v28, 0.0 }
 0xa1f   :  { %5711 = vmatmul.mubr.bf16.gmra.mrb[232].mxu0 %v5270_v18  ;;  %5890 = vmatmul.mubr.bf16.gmra.mrb[64].mxu1 %v5270_v18  ;;  %v16926_v18 = vld [vmem:[#allocation45_spill] sm:$0xff] }
 0xa20   :  { %v16927_v8 = vmax.f32 %v16926_v18, 0.0 }
 0xa31   :  { %v4977_v27 = vpop.f32.mrb[4].mxu1 }
 0xa32   :  { %v5096_v53 = vadd.f32 %v14178_v54, %v4977_v27  ;;  %v4979_v16 = vpop.f32.mrb[5].mxu1 }
 0xa33   :  { %v5097_v15 = vadd.f32 %v14186_v41, %v4979_v16  ;;  %v4981_v59 = vpop.f32.mrb[6].mxu1  ;;  %v16930_v16 = vmax.f32 %v16929_v45, 0.0 }
 0xa34   :  { %v5098_v58 = vadd.f32 %v14178_v54, %v4981_v59  ;;  %v4983_v42 = vpop.f32.mrb[7].mxu1  ;;  %v14454_v24 = vadd.f32 %v5096_v53, %v16924_v10 }
 0xa35   :  { %v14449_v25 = vadd.f32 %v5097_v15, %v16921_v63  ;;  %v5099_v40 = vadd.f32 %v14186_v41, %v4983_v42 }
 0xa36   :  { %16925 = vst [vmem:[#allocation103_spill] sm:$0xff] %v14454_v24  ;;  %v14458_v27 = vadd.f32 %v5098_v58, %v16927_v8  ;;  %v16310_v42 = vmax.f32 %v14454_v24, 0.0 }
 0xa37   :  { %16922 = vst [vmem:[#allocation100_spill] sm:$0xff] %v14449_v25  ;;  %v14462_v4 = vadd.f32 %v5099_v40, %v16930_v16  ;;  %v16307_v14 = vmax.f32 %v14449_v25, 0.0  ;;  %v16932_v16 = vld [vmem:[#allocation46_spill] sm:$0xff] }
 0xa38   :  { %16928 = vst [vmem:[#allocation102_spill] sm:$0xff] %v14458_v27  ;;  %v16309_v59 = vmax.f32 %v14458_v27, 0.0  ;;  %v16933_v38 = vmax.f32 %v16932_v16, 0.0 }
 0xa39   :  { %16931 = vst [vmem:[#allocation105_spill] sm:$0xff] %v14462_v4  ;;  %v16306_v63 = vmax.f32 %v14462_v4, 0.0  ;;  %v4987_v15 = vpop.f32.mrb[8].mxu1 }
 0xa3a   :  { %v5100_v28 = vadd.f32 %v14178_v54, %v4987_v15  ;;  %v4989_v53 = vpop.f32.mrb[9].mxu1  ;;  %v5272_v18 = vpack.c.bf16 %v16309_v59, %v16310_v42  ;;  %v16942_v59 = vmax.f32 %v16941_v55, 0.0 }
 0xa3b   :  { %v5101_v10 = vadd.f32 %v14186_v41, %v4989_v53  ;;  %v4991_v8 = vpop.f32.mrb[10].mxu1  ;;  %v5273_v45 = vpack.c.bf16 %v16306_v63, %v16307_v14  ;;  %v16938_v63 = vld [vmem:[#allocation51_spill] sm:$0xff] }
 0xa3c   :  { %v5102_v40 = vadd.f32 %v14178_v54, %v4991_v8  ;;  %v4993_v58 = vpop.f32.mrb[11].mxu1  ;;  %v14486_v49 = vadd.f32 %v5100_v28, %v16936_v9  ;;  %v16939_v8 = vmax.f32 %v16938_v63, 0.0 }
 0xa3d   :  { %v14481_v15 = vadd.f32 %v5101_v10, %v16933_v38  ;;  %v5103_v53 = vadd.f32 %v14186_v41, %v4993_v58  ;;  %5720 = vmatprep.mubr.bf16.mxu0 %v5273_v45  ;;  %5897 = vmatprep.mubr.bf16.mxu1 %v5273_v45 }
 0xa3e   :  { %16937 = vst [vmem:[#allocation107_spill] sm:$0xff] %v14486_v49  ;;  %v14490_v14 = vadd.f32 %v5102_v40, %v16939_v8  ;;  %5721 = vmatmul.mubr.bf16.gmra.mrb[236].mxu0 %v5272_v18  ;;  %5898 = vmatmul.mubr.bf16.gmra.mrb[68].mxu1 %v5272_v18  ;;  %v16318_v29 = vmax.f32 %v14486_v49, 0.0 }
 0xa3f   :  { %16934 = vst [vmem:[#allocation104_spill] sm:$0xff] %v14481_v15  ;;  %v14494_v42 = vadd.f32 %v5103_v53, %v16942_v59  ;;  %v16315_v10 = vmax.f32 %v14481_v15, 0.0  ;;  %v16944_v53 = vld [vmem:[#allocation52_spill] sm:$0xff] }
 0xa40   :  { %16940 = vst [vmem:[#allocation106_spill] sm:$0xff] %v14490_v14  ;;  %v16317_v38 = vmax.f32 %v14490_v14, 0.0  ;;  %v16945_v8 = vmax.f32 %v16944_v53, 0.0 }
 0xa41   :  { %16943 = vst [vmem:[#allocation109_spill] sm:$0xff] %v14494_v42  ;;  %v16314_v45 = vmax.f32 %v14494_v42, 0.0  ;;  %v4997_v58 = vpop.f32.mrb[12].mxu1  ;;  %v16953_v42 = vld [vmem:[#allocation54_spill] sm:$0xff] }
 0xa42   :  { %v5104_v9 = vadd.f32 %v14178_v54, %v4997_v58  ;;  %v4999_v63 = vpop.f32.mrb[13].mxu1  ;;  %v5274_v16 = vpack.c.bf16 %v16317_v38, %v16318_v29  ;;  %v16954_v38 = vmax.f32 %v16953_v42, 0.0 }
 0xa43   :  { %v5105_v28 = vadd.f32 %v14186_v41, %v4999_v63  ;;  %v5001_v40 = vpop.f32.mrb[14].mxu1  ;;  %v5275_v55 = vpack.c.bf16 %v16314_v45, %v16315_v10  ;;  %v16950_v45 = vld [vmem:[#allocation55_spill] sm:$0xff] }
 0xa44   :  { %v5106_v59 = vadd.f32 %v14178_v54, %v5001_v40  ;;  %v5003_v18 = vpop.f32.mrb[15].mxu1  ;;  %v14518_v23 = vadd.f32 %v5104_v9, %v16948_v13  ;;  %v16951_v40 = vmax.f32 %v16950_v45, 0.0 }
 0xa45   :  { %v14513_v58 = vadd.f32 %v5105_v28, %v16945_v8  ;;  %v5107_v63 = vadd.f32 %v14186_v41, %v5003_v18  ;;  %5730 = vmatprep.mubr.bf16.mxu0 %v5275_v55  ;;  %5905 = vmatprep.mubr.bf16.mxu1 %v5275_v55 }
 0xa46   :  { %16949 = vst [vmem:[#allocation8_spill] sm:$0xff] %v14518_v23  ;;  %v14522_v10 = vadd.f32 %v5106_v59, %v16951_v40  ;;  %5731 = vmatmul.mubr.bf16.gmra.mrb[240].mxu0 %v5274_v16  ;;  %5906 = vmatmul.mubr.bf16.gmra.mrb[72].mxu1 %v5274_v16  ;;  %v16322_v34 = vmax.f32 %v14518_v23, 0.0 }
 0xa47   :  { %16946 = vst [vmem:[#allocation108_spill] sm:$0xff] %v14513_v58  ;;  %v14526_v29 = vadd.f32 %v5107_v63, %v16954_v38  ;;  %v16321_v18 = vmax.f32 %v14513_v58, 0.0  ;;  %v16956_v63 = vld [vmem:[#allocation56_spill] sm:$0xff] }
 0xa48   :  { %16952 = vst [vmem:[#allocation17_spill] sm:$0xff] %v14522_v10  ;;  %v16320_v28 = vmax.f32 %v14522_v10, 0.0  ;;  %v16957_v40 = vmax.f32 %v16956_v63, 0.0  ;;  %v16965_v10 = vld [vmem:[#allocation58_spill] sm:$0xff] }
 0xa49   :  { %16955 = vst [vmem:[#allocation18_spill] sm:$0xff] %v14526_v29  ;;  %v16319_v55 = vmax.f32 %v14526_v29, 0.0 }
 0xa4a   :  { %v5276_v42 = vpack.c.bf16 %v16320_v28, %v16322_v34 }
 0xa4b   :  { %v5277_v13 = vpack.c.bf16 %v16319_v55, %v16321_v18  ;;  %v16959_v18 = vld [vmem:[#allocation57_spill] sm:$0xff] }
 0xa4d   :  { %5740 = vmatprep.mubr.bf16.mxu0 %v5277_v13  ;;  %5913 = vmatprep.mubr.bf16.mxu1 %v5277_v13  ;;  %v16960_v13 = vmax.f32 %v16959_v18, 0.0 }
 0xa4e   :  { %5741 = vmatmul.mubr.bf16.gmra.mrb[244].mxu0 %v5276_v42  ;;  %5914 = vmatmul.mubr.bf16.gmra.mrb[76].mxu1 %v5276_v42  ;;  %v16962_v42 = vld [vmem:[#allocation59_spill] sm:$0xff] }
 0xa4f   :  { %v16963_v29 = vmax.f32 %v16962_v42, 0.0 }
 0xa66   :  { %v5007_v38 = vpop.f32.mrb[16].mxu1 }
 0xa67   :  { %v5108_v45 = vadd.f32 %v14178_v54, %v5007_v38  ;;  %v5009_v9 = vpop.f32.mrb[17].mxu1 }
 0xa68   :  { %v5109_v59 = vadd.f32 %v14186_v41, %v5009_v9  ;;  %v5011_v16 = vpop.f32.mrb[18].mxu1  ;;  %v16966_v9 = vmax.f32 %v16965_v10, 0.0 }
 0xa69   :  { %v5110_v53 = vadd.f32 %v14178_v54, %v5011_v16  ;;  %v5013_v8 = vpop.f32.mrb[19].mxu1  ;;  %v14550_v34 = vadd.f32 %v5108_v45, %v16960_v13 }
 0xa6a   :  { %v14545_v55 = vadd.f32 %v5109_v59, %v16957_v40  ;;  %v5111_v28 = vadd.f32 %v14186_v41, %v5013_v8 }
 0xa6b   :  { %16961 = vst [vmem:[#allocation22_spill] sm:$0xff] %v14550_v34  ;;  %v14554_v38 = vadd.f32 %v5110_v53, %v16963_v29  ;;  %v16334_v8 = vmax.f32 %v14550_v34, 0.0 }
 0xa6c   :  { %16958 = vst [vmem:[#allocation19_spill] sm:$0xff] %v14545_v55  ;;  %v14558_v58 = vadd.f32 %v5111_v28, %v16966_v9  ;;  %v16331_v63 = vmax.f32 %v14545_v55, 0.0  ;;  %v16968_v9 = vld [vmem:[#allocation60_spill] sm:$0xff]  ;;  %v16971_v55 = vld [vmem:[#allocation61_spill] sm:$0xff] }
 0xa6d   :  { %16964 = vst [vmem:[#allocation29_spill] sm:$0xff] %v14554_v38  ;;  %v16333_v16 = vmax.f32 %v14554_v38, 0.0  ;;  %v16969_v23 = vmax.f32 %v16968_v9, 0.0  ;;  %v16972_v14 = vmax.f32 %v16971_v55, 0.0  ;;  %v16977_v38 = vld [vmem:[#allocation62_spill] sm:$0xff] }
 0xa6e   :  { %16967 = vst [vmem:[#allocation31_spill] sm:$0xff] %v14558_v58  ;;  %v16330_v59 = vmax.f32 %v14558_v58, 0.0  ;;  %v5017_v40 = vpop.f32.mrb[20].mxu1 }
 0xa6f   :  { %v5112_v18 = vadd.f32 %v14178_v54, %v5017_v40  ;;  %v5019_v45 = vpop.f32.mrb[21].mxu1  ;;  %v5278_v42 = vpack.c.bf16 %v16333_v16, %v16334_v8  ;;  %v16978_v16 = vmax.f32 %v16977_v38, 0.0 }
 0xa70   :  { %v5113_v13 = vadd.f32 %v14186_v41, %v5019_v45  ;;  %v5021_v29 = vpop.f32.mrb[22].mxu1  ;;  %v5279_v10 = vpack.c.bf16 %v16330_v59, %v16331_v63  ;;  %v16974_v59 = vld [vmem:[#allocation63_spill] sm:$0xff] }
 0xa71   :  { %v5114_v28 = vadd.f32 %v14178_v54, %v5021_v29  ;;  %v5023_v53 = vpop.f32.mrb[23].mxu1  ;;  %v14582_v58 = vadd.f32 %v5112_v18, %v16972_v14  ;;  %v16975_v29 = vmax.f32 %v16974_v59, 0.0 }
 0xa72   :  { %v14577_v40 = vadd.f32 %v5113_v13, %v16969_v23  ;;  %v5115_v45 = vadd.f32 %v14186_v41, %v5023_v53  ;;  %5750 = vmatprep.mubr.bf16.mxu0 %v5279_v10  ;;  %5921 = vmatprep.mubr.bf16.mxu1 %v5279_v10 }
 0xa73   :  { %16973 = vst [vmem:[#allocation32_spill] sm:$0xff] %v14582_v58  ;;  %v14586_v63 = vadd.f32 %v5114_v28, %v16975_v29  ;;  %5751 = vmatmul.mubr.bf16.gmra.mrb[248].mxu0 %v5278_v42  ;;  %5922 = vmatmul.mubr.bf16.gmra.mrb[80].mxu1 %v5278_v42  ;;  %v16342_v14 = vmax.f32 %v14582_v58, 0.0 }
 0xa74   :  { %16970 = vst [vmem:[#allocation30_spill] sm:$0xff] %v14577_v40  ;;  %v14590_v8 = vadd.f32 %v5115_v45, %v16978_v16  ;;  %v16339_v13 = vmax.f32 %v14577_v40, 0.0  ;;  %v16980_v45 = vld [vmem:[#allocation64_spill] sm:$0xff]  ;;  %v16983_v40 = vld [vmem:[#allocation66_spill] sm:$0xff] }
 0xa75   :  { %16976 = vst [vmem:[#allocation34_spill] sm:$0xff] %v14586_v63  ;;  %v16341_v23 = vmax.f32 %v14586_v63, 0.0  ;;  %v16981_v29 = vmax.f32 %v16980_v45, 0.0  ;;  %v16984_v34 = vmax.f32 %v16983_v40, 0.0  ;;  %v16989_v63 = vld [vmem:[#allocation67_spill] sm:$0xff] }
 0xa76   :  { %16979 = vst [vmem:[#allocation37_spill] sm:$0xff] %v14590_v8  ;;  %v16338_v10 = vmax.f32 %v14590_v8, 0.0  ;;  %v5027_v53 = vpop.f32.mrb[24].mxu1 }
 0xa77   :  { %v5116_v55 = vadd.f32 %v14178_v54, %v5027_v53  ;;  %v5029_v59 = vpop.f32.mrb[25].mxu1  ;;  %v5280_v9 = vpack.c.bf16 %v16341_v23, %v16342_v14  ;;  %v16990_v23 = vmax.f32 %v16989_v63, 0.0 }
 0xa78   :  { %v5117_v18 = vadd.f32 %v14186_v41, %v5029_v59  ;;  %v5031_v28 = vpop.f32.mrb[26].mxu1  ;;  %v5281_v38 = vpack.c.bf16 %v16338_v10, %v16339_v13  ;;  %v16986_v10 = vld [vmem:[#allocation65_spill] sm:$0xff] }
 0xa79   :  { %v5118_v16 = vadd.f32 %v14178_v54, %v5031_v28  ;;  %v5033_v42 = vpop.f32.mrb[27].mxu1  ;;  %v14614_v8 = vadd.f32 %v5116_v55, %v16984_v34  ;;  %v16987_v28 = vmax.f32 %v16986_v10, 0.0 }
 0xa7a   :  { %v14609_v53 = vadd.f32 %v5117_v18, %v16981_v29  ;;  %v5119_v59 = vadd.f32 %v14186_v41, %v5033_v42  ;;  %5760 = vmatprep.mubr.bf16.mxu0 %v5281_v38  ;;  %5929 = vmatprep.mubr.bf16.mxu1 %v5281_v38 }
 0xa7b   :  { %16985 = vst [vmem:[#allocation38_spill] sm:$0xff] %v14614_v8  ;;  %v14618_v13 = vadd.f32 %v5118_v16, %v16987_v28  ;;  %5761 = vmatmul.mubr.bf16.gmra.mrb[252].mxu0 %v5280_v9  ;;  %5930 = vmatmul.mubr.bf16.gmra.mrb[84].mxu1 %v5280_v9  ;;  %v16350_v34 = vmax.f32 %v14614_v8, 0.0 }
 0xa7c   :  { %16982 = vst [vmem:[#allocation36_spill] sm:$0xff] %v14609_v53  ;;  %v14622_v14 = vadd.f32 %v5119_v59, %v16990_v23  ;;  %v16347_v42 = vmax.f32 %v14609_v53, 0.0  ;;  %v16992_v59 = vld [vmem:[#allocation68_spill] sm:$0xff]  ;;  %v16995_v53 = vld [vmem:[#allocation70_spill] sm:$0xff] }
 0xa7d   :  { %16988 = vst [vmem:[#allocation42_spill] sm:$0xff] %v14618_v13  ;;  %v16349_v18 = vmax.f32 %v14618_v13, 0.0  ;;  %v16993_v28 = vmax.f32 %v16992_v59, 0.0  ;;  %v16996_v58 = vmax.f32 %v16995_v53, 0.0 }
 0xa7e   :  { %16991 = vst [vmem:[#allocation45_spill] sm:$0xff] %v14622_v14  ;;  %v16346_v38 = vmax.f32 %v14622_v14, 0.0  ;;  %v5037_v45 = vpop.f32.mrb[28].mxu1 }
 0xa7f   :  { %v5120_v40 = vadd.f32 %v14178_v54, %v5037_v45  ;;  %v5039_v10 = vpop.f32.mrb[29].mxu1  ;;  %v5282_v23 = vpack.c.bf16 %v16349_v18, %v16350_v34 }
 0xa80   :  { %v5121_v55 = vadd.f32 %v14186_v41, %v5039_v10  ;;  %v5041_v16 = vpop.f32.mrb[30].mxu1  ;;  %v5283_v63 = vpack.c.bf16 %v16346_v38, %v16347_v42  ;;  %v16998_v38 = vld [vmem:[#allocation69_spill] sm:$0xff] }
 0xa81   :  { %v5122_v9 = vadd.f32 %v14178_v54, %v5041_v16  ;;  %v5043_v29 = vpop.f32.mrb[31].mxu1  ;;  %v14646_v14 = vadd.f32 %v5120_v40, %v16996_v58  ;;  %v16999_v42 = vmax.f32 %v16998_v38, 0.0  ;;  %v17001_v16 = vld [vmem:[#allocation71_spill] sm:$0xff] }
 0xa82   :  { %v14641_v45 = vadd.f32 %v5121_v55, %v16993_v28  ;;  %v5123_v10 = vadd.f32 %v14186_v41, %v5043_v29  ;;  %5770 = vmatprep.mubr.bf16.mxu0 %v5283_v63  ;;  %5937 = vmatprep.mubr.bf16.mxu1 %v5283_v63  ;;  %v17002_v18 = vmax.f32 %v17001_v16, 0.0 }
 0xa83   :  { %16997 = vst [vmem:[#allocation46_spill] sm:$0xff] %v14646_v14  ;;  %v14650_v8 = vadd.f32 %v5122_v9, %v16999_v42  ;;  %5771 = vmatmul.mubr.bf16.gmra.mrb[0].mxu0 %v5282_v23  ;;  %5938 = vmatmul.mubr.bf16.gmra.mrb[88].mxu1 %v5282_v23  ;;  %v16362_v58 = vmax.f32 %v14646_v14, 0.0 }
 0xa84   :  { %16994 = vst [vmem:[#allocation44_spill] sm:$0xff] %v14641_v45  ;;  %v14654_v34 = vadd.f32 %v5123_v10, %v17002_v18  ;;  %v16355_v29 = vmax.f32 %v14641_v45, 0.0  ;;  %v17004_v10 = vld [vmem:[#allocation72_spill] sm:$0xff]  ;;  %v17007_v45 = vld [vmem:[#allocation74_spill] sm:$0xff] }
 0xa85   :  { %17000 = vst [vmem:[#allocation49_spill] sm:$0xff] %v14650_v8  ;;  %v16357_v55 = vmax.f32 %v14650_v8, 0.0  ;;  %v17005_v16 = vmax.f32 %v17004_v10, 0.0  ;;  %v17008_v13 = vmax.f32 %v17007_v45, 0.0 }
 0xa86   :  { %17003 = vst [vmem:[#allocation51_spill] sm:$0xff] %v14654_v34  ;;  %v16354_v63 = vmax.f32 %v14654_v34, 0.0  ;;  %v5047_v59 = vpop.f32.mrb[32].mxu1 }
 0xa87   :  { %v5124_v53 = vadd.f32 %v14178_v54, %v5047_v59  ;;  %v5049_v38 = vpop.f32.mrb[33].mxu1  ;;  %v5284_v23 = vpack.c.bf16 %v16357_v55, %v16362_v58 }
 0xa88   :  { %v5125_v42 = vadd.f32 %v14186_v41, %v5049_v38  ;;  %v5051_v40 = vpop.f32.mrb[34].mxu1  ;;  %v5285_v18 = vpack.c.bf16 %v16354_v63, %v16355_v29  ;;  %v17010_v63 = vld [vmem:[#allocation73_spill] sm:$0xff] }
 0xa89   :  { %v5126_v9 = vadd.f32 %v14178_v54, %v5051_v40  ;;  %v5053_v28 = vpop.f32.mrb[35].mxu1  ;;  %v14678_v34 = vadd.f32 %v5124_v53, %v17008_v13  ;;  %v17011_v29 = vmax.f32 %v17010_v63, 0.0  ;;  %v17013_v54 = vld [vmem:[#allocation75_spill] sm:$0xff] }
 0xa8a   :  { %v14673_v59 = vadd.f32 %v5125_v42, %v17005_v16  ;;  %v5127_v38 = vadd.f32 %v14186_v41, %v5053_v28  ;;  %5780 = vmatprep.mubr.bf16.mxu0 %v5285_v18  ;;  %5945 = vmatprep.mubr.bf16.mxu1 %v5285_v18  ;;  %v17014_v40 = vmax.f32 %v17013_v54, 0.0 }
 0xa8b   :  { %17009 = vst [vmem:[#allocation52_spill] sm:$0xff] %v14678_v34  ;;  %v14682_v14 = vadd.f32 %v5126_v9, %v17011_v29  ;;  %5781 = vmatmul.mubr.bf16.gmra.mrb[4].mxu0 %v5284_v23  ;;  %5946 = vmatmul.mubr.bf16.gmra.mrb[92].mxu1 %v5284_v23  ;;  %v16361_v45 = vmax.f32 %v14678_v34, 0.0  ;;  %v16363_v29 = vrot.slane %v14183_v51, 5 }
 0xa8c   :  { %17006 = vst [vmem:[#allocation50_spill] sm:$0xff] %v14673_v59  ;;  %v14686_v55 = vadd.f32 %v5127_v38, %v17014_v40  ;;  %v16360_v41 = vmax.f32 %v14673_v59, 0.0 }
 0xa8d   :  { %17012 = vst [vmem:[#allocation53_spill] sm:$0xff] %v14682_v14  ;;  %v16359_v42 = vmax.f32 %v14682_v14, 0.0 }
 0xa8e   :  { %17015 = vst [vmem:[#allocation55_spill] sm:$0xff] %v14686_v55  ;;  %v16358_v18 = vmax.f32 %v14686_v55, 0.0 }
 0xa8f   :  { %v5286_v63 = vpack.c.bf16 %v16359_v42, %v16361_v45 }
 0xa90   :  { %v5287_v13 = vpack.c.bf16 %v16358_v18, %v16360_v41 }
 0xa92   :  { %5790 = vmatprep.mubr.bf16.mxu0 %v5287_v13  ;;  %5953 = vmatprep.mubr.bf16.mxu1 %v5287_v13 }
 0xa93   :  { %5791 = vmatmul.mubr.bf16.gmra.mrb[8].mxu0 %v5286_v63  ;;  %5954 = vmatmul.mubr.bf16.gmra.mrb[96].mxu1 %v5286_v63 }
 0xa94   :  { %6030 = vmatprep.mubr.f32.mxu0 %v16363_v29  ;;  %6400 = vmatprep.mubr.bf16.mxu1 %v16505_v50 }
 0xaa5   :  { %v5642_v53 = vpop.f32.mrb[204].mxu0  ;;  %v9207_v23 = vpop.f32.mrb[36].mxu1 }
 0xaa6   :  { %v5644_v9 = vpop.f32.mrb[205].mxu0  ;;  %v9208_v28 = vpop.f32.mrb[37].mxu1 }
 0xaa7   :  { %v9209_v10 = vadd.f32 %v9208_v28, %v9207_v23  ;;  %v5646_v16 = vpop.f32.mrb[206].mxu0  ;;  %v9210_v38 = vpop.f32.mrb[38].mxu1 }
 0xaa8   :  { %v10087_v54 = vpack.c.bf16 %v5646_v16, %v5642_v53  ;;  %v5648_v40 = vpop.f32.mrb[207].mxu0  ;;  %v9211_v18 = vpop.f32.mrb[39].mxu1 }
 0xaa9   :  { %v10085_v42 = vpack.c.bf16 %v5648_v40, %v5644_v9  ;;  %v9212_v41 = vadd.f32 %v9211_v18, %v9210_v38  ;;  %6038 = vperm.xlu0 %10207, %v9209_v10  }
 0xaab   :  { %6043 = vperm.xlu1 %10208, %v9212_v41   ;;  %10086 = vmatprep.subr.bf16.mxu0 %v10085_v42 }
 0xaac   :  { %6368 = vmatprep.subr.bf16.mxu1 %v10085_v42  ;;  %10088 = vmatpush1.bf16.xpose.msra.mxu0 %v10087_v54 }
 0xaad   :  { %6369 = vmatpush1.bf16.msra.mxu1 %v10087_v54 }
 0xaaf   :  { %v5652_v13 = vpop.f32.mrb[208].mxu0  ;;  %v9213_v63 = vpop.f32.mrb[40].mxu1 }
 0xab0   :  { %v5654_v45 = vpop.f32.mrb[209].mxu0  ;;  %v9214_v58 = vpop.f32.mrb[41].mxu1 }
 0xab1   :  { %v9215_v29 = vadd.f32 %v9214_v58, %v9213_v63  ;;  %v5656_v55 = vpop.f32.mrb[210].mxu0  ;;  %v9216_v23 = vpop.f32.mrb[42].mxu1 }
 0xab2   :  { %v10091_v28 = vpack.c.bf16 %v5656_v55, %v5652_v13  ;;  %v5658_v14 = vpop.f32.mrb[211].mxu0  ;;  %v9217_v53 = vpop.f32.mrb[43].mxu1 }
 0xab3   :  { %v10089_v16 = vpack.c.bf16 %v5658_v14, %v5654_v45  ;;  %v9218_v59 = vadd.f32 %v9217_v53, %v9216_v23  ;;  %6048 = vperm.xlu1 %10208, %v9215_v29  }
 0xab5   :  { %6053 = vperm.xlu0 %10207, %v9218_v59   ;;  %10090 = vmatprep.subr.bf16.mxu0 %v10089_v16 }
 0xab6   :  { %6370 = vmatprep.subr.bf16.mxu1 %v10089_v16  ;;  %10092 = vmatpush1.bf16.xpose.msra.mxu0 %v10091_v28 }
 0xab7   :  { %6371 = vmatpush1.bf16.msra.mxu1 %v10091_v28  ;;  %v5662_v42 = vpop.f32.mrb[212].mxu0  ;;  %v9219_v41 = vpop.f32.mrb[44].mxu1 }
 0xab8   :  { %v5664_v18 = vpop.f32.mrb[213].mxu0  ;;  %v9220_v9 = vpop.f32.mrb[45].mxu1 }
 0xab9   :  { %v9221_v10 = vadd.f32 %v9220_v9, %v9219_v41  ;;  %v5666_v38 = vpop.f32.mrb[214].mxu0  ;;  %v9222_v58 = vpop.f32.mrb[46].mxu1 }
 0xaba   :  { %v10095_v54 = vpack.c.bf16 %v5666_v38, %v5662_v42  ;;  %v5668_v40 = vpop.f32.mrb[215].mxu0  ;;  %v9223_v55 = vpop.f32.mrb[47].mxu1 }
 0xabb   :  { %v10093_v13 = vpack.c.bf16 %v5668_v40, %v5664_v18  ;;  %v9224_v63 = vadd.f32 %v9223_v55, %v9222_v58  ;;  %6058 = vperm.xlu1 %10208, %v9221_v10  }
 0xabd   :  { %6063 = vperm.xlu0 %10207, %v9224_v63   ;;  %10094 = vmatprep.subr.bf16.mxu0 %v10093_v13 }
 0xabe   :  { %6372 = vmatprep.subr.bf16.mxu1 %v10093_v13  ;;  %10096 = vmatpush1.bf16.xpose.msra.mxu0 %v10095_v54 }
 0xabf   :  { %6373 = vmatpush1.bf16.msra.mxu1 %v10095_v54  ;;  %v5672_v14 = vpop.f32.mrb[216].mxu0  ;;  %v9225_v59 = vpop.f32.mrb[48].mxu1 }
 0xac0   :  { %v5674_v45 = vpop.f32.mrb[217].mxu0  ;;  %v9226_v29 = vpop.f32.mrb[49].mxu1 }
 0xac1   :  { %v9227_v23 = vadd.f32 %v9226_v29, %v9225_v59  ;;  %v5676_v28 = vpop.f32.mrb[218].mxu0  ;;  %v9228_v53 = vpop.f32.mrb[50].mxu1 }
 0xac2   :  { %v10099_v16 = vpack.c.bf16 %v5676_v28, %v5672_v14  ;;  %v5678_v41 = vpop.f32.mrb[219].mxu0  ;;  %v9229_v42 = vpop.f32.mrb[51].mxu1 }
 0xac3   :  { %v10097_v9 = vpack.c.bf16 %v5678_v41, %v5674_v45  ;;  %v9230_v38 = vadd.f32 %v9229_v42, %v9228_v53  ;;  %6068 = vperm.xlu1 %10208, %v9227_v23  }
 0xac5   :  { %6073 = vperm.xlu0 %10207, %v9230_v38   ;;  %10098 = vmatprep.subr.bf16.mxu0 %v10097_v9 }
 0xac6   :  { %6374 = vmatprep.subr.bf16.mxu1 %v10097_v9  ;;  %10100 = vmatpush1.bf16.xpose.msra.mxu0 %v10099_v16 }
 0xac7   :  { %6375 = vmatpush1.bf16.msra.mxu1 %v10099_v16  ;;  %v5682_v18 = vpop.f32.mrb[220].mxu0  ;;  %v9231_v10 = vpop.f32.mrb[52].mxu1 }
 0xac8   :  { %v5684_v58 = vpop.f32.mrb[221].mxu0  ;;  %v9232_v54 = vpop.f32.mrb[53].mxu1 }
 0xac9   :  { %v9233_v40 = vadd.f32 %v9232_v54, %v9231_v10  ;;  %v5686_v55 = vpop.f32.mrb[222].mxu0  ;;  %v9234_v13 = vpop.f32.mrb[54].mxu1 }
 0xaca   :  { %v10103_v63 = vpack.c.bf16 %v5686_v55, %v5682_v18  ;;  %v5688_v59 = vpop.f32.mrb[223].mxu0  ;;  %v9235_v14 = vpop.f32.mrb[55].mxu1 }
 0xacb   :  { %v10101_v29 = vpack.c.bf16 %v5688_v59, %v5684_v58  ;;  %v9236_v28 = vadd.f32 %v9235_v14, %v9234_v13  ;;  %6078 = vperm.xlu1 %10208, %v9233_v40  }
 0xacd   :  { %6083 = vperm.xlu0 %10207, %v9236_v28   ;;  %10102 = vmatprep.subr.bf16.mxu0 %v10101_v29 }
 0xace   :  { %6376 = vmatprep.subr.bf16.mxu1 %v10101_v29  ;;  %10104 = vmatpush1.bf16.xpose.msra.mxu0 %v10103_v63 }
 0xacf   :  { %6377 = vmatpush1.bf16.msra.mxu1 %v10103_v63  ;;  %v5692_v45 = vpop.f32.mrb[224].mxu0  ;;  %v9237_v23 = vpop.f32.mrb[56].mxu1 }
 0xad0   :  { %v5694_v53 = vpop.f32.mrb[225].mxu0  ;;  %v9238_v16 = vpop.f32.mrb[57].mxu1 }
 0xad1   :  { %v9239_v41 = vadd.f32 %v9238_v16, %v9237_v23  ;;  %v5696_v42 = vpop.f32.mrb[226].mxu0  ;;  %v9240_v9 = vpop.f32.mrb[58].mxu1 }
 0xad2   :  { %v10107_v38 = vpack.c.bf16 %v5696_v42, %v5692_v45  ;;  %v5698_v10 = vpop.f32.mrb[227].mxu0  ;;  %v9241_v18 = vpop.f32.mrb[59].mxu1 }
 0xad3   :  { %v10105_v54 = vpack.c.bf16 %v5698_v10, %v5694_v53  ;;  %v9242_v55 = vadd.f32 %v9241_v18, %v9240_v9  ;;  %6088 = vperm.xlu1 %10208, %v9239_v41  }
 0xad5   :  { %6093 = vperm.xlu0 %10207, %v9242_v55   ;;  %10106 = vmatprep.subr.bf16.mxu0 %v10105_v54 }
 0xad6   :  { %6378 = vmatprep.subr.bf16.mxu1 %v10105_v54  ;;  %10108 = vmatpush1.bf16.xpose.msra.mxu0 %v10107_v38 }
 0xad7   :  { %6379 = vmatpush1.bf16.msra.mxu1 %v10107_v38  ;;  %v5702_v58 = vpop.f32.mrb[228].mxu0  ;;  %v9243_v40 = vpop.f32.mrb[60].mxu1 }
 0xad8   :  { %v5704_v13 = vpop.f32.mrb[229].mxu0  ;;  %v9244_v63 = vpop.f32.mrb[61].mxu1 }
 0xad9   :  { %v9245_v59 = vadd.f32 %v9244_v63, %v9243_v40  ;;  %v5706_v14 = vpop.f32.mrb[230].mxu0  ;;  %v9246_v29 = vpop.f32.mrb[62].mxu1 }
 0xada   :  { %v10111_v28 = vpack.c.bf16 %v5706_v14, %v5702_v58  ;;  %v5708_v23 = vpop.f32.mrb[231].mxu0  ;;  %v9247_v45 = vpop.f32.mrb[63].mxu1 }
 0xadb   :  { %v10109_v16 = vpack.c.bf16 %v5708_v23, %v5704_v13  ;;  %v9248_v42 = vadd.f32 %v9247_v45, %v9246_v29  ;;  %6098 = vperm.xlu1 %10208, %v9245_v59   ;;  %v16367_v13 = vrot.slane %v14175_v7, 5  ;;  %v17016_v59 = vrot.slane %v14183_v51, 5 }
 0xadd   :  { %6103 = vperm.xlu0 %10207, %v9248_v42   ;;  %10110 = vmatprep.subr.bf16.mxu0 %v10109_v16 }
 0xade   :  { %6380 = vmatprep.subr.bf16.mxu1 %v10109_v16  ;;  %10112 = vmatpush1.bf16.xpose.msra.mxu0 %v10111_v28 }
 0xadf   :  { %6381 = vmatpush1.bf16.msra.mxu1 %v10111_v28 }
 0xaf2   :  { %v5712_v53 = vpop.f32.mrb[232].mxu0  ;;  %v9249_v41 = vpop.f32.mrb[64].mxu1 }
 0xaf3   :  { %v5714_v9 = vpop.f32.mrb[233].mxu0  ;;  %v9250_v38 = vpop.f32.mrb[65].mxu1 }
 0xaf4   :  { %v9251_v10 = vadd.f32 %v9250_v38, %v9249_v41  ;;  %v5716_v18 = vpop.f32.mrb[234].mxu0  ;;  %v9252_v54 = vpop.f32.mrb[66].mxu1 }
 0xaf5   :  { %v10115_v55 = vpack.c.bf16 %v5716_v18, %v5712_v53  ;;  %v5718_v40 = vpop.f32.mrb[235].mxu0  ;;  %v9253_v58 = vpop.f32.mrb[67].mxu1 }
 0xaf6   :  { %v10113_v63 = vpack.c.bf16 %v5718_v40, %v5714_v9  ;;  %v9254_v14 = vadd.f32 %v9253_v58, %v9252_v54  ;;  %6108 = vperm.xlu1 %10208, %v9251_v10  }
 0xaf8   :  { %6113 = vperm.xlu0 %10207, %v9254_v14   ;;  %10114 = vmatprep.subr.bf16.mxu0 %v10113_v63 }
 0xaf9   :  { %6382 = vmatprep.subr.bf16.mxu1 %v10113_v63  ;;  %10116 = vmatpush1.bf16.xpose.msra.mxu0 %v10115_v55 }
 0xafa   :  { %6383 = vmatpush1.bf16.msra.mxu1 %v10115_v55 }
 0xb00   :  { %6031 = vmatmul.mubr.f32.vlgmr.msra.gmra.mrb[202].mxu0 %v16367_v13 }
 0xb01   :  { %6545 = vmatprep.mubr.f32.mxu0 %v17016_v59 }
 0xb11   :  { %v5722_v29 = vpop.f32.mrb[236].mxu0  ;;  %v9255_v28 = vpop.f32.mrb[68].mxu1 }
 0xb12   :  { %v5724_v23 = vpop.f32.mrb[237].mxu0  ;;  %v9256_v45 = vpop.f32.mrb[69].mxu1 }
 0xb13   :  { %v9257_v16 = vadd.f32 %v9256_v45, %v9255_v28  ;;  %v5726_v42 = vpop.f32.mrb[238].mxu0  ;;  %v9258_v53 = vpop.f32.mrb[70].mxu1 }
 0xb14   :  { %v14709_v41 = vpack.c.bf16 %v5726_v42, %v5722_v29  ;;  %v5728_v9 = vpop.f32.mrb[239].mxu0  ;;  %v9259_v38 = vpop.f32.mrb[71].mxu1 }
 0xb15   :  { %v10117_v10 = vpack.c.bf16 %v5728_v9, %v5724_v23  ;;  %v9260_v18 = vadd.f32 %v9259_v38, %v9258_v53  ;;  %6553 = vperm.xlu1 %10208, %v9257_v16  }
 0xb17   :  { %6558 = vperm.xlu0 %10207, %v9260_v18   ;;  %10118 = vmatprep.subr.bf16.mxu0 %v10117_v10 }
 0xb18   :  { %6883 = vmatprep.subr.bf16.mxu1 %v10117_v10  ;;  %10120 = vmatpush1.bf16.xpose.msra.mxu0 %v14709_v41 }
 0xb19   :  { %v5732_v51 = vpop.f32.mrb[240].mxu0  ;;  %v9261_v54 = vpop.f32.mrb[72].mxu1 }
 0xb1a   :  { %v5734_v55 = vpop.f32.mrb[241].mxu0  ;;  %v9262_v40 = vpop.f32.mrb[73].mxu1 }
 0xb1b   :  { %v9263_v58 = vadd.f32 %v9262_v40, %v9261_v54  ;;  %v5736_v63 = vpop.f32.mrb[242].mxu0  ;;  %v9264_v14 = vpop.f32.mrb[74].mxu1 }
 0xb1c   :  { %v14712_v59 = vpack.c.bf16 %v5736_v63, %v5732_v51  ;;  %v5738_v29 = vpop.f32.mrb[243].mxu0  ;;  %v9265_v28 = vpop.f32.mrb[75].mxu1 }
 0xb1d   :  { %v14714_v45 = vpack.c.bf16 %v5738_v29, %v5734_v55  ;;  %v9266_v23 = vadd.f32 %v9265_v28, %v9264_v14  ;;  %6563 = vperm.xlu0 %10207, %v9263_v58  }
 0xb1f   :  { %6568 = vperm.xlu1 %10208, %v9266_v23   ;;  %10122 = vmatprep.subr.bf16.mxu0 %v14714_v45 }
 0xb20   :  { %10124 = vmatpush1.bf16.xpose.msra.mxu0 %v14712_v59 }
 0xb21   :  { %v5742_v16 = vpop.f32.mrb[244].mxu0  ;;  %v9267_v42 = vpop.f32.mrb[76].mxu1 }
 0xb22   :  { %v5744_v53 = vpop.f32.mrb[245].mxu0  ;;  %v9268_v9 = vpop.f32.mrb[77].mxu1 }
 0xb23   :  { %v9269_v38 = vadd.f32 %v9268_v9, %v9267_v42  ;;  %v5746_v10 = vpop.f32.mrb[246].mxu0  ;;  %v9270_v18 = vpop.f32.mrb[78].mxu1 }
 0xb24   :  { %v14718_v51 = vpack.c.bf16 %v5746_v10, %v5742_v16  ;;  %v5748_v54 = vpop.f32.mrb[247].mxu0  ;;  %v9271_v40 = vpop.f32.mrb[79].mxu1 }
 0xb25   :  { %v14720_v55 = vpack.c.bf16 %v5748_v54, %v5744_v53  ;;  %v9272_v63 = vadd.f32 %v9271_v40, %v9270_v18  ;;  %6573 = vperm.xlu0 %10207, %v9269_v38  }
 0xb27   :  { %6578 = vperm.xlu1 %10208, %v9272_v63   ;;  %10126 = vmatprep.subr.bf16.mxu0 %v14720_v55 }
 0xb28   :  { %10128 = vmatpush1.bf16.xpose.msra.mxu0 %v14718_v51 }
 0xb46   :  { %v5752_v58 = vpop.f32.mrb[248].mxu0  ;;  %v9273_v14 = vpop.f32.mrb[80].mxu1 }
 0xb47   :  { %v5754_v29 = vpop.f32.mrb[249].mxu0  ;;  %v9274_v28 = vpop.f32.mrb[81].mxu1 }
 0xb48   :  { %v9275_v23 = vadd.f32 %v9274_v28, %v9273_v14  ;;  %v9276_v42 = vpop.f32.mrb[82].mxu1  ;;  %v5756_v9 = vpop.f32.mrb[250].mxu0 }
 0xb49   :  { %v14724_v16 = vpack.c.bf16 %v5756_v9, %v5752_v58  ;;  %v5758_v10 = vpop.f32.mrb[251].mxu0  ;;  %v9277_v13 = vpop.f32.mrb[83].mxu1 }
 0xb4a   :  { %v14726_v53 = vpack.c.bf16 %v5758_v10, %v5754_v29  ;;  %v9278_v18 = vadd.f32 %v9277_v13, %v9276_v42  ;;  %6583 = vperm.xlu0 %10207, %v9275_v23  }
 0xb4c   :  { %6588 = vperm.xlu1 %10208, %v9278_v18   ;;  %10130 = vmatprep.subr.bf16.mxu0 %v14726_v53 }
 0xb4d   :  { %10132 = vmatpush1.bf16.xpose.msra.mxu0 %v14724_v16 }
 0xb4e   :  { %v5762_v38 = vpop.f32.mrb[252].mxu0  ;;  %v9279_v54 = vpop.f32.mrb[84].mxu1 }
 0xb4f   :  { %v5764_v40 = vpop.f32.mrb[253].mxu0  ;;  %v9280_v63 = vpop.f32.mrb[85].mxu1 }
 0xb50   :  { %v9281_v14 = vadd.f32 %v9280_v63, %v9279_v54  ;;  %v9282_v28 = vpop.f32.mrb[86].mxu1  ;;  %v5766_v34 = vpop.f32.mrb[254].mxu0 }
 0xb51   :  { %v14730_v58 = vpack.c.bf16 %v5766_v34, %v5762_v38  ;;  %v5768_v9 = vpop.f32.mrb[255].mxu0  ;;  %v9283_v8 = vpop.f32.mrb[87].mxu1 }
 0xb52   :  { %v14732_v29 = vpack.c.bf16 %v5768_v9, %v5764_v40  ;;  %v9284_v13 = vadd.f32 %v9283_v8, %v9282_v28  ;;  %6593 = vperm.xlu0 %10207, %v9281_v14  }
 0xb54   :  { %6598 = vperm.xlu1 %10208, %v9284_v13   ;;  %10134 = vmatprep.subr.bf16.mxu0 %v14732_v29 }
 0xb55   :  { %10136 = vmatpush1.bf16.xpose.msra.mxu0 %v14730_v58 }
 0xb56   :  { %v5772_v23 = vpop.f32.mrb[0].mxu0  ;;  %v9285_v42 = vpop.f32.mrb[88].mxu1 }
 0xb57   :  { %v5774_v10 = vpop.f32.mrb[1].mxu0  ;;  %v9286_v18 = vpop.f32.mrb[89].mxu1 }
 0xb58   :  { %v9287_v54 = vadd.f32 %v9286_v18, %v9285_v42  ;;  %v9288_v63 = vpop.f32.mrb[90].mxu1  ;;  %v5776_v15 = vpop.f32.mrb[2].mxu0 }
 0xb59   :  { %v14736_v34 = vpack.c.bf16 %v5776_v15, %v5772_v23  ;;  %v5778_v38 = vpop.f32.mrb[3].mxu0  ;;  %v9289_v49 = vpop.f32.mrb[91].mxu1 }
 0xb5a   :  { %v14738_v40 = vpack.c.bf16 %v5778_v38, %v5774_v10  ;;  %v9290_v8 = vadd.f32 %v9289_v49, %v9288_v63  ;;  %6603 = vperm.xlu0 %10207, %v9287_v54  }
 0xb5c   :  { %6608 = vperm.xlu1 %10208, %v9290_v8   ;;  %10138 = vmatprep.subr.bf16.mxu0 %v14738_v40 }
 0xb5d   :  { %10140 = vmatpush1.bf16.xpose.msra.mxu0 %v14736_v34 }
 0xb5e   :  { %v5782_v14 = vpop.f32.mrb[4].mxu0  ;;  %v9291_v28 = vpop.f32.mrb[92].mxu1 }
 0xb5f   :  { %v5784_v9 = vpop.f32.mrb[5].mxu0  ;;  %v9292_v13 = vpop.f32.mrb[93].mxu1 }
 0xb60   :  { %v9293_v42 = vadd.f32 %v9292_v13, %v9291_v28  ;;  %v5786_v18 = vpop.f32.mrb[6].mxu0  ;;  %v9294_v4 = vpop.f32.mrb[94].mxu1 }
 0xb61   :  { %v14742_v15 = vpack.c.bf16 %v5786_v18, %v5782_v14  ;;  %v5788_v23 = vpop.f32.mrb[7].mxu0  ;;  %v9295_v27 = vpop.f32.mrb[95].mxu1 }
 0xb62   :  { %v14744_v10 = vpack.c.bf16 %v5788_v23, %v5784_v9  ;;  %v9296_v49 = vadd.f32 %v9295_v27, %v9294_v4  ;;  %6613 = vperm.xlu0 %10207, %v9293_v42   ;;  %v17017_v27 = vrot.slane %v14175_v7, 5  ;;  %v6039_v42 = vpop.permute.xlu0 %6038 }
 0xb64   :  { %6618 = vperm.xlu1 %10208, %v9296_v49   ;;  %10142 = vmatprep.subr.bf16.mxu0 %v14744_v10  ;;  %v6044_v49 = vpop.permute.xlu1 %6043 }
 0xb65   :  { %10144 = vmatpush1.bf16.xpose.msra.mxu0 %v14742_v15 }
 0xb66   :  { %v5792_v54 = vpop.f32.mrb[8].mxu0  ;;  %v9297_v63 = vpop.f32.mrb[96].mxu1 }
 0xb67   :  { %v5794_v38 = vpop.f32.mrb[9].mxu0  ;;  %v9298_v8 = vpop.f32.mrb[97].mxu1 }
 0xb68   :  { %v14748_v28 = vadd.f32 %v9298_v8, %v9297_v63  ;;  %v5796_v13 = vpop.f32.mrb[10].mxu0  ;;  %v9300_v14 = vpop.f32.mrb[98].mxu1 }
 0xb69   :  { %v14750_v18 = vpack.c.bf16 %v5796_v13, %v5792_v54  ;;  %v5798_v25 = vpop.f32.mrb[11].mxu0  ;;  %v9301_v9 = vpop.f32.mrb[99].mxu1  ;;  %v17018_v54 = vld [vmem:[#allocation9_spill] sm:$0xff] }
 0xb6a   :  { %v14752_v23 = vpack.c.bf16 %v5798_v25, %v5794_v38  ;;  %v14754_v4 = vadd.f32 %v9301_v9, %v9300_v14  ;;  %v6049_v63 = vpop.permute.xlu1 %6048  ;;  %v6054_v8 = vpop.permute.xlu0 %6053 }
 0xb6c   :  { %10146 = vmatprep.subr.bf16.mxu0 %v14752_v23 }
 0xb6d   :  { %10148 = vmatpush1.bf16.xpose.msra.mxu0 %v14750_v18 }
 0xb6e   :  { %v6059_v25 = vpop.permute.xlu1 %6058  ;;  %v6064_v38 = vpop.permute.xlu0 %6063 }
 0xb72   :  { %v6069_v52 = vpop.permute.xlu1 %6068 }
 0xb74   :  { %6546 = vmatmul.mubr.f32.vlgmr.msra.gmra.mrb[12].mxu0 %v17017_v27 }
 0xbd3   :  { %v6032_v24 = vpop.f32.mrb[202].mxu0 }
 0xbd4   :  { %v14761_v13 = vrot.slane %v6032_v24, %v17018_v54  ;;  %v6034_v26 = vpop.f32.mrb[203].mxu0 }
 0xbd6   :  { %v6121_v14 = vadd.f32 %v14761_v13, %v6044_v49  ;;  %v6120_v9 = vadd.f32 %v14761_v13, %v6039_v42  ;;  %v6123_v30 = vadd.f32 %v14761_v13, %v6054_v8  ;;  %v6122_v7 = vadd.f32 %v14761_v13, %v6049_v63  ;;  %v6074_v49 = vpop.permute.xlu0 %6073  ;;  %v17020_v63 = vld [vmem:[#allocation110_spill] sm:$0xff] }
 0xbd7   :  { %v6125_v27 = vadd.f32 %v14761_v13, %v6064_v38  ;;  %v6124_v46 = vadd.f32 %v14761_v13, %v6059_v25  ;;  %v6127_v25 = vadd.f32 %v14761_v13, %v6074_v49  ;;  %v6126_v37 = vadd.f32 %v14761_v13, %v6069_v52 }
 0xbd8   :  { %vm6137_vm11 = vcmp.gt.f32.partialorder %v6121_v14, 0.0  ;;  %v6153_v47 = vmul.f32 0.2, %v6121_v14  ;;  %vm6136_vm12 = vcmp.gt.f32.partialorder %v6120_v9, 0.0  ;;  %v6152_v24 = vmul.f32 0.2, %v6120_v9 }
 0xbd9   :  { %vm6139_vm13 = vcmp.gt.f32.partialorder %v6123_v30, 0.0  ;;  %v6155_v26 = vmul.f32 0.2, %v6123_v30  ;;  %vm6138_vm14 = vcmp.gt.f32.partialorder %v6122_v7, 0.0  ;;  %v6154_v35 = vmul.f32 0.2, %v6122_v7 }
 0xbda   :  { %v6169_v6 = vsel %vm6137_vm11, %v6121_v14, %v6153_v47  ;;  %v6168_v42 = vsel %vm6136_vm12, %v6120_v9, %v6152_v24  ;;  %v6157_v38 = vmul.f32 0.2, %v6125_v27  ;;  %vm6141_vm15 = vcmp.gt.f32.partialorder %v6125_v27, 0.0  ;;  %v6079_v14 = vpop.permute.xlu1 %6078  ;;  %v17021_v9 = vld [vmem:[#allocation117_spill] sm:$0xff] }
 0xbdb   :  { %v14770_v8 = vadd.f32 %v6169_v6, %v17019_v19  ;;  %v14773_v56 = vadd.f32 %v6168_v42, %v17020_v63  ;;  %v6171_v22 = vsel %vm6139_vm13, %v6123_v30, %v6155_v26  ;;  %v6170_v11 = vsel %vm6138_vm14, %v6122_v7, %v6154_v35  ;;  %v6084_v6 = vpop.permute.xlu0 %6083  ;;  %v17022_v42 = vld [vmem:[#allocation115_spill] sm:$0xff] }
 0xbdc   :  { %vm6140_vm1 = vcmp.gt.f32.partialorder %v6124_v46, 0.0  ;;  %v6156_v47 = vmul.f32 0.2, %v6124_v46  ;;  %v14780_v24 = vadd.f32 %v6171_v22, %v17021_v9  ;;  %v14783_v63 = vadd.f32 %v6170_v11, %v17022_v42  ;;  %v17023_v9 = vld [vmem:[#allocation119_spill] sm:$0xff]  ;;  %v17024_v11 = vld [vmem:[#allocation118_spill] sm:$0xff] }
 0xbdd   :  { %6202 = vmax.xlane.f32.xlu0 %v14770_v8  ;;  %6200 = vmax.xlane.f32.xlu1 %v14773_v56  ;;  %v6173_v49 = vsel %vm6141_vm15, %v6125_v27, %v6157_v38  ;;  %v6159_v30 = vmul.f32 0.2, %v6127_v25  ;;  %v6158_v7 = vmul.f32 0.2, %v6126_v37  ;;  %v6129_v52 = vadd.f32 %v14761_v13, %v6084_v6 }
 0xbde   :  { %v6172_v35 = vsel %vm6140_vm1, %v6124_v46, %v6156_v47  ;;  %v6128_v26 = vadd.f32 %v14761_v13, %v6079_v14  ;;  %vm6143_vm2 = vcmp.gt.f32.partialorder %v6127_v25, 0.0  ;;  %vm6142_vm3 = vcmp.gt.f32.partialorder %v6126_v37, 0.0  ;;  %v6089_v19 = vpop.permute.xlu1 %6088 }
 0xbdf   :  { %v6094_v22 = vpop.permute.xlu0 %6093  ;;  %v14790_v1 = vadd.f32 %v6173_v49, %v17023_v9  ;;  %v14793_v27 = vadd.f32 %v6172_v35, %v17024_v11  ;;  %v6130_v38 = vadd.f32 %v14761_v13, %v6089_v19  ;;  %v6175_v47 = vsel %vm6143_vm2, %v6127_v25, %v6159_v30  ;;  %v17025_v9 = vld [vmem:[#allocation120_spill] sm:$0xff]  ;;  %v17026_v35 = vld [vmem:[#allocation111_spill] sm:$0xff] }
 0xbe0   :  { %v6131_v46 = vadd.f32 %v14761_v13, %v6094_v22  ;;  %v6174_v14 = vsel %vm6142_vm3, %v6126_v37, %v6158_v7  ;;  %v6161_v6 = vmul.f32 0.2, %v6129_v52  ;;  %v6160_v42 = vmul.f32 0.2, %v6128_v26 }
 0xbe1   :  { %6206 = vmax.xlane.f32.xlu0 %v14780_v24  ;;  %6204 = vmax.xlane.f32.xlu1 %v14783_v63  ;;  %vm6145_vm4 = vcmp.gt.f32.partialorder %v6129_v52, 0.0  ;;  %vm6144_vm5 = vcmp.gt.f32.partialorder %v6128_v26, 0.0  ;;  %v14800_v33 = vadd.f32 %v6175_v47, %v17025_v9  ;;  %v14803_v11 = vadd.f32 %v6174_v14, %v17026_v35  ;;  %v17028_v9 = vld [vmem:[#allocation112_spill] sm:$0xff] }
 0xbe2   :  { %v6099_v57 = vpop.permute.xlu1 %6098  ;;  %v6163_v22 = vmul.f32 0.2, %v6131_v46  ;;  %v6162_v19 = vmul.f32 0.2, %v6130_v38  ;;  %v6177_v25 = vsel %vm6145_vm4, %v6129_v52, %v6161_v6  ;;  %v6176_v37 = vsel %vm6144_vm5, %v6128_v26, %v6160_v42  ;;  %v17030_v6 = vld [vmem:[#allocation114_spill] sm:$0xff] }
 0xbe3   :  { %v6104_v49 = vpop.permute.xlu0 %6103  ;;  %v6132_v7 = vadd.f32 %v14761_v13, %v6099_v57  ;;  %vm6147_vm6 = vcmp.gt.f32.partialorder %v6131_v46, 0.0  ;;  %vm6146_vm7 = vcmp.gt.f32.partialorder %v6130_v38, 0.0  ;;  %v14810_v47 = vadd.f32 %v6177_v25, %v17027_v17  ;;  %v17029_v57 = vld [vmem:[#allocation122_spill] sm:$0xff] }
 0xbe4   :  { %v6133_v30 = vadd.f32 %v14761_v13, %v6104_v49  ;;  %v14813_v14 = vadd.f32 %v6176_v37, %v17028_v9  ;;  %v6179_v35 = vsel %vm6147_vm6, %v6131_v46, %v6163_v22  ;;  %v6178_v12 = vsel %vm6146_vm7, %v6130_v38, %v6162_v19  ;;  %v17031_v46 = vld [vmem:[#allocation116_spill] sm:$0xff]  ;;  %v17032_v22 = vld [vmem:[#allocation123_spill] sm:$0xff] }
 0xbe5   :  { %6210 = vmax.xlane.f32.xlu0 %v14790_v1  ;;  %6208 = vmax.xlane.f32.xlu1 %v14793_v27  ;;  %v6164_v42 = vmul.f32 0.2, %v6132_v7  ;;  %vm6148_vm9 = vcmp.gt.f32.partialorder %v6132_v7, 0.0  ;;  %v14818_v26 = vadd.f32 %v6179_v35, %v17029_v57  ;;  %v14821_v49 = vadd.f32 %v6178_v12, %v17030_v6  ;;  %v17034_v57 = vld [vmem:[#allocation24_spill] sm:$0xff] }
 0xbe6   :  { %v6165_v52 = vmul.f32 0.2, %v6133_v30  ;;  %vm6149_vm8 = vcmp.gt.f32.partialorder %v6133_v30, 0.0  ;;  %v6109_v12 = vpop.permute.xlu1 %6108 }
 0xbe7   :  { %v6180_v17 = vsel %vm6148_vm9, %v6132_v7, %v6164_v42  ;;  %v6114_v35 = vpop.permute.xlu0 %6113 }
 0xbe8   :  { %v6181_v25 = vsel %vm6149_vm8, %v6133_v30, %v6165_v52  ;;  %v14829_v19 = vadd.f32 %v6180_v17, %v17032_v22  ;;  %v6135_v37 = vadd.f32 %v14761_v13, %v6114_v35  ;;  %v6134_v30 = vadd.f32 %v14761_v13, %v6109_v12 }
 0xbe9   :  { %6214 = vmax.xlane.f32.xlu0 %v14800_v33  ;;  %6212 = vmax.xlane.f32.xlu1 %v14803_v11  ;;  %v14826_v38 = vadd.f32 %v6181_v25, %v17031_v46  ;;  %v17033_v25 = vld [vmem:[#allocation124_spill] sm:$0xff] }
 0xbea   :  { %v6167_v7 = vmul.f32 0.2, %v6135_v37  ;;  %v6166_v52 = vmul.f32 0.2, %v6134_v30  ;;  %vm6151_vm10 = vcmp.gt.f32.partialorder %v6135_v37, 0.0  ;;  %vm6150_vm11 = vcmp.gt.f32.partialorder %v6134_v30, 0.0 }
 0xbec   :  { %v6183_v17 = vsel %vm6151_vm10, %v6135_v37, %v6167_v7  ;;  %v6182_v42 = vsel %vm6150_vm11, %v6134_v30, %v6166_v52 }
 0xbed   :  { %6218 = vmax.xlane.f32.xlu0 %v14810_v47  ;;  %6216 = vmax.xlane.f32.xlu1 %v14813_v14  ;;  %v14838_v46 = vadd.f32 %v6183_v17, %v17033_v25  ;;  %v14841_v22 = vadd.f32 %v6182_v42, %v17034_v57 }
 0xbf1   :  { %6222 = vmax.xlane.f32.xlu0 %v14818_v26  ;;  %6220 = vmax.xlane.f32.xlu1 %v14821_v49 }
 0xbf5   :  { %6226 = vmax.xlane.f32.xlu0 %v14826_v38  ;;  %6224 = vmax.xlane.f32.xlu1 %v14829_v19 }
 0xc06   :  { %6628 = vperm.xlu1 %10208, %v14754_v4   ;;  %v6559_v4 = vpop.permute.xlu0 %6558 }
 0xc0a   :  { %v6564_v35 = vpop.permute.xlu0 %6563 }
 0xc0b   :  { %6623 = vperm.xlu0 %10207, %v14748_v28   ;;  %v6554_v28 = vpop.permute.xlu1 %6553 }
 0xc0e   :  { %v6574_v30 = vpop.permute.xlu0 %6573 }
 0xc0f   :  { %v6569_v13 = vpop.permute.xlu1 %6568 }
 0xc13   :  { %v6579_v7 = vpop.permute.xlu1 %6578 }
 0xc2a   :  { %6230 = vmax.xlane.f32.xlu0 %v14838_v46  ;;  %6228 = vmax.xlane.f32.xlu1 %v14841_v22 }
 0xc47   :  { %v6547_v12 = vpop.f32.mrb[12].mxu0 }
 0xc48   :  { %v14846_v6 = vrot.slane %v6547_v12, %v17018_v54  ;;  %v6549_v37 = vpop.f32.mrb[13].mxu0 }
 0xc4a   :  { %v6636_v52 = vadd.f32 %v14846_v6, %v6559_v4  ;;  %v6635_v17 = vadd.f32 %v14846_v6, %v6554_v28  ;;  %v6638_v42 = vadd.f32 %v14846_v6, %v6569_v13  ;;  %v6637_v25 = vadd.f32 %v14846_v6, %v6564_v35  ;;  %v17036_v13 = vld [vmem:[#allocation125_spill] sm:$0xff] }
 0xc4b   :  { %v6640_v57 = vadd.f32 %v14846_v6, %v6579_v7  ;;  %v6639_v9 = vadd.f32 %v14846_v6, %v6574_v30 }
 0xc4c   :  { %vm6652_vm12 = vcmp.gt.f32.partialorder %v6636_v52, 0.0  ;;  %v6668_v20 = vmul.f32 0.2, %v6636_v52  ;;  %vm6651_vm13 = vcmp.gt.f32.partialorder %v6635_v17, 0.0  ;;  %v6667_v12 = vmul.f32 0.2, %v6635_v17 }
 0xc4d   :  { %vm6654_vm14 = vcmp.gt.f32.partialorder %v6638_v42, 0.0  ;;  %v6670_v37 = vmul.f32 0.2, %v6638_v42  ;;  %vm6653_vm15 = vcmp.gt.f32.partialorder %v6637_v25, 0.0  ;;  %v6669_v54 = vmul.f32 0.2, %v6637_v25 }
 0xc4e   :  { %v6684_v43 = vsel %vm6652_vm12, %v6636_v52, %v6668_v20  ;;  %v6683_v4 = vsel %vm6651_vm13, %v6635_v17, %v6667_v12  ;;  %v6672_v48 = vmul.f32 0.2, %v6640_v57  ;;  %vm6656_vm1 = vcmp.gt.f32.partialorder %v6640_v57, 0.0  ;;  %v17038_v20 = vld [vmem:[#allocation16_spill] sm:$0xff] }
 0xc4f   :  { %v14855_v28 = vadd.f32 %v6684_v43, %v17035_v5  ;;  %v14858_v62 = vadd.f32 %v6683_v4, %v17036_v13  ;;  %v6686_v35 = vsel %vm6654_vm14, %v6638_v42, %v6670_v37  ;;  %v6685_v7 = vsel %vm6653_vm15, %v6637_v25, %v6669_v54  ;;  %v17039_v54 = vld [vmem:[#allocation13_spill] sm:$0xff]  ;;  %v17040_v42 = vld [vmem:[#allocation23_spill] sm:$0xff]  ;;  %v6584_v37 = vpop.permute.xlu0 %6583  ;;  %v6589_v4 = vpop.permute.xlu1 %6588 }
 0xc50   :  { %vm6655_vm2 = vcmp.gt.f32.partialorder %v6639_v9, 0.0  ;;  %v6671_v30 = vmul.f32 0.2, %v6639_v9  ;;  %v14863_v2 = vadd.f32 %v6686_v35, %v17037_v32  ;;  %v14866_v52 = vadd.f32 %v6685_v7, %v17038_v20 }
 0xc51   :  { %6717 = vmax.xlane.f32.xlu1 %v14855_v28  ;;  %6715 = vmax.xlane.f32.xlu0 %v14858_v62  ;;  %v6688_v43 = vsel %vm6656_vm1, %v6640_v57, %v6672_v48  ;;  %v6642_v3 = vadd.f32 %v14846_v6, %v6589_v4  ;;  %v6641_v60 = vadd.f32 %v14846_v6, %v6584_v37  ;;  %v17041_v37 = vld [vmem:[#allocation14_spill] sm:$0xff] }
 0xc52   :  { %v6687_v17 = vsel %vm6655_vm2, %v6639_v9, %v6671_v30  ;;  %v14871_v25 = vadd.f32 %v6688_v43, %v17039_v54 }
 0xc53   :  { %v14874_v12 = vadd.f32 %v6687_v17, %v17040_v42  ;;  %v6594_v35 = vpop.permute.xlu0 %6593  ;;  %v6599_v7 = vpop.permute.xlu1 %6598  ;;  %vm6658_vm3 = vcmp.gt.f32.partialorder %v6642_v3, 0.0  ;;  %vm6657_vm4 = vcmp.gt.f32.partialorder %v6641_v60, 0.0 }
 0xc55   :  { %6721 = vmax.xlane.f32.xlu1 %v14863_v2  ;;  %6719 = vmax.xlane.f32.xlu0 %v14866_v52 }
 0xc57   :  { %v14878_v48 = vpop.permute.xlu0 %6603  ;;  %v6609_v9 = vpop.permute.xlu1 %6608 }
 0xc59   :  { %6725 = vmax.xlane.f32.xlu1 %v14871_v25  ;;  %6723 = vmax.xlane.f32.xlu0 %v14874_v12 }
 0xc5b   :  { %v14880_v57 = vpop.permute.xlu0 %6613  ;;  %v14882_v30 = vpop.permute.xlu1 %6618 }
 0xc6a   :  { %v6203_v43 = vpop.xlane.xlu0 %6202  ;;  %v6201_v54 = vpop.xlane.xlu1 %6200 }
 0xc6b   :  { %v6233_v17 = vsub.f32 %v14770_v8, %v6203_v43  ;;  %v6232_v42 = vsub.f32 %v14773_v56, %v6201_v54  ;;  %v6674_v43 = vmul.f32 0.2, %v6642_v3  ;;  %v6673_v54 = vmul.f32 0.2, %v6641_v60 }
 0xc6d   :  { %v6250_v20 = vmul.f32 1.442695, %v6233_v17  ;;  %v6248_v32 = vmul.f32 1.442695, %v6232_v42  ;;  %v6643_v42 = vadd.f32 %v14846_v6, %v6594_v35 }
 0xc6e   :  { %v6207_v13 = vpop.xlane.xlu0 %6206  ;;  %v6205_v5 = vpop.xlane.xlu1 %6204 }
 0xc6f   :  { %10677 = vpow2.f32 %v6250_v20  ;;  %v6235_v0 = vsub.f32 %v14780_v24, %v6207_v13  ;;  %v6234_v44 = vsub.f32 %v14783_v63, %v6205_v5  ;;  %v6690_v24 = vsel %vm6658_vm3, %v6642_v3, %v6674_v43 }
 0xc70   :  { %10679 = vpow2.f32 %v6248_v32  ;;  %v6644_v13 = vadd.f32 %v14846_v6, %v6599_v7  ;;  %v6675_v7 = vmul.f32 0.2, %v6643_v42  ;;  %vm6659_vm6 = vcmp.gt.f32.partialorder %v6643_v42, 0.0 }
 0xc71   :  { %v6254_v31 = vmul.f32 1.442695, %v6235_v0  ;;  %v6252_v8 = vmul.f32 1.442695, %v6234_v44  ;;  %v6689_v44 = vsel %vm6657_vm4, %v6641_v60, %v6673_v54  ;;  %v6646_v54 = vadd.f32 %v14846_v6, %v6609_v9 }
 0xc72   :  { %v6209_v61 = vpop.xlane.xlu1 %6208  ;;  %v6211_v21 = vpop.xlane.xlu0 %6210  ;;  %v6676_v3 = vmul.f32 0.2, %v6644_v13  ;;  %vm6660_vm5 = vcmp.gt.f32.partialorder %v6644_v13, 0.0 }
 0xc73   :  { %10681 = vpow2.f32 %v6254_v31  ;;  %v6237_v20 = vsub.f32 %v14790_v1, %v6211_v21  ;;  %v6236_v32 = vsub.f32 %v14793_v27, %v6209_v61  ;;  %v14901_v61 = vadd.f32 %v6690_v24, %v17041_v37  ;;  %v17042_v27 = vld [vmem:[#allocation12_spill] sm:$0xff] }
 0xc74   :  { %10683 = vpow2.f32 %v6252_v8  ;;  %v14904_v4 = vadd.f32 %v6689_v44, %v17042_v27  ;;  %v6692_v43 = vsel %vm6660_vm5, %v6644_v13, %v6676_v3  ;;  %v6691_v24 = vsel %vm6659_vm6, %v6643_v42, %v6675_v7  ;;  %v17044_v13 = vld [vmem:[#allocation35_spill] sm:$0xff] }
 0xc75   :  { %v6258_v31 = vmul.f32 1.442695, %v6237_v20  ;;  %v6256_v21 = vmul.f32 1.442695, %v6236_v32  ;;  %v6678_v9 = vmul.f32 0.2, %v6646_v54 }
 0xc76   :  { %v6213_v56 = vpop.xlane.xlu1 %6212  ;;  %v6215_v63 = vpop.xlane.xlu0 %6214  ;;  %vm6662_vm7 = vcmp.gt.f32.partialorder %v6646_v54, 0.0 }
 0xc77   :  { %10685 = vpow2.f32 %v6258_v31  ;;  %v6239_v60 = vsub.f32 %v14800_v33, %v6215_v63  ;;  %v6238_v17 = vsub.f32 %v14803_v11, %v6213_v56  ;;  %v6645_v33 = vadd.f32 %v14846_v6, %v14878_v48  ;;  %v17043_v31 = vld [vmem:[#allocation33_spill] sm:$0xff] }
 0xc78   :  { %10687 = vpow2.f32 %v6256_v21  ;;  %v14920_v11 = vadd.f32 %v6692_v43, %v17043_v31  ;;  %v14923_v21 = vadd.f32 %v6691_v24, %v17044_v13  ;;  %v6648_v43 = vadd.f32 %v14846_v6, %v14882_v30 }
 0xc79   :  { %v14892_v5 = vpop.eup %10677  ;;  %v6262_v63 = vmul.f32 1.442695, %v6239_v60  ;;  %v6260_v44 = vmul.f32 1.442695, %v6238_v17  ;;  %v6677_v3 = vmul.f32 0.2, %v6645_v33  ;;  %v6694_v17 = vsel %vm6662_vm7, %v6646_v54, %v6678_v9 }
 0xc7a   :  { %v14895_v0 = vpop.eup %10679  ;;  %6282 = vadd.xlane.f32.xlu1 %v14892_v5  ;;  %v6217_v1 = vpop.xlane.xlu1 %6216  ;;  %vm6661_vm8 = vcmp.gt.f32.partialorder %v6645_v33, 0.0  ;;  %v17046_v54 = vld [vmem:[#allocation40_spill] sm:$0xff]  ;;  %v6680_v30 = vmul.f32 0.2, %v6648_v43  ;;  %vm6664_vm9 = vcmp.gt.f32.partialorder %v6648_v43, 0.0 }
 0xc7b   :  { %6280 = vadd.xlane.f32.xlu0 %v14895_v0  ;;  %v6219_v35 = vpop.xlane.xlu0 %6218  ;;  %10689 = vpow2.f32 %v6262_v63  ;;  %v6240_v48 = vsub.f32 %v14813_v14, %v6217_v1  ;;  %v6693_v63 = vsel %vm6661_vm8, %v6645_v33, %v6677_v3  ;;  %v17045_v1 = vld [vmem:[#allocation39_spill] sm:$0xff] }
 0xc7c   :  { %v6241_v42 = vsub.f32 %v14810_v47, %v6219_v35  ;;  %10691 = vpow2.f32 %v6260_v44  ;;  %v6647_v47 = vadd.f32 %v14846_v6, %v14880_v57  ;;  %v14940_v44 = vadd.f32 %v6694_v17, %v17045_v1 }
 0xc7d   :  { %v14910_v8 = vpop.eup %10681  ;;  %v6264_v14 = vmul.f32 1.442695, %v6240_v48  ;;  %v14943_v9 = vadd.f32 %v6693_v63, %v17046_v54  ;;  %v6696_v63 = vsel %vm6664_vm9, %v6648_v43, %v6680_v30  ;;  %v17048_v43 = vld [vmem:[#allocation43_spill] sm:$0xff] }
 0xc7e   :  { %6729 = vmax.xlane.f32.xlu1 %v14901_v61  ;;  %v14913_v20 = vpop.eup %10683  ;;  %v6221_v32 = vpop.xlane.xlu1 %6220  ;;  %v6266_v35 = vmul.f32 1.442695, %v6241_v42  ;;  %v6679_v33 = vmul.f32 0.2, %v6647_v47  ;;  %vm6663_vm10 = vcmp.gt.f32.partialorder %v6647_v47, 0.0 }
 0xc7f   :  { %6727 = vmax.xlane.f32.xlu0 %v14904_v4  ;;  %v6223_v56 = vpop.xlane.xlu0 %6222  ;;  %v6242_v42 = vsub.f32 %v14821_v49, %v6221_v32  ;;  %v17047_v32 = vld [vmem:[#allocation41_spill] sm:$0xff] }
 0xc80   :  { %10693 = vpow2.f32 %v6266_v35  ;;  %v6243_v57 = vsub.f32 %v14818_v26, %v6223_v56  ;;  %v6695_v35 = vsel %vm6663_vm10, %v6647_v47, %v6679_v33  ;;  %v14960_v27 = vadd.f32 %v6696_v63, %v17047_v32 }
 0xc81   :  { %v14929_v60 = vpop.eup %10685  ;;  %10695 = vpow2.f32 %v6264_v14  ;;  %v6268_v14 = vmul.f32 1.442695, %v6242_v42  ;;  %v14963_v30 = vadd.f32 %v6695_v35, %v17048_v43  ;;  %v17050_v42 = vld [vmem:[#allocation48_spill] sm:$0xff] }
 0xc82   :  { %6286 = vadd.xlane.f32.xlu1 %v14910_v8  ;;  %v6225_v7 = vpop.xlane.xlu1 %6224  ;;  %v14933_v24 = vpop.eup %10687  ;;  %v6270_v26 = vmul.f32 1.442695, %v6243_v57  ;;  %v17049_v57 = vld [vmem:[#allocation47_spill] sm:$0xff] }
 0xc83   :  { %6284 = vadd.xlane.f32.xlu0 %v14913_v20  ;;  %v6227_v13 = vpop.xlane.xlu0 %6226  ;;  %v6244_v49 = vsub.f32 %v14829_v19, %v6225_v7 }
 0xc84   :  { %v6245_v56 = vsub.f32 %v14826_v38, %v6227_v13  ;;  %10697 = vpow2.f32 %v6270_v26 }
 0xc85   :  { %v14949_v48 = vpop.eup %10689  ;;  %10699 = vpow2.f32 %v6268_v14  ;;  %v6272_v38 = vmul.f32 1.442695, %v6244_v49 }
 0xc86   :  { %6733 = vmax.xlane.f32.xlu1 %v14920_v11  ;;  %v6629_v31 = vpop.permute.xlu1 %6628  ;;  %v14952_v54 = vpop.eup %10691  ;;  %v6274_v47 = vmul.f32 1.442695, %v6245_v56 }
 0xc87   :  { %6731 = vmax.xlane.f32.xlu0 %v14923_v21  ;;  %v6650_v17 = vadd.f32 %v14846_v6, %v6629_v31 }
 0xc88   :  { %10701 = vpow2.f32 %v6274_v47 }
 0xc89   :  { %v6682_v31 = vmul.f32 0.2, %v6650_v17  ;;  %vm6666_vm11 = vcmp.gt.f32.partialorder %v6650_v17, 0.0  ;;  %10703 = vpow2.f32 %v6272_v38 }
 0xc8a   :  { %6290 = vadd.xlane.f32.xlu1 %v14929_v60  ;;  %v6624_v3 = vpop.permute.xlu0 %6623  ;;  %v14967_v13 = vpop.eup %10693 }
 0xc8b   :  { %6288 = vadd.xlane.f32.xlu0 %v14933_v24  ;;  %v6649_v1 = vadd.f32 %v14846_v6, %v6624_v3  ;;  %v6698_v19 = vsel %vm6666_vm11, %v6650_v17, %v6682_v31  ;;  %v14969_v7 = vpop.eup %10695 }
 0xc8c   :  { %v14974_v3 = vadd.f32 %v6698_v19, %v17049_v57 }
 0xc8d   :  { %v6681_v6 = vmul.f32 0.2, %v6649_v1  ;;  %vm6665_vm12 = vcmp.gt.f32.partialorder %v6649_v1, 0.0 }
 0xc8e   :  { %6737 = vmax.xlane.f32.xlu1 %v14940_v44  ;;  %v14981_v17 = vpop.eup %10697 }
 0xc8f   :  { %6735 = vmax.xlane.f32.xlu0 %v14943_v9  ;;  %v6697_v33 = vsel %vm6665_vm12, %v6649_v1, %v6681_v6  ;;  %v14983_v35 = vpop.eup %10699 }
 0xc90   :  { %v14977_v63 = vadd.f32 %v6697_v33, %v17050_v42 }
 0xc92   :  { %6294 = vadd.xlane.f32.xlu1 %v14949_v48  ;;  %v14987_v1 = vpop.eup %10701 }
 0xc93   :  { %6292 = vadd.xlane.f32.xlu0 %v14952_v54  ;;  %v14989_v26 = vpop.eup %10703 }
 0xc96   :  { %6741 = vmax.xlane.f32.xlu1 %v14960_v27 }
 0xc97   :  { %6739 = vmax.xlane.f32.xlu0 %v14963_v30 }
 0xc9a   :  { %6298 = vadd.xlane.f32.xlu1 %v14967_v13 }
 0xc9b   :  { %6296 = vadd.xlane.f32.xlu0 %v14969_v7 }
 0xc9e   :  { %6745 = vmax.xlane.f32.xlu1 %v14974_v3 }
 0xc9f   :  { %6743 = vmax.xlane.f32.xlu0 %v14977_v63 }
 0xca2   :  { %6302 = vadd.xlane.f32.xlu1 %v14981_v17 }
 0xca3   :  { %6300 = vadd.xlane.f32.xlu0 %v14983_v35 }
 0xca6   :  { %6306 = vadd.xlane.f32.xlu1 %v14987_v1 }
 0xca7   :  { %6304 = vadd.xlane.f32.xlu0 %v14989_v26 }
 0xcb7   :  { %v6231_v56 = vpop.xlane.xlu0 %6230  ;;  %v6229_v14 = vpop.xlane.xlu1 %6228 }
 0xcb8   :  { %v6247_v49 = vsub.f32 %v14838_v46, %v6231_v56  ;;  %v6246_v31 = vsub.f32 %v14841_v22, %v6229_v14 }
 0xcba   :  { %v6278_v6 = vmul.f32 1.442695, %v6247_v49  ;;  %v6276_v47 = vmul.f32 1.442695, %v6246_v31 }
 0xcbc   :  { %10705 = vpow2.f32 %v6278_v6 }
 0xcbd   :  { %10707 = vpow2.f32 %v6276_v47 }
 0xcc6   :  { %v14995_v38 = vpop.eup %10705 }
 0xcc7   :  { %v14997_v19 = vpop.eup %10707  ;;  %6310 = vadd.xlane.f32.xlu1 %v14995_v38 }
 0xcc8   :  { %6308 = vadd.xlane.f32.xlu0 %v14997_v19 }
 0xcde   :  { %v6718_v33 = vpop.xlane.xlu1 %6717  ;;  %v6716_v42 = vpop.xlane.xlu0 %6715 }
 0xcdf   :  { %v6748_v57 = vsub.f32 %v14855_v28, %v6718_v33  ;;  %v6747_v46 = vsub.f32 %v14858_v62, %v6716_v42 }
 0xce1   :  { %v6765_v56 = vmul.f32 1.442695, %v6748_v57  ;;  %v6763_v22 = vmul.f32 1.442695, %v6747_v46 }
 0xce2   :  { %v6722_v14 = vpop.xlane.xlu1 %6721  ;;  %v6720_v49 = vpop.xlane.xlu0 %6719 }
 0xce3   :  { %10709 = vpow2.f32 %v6765_v56  ;;  %v6750_v31 = vsub.f32 %v14863_v2, %v6722_v14  ;;  %v6749_v6 = vsub.f32 %v14866_v52, %v6720_v49 }
 0xce4   :  { %10711 = vpow2.f32 %v6763_v22 }
 0xce5   :  { %v6769_v47 = vmul.f32 1.442695, %v6750_v31  ;;  %v6767_v43 = vmul.f32 1.442695, %v6749_v6 }
 0xce6   :  { %v6726_v32 = vpop.xlane.xlu1 %6725  ;;  %v6724_v37 = vpop.xlane.xlu0 %6723 }
 0xce7   :  { %10713 = vpow2.f32 %v6769_v47  ;;  %v6752_v39 = vsub.f32 %v14871_v25, %v6726_v32  ;;  %v6751_v28 = vsub.f32 %v14874_v12, %v6724_v37 }
 0xce8   :  { %10715 = vpow2.f32 %v6767_v43 }
 0xce9   :  { %v6773_v62 = vmul.f32 1.442695, %v6752_v39  ;;  %v6771_v57 = vmul.f32 1.442695, %v6751_v28 }
 0xceb   :  { %10717 = vpow2.f32 %v6773_v62 }
 0xcec   :  { %10719 = vpow2.f32 %v6771_v57 }
 0xced   :  { %v15007_v42 = vpop.eup %10709 }
 0xcee   :  { %v15009_v2 = vpop.eup %10711  ;;  %6797 = vadd.xlane.f32.xlu1 %v15007_v42 }
 0xcef   :  { %6795 = vadd.xlane.f32.xlu0 %v15009_v2 }
 0xcf1   :  { %v15013_v52 = vpop.eup %10713 }
 0xcf2   :  { %v15015_v33 = vpop.eup %10715  ;;  %6801 = vadd.xlane.f32.xlu1 %v15013_v52 }
 0xcf3   :  { %6799 = vadd.xlane.f32.xlu0 %v15015_v33 }
 0xcf5   :  { %v15019_v39 = vpop.eup %10717 }
 0xcf6   :  { %v15021_v25 = vpop.eup %10719  ;;  %6805 = vadd.xlane.f32.xlu1 %v15019_v39 }
 0xcf7   :  { %6803 = vadd.xlane.f32.xlu0 %v15021_v25 }
 0xd07   :  { %v6283_v12 = vpop.xlane.xlu1 %6282 }
 0xd08   :  { %10721 = vrcp.f32 %v6283_v12  ;;  %v6281_v37 = vpop.xlane.xlu0 %6280 }
 0xd09   :  { %10723 = vrcp.f32 %v6281_v37 }
 0xd0b   :  { %v6730_v32 = vpop.xlane.xlu1 %6729 }
 0xd0c   :  { %v6754_v43 = vsub.f32 %v14901_v61, %v6730_v32  ;;  %v6728_v46 = vpop.xlane.xlu0 %6727 }
 0xd0d   :  { %v6753_v56 = vsub.f32 %v14904_v4, %v6728_v46 }
 0xd0e   :  { %v6777_v22 = vmul.f32 1.442695, %v6754_v43 }
 0xd0f   :  { %v6775_v14 = vmul.f32 1.442695, %v6753_v56  ;;  %v6287_v49 = vpop.xlane.xlu1 %6286 }
 0xd10   :  { %10725 = vpow2.f32 %v6777_v22  ;;  %v6285_v31 = vpop.xlane.xlu0 %6284 }
 0xd11   :  { %10727 = vpow2.f32 %v6775_v14 }
 0xd12   :  { %v10722_v6 = vpop.eup %10721  ;;  %10729 = vrcp.f32 %v6287_v49 }
 0xd13   :  { %v10724_v47 = vpop.eup %10723  ;;  %v6329_v28 = vmul.f32 %v10722_v6, %v14892_v5  ;;  %10731 = vrcp.f32 %v6285_v31  ;;  %v6734_v62 = vpop.xlane.xlu1 %6733 }
 0xd14   :  { %v6328_v57 = vmul.f32 %v10724_v47, %v14895_v0  ;;  %v6756_v61 = vsub.f32 %v14920_v11, %v6734_v62  ;;  %v6732_v12 = vpop.xlane.xlu0 %6731 }
 0xd15   :  { %v6755_v4 = vsub.f32 %v14923_v21, %v6732_v12 }
 0xd16   :  { %v6344_v37 = vpack.c.bf16 %v6329_v28, %v6328_v57  ;;  %v6781_v32 = vmul.f32 1.442695, %v6756_v61 }
 0xd17   :  { %v6779_v43 = vmul.f32 1.442695, %v6755_v4  ;;  %v6291_v46 = vpop.xlane.xlu1 %6290 }
 0xd18   :  { %10733 = vpow2.f32 %v6781_v32  ;;  %6401 = vmatmul.mubr.bf16.vlgmr.msra.gmra.mrb[100].mxu1 %v6344_v37  ;;  %v6289_v56 = vpop.xlane.xlu0 %6288 }
 0xd19   :  { %10735 = vpow2.f32 %v6779_v43  ;;  %6884 = vmatpush1.bf16.msra.mxu1 %v14709_v41  ;;  %6410 = vmatprep.mubr.bf16.mxu1 %v16505_v50 }
 0xd1a   :  { %v15033_v5 = vpop.eup %10725  ;;  %10737 = vrcp.f32 %v6291_v46  ;;  %6885 = vmatprep.subr.bf16.mxu1 %v14714_v45 }
 0xd1b   :  { %v15036_v0 = vpop.eup %10727  ;;  %10739 = vrcp.f32 %v6289_v56  ;;  %6809 = vadd.xlane.f32.xlu1 %v15033_v5  ;;  %v6738_v11 = vpop.xlane.xlu1 %6737 }
 0xd1c   :  { %v10730_v21 = vpop.eup %10729  ;;  %v6758_v22 = vsub.f32 %v14940_v44, %v6738_v11  ;;  %6807 = vadd.xlane.f32.xlu0 %v15036_v0  ;;  %v6736_v14 = vpop.xlane.xlu0 %6735 }
 0xd1d   :  { %v10732_v41 = vpop.eup %10731  ;;  %v6331_v49 = vmul.f32 %v10730_v21, %v14910_v8  ;;  %6886 = vmatpush1.bf16.msra.mxu1 %v14712_v59  ;;  %v6757_v31 = vsub.f32 %v14943_v9, %v6736_v14 }
 0xd1e   :  { %v6330_v45 = vmul.f32 %v10732_v41, %v14913_v20  ;;  %v6785_v6 = vmul.f32 1.442695, %v6758_v22  ;;  %6887 = vmatprep.subr.bf16.mxu1 %v14720_v55 }
 0xd1f   :  { %v6783_v47 = vmul.f32 1.442695, %v6757_v31  ;;  %v6295_v28 = vpop.xlane.xlu1 %6294 }
 0xd20   :  { %v6345_v62 = vpack.c.bf16 %v6331_v49, %v6330_v45  ;;  %10741 = vpow2.f32 %v6785_v6  ;;  %v6293_v44 = vpop.xlane.xlu0 %6292 }
 0xd21   :  { %10743 = vpow2.f32 %v6783_v47  ;;  %6888 = vmatpush1.bf16.msra.mxu1 %v14718_v51 }
 0xd22   :  { %v15047_v57 = vpop.eup %10733  ;;  %10745 = vrcp.f32 %v6295_v28  ;;  %6411 = vmatmul.mubr.bf16.gmra.mrb[104].mxu1 %v6345_v62  ;;  %6889 = vmatprep.subr.bf16.mxu1 %v14726_v53 }
 0xd23   :  { %v15050_v59 = vpop.eup %10735  ;;  %10747 = vrcp.f32 %v6293_v44  ;;  %6813 = vadd.xlane.f32.xlu1 %v15047_v57  ;;  %v6742_v55 = vpop.xlane.xlu1 %6741  ;;  %6420 = vmatprep.mubr.bf16.mxu1 %v16505_v50 }
 0xd24   :  { %v10738_v8 = vpop.eup %10737  ;;  %v6760_v20 = vsub.f32 %v14960_v27, %v6742_v55  ;;  %6811 = vadd.xlane.f32.xlu0 %v15050_v59  ;;  %v6740_v51 = vpop.xlane.xlu0 %6739 }
 0xd25   :  { %v10740_v9 = vpop.eup %10739  ;;  %v6333_v61 = vmul.f32 %v10738_v8, %v14929_v60  ;;  %6890 = vmatpush1.bf16.msra.mxu1 %v14724_v16  ;;  %v6759_v53 = vsub.f32 %v14963_v30, %v6740_v51 }
 0xd26   :  { %v6332_v12 = vmul.f32 %v10740_v9, %v14933_v24  ;;  %v6789_v4 = vmul.f32 1.442695, %v6760_v20  ;;  %6891 = vmatprep.subr.bf16.mxu1 %v14732_v29 }
 0xd27   :  { %v6787_v37 = vmul.f32 1.442695, %v6759_v53  ;;  %v6299_v32 = vpop.xlane.xlu1 %6298  ;;  %v10409_v53 = vld [vmem:[%s15928_s7 + $0x50] sm:$0xff]  }
 0xd28   :  { %v6346_v43 = vpack.c.bf16 %v6333_v61, %v6332_v12  ;;  %10749 = vpow2.f32 %v6789_v4  ;;  %v6297_v27 = vpop.xlane.xlu0 %6296  ;;  %v10410_v4 = vld [vmem:[%s15928_s7 + $0x10] sm:$0xff]  }
 0xd29   :  { %10751 = vpow2.f32 %v6787_v37  ;;  %6892 = vmatpush1.bf16.msra.mxu1 %v14730_v58 }
 0xd2a   :  { %v15062_v46 = vpop.eup %10741  ;;  %10753 = vrcp.f32 %v6299_v32  ;;  %6421 = vmatmul.mubr.bf16.gmra.mrb[108].mxu1 %v6346_v43  ;;  %6893 = vmatprep.subr.bf16.mxu1 %v14738_v40  ;;  %v10411_v43 = vld [vmem:[%s15928_s7 + $0x58] sm:$0xff]  }
 0xd2b   :  { %v15065_v16 = vpop.eup %10743  ;;  %10755 = vrcp.f32 %v6297_v27  ;;  %6817 = vadd.xlane.f32.xlu1 %v15062_v46  ;;  %v6746_v29 = vpop.xlane.xlu1 %6745  ;;  %6430 = vmatprep.mubr.bf16.mxu1 %v16505_v50 }
 0xd2c   :  { %v10746_v60 = vpop.eup %10745  ;;  %v6762_v24 = vsub.f32 %v14974_v3, %v6746_v29  ;;  %6815 = vadd.xlane.f32.xlu0 %v15065_v16  ;;  %v6744_v58 = vpop.xlane.xlu0 %6743 }
 0xd2d   :  { %v10748_v30 = vpop.eup %10747  ;;  %v6335_v56 = vmul.f32 %v10746_v60, %v14949_v48  ;;  %6894 = vmatpush1.bf16.msra.mxu1 %v14736_v34  ;;  %v6761_v40 = vsub.f32 %v14977_v63, %v6744_v58  ;;  %v10412_v60 = vld [vmem:[%s15928_s7 + $0x18] sm:$0xff]   ;;  %v10416_v58 = vld [vmem:[%s15928_s7 + $0x28] sm:$0xff]  }
 0xd2e   :  { %v6334_v11 = vmul.f32 %v10748_v30, %v14952_v54  ;;  %v6793_v21 = vmul.f32 1.442695, %v6762_v24  ;;  %6895 = vmatprep.subr.bf16.mxu1 %v14744_v10  ;;  %v10413_v24 = vld [vmem:[%s15928_s7 + $0x60] sm:$0xff]   ;;  %v10417_v30 = vld [vmem:[%s15928_s7 + $0x70] sm:$0xff]  }
 0xd2f   :  { %v6791_v22 = vmul.f32 1.442695, %v6761_v40  ;;  %v6303_v14 = vpop.xlane.xlu1 %6302 }
 0xd30   :  { %v6347_v41 = vpack.c.bf16 %v6335_v56, %v6334_v11  ;;  %10757 = vpow2.f32 %v6793_v21  ;;  %v6301_v3 = vpop.xlane.xlu0 %6300  ;;  %v10418_v56 = vld [vmem:[%s15928_s7 + $0x30] sm:$0xff]   ;;  %v10419_v11 = vld [vmem:[%s15928_s7 + $0x78] sm:$0xff]  }
 0xd31   :  { %10759 = vpow2.f32 %v6791_v22  ;;  %6896 = vmatpush1.bf16.msra.mxu1 %v14742_v15  ;;  %v10420_v22 = vld [vmem:[%s15928_s7 + $0x38] sm:$0xff]  }
 0xd32   :  { %v15077_v49 = vpop.eup %10749  ;;  %10761 = vrcp.f32 %v6303_v14  ;;  %6431 = vmatmul.mubr.bf16.gmra.mrb[112].mxu1 %v6347_v41  ;;  %6897 = vmatprep.subr.bf16.mxu1 %v14752_v23  ;;  %v17051_v23 = vmov 0.0|0.0  }
 0xd33   :  { %v15080_v34 = vpop.eup %10751  ;;  %10763 = vrcp.f32 %v6301_v3  ;;  %6821 = vadd.xlane.f32.xlu1 %v15077_v49  ;;  %v6307_v10 = vpop.xlane.xlu1 %6306  ;;  %6440 = vmatprep.mubr.bf16.mxu1 %v16505_v50 }
 0xd34   :  { %v10754_v54 = vpop.eup %10753  ;;  %6819 = vadd.xlane.f32.xlu0 %v15080_v34  ;;  %v6305_v48 = vpop.xlane.xlu0 %6304  ;;  %10765 = vrcp.f32 %v6307_v10 }
 0xd35   :  { %v10756_v63 = vpop.eup %10755  ;;  %v6337_v15 = vmul.f32 %v10754_v54, %v14967_v13  ;;  %6898 = vmatpush1.bf16.msra.mxu1 %v14750_v18  ;;  %10767 = vrcp.f32 %v6305_v48 }
 0xd36   :  { %v6336_v31 = vmul.f32 %v10756_v63, %v14969_v7  ;;  %10149 = vmatprep.subr.bf16.mxu1 %v17051_v23 }
 0xd38   :  { %v6348_v45 = vpack.c.bf16 %v6337_v15, %v6336_v31 }
 0xd3a   :  { %v15089_v6 = vpop.eup %10757  ;;  %6441 = vmatmul.mubr.bf16.gmra.mrb[116].mxu1 %v6348_v45 }
 0xd3b   :  { %v15091_v47 = vpop.eup %10759  ;;  %6825 = vadd.xlane.f32.xlu1 %v15089_v6  ;;  %6450 = vmatprep.mubr.bf16.mxu1 %v16505_v50 }
 0xd3c   :  { %v10762_v28 = vpop.eup %10761  ;;  %6823 = vadd.xlane.f32.xlu0 %v15091_v47 }
 0xd3d   :  { %v10764_v18 = vpop.eup %10763  ;;  %v6339_v13 = vmul.f32 %v10762_v28, %v14981_v17  ;;  %v10405_v17 = vld [vmem:[%s15928_s7 + $0x40] sm:$0xff]  }
 0xd3e   :  { %v6338_v7 = vmul.f32 %v10764_v18, %v14983_v35  ;;  %v10766_v62 = vpop.eup %10765  ;;  %9303 = vmatprep.subr.bf16.mxu0 %v10405_v17  ;;  %v10406_v35 = vld [vmem:[%s15928_s7] sm:$0xff]  }
 0xd3f   :  { %v10768_v55 = vpop.eup %10767  ;;  %v6341_v8 = vmul.f32 %v10766_v62, %v14987_v1  ;;  %v10407_v1 = vld [vmem:[%s15928_s7 + $0x48] sm:$0xff]   ;;  %9304 = vmatpush3.bf16.msra.mxu0 %v10406_v35 }
 0xd40   :  { %v6349_v44 = vpack.c.bf16 %v6339_v13, %v6338_v7  ;;  %v6340_v20 = vmul.f32 %v10768_v55, %v14989_v26  ;;  %v10408_v26 = vld [vmem:[%s15928_s7 + $0x8] sm:$0xff]   ;;  %9305 = vmatprep.subr.bf16.mxu0 %v10407_v1 }
 0xd42   :  { %6451 = vmatmul.mubr.bf16.gmra.mrb[120].mxu1 %v6349_v44  ;;  %v6350_v51 = vpack.c.bf16 %v6341_v8, %v6340_v20 }
 0xd43   :  { %6460 = vmatprep.mubr.bf16.mxu1 %v16505_v50  ;;  %9306 = vmatpush3.bf16.msra.mxu0 %v10408_v26 }
 0xd44   :  { %9307 = vmatprep.subr.bf16.mxu0 %v10409_v53 }
 0xd47   :  { %9308 = vmatpush3.bf16.msra.mxu0 %v10410_v4 }
 0xd48   :  { %9309 = vmatprep.subr.bf16.mxu0 %v10411_v43 }
 0xd4a   :  { %6461 = vmatmul.mubr.bf16.gmra.mrb[124].mxu1 %v6350_v51 }
 0xd4b   :  { %6470 = vmatprep.mubr.bf16.mxu1 %v16505_v50  ;;  %9310 = vmatpush3.bf16.msra.mxu0 %v10412_v60 }
 0xd4c   :  { %9311 = vmatprep.subr.bf16.mxu0 %v10413_v24 }
 0xd54   :  { %v6311_v9 = vpop.xlane.xlu1 %6310 }
 0xd55   :  { %10769 = vrcp.f32 %v6311_v9  ;;  %v6309_v61 = vpop.xlane.xlu0 %6308 }
 0xd56   :  { %10771 = vrcp.f32 %v6309_v61 }
 0xd5f   :  { %v10770_v12 = vpop.eup %10769 }
 0xd60   :  { %v10772_v37 = vpop.eup %10771  ;;  %v6343_v32 = vmul.f32 %v10770_v12, %v14995_v38  ;;  %v10414_v38 = vld [vmem:[%s15928_s7 + $0x20] sm:$0xff]  }
 0xd61   :  { %v6342_v27 = vmul.f32 %v10772_v37, %v14997_v19  ;;  %9312 = vmatpush3.bf16.msra.mxu0 %v10414_v38  ;;  %v10415_v19 = vld [vmem:[%s15928_s7 + $0x68] sm:$0xff]  }
 0xd62   :  { %9313 = vmatprep.subr.bf16.mxu0 %v10415_v19 }
 0xd63   :  { %v6351_v29 = vpack.c.bf16 %v6343_v32, %v6342_v27 }
 0xd65   :  { %6471 = vmatmul.mubr.bf16.gmra.mrb[128].mxu1 %v6351_v29  ;;  %9314 = vmatpush3.bf16.msra.mxu0 %v10416_v58 }
 0xd66   :  { %6915 = vmatprep.mubr.bf16.mxu1 %v16505_v50  ;;  %9315 = vmatprep.subr.bf16.mxu0 %v10417_v30 }
 0xd69   :  { %9316 = vmatpush3.bf16.msra.mxu0 %v10418_v56 }
 0xd6a   :  { %9317 = vmatprep.subr.bf16.mxu0 %v10419_v11  ;;  %v17052_v11 = vmov 0.0  }
 0xd6d   :  { %9318 = vmatpush3.bf16.msra.mxu0 %v10420_v22 }
 0xd6e   :  { %10173 = vmatprep.subr.bf16.mxu0 %v17051_v23 }
 0xd7b   :  { %v6798_v40 = vpop.xlane.xlu1 %6797 }
 0xd7c   :  { %10773 = vrcp.f32 %v6798_v40  ;;  %v6796_v21 = vpop.xlane.xlu0 %6795 }
 0xd7d   :  { %10775 = vrcp.f32 %v6796_v21  ;;  %v6998_v21 = vsub.s32 6, %v16610_v36 }
 0xd7f   :  { %v6802_v14 = vpop.xlane.xlu1 %6801 }
 0xd80   :  { %10777 = vrcp.f32 %v6802_v14  ;;  %v6800_v41 = vpop.xlane.xlu0 %6799 }
 0xd81   :  { %10779 = vrcp.f32 %v6800_v41 }
 0xd83   :  { %v6806_v3 = vpop.xlane.xlu1 %6805 }
 0xd84   :  { %v6804_v54 = vpop.xlane.xlu0 %6803  ;;  %10781 = vrcp.f32 %v6806_v3  ;;  %v17053_v3 = vld [vmem:[#allocation78_spill] sm:$0xff] }
 0xd85   :  { %10783 = vrcp.f32 %v6804_v54 }
 0xd86   :  { %v10774_v10 = vpop.eup %10773 }
 0xd87   :  { %v10776_v48 = vpop.eup %10775  ;;  %v6844_v63 = vmul.f32 %v10774_v10, %v15007_v42  ;;  %v17054_v10 = vmax.f32 %v17053_v3, 0.0 }
 0xd88   :  { %v6843_v15 = vmul.f32 %v10776_v48, %v15009_v2 }
 0xd8a   :  { %v10778_v31 = vpop.eup %10777  ;;  %v6859_v45 = vpack.c.bf16 %v6844_v63, %v6843_v15  ;;  %v17055_v15 = vld [vmem:[#allocation76_spill] sm:$0xff] }
 0xd8b   :  { %v10780_v28 = vpop.eup %10779  ;;  %v6846_v18 = vmul.f32 %v10778_v31, %v15013_v52  ;;  %v17056_v31 = vmax.f32 %v17055_v15, 0.0  ;;  %v17075_v15 = vld [vmem:[#allocation87_spill] sm:$0xff] }
 0xd8c   :  { %6916 = vmatmul.mubr.bf16.vlgmr.msra.gmra.mrb[132].mxu1 %v6859_v45  ;;  %v6845_v13 = vmul.f32 %v10780_v28, %v15015_v33 }
 0xd8d   :  { %6925 = vmatprep.mubr.bf16.mxu1 %v16505_v50 }
 0xd8e   :  { %v10782_v7 = vpop.eup %10781  ;;  %v6860_v62 = vpack.c.bf16 %v6846_v18, %v6845_v13  ;;  %v17057_v18 = vld [vmem:[#allocation77_spill] sm:$0xff] }
 0xd8f   :  { %v10784_v44 = vpop.eup %10783  ;;  %v6848_v42 = vmul.f32 %v10782_v7, %v15019_v39  ;;  %v17058_v13 = vmax.f32 %v17057_v18, 0.0 }
 0xd90   :  { %v6847_v2 = vmul.f32 %v10784_v44, %v15021_v25 }
 0xd92   :  { %v6861_v55 = vpack.c.bf16 %v6848_v42, %v6847_v2 }
 0xd94   :  { %6926 = vmatmul.mubr.bf16.gmra.mrb[136].mxu1 %v6860_v62  ;;  %v17059_v62 = vld [vmem:[#allocation79_spill] sm:$0xff] }
 0xd95   :  { %6935 = vmatprep.mubr.bf16.mxu1 %v16505_v50  ;;  %v17060_v44 = vmax.f32 %v17059_v62, 0.0 }
 0xd9c   :  { %6936 = vmatmul.mubr.bf16.gmra.mrb[140].mxu1 %v6861_v55 }
 0xd9d   :  { %6945 = vmatprep.mubr.bf16.mxu1 %v16505_v50 }
 0xda8   :  { %v6810_v8 = vpop.xlane.xlu1 %6809 }
 0xda9   :  { %10785 = vrcp.f32 %v6810_v8  ;;  %v6808_v20 = vpop.xlane.xlu0 %6807 }
 0xdaa   :  { %10787 = vrcp.f32 %v6808_v20 }
 0xdb0   :  { %v6814_v52 = vpop.xlane.xlu1 %6813 }
 0xdb1   :  { %10789 = vrcp.f32 %v6814_v52  ;;  %v6812_v33 = vpop.xlane.xlu0 %6811 }
 0xdb2   :  { %10791 = vrcp.f32 %v6812_v33 }
 0xdb3   :  { %v10786_v51 = vpop.eup %10785 }
 0xdb4   :  { %v10788_v9 = vpop.eup %10787  ;;  %v6850_v61 = vmul.f32 %v10786_v51, %v15033_v5 }
 0xdb5   :  { %v6849_v39 = vmul.f32 %v10788_v9, %v15036_v0 }
 0xdb7   :  { %v6862_v17 = vpack.c.bf16 %v6850_v61, %v6849_v39 }
 0xdb8   :  { %v6818_v25 = vpop.xlane.xlu1 %6817 }
 0xdb9   :  { %10793 = vrcp.f32 %v6818_v25  ;;  %6946 = vmatmul.mubr.bf16.gmra.mrb[144].mxu1 %v6862_v17  ;;  %v6816_v35 = vpop.xlane.xlu0 %6815  ;;  %v17061_v25 = vld [vmem:[#allocation82_spill] sm:$0xff] }
 0xdba   :  { %10795 = vrcp.f32 %v6816_v35  ;;  %6955 = vmatprep.mubr.bf16.mxu1 %v16505_v50  ;;  %v17062_v35 = vmax.f32 %v17061_v25, 0.0 }
 0xdbb   :  { %v10790_v1 = vpop.eup %10789 }
 0xdbc   :  { %v10792_v26 = vpop.eup %10791  ;;  %v6852_v53 = vmul.f32 %v10790_v1, %v15047_v57 }
 0xdbd   :  { %v6851_v12 = vmul.f32 %v10792_v26, %v15050_v59 }
 0xdbf   :  { %v6863_v4 = vpack.c.bf16 %v6852_v53, %v6851_v12  ;;  %v17063_v12 = vld [vmem:[#allocation80_spill] sm:$0xff] }
 0xdc0   :  { %v6822_v37 = vpop.xlane.xlu1 %6821 }
 0xdc1   :  { %10797 = vrcp.f32 %v6822_v37  ;;  %6956 = vmatmul.mubr.bf16.gmra.mrb[148].mxu1 %v6863_v4  ;;  %v6820_v5 = vpop.xlane.xlu0 %6819  ;;  %v17064_v4 = vmax.f32 %v17063_v12, 0.0  ;;  %v17083_v12 = vld [vmem:[#allocation91_spill] sm:$0xff] }
 0xdc2   :  { %10799 = vrcp.f32 %v6820_v5  ;;  %6965 = vmatprep.mubr.bf16.mxu1 %v16505_v50 }
 0xdc3   :  { %v10794_v0 = vpop.eup %10793 }
 0xdc4   :  { %v10796_v32 = vpop.eup %10795  ;;  %v6854_v43 = vmul.f32 %v10794_v0, %v15062_v46  ;;  %v17065_v0 = vld [vmem:[#allocation81_spill] sm:$0xff] }
 0xdc5   :  { %v6853_v27 = vmul.f32 %v10796_v32, %v15065_v16  ;;  %v17066_v32 = vmax.f32 %v17065_v0, 0.0 }
 0xdc7   :  { %v6864_v29 = vpack.c.bf16 %v6854_v43, %v6853_v27  ;;  %v17067_v27 = vld [vmem:[#allocation83_spill] sm:$0xff] }
 0xdc8   :  { %v6826_v60 = vpop.xlane.xlu1 %6825 }
 0xdc9   :  { %10801 = vrcp.f32 %v6826_v60  ;;  %6966 = vmatmul.mubr.bf16.gmra.mrb[152].mxu1 %v6864_v29  ;;  %v6824_v57 = vpop.xlane.xlu0 %6823  ;;  %v17068_v29 = vmax.f32 %v17067_v27, 0.0 }
 0xdca   :  { %10803 = vrcp.f32 %v6824_v57  ;;  %6975 = vmatprep.mubr.bf16.mxu1 %v16505_v50 }
 0xdcb   :  { %v10798_v59 = vpop.eup %10797 }
 0xdcc   :  { %v10800_v24 = vpop.eup %10799  ;;  %v6856_v38 = vmul.f32 %v10798_v59, %v15077_v49  ;;  %v15183_v49 = vld [vmem:[%s15923_s2] sm:$0xff] }
 0xdcd   :  { %v6855_v19 = vmul.f32 %v10800_v24, %v15080_v34  ;;  %v10947_v34 = vld [vmem:[%s15923_s2 + $0x8] sm:$0xff] }
 0xdcf   :  { %v6865_v58 = vpack.c.bf16 %v6856_v38, %v6855_v19 }
 0xdd1   :  { %6976 = vmatmul.mubr.bf16.gmra.mrb[156].mxu1 %v6865_v58 }
 0xdd2   :  { %6985 = vmatprep.mubr.bf16.mxu1 %v16505_v50  ;;  %v15186_v50 = vrot.slane %v15183_v49, %v6998_v21 }
 0xdd3   :  { %v10802_v46 = vpop.eup %10801 }
 0xdd4   :  { %v10804_v16 = vpop.eup %10803  ;;  %v6858_v30 = vmul.f32 %v10802_v46, %v15089_v6  ;;  %v15191_v6 = vrot.slane %v10947_v34, %v6998_v21  ;;  %v17069_v21 = vld [vmem:[#allocation86_spill] sm:$0xff] }
 0xdd5   :  { %v6857_v56 = vmul.f32 %v10804_v16, %v15091_v47  ;;  %v17070_v34 = vmax.f32 %v17069_v21, 0.0 }
 0xdd7   :  { %v6866_v40 = vpack.c.bf16 %v6858_v30, %v6857_v56 }
 0xdd9   :  { %6986 = vmatmul.mubr.bf16.gmra.mrb[160].mxu1 %v6866_v40 }
 0xdda   :  { %9695 = vmatprep.mubr.msk.f32.mxu1 %vm11001_vm0, %v17052_v11 }
 0xdeb   :  { %v6402_v47 = vpop.f32.mrb[100].mxu1 }
 0xdec   :  { %v7004_v22 = vadd.f32 %v15186_v50, %v6402_v47  ;;  %v6404_v14 = vpop.f32.mrb[101].mxu1 }
 0xded   :  { %v7005_v36 = vadd.f32 %v15191_v6, %v6404_v14  ;;  %v6406_v41 = vpop.f32.mrb[102].mxu1 }
 0xdee   :  { %v7068_v54 = vadd.f32 %v7004_v22, %v17054_v10  ;;  %v7006_v48 = vadd.f32 %v15186_v50, %v6406_v41  ;;  %v6408_v63 = vpop.f32.mrb[103].mxu1 }
 0xdef   :  { %v7069_v45 = vadd.f32 %v7005_v36, %v17056_v31  ;;  %v7007_v28 = vadd.f32 %v15191_v6, %v6408_v63  ;;  %v17071_v36 = vld [vmem:[#allocation84_spill] sm:$0xff]  ;;  %v17076_v31 = vmax.f32 %v17075_v15, 0.0 }
 0xdf0   :  { %v7070_v7 = vadd.f32 %v7006_v48, %v17058_v13  ;;  %v7132_v2 = vmax.f32 %v7068_v54, 0.0  ;;  %v17072_v41 = vmax.f32 %v17071_v36, 0.0  ;;  %v17073_v54 = vld [vmem:[#allocation85_spill] sm:$0xff]  ;;  %v17091_v36 = vld [vmem:[#allocation95_spill] sm:$0xff] }
 0xdf1   :  { %v7071_v42 = vadd.f32 %v7007_v28, %v17060_v44  ;;  %v7133_v8 = vmax.f32 %v7069_v45, 0.0  ;;  %v17074_v48 = vmax.f32 %v17073_v54, 0.0 }
 0xdf2   :  { %v7134_v55 = vmax.f32 %v7070_v7, 0.0 }
 0xdf3   :  { %v7135_v20 = vmax.f32 %v7071_v42, 0.0 }
 0xdf4   :  { %v7196_v52 = vpack.c.bf16 %v7134_v55, %v7132_v2 }
 0xdf5   :  { %v6412_v33 = vpop.f32.mrb[104].mxu1  ;;  %v7197_v51 = vpack.c.bf16 %v7135_v20, %v7133_v8 }
 0xdf6   :  { %v7008_v9 = vadd.f32 %v15186_v50, %v6412_v33  ;;  %v6414_v61 = vpop.f32.mrb[105].mxu1 }
 0xdf7   :  { %v7009_v39 = vadd.f32 %v15191_v6, %v6414_v61  ;;  %v6416_v17 = vpop.f32.mrb[106].mxu1  ;;  %7388 = vmatprep.mubr.bf16.mxu0 %v7197_v51 }
 0xdf8   :  { %v7072_v1 = vadd.f32 %v7008_v9, %v17062_v35  ;;  %v7010_v26 = vadd.f32 %v15186_v50, %v6416_v17  ;;  %v6418_v53 = vpop.f32.mrb[107].mxu1  ;;  %7389 = vmatmul.mubr.bf16.vlgmr.msra.gmra.mrb[16].mxu0 %v7196_v52  ;;  %v17077_v52 = vld [vmem:[#allocation90_spill] sm:$0xff] }
 0xdf9   :  { %v7073_v37 = vadd.f32 %v7009_v39, %v17064_v4  ;;  %v7011_v5 = vadd.f32 %v15191_v6, %v6418_v53  ;;  %v17078_v33 = vmax.f32 %v17077_v52, 0.0  ;;  %v17079_v39 = vld [vmem:[#allocation88_spill] sm:$0xff]  ;;  %v17084_v4 = vmax.f32 %v17083_v12, 0.0 }
 0xdfa   :  { %v7074_v43 = vadd.f32 %v7010_v26, %v17066_v32  ;;  %v7136_v57 = vmax.f32 %v7072_v1, 0.0  ;;  %v17080_v17 = vmax.f32 %v17079_v39, 0.0  ;;  %v17081_v1 = vld [vmem:[#allocation89_spill] sm:$0xff] }
 0xdfb   :  { %v7075_v60 = vadd.f32 %v7011_v5, %v17068_v29  ;;  %v7137_v24 = vmax.f32 %v7073_v37, 0.0  ;;  %v17082_v26 = vmax.f32 %v17081_v1, 0.0  ;;  %v17099_v39 = vld [vmem:[#allocation21_spill] sm:$0xff] }
 0xdfc   :  { %v7138_v59 = vmax.f32 %v7074_v43, 0.0 }
 0xdfd   :  { %v7139_v38 = vmax.f32 %v7075_v60, 0.0  ;;  %v6422_v19 = vpop.f32.mrb[108].mxu1 }
 0xdfe   :  { %v7198_v58 = vpack.c.bf16 %v7138_v59, %v7136_v57  ;;  %v7012_v46 = vadd.f32 %v15186_v50, %v6422_v19  ;;  %v6424_v16 = vpop.f32.mrb[109].mxu1  ;;  %v17085_v19 = vld [vmem:[#allocation94_spill] sm:$0xff] }
 0xdff   :  { %v7013_v30 = vadd.f32 %v15191_v6, %v6424_v16  ;;  %v6426_v56 = vpop.f32.mrb[110].mxu1  ;;  %v7199_v40 = vpack.c.bf16 %v7139_v38, %v7137_v24 }
 0xe00   :  { %v7076_v47 = vadd.f32 %v7012_v46, %v17070_v34  ;;  %v7014_v22 = vadd.f32 %v15186_v50, %v6426_v56  ;;  %v6428_v14 = vpop.f32.mrb[111].mxu1  ;;  %v17087_v56 = vld [vmem:[#allocation92_spill] sm:$0xff] }
 0xe01   :  { %v7077_v3 = vadd.f32 %v7013_v30, %v17072_v41  ;;  %v7015_v10 = vadd.f32 %v15191_v6, %v6428_v14  ;;  %7396 = vmatprep.mubr.bf16.mxu0 %v7199_v40  ;;  %v17088_v40 = vmax.f32 %v17087_v56, 0.0  ;;  %v17092_v41 = vmax.f32 %v17091_v36, 0.0  ;;  %v17107_v56 = vld [vmem:[#allocation26_spill] sm:$0xff] }
 0xe02   :  { %v7078_v63 = vadd.f32 %v7014_v22, %v17074_v48  ;;  %7397 = vmatmul.mubr.bf16.gmra.mrb[20].mxu0 %v7198_v58  ;;  %v7140_v28 = vmax.f32 %v7076_v47, 0.0  ;;  %v17086_v58 = vmax.f32 %v17085_v19, 0.0  ;;  %v17089_v47 = vld [vmem:[#allocation93_spill] sm:$0xff] }
 0xe03   :  { %v7079_v45 = vadd.f32 %v7015_v10, %v17076_v31  ;;  %v7141_v13 = vmax.f32 %v7077_v3, 0.0  ;;  %v17090_v22 = vmax.f32 %v17089_v47, 0.0 }
 0xe04   :  { %v7142_v18 = vmax.f32 %v7078_v63, 0.0 }
 0xe05   :  { %v7143_v7 = vmax.f32 %v7079_v45, 0.0  ;;  %v6432_v62 = vpop.f32.mrb[112].mxu1 }
 0xe06   :  { %v7200_v44 = vpack.c.bf16 %v7142_v18, %v7140_v28  ;;  %v7016_v42 = vadd.f32 %v15186_v50, %v6432_v62  ;;  %v6434_v2 = vpop.f32.mrb[113].mxu1  ;;  %v17093_v62 = vld [vmem:[#allocation15_spill] sm:$0xff] }
 0xe07   :  { %v7017_v55 = vadd.f32 %v15191_v6, %v6434_v2  ;;  %v6436_v8 = vpop.f32.mrb[114].mxu1  ;;  %v7201_v20 = vpack.c.bf16 %v7143_v7, %v7141_v13 }
 0xe08   :  { %v7080_v51 = vadd.f32 %v7016_v42, %v17078_v33  ;;  %v7018_v9 = vadd.f32 %v15186_v50, %v6436_v8  ;;  %v6438_v61 = vpop.f32.mrb[115].mxu1  ;;  %v17095_v8 = vld [vmem:[#allocation96_spill] sm:$0xff] }
 0xe09   :  { %v7081_v25 = vadd.f32 %v7017_v55, %v17080_v17  ;;  %v7019_v35 = vadd.f32 %v15191_v6, %v6438_v61  ;;  %7404 = vmatprep.mubr.bf16.mxu0 %v7201_v20  ;;  %v17096_v20 = vmax.f32 %v17095_v8, 0.0  ;;  %v17100_v17 = vmax.f32 %v17099_v39, 0.0  ;;  %v17115_v8 = vld [vmem:[#allocation101_spill] sm:$0xff] }
 0xe0a   :  { %v7082_v53 = vadd.f32 %v7018_v9, %v17082_v26  ;;  %7405 = vmatmul.mubr.bf16.gmra.mrb[24].mxu0 %v7200_v44  ;;  %v7144_v5 = vmax.f32 %v7080_v51, 0.0  ;;  %v17094_v44 = vmax.f32 %v17093_v62, 0.0  ;;  %v17097_v51 = vld [vmem:[#allocation20_spill] sm:$0xff] }
 0xe0b   :  { %v7083_v37 = vadd.f32 %v7019_v35, %v17084_v4  ;;  %v7145_v32 = vmax.f32 %v7081_v25, 0.0  ;;  %v17098_v9 = vmax.f32 %v17097_v51, 0.0 }
 0xe0c   :  { %v7146_v0 = vmax.f32 %v7082_v53, 0.0 }
 0xe0d   :  { %v7147_v43 = vmax.f32 %v7083_v37, 0.0  ;;  %v6442_v27 = vpop.f32.mrb[116].mxu1 }
 0xe0e   :  { %v7202_v29 = vpack.c.bf16 %v7146_v0, %v7144_v5  ;;  %v7020_v60 = vadd.f32 %v15186_v50, %v6442_v27  ;;  %v6444_v57 = vpop.f32.mrb[117].mxu1  ;;  %v17101_v27 = vld [vmem:[#allocation28_spill] sm:$0xff] }
 0xe0f   :  { %v7021_v59 = vadd.f32 %v15191_v6, %v6444_v57  ;;  %v6446_v24 = vpop.f32.mrb[118].mxu1  ;;  %v7203_v38 = vpack.c.bf16 %v7147_v43, %v7145_v32 }
 0xe10   :  { %v7084_v46 = vadd.f32 %v7020_v60, %v17086_v58  ;;  %v7022_v16 = vadd.f32 %v15186_v50, %v6446_v24  ;;  %v6448_v30 = vpop.f32.mrb[119].mxu1  ;;  %v17103_v24 = vld [vmem:[#allocation27_spill] sm:$0xff] }
 0xe11   :  { %v7085_v21 = vadd.f32 %v7021_v59, %v17088_v40  ;;  %v7023_v34 = vadd.f32 %v15191_v6, %v6448_v30  ;;  %7412 = vmatprep.mubr.bf16.mxu0 %v7203_v38  ;;  %v17104_v38 = vmax.f32 %v17103_v24, 0.0  ;;  %v17108_v40 = vmax.f32 %v17107_v56, 0.0 }
 0xe12   :  { %v7086_v14 = vadd.f32 %v7022_v16, %v17090_v22  ;;  %7413 = vmatmul.mubr.bf16.gmra.mrb[28].mxu0 %v7202_v29  ;;  %v7148_v10 = vmax.f32 %v7084_v46, 0.0  ;;  %v17102_v29 = vmax.f32 %v17101_v27, 0.0  ;;  %v17105_v46 = vld [vmem:[#allocation25_spill] sm:$0xff] }
 0xe13   :  { %v7087_v3 = vadd.f32 %v7023_v34, %v17092_v41  ;;  %v7149_v48 = vmax.f32 %v7085_v21, 0.0  ;;  %v17106_v16 = vmax.f32 %v17105_v46, 0.0 }
 0xe14   :  { %v7150_v54 = vmax.f32 %v7086_v14, 0.0 }
 0xe15   :  { %v7151_v63 = vmax.f32 %v7087_v3, 0.0  ;;  %v6452_v15 = vpop.f32.mrb[120].mxu1 }
 0xe16   :  { %v7204_v31 = vpack.c.bf16 %v7150_v54, %v7148_v10  ;;  %v7024_v45 = vadd.f32 %v15186_v50, %v6452_v15  ;;  %v6454_v28 = vpop.f32.mrb[121].mxu1  ;;  %v17109_v15 = vld [vmem:[#allocation99_spill] sm:$0xff] }
 0xe17   :  { %v7025_v18 = vadd.f32 %v15191_v6, %v6454_v28  ;;  %v6456_v13 = vpop.f32.mrb[122].mxu1  ;;  %v7205_v7 = vpack.c.bf16 %v7151_v63, %v7149_v48 }
 0xe18   :  { %v7088_v42 = vadd.f32 %v7024_v45, %v17094_v44  ;;  %v7026_v2 = vadd.f32 %v15186_v50, %v6456_v13  ;;  %v6458_v55 = vpop.f32.mrb[123].mxu1  ;;  %v17111_v13 = vld [vmem:[#allocation97_spill] sm:$0xff] }
 0xe19   :  { %v7089_v52 = vadd.f32 %v7025_v18, %v17096_v20  ;;  %v7027_v33 = vadd.f32 %v15191_v6, %v6458_v55  ;;  %7420 = vmatprep.mubr.bf16.mxu0 %v7205_v7  ;;  %v17112_v7 = vmax.f32 %v17111_v13, 0.0  ;;  %v17116_v20 = vmax.f32 %v17115_v8, 0.0 }
 0xe1a   :  { %v7090_v61 = vadd.f32 %v7026_v2, %v17098_v9  ;;  %7421 = vmatmul.mubr.bf16.gmra.mrb[32].mxu0 %v7204_v31  ;;  %v7152_v35 = vmax.f32 %v7088_v42, 0.0  ;;  %v17110_v31 = vmax.f32 %v17109_v15, 0.0  ;;  %v17113_v42 = vld [vmem:[#allocation98_spill] sm:$0xff] }
 0xe1b   :  { %v7091_v25 = vadd.f32 %v7027_v33, %v17100_v17  ;;  %v7153_v26 = vmax.f32 %v7089_v52, 0.0  ;;  %v17114_v2 = vmax.f32 %v17113_v42, 0.0 }
 0xe1c   :  { %v7154_v1 = vmax.f32 %v7090_v61, 0.0 }
 0xe1d   :  { %v7155_v53 = vmax.f32 %v7091_v25, 0.0  ;;  %v6462_v12 = vpop.f32.mrb[124].mxu1  ;;  %v11005_v25 = vmov 32  }
 0xe1e   :  { %v7206_v4 = vpack.c.bf16 %v7154_v1, %v7152_v35  ;;  %v7028_v37 = vadd.f32 %v15186_v50, %v6462_v12  ;;  %v6464_v5 = vpop.f32.mrb[125].mxu1  ;;  %10209 = vset.pattern.permute.xlu0 %v11005_v25  ;;  %10210 = vset.pattern.permute.xlu1 %v11005_v25 }
 0xe1f   :  { %v7029_v0 = vadd.f32 %v15191_v6, %v6464_v5  ;;  %v6466_v32 = vpop.f32.mrb[126].mxu1  ;;  %v7207_v43 = vpack.c.bf16 %v7155_v53, %v7153_v26 }
 0xe20   :  { %v7092_v60 = vadd.f32 %v7028_v37, %v17102_v29  ;;  %v7030_v57 = vadd.f32 %v15186_v50, %v6466_v32  ;;  %v6468_v59 = vpop.f32.mrb[127].mxu1 }
 0xe21   :  { %v7093_v19 = vadd.f32 %v7029_v0, %v17104_v38  ;;  %v7031_v58 = vadd.f32 %v15191_v6, %v6468_v59  ;;  %7428 = vmatprep.mubr.bf16.mxu0 %v7207_v43  ;;  %v17119_v43 = vld [vmem:[#allocation100_spill] sm:$0xff]  ;;  %v17123_v38 = vld [vmem:[#allocation105_spill] sm:$0xff] }
 0xe22   :  { %v7094_v30 = vadd.f32 %v7030_v57, %v17106_v16  ;;  %7429 = vmatmul.mubr.bf16.gmra.mrb[36].mxu0 %v7206_v4  ;;  %v7156_v34 = vmax.f32 %v7092_v60, 0.0  ;;  %v17117_v4 = vld [vmem:[#allocation103_spill] sm:$0xff]  ;;  %v17120_v27 = vmax.f32 %v17119_v43, 0.0  ;;  %v17121_v57 = vld [vmem:[#allocation102_spill] sm:$0xff] }
 0xe23   :  { %v7095_v21 = vadd.f32 %v7031_v58, %v17108_v40  ;;  %v7157_v22 = vmax.f32 %v7093_v19, 0.0  ;;  %v17118_v37 = vmax.f32 %v17117_v4, 0.0  ;;  %v17122_v59 = vmax.f32 %v17121_v57, 0.0  ;;  %v17139_v43 = vld [vmem:[#allocation18_spill] sm:$0xff] }
 0xe24   :  { %v7158_v47 = vmax.f32 %v7094_v30, 0.0  ;;  %v17124_v19 = vmax.f32 %v17123_v38, 0.0 }
 0xe25   :  { %v7159_v14 = vmax.f32 %v7095_v21, 0.0 }
 0xe26   :  { %v7208_v36 = vpack.c.bf16 %v7158_v47, %v7156_v34 }
 0xe27   :  { %v7209_v41 = vpack.c.bf16 %v7159_v14, %v7157_v22 }
 0xe29   :  { %7436 = vmatprep.mubr.bf16.mxu0 %v7209_v41  ;;  %v17125_v41 = vld [vmem:[#allocation107_spill] sm:$0xff] }
 0xe2a   :  { %7437 = vmatmul.mubr.bf16.gmra.mrb[40].mxu0 %v7208_v36 }
 0xe38   :  { %v6472_v3 = vpop.f32.mrb[128].mxu1 }
 0xe39   :  { %v7032_v10 = vadd.f32 %v15186_v50, %v6472_v3  ;;  %v6474_v54 = vpop.f32.mrb[129].mxu1  ;;  %v17126_v3 = vmax.f32 %v17125_v41, 0.0 }
 0xe3a   :  { %v7033_v48 = vadd.f32 %v15191_v6, %v6474_v54  ;;  %v6476_v63 = vpop.f32.mrb[130].mxu1 }
 0xe3b   :  { %v7096_v45 = vadd.f32 %v7032_v10, %v17110_v31  ;;  %v7034_v28 = vadd.f32 %v15186_v50, %v6476_v63  ;;  %v6478_v18 = vpop.f32.mrb[131].mxu1  ;;  %v17127_v63 = vld [vmem:[#allocation104_spill] sm:$0xff] }
 0xe3c   :  { %v7097_v62 = vadd.f32 %v7033_v48, %v17112_v7  ;;  %v7035_v44 = vadd.f32 %v15191_v6, %v6478_v18  ;;  %v17128_v15 = vmax.f32 %v17127_v63, 0.0  ;;  %v17131_v7 = vld [vmem:[#allocation109_spill] sm:$0xff]  ;;  %v17147_v63 = vld [vmem:[#allocation31_spill] sm:$0xff] }
 0xe3d   :  { %v7098_v55 = vadd.f32 %v7034_v28, %v17114_v2  ;;  %v7160_v33 = vmax.f32 %v7096_v45, 0.0  ;;  %v17129_v28 = vld [vmem:[#allocation106_spill] sm:$0xff] }
 0xe3e   :  { %v7099_v52 = vadd.f32 %v7035_v44, %v17116_v20  ;;  %v7161_v9 = vmax.f32 %v7097_v62, 0.0  ;;  %v17130_v18 = vmax.f32 %v17129_v28, 0.0  ;;  %v17132_v62 = vmax.f32 %v17131_v7, 0.0 }
 0xe3f   :  { %v7162_v51 = vmax.f32 %v7098_v55, 0.0 }
 0xe40   :  { %v7163_v61 = vmax.f32 %v7099_v52, 0.0 }
 0xe41   :  { %v7210_v39 = vpack.c.bf16 %v7162_v51, %v7160_v33 }
 0xe42   :  { %v7211_v17 = vpack.c.bf16 %v7163_v61, %v7161_v9 }
 0xe44   :  { %7444 = vmatprep.mubr.bf16.mxu0 %v7211_v17  ;;  %v17133_v17 = vld [vmem:[#allocation8_spill] sm:$0xff] }
 0xe45   :  { %7445 = vmatmul.mubr.bf16.gmra.mrb[44].mxu0 %v7210_v39  ;;  %v17134_v25 = vmax.f32 %v17133_v17, 0.0 }
 0xe5f   :  { %v6917_v35 = vpop.f32.mrb[132].mxu1 }
 0xe60   :  { %v7036_v1 = vadd.f32 %v15186_v50, %v6917_v35  ;;  %v6919_v26 = vpop.f32.mrb[133].mxu1 }
 0xe61   :  { %v7037_v53 = vadd.f32 %v15191_v6, %v6919_v26  ;;  %v6921_v12 = vpop.f32.mrb[134].mxu1 }
 0xe62   :  { %v7100_v5 = vadd.f32 %v7036_v1, %v17118_v37  ;;  %v7038_v0 = vadd.f32 %v15186_v50, %v6921_v12  ;;  %v6923_v32 = vpop.f32.mrb[135].mxu1 }
 0xe63   :  { %v7101_v29 = vadd.f32 %v7037_v53, %v17120_v27  ;;  %v7039_v60 = vadd.f32 %v15191_v6, %v6923_v32  ;;  %v17135_v53 = vld [vmem:[#allocation108_spill] sm:$0xff]  ;;  %v17140_v27 = vmax.f32 %v17139_v43, 0.0 }
 0xe64   :  { %v7102_v24 = vadd.f32 %v7038_v0, %v17122_v59  ;;  %v7164_v46 = vmax.f32 %v7100_v5, 0.0  ;;  %v17136_v12 = vmax.f32 %v17135_v53, 0.0  ;;  %v17137_v5 = vld [vmem:[#allocation17_spill] sm:$0xff] }
 0xe65   :  { %v7103_v58 = vadd.f32 %v7039_v60, %v17124_v19  ;;  %v7165_v30 = vmax.f32 %v7101_v29, 0.0  ;;  %v17138_v0 = vmax.f32 %v17137_v5, 0.0  ;;  %v17155_v53 = vld [vmem:[#allocation37_spill] sm:$0xff] }
 0xe66   :  { %v7166_v16 = vmax.f32 %v7102_v24, 0.0 }
 0xe67   :  { %v7167_v56 = vmax.f32 %v7103_v58, 0.0  ;;  %v6927_v40 = vpop.f32.mrb[136].mxu1 }
 0xe68   :  { %v7212_v21 = vpack.c.bf16 %v7166_v16, %v7164_v46  ;;  %v7040_v34 = vadd.f32 %v15186_v50, %v6927_v40  ;;  %v6929_v47 = vpop.f32.mrb[137].mxu1  ;;  %v17141_v40 = vld [vmem:[#allocation22_spill] sm:$0xff] }
 0xe69   :  { %v7041_v22 = vadd.f32 %v15191_v6, %v6929_v47  ;;  %v6931_v14 = vpop.f32.mrb[138].mxu1  ;;  %v7213_v36 = vpack.c.bf16 %v7167_v56, %v7165_v30 }
 0xe6a   :  { %v7104_v10 = vadd.f32 %v7040_v34, %v17126_v3  ;;  %v7042_v54 = vadd.f32 %v15186_v50, %v6931_v14  ;;  %v6933_v48 = vpop.f32.mrb[139].mxu1  ;;  %v17143_v14 = vld [vmem:[#allocation19_spill] sm:$0xff] }
 0xe6b   :  { %v7105_v31 = vadd.f32 %v7041_v22, %v17128_v15  ;;  %v7043_v45 = vadd.f32 %v15191_v6, %v6933_v48  ;;  %7452 = vmatprep.mubr.bf16.mxu0 %v7213_v36  ;;  %v17144_v36 = vmax.f32 %v17143_v14, 0.0  ;;  %v17148_v15 = vmax.f32 %v17147_v63, 0.0  ;;  %v17163_v14 = vld [vmem:[#allocation45_spill] sm:$0xff] }
 0xe6c   :  { %v7106_v13 = vadd.f32 %v7042_v54, %v17130_v18  ;;  %7453 = vmatmul.mubr.bf16.gmra.mrb[48].mxu0 %v7212_v21  ;;  %v7168_v42 = vmax.f32 %v7104_v10, 0.0  ;;  %v17142_v21 = vmax.f32 %v17141_v40, 0.0  ;;  %v17145_v10 = vld [vmem:[#allocation29_spill] sm:$0xff] }
 0xe6d   :  { %v7107_v44 = vadd.f32 %v7043_v45, %v17132_v62  ;;  %v7169_v55 = vmax.f32 %v7105_v31, 0.0  ;;  %v17146_v54 = vmax.f32 %v17145_v10, 0.0 }
 0xe6e   :  { %v7170_v2 = vmax.f32 %v7106_v13, 0.0 }
 0xe6f   :  { %v7171_v8 = vmax.f32 %v7107_v44, 0.0  ;;  %v6937_v20 = vpop.f32.mrb[140].mxu1 }
 0xe70   :  { %v7214_v52 = vpack.c.bf16 %v7170_v2, %v7168_v42  ;;  %v7044_v33 = vadd.f32 %v15186_v50, %v6937_v20  ;;  %v6939_v51 = vpop.f32.mrb[141].mxu1  ;;  %v17149_v20 = vld [vmem:[#allocation32_spill] sm:$0xff] }
 0xe71   :  { %v7045_v9 = vadd.f32 %v15191_v6, %v6939_v51  ;;  %v6941_v61 = vpop.f32.mrb[142].mxu1  ;;  %v7215_v39 = vpack.c.bf16 %v7171_v8, %v7169_v55 }
 0xe72   :  { %v7108_v35 = vadd.f32 %v7044_v33, %v17134_v25  ;;  %v7046_v1 = vadd.f32 %v15186_v50, %v6941_v61  ;;  %v6943_v26 = vpop.f32.mrb[143].mxu1  ;;  %v17151_v61 = vld [vmem:[#allocation30_spill] sm:$0xff] }
 0xe73   :  { %v7109_v4 = vadd.f32 %v7045_v9, %v17136_v12  ;;  %v7047_v37 = vadd.f32 %v15191_v6, %v6943_v26  ;;  %7460 = vmatprep.mubr.bf16.mxu0 %v7215_v39  ;;  %v17152_v39 = vmax.f32 %v17151_v61, 0.0  ;;  %v17156_v12 = vmax.f32 %v17155_v53, 0.0  ;;  %v17171_v61 = vld [vmem:[#allocation51_spill] sm:$0xff] }
 0xe74   :  { %v7110_v32 = vadd.f32 %v7046_v1, %v17138_v0  ;;  %7461 = vmatmul.mubr.bf16.gmra.mrb[52].mxu0 %v7214_v52  ;;  %v7172_v60 = vmax.f32 %v7108_v35, 0.0  ;;  %v17150_v52 = vmax.f32 %v17149_v20, 0.0  ;;  %v17153_v35 = vld [vmem:[#allocation34_spill] sm:$0xff] }
 0xe75   :  { %v7111_v29 = vadd.f32 %v7047_v37, %v17140_v27  ;;  %v7173_v59 = vmax.f32 %v7109_v4, 0.0  ;;  %v17154_v1 = vmax.f32 %v17153_v35, 0.0 }
 0xe76   :  { %v7174_v57 = vmax.f32 %v7110_v32, 0.0 }
 0xe77   :  { %v7175_v24 = vmax.f32 %v7111_v29, 0.0 }
 0xe78   :  { %v7216_v38 = vpack.c.bf16 %v7174_v57, %v7172_v60 }
 0xe79   :  { %v7217_v19 = vpack.c.bf16 %v7175_v24, %v7173_v59 }
 0xe7b   :  { %7468 = vmatprep.mubr.bf16.mxu0 %v7217_v19 }
 0xe7c   :  { %7469 = vmatmul.mubr.bf16.gmra.mrb[56].mxu0 %v7216_v38  ;;  %v17157_v38 = vld [vmem:[#allocation38_spill] sm:$0xff] }
 0xe7d   :  { %v17158_v19 = vmax.f32 %v17157_v38, 0.0 }
 0xe8c   :  { %v6947_v58 = vpop.f32.mrb[144].mxu1 }
 0xe8d   :  { %v7048_v46 = vadd.f32 %v15186_v50, %v6947_v58  ;;  %v6949_v16 = vpop.f32.mrb[145].mxu1 }
 0xe8e   :  { %v7049_v30 = vadd.f32 %v15191_v6, %v6949_v16  ;;  %v6951_v56 = vpop.f32.mrb[146].mxu1 }
 0xe8f   :  { %v7112_v34 = vadd.f32 %v7048_v46, %v17142_v21  ;;  %v7050_v47 = vadd.f32 %v15186_v50, %v6951_v56  ;;  %v6953_v22 = vpop.f32.mrb[147].mxu1 }
 0xe90   :  { %v7113_v41 = vadd.f32 %v7049_v30, %v17144_v36  ;;  %v7051_v3 = vadd.f32 %v15191_v6, %v6953_v22  ;;  %v17159_v30 = vld [vmem:[#allocation36_spill] sm:$0xff]  ;;  %v17164_v36 = vmax.f32 %v17163_v14, 0.0 }
 0xe91   :  { %v7114_v48 = vadd.f32 %v7050_v47, %v17146_v54  ;;  %v7176_v45 = vmax.f32 %v7112_v34, 0.0  ;;  %v17160_v56 = vmax.f32 %v17159_v30, 0.0  ;;  %v17161_v34 = vld [vmem:[#allocation42_spill] sm:$0xff]  ;;  %v17179_v30 = vld [vmem:[#allocation55_spill] sm:$0xff] }
 0xe92   :  { %v7115_v31 = vadd.f32 %v7051_v3, %v17148_v15  ;;  %v7177_v18 = vmax.f32 %v7113_v41, 0.0  ;;  %v17162_v47 = vmax.f32 %v17161_v34, 0.0 }
 0xe93   :  { %v7178_v28 = vmax.f32 %v7114_v48, 0.0 }
 0xe94   :  { %v7179_v13 = vmax.f32 %v7115_v31, 0.0  ;;  %v6957_v7 = vpop.f32.mrb[148].mxu1 }
 0xe95   :  { %v7218_v62 = vpack.c.bf16 %v7178_v28, %v7176_v45  ;;  %v7052_v44 = vadd.f32 %v15186_v50, %v6957_v7  ;;  %v6959_v42 = vpop.f32.mrb[149].mxu1  ;;  %v17165_v7 = vld [vmem:[#allocation46_spill] sm:$0xff] }
 0xe96   :  { %v7053_v2 = vadd.f32 %v15191_v6, %v6959_v42  ;;  %v6961_v55 = vpop.f32.mrb[150].mxu1  ;;  %v7219_v8 = vpack.c.bf16 %v7179_v13, %v7177_v18 }
 0xe97   :  { %v7116_v33 = vadd.f32 %v7052_v44, %v17150_v52  ;;  %v7054_v51 = vadd.f32 %v15186_v50, %v6961_v55  ;;  %v6963_v9 = vpop.f32.mrb[151].mxu1  ;;  %v17167_v55 = vld [vmem:[#allocation44_spill] sm:$0xff] }
 0xe98   :  { %v7117_v17 = vadd.f32 %v7053_v2, %v17152_v39  ;;  %v7055_v25 = vadd.f32 %v15191_v6, %v6963_v9  ;;  %7476 = vmatprep.mubr.bf16.mxu0 %v7219_v8  ;;  %v17168_v8 = vmax.f32 %v17167_v55, 0.0  ;;  %v17172_v39 = vmax.f32 %v17171_v61, 0.0 }
 0xe99   :  { %v7118_v26 = vadd.f32 %v7054_v51, %v17154_v1  ;;  %7477 = vmatmul.mubr.bf16.gmra.mrb[60].mxu0 %v7218_v62  ;;  %v7180_v37 = vmax.f32 %v7116_v33, 0.0  ;;  %v17166_v62 = vmax.f32 %v17165_v7, 0.0  ;;  %v17169_v33 = vld [vmem:[#allocation49_spill] sm:$0xff] }
 0xe9a   :  { %v7119_v4 = vadd.f32 %v7055_v25, %v17156_v12  ;;  %v7181_v0 = vmax.f32 %v7117_v17, 0.0  ;;  %v17170_v51 = vmax.f32 %v17169_v33, 0.0 }
 0xe9b   :  { %v7182_v5 = vmax.f32 %v7118_v26, 0.0 }
 0xe9c   :  { %v7183_v32 = vmax.f32 %v7119_v4, 0.0  ;;  %v6967_v43 = vpop.f32.mrb[152].mxu1 }
 0xe9d   :  { %v7220_v27 = vpack.c.bf16 %v7182_v5, %v7180_v37  ;;  %v7056_v29 = vadd.f32 %v15186_v50, %v6967_v43  ;;  %v6969_v60 = vpop.f32.mrb[153].mxu1  ;;  %v17173_v43 = vld [vmem:[#allocation52_spill] sm:$0xff] }
 0xe9e   :  { %v7057_v57 = vadd.f32 %v15191_v6, %v6969_v60  ;;  %v6971_v59 = vpop.f32.mrb[154].mxu1  ;;  %v7221_v24 = vpack.c.bf16 %v7183_v32, %v7181_v0 }
 0xe9f   :  { %v7120_v58 = vadd.f32 %v7056_v29, %v17158_v19  ;;  %v7058_v46 = vadd.f32 %v15186_v50, %v6971_v59  ;;  %v6973_v16 = vpop.f32.mrb[155].mxu1  ;;  %v17175_v59 = vld [vmem:[#allocation50_spill] sm:$0xff] }
 0xea0   :  { %v7121_v40 = vadd.f32 %v7057_v57, %v17160_v56  ;;  %v7059_v21 = vadd.f32 %v15191_v6, %v6973_v16  ;;  %7484 = vmatprep.mubr.bf16.mxu0 %v7221_v24  ;;  %v17176_v24 = vmax.f32 %v17175_v59, 0.0  ;;  %v17180_v56 = vmax.f32 %v17179_v30, 0.0 }
 0xea1   :  { %v7122_v22 = vadd.f32 %v7058_v46, %v17162_v47  ;;  %7485 = vmatmul.mubr.bf16.gmra.mrb[64].mxu0 %v7220_v27  ;;  %v7184_v3 = vmax.f32 %v7120_v58, 0.0  ;;  %v17174_v27 = vmax.f32 %v17173_v43, 0.0  ;;  %v17177_v58 = vld [vmem:[#allocation53_spill] sm:$0xff] }
 0xea2   :  { %v7123_v41 = vadd.f32 %v7059_v21, %v17164_v36  ;;  %v7185_v54 = vmax.f32 %v7121_v40, 0.0  ;;  %v17178_v46 = vmax.f32 %v17177_v58, 0.0 }
 0xea3   :  { %v7186_v10 = vmax.f32 %v7122_v22, 0.0 }
 0xea4   :  { %v7187_v48 = vmax.f32 %v7123_v41, 0.0  ;;  %v6977_v63 = vpop.f32.mrb[156].mxu1 }
 0xea5   :  { %v7222_v15 = vpack.c.bf16 %v7186_v10, %v7184_v3  ;;  %v7060_v31 = vadd.f32 %v15186_v50, %v6977_v63  ;;  %v6979_v45 = vpop.f32.mrb[157].mxu1 }
 0xea6   :  { %v7061_v28 = vadd.f32 %v15191_v6, %v6979_v45  ;;  %v6981_v18 = vpop.f32.mrb[158].mxu1  ;;  %v7223_v13 = vpack.c.bf16 %v7187_v48, %v7185_v54 }
 0xea7   :  { %v7124_v44 = vadd.f32 %v7060_v31, %v17166_v62  ;;  %v7062_v42 = vadd.f32 %v15186_v50, %v6981_v18  ;;  %v6983_v2 = vpop.f32.mrb[159].mxu1 }
 0xea8   :  { %v7125_v20 = vadd.f32 %v7061_v28, %v17168_v8  ;;  %v7063_v52 = vadd.f32 %v15191_v6, %v6983_v2  ;;  %7492 = vmatprep.mubr.bf16.mxu0 %v7223_v13 }
 0xea9   :  { %v7126_v9 = vadd.f32 %v7062_v42, %v17170_v51  ;;  %7493 = vmatmul.mubr.bf16.gmra.mrb[68].mxu0 %v7222_v15  ;;  %v7188_v25 = vmax.f32 %v7124_v44, 0.0 }
 0xeaa   :  { %v7127_v17 = vadd.f32 %v7063_v52, %v17172_v39  ;;  %v7189_v1 = vmax.f32 %v7125_v20, 0.0 }
 0xeab   :  { %v7190_v35 = vmax.f32 %v7126_v9, 0.0 }
 0xeac   :  { %v7191_v26 = vmax.f32 %v7127_v17, 0.0  ;;  %v6987_v53 = vpop.f32.mrb[160].mxu1 }
 0xead   :  { %v7224_v12 = vpack.c.bf16 %v7190_v35, %v7188_v25  ;;  %v7064_v4 = vadd.f32 %v15186_v50, %v6987_v53  ;;  %v6989_v37 = vpop.f32.mrb[161].mxu1 }
 0xeae   :  { %v7065_v5 = vadd.f32 %v15191_v6, %v6989_v37  ;;  %v6991_v0 = vpop.f32.mrb[162].mxu1  ;;  %v7225_v32 = vpack.c.bf16 %v7191_v26, %v7189_v1 }
 0xeaf   :  { %v7128_v29 = vadd.f32 %v7064_v4, %v17174_v27  ;;  %v7066_v60 = vadd.f32 %v15186_v50, %v6991_v0  ;;  %v6993_v57 = vpop.f32.mrb[163].mxu1 }
 0xeb0   :  { %v7129_v38 = vadd.f32 %v7065_v5, %v17176_v24  ;;  %v7067_v19 = vadd.f32 %v15191_v6, %v6993_v57  ;;  %7500 = vmatprep.mubr.bf16.mxu0 %v7225_v32 }
 0xeb1   :  { %v7130_v16 = vadd.f32 %v7066_v60, %v17178_v46  ;;  %7501 = vmatmul.mubr.bf16.gmra.mrb[72].mxu0 %v7224_v12  ;;  %v7192_v21 = vmax.f32 %v7128_v29, 0.0 }
 0xeb2   :  { %v7131_v40 = vadd.f32 %v7067_v19, %v17180_v56  ;;  %v7193_v47 = vmax.f32 %v7129_v38, 0.0 }
 0xeb3   :  { %v7194_v34 = vmax.f32 %v7130_v16, 0.0 }
 0xeb4   :  { %v7195_v22 = vmax.f32 %v7131_v40, 0.0 }
 0xeb5   :  { %v7226_v14 = vpack.c.bf16 %v7194_v34, %v7192_v21  ;;  %v7517_v21 = vrot.slane %v15183_v49, 7 }
 0xeb6   :  { %v7227_v50 = vpack.c.bf16 %v7195_v22, %v7193_v47 }
 0xeb8   :  { %7508 = vmatprep.mubr.bf16.mxu0 %v7227_v50 }
 0xeb9   :  { %7509 = vmatmul.mubr.bf16.gmra.mrb[76].mxu0 %v7226_v14 }
 0xeba   :  { %9762 = vmatprep.mubr.msk.f32.mxu0 %vm11001_vm0, %v17052_v11 }
 0xecb   :  { %v9319_v6 = vpop.f32.mrb[16].mxu0 }
 0xecc   :  { %v9320_v36 = vpop.f32.mrb[17].mxu0 }
 0xecd   :  { %v9321_v41 = vadd.f32 %v9320_v36, %v9319_v6  ;;  %v9322_v3 = vpop.f32.mrb[18].mxu0 }
 0xece   :  { %v9323_v10 = vpop.f32.mrb[19].mxu0 }
 0xecf   :  { %v9324_v54 = vadd.f32 %v9323_v10, %v9322_v3  ;;  %7591 = vperm.xlu0 %10209, %v9321_v41  }
 0xed1   :  { %v15387_v48 = vpack.c.bf16 %v9324_v54, %v9321_v41  ;;  %7596 = vperm.xlu1 %10210, %v9324_v54  }
 0xed3   :  { %10151 = vmatpush3.bf16.xpose.msra.mxu1 %v15387_v48 }
 0xed4   :  { %10152 = vmatprep.subr.bf16.mxu1 %v17051_v23 }
 0xed5   :  { %v9325_v63 = vpop.f32.mrb[20].mxu0 }
 0xed6   :  { %v9326_v15 = vpop.f32.mrb[21].mxu0 }
 0xed7   :  { %v9327_v31 = vadd.f32 %v9326_v15, %v9325_v63  ;;  %v9328_v45 = vpop.f32.mrb[22].mxu0 }
 0xed8   :  { %v9329_v28 = vpop.f32.mrb[23].mxu0 }
 0xed9   :  { %v9330_v11 = vadd.f32 %v9329_v28, %v9328_v45  ;;  %7601 = vperm.xlu1 %10210, %v9327_v31  }
 0xedb   :  { %v15391_v18 = vpack.c.bf16 %v9330_v11, %v9327_v31 }
 0xedd   :  { %v9331_v13 = vpop.f32.mrb[24].mxu0  ;;  %7606 = vperm.xlu1 %10210, %v9330_v11   ;;  %10154 = vmatpush3.bf16.xpose.msra.mxu1 %v15391_v18 }
 0xede   :  { %v9332_v7 = vpop.f32.mrb[25].mxu0  ;;  %10155 = vmatprep.subr.bf16.mxu1 %v17051_v23 }
 0xedf   :  { %v9333_v62 = vadd.f32 %v9332_v7, %v9331_v13  ;;  %v9334_v44 = vpop.f32.mrb[26].mxu0 }
 0xee0   :  { %v9335_v42 = vpop.f32.mrb[27].mxu0 }
 0xee1   :  { %v9336_v2 = vadd.f32 %v9335_v42, %v9334_v44  ;;  %7611 = vperm.xlu1 %10210, %v9333_v62  }
 0xee3   :  { %v15395_v55 = vpack.c.bf16 %v9336_v2, %v9333_v62 }
 0xee5   :  { %v9337_v8 = vpop.f32.mrb[28].mxu0  ;;  %7616 = vperm.xlu1 %10210, %v9336_v2   ;;  %10157 = vmatpush3.bf16.xpose.msra.mxu1 %v15395_v55 }
 0xee6   :  { %v9338_v20 = vpop.f32.mrb[29].mxu0  ;;  %10158 = vmatprep.subr.bf16.mxu1 %v17051_v23 }
 0xee7   :  { %v9339_v52 = vadd.f32 %v9338_v20, %v9337_v8  ;;  %v9340_v33 = vpop.f32.mrb[30].mxu0 }
 0xee8   :  { %v9341_v51 = vpop.f32.mrb[31].mxu0 }
 0xee9   :  { %v9342_v9 = vadd.f32 %v9341_v51, %v9340_v33  ;;  %7621 = vperm.xlu1 %10210, %v9339_v52  }
 0xeeb   :  { %v10159_v61 = vpack.c.bf16 %v9342_v9, %v9339_v52 }
 0xeed   :  { %v9343_v39 = vpop.f32.mrb[32].mxu0  ;;  %7626 = vperm.xlu1 %10210, %v9342_v9   ;;  %10160 = vmatpush3.bf16.xpose.msra.mxu1 %v10159_v61 }
 0xeee   :  { %v9344_v17 = vpop.f32.mrb[33].mxu0  ;;  %10161 = vmatprep.subr.bf16.mxu1 %v17051_v23 }
 0xeef   :  { %v9345_v25 = vadd.f32 %v9344_v17, %v9343_v39  ;;  %v9346_v35 = vpop.f32.mrb[34].mxu0 }
 0xef0   :  { %v9347_v1 = vpop.f32.mrb[35].mxu0 }
 0xef1   :  { %v9348_v26 = vadd.f32 %v9347_v1, %v9346_v35  ;;  %7631 = vperm.xlu1 %10210, %v9345_v25  }
 0xef3   :  { %v10162_v53 = vpack.c.bf16 %v9348_v26, %v9345_v25  ;;  %7636 = vperm.xlu0 %10209, %v9348_v26  }
 0xef5   :  { %v9349_v12 = vpop.f32.mrb[36].mxu0  ;;  %10163 = vmatpush3.bf16.xpose.msra.mxu1 %v10162_v53 }
 0xef6   :  { %v9350_v4 = vpop.f32.mrb[37].mxu0  ;;  %10164 = vmatprep.subr.bf16.mxu1 %v17051_v23 }
 0xef7   :  { %v9351_v37 = vadd.f32 %v9350_v4, %v9349_v12  ;;  %v9352_v5 = vpop.f32.mrb[38].mxu0 }
 0xef8   :  { %v9353_v0 = vpop.f32.mrb[39].mxu0 }
 0xef9   :  { %v9354_v32 = vadd.f32 %v9353_v0, %v9352_v5  ;;  %7641 = vperm.xlu1 %10210, %v9351_v37  }
 0xefb   :  { %v10165_v43 = vpack.c.bf16 %v9354_v32, %v9351_v37  ;;  %7646 = vperm.xlu0 %10209, %v9354_v32  }
 0xefd   :  { %v9355_v27 = vpop.f32.mrb[40].mxu0  ;;  %10166 = vmatpush3.bf16.xpose.msra.mxu1 %v10165_v43 }
 0xefe   :  { %v9356_v29 = vpop.f32.mrb[41].mxu0  ;;  %10167 = vmatprep.subr.bf16.mxu1 %v17051_v23 }
 0xeff   :  { %v9357_v60 = vadd.f32 %v9356_v29, %v9355_v27  ;;  %v9358_v57 = vpop.f32.mrb[42].mxu0 }
 0xf00   :  { %v9359_v59 = vpop.f32.mrb[43].mxu0 }
 0xf01   :  { %v9360_v24 = vadd.f32 %v9359_v59, %v9358_v57  ;;  %7651 = vperm.xlu1 %10210, %v9357_v60  }
 0xf03   :  { %v10168_v38 = vpack.c.bf16 %v9360_v24, %v9357_v60  ;;  %7656 = vperm.xlu0 %10209, %v9360_v24  }
 0xf05   :  { %10169 = vmatpush3.bf16.xpose.msra.mxu1 %v10168_v38 }
 0xf06   :  { %10170 = vmatprep.subr.bf16.mxu1 %v17051_v23 }
 0xf18   :  { %v9361_v19 = vpop.f32.mrb[44].mxu0 }
 0xf19   :  { %v9362_v58 = vpop.f32.mrb[45].mxu0 }
 0xf1a   :  { %v9363_v46 = vadd.f32 %v9362_v58, %v9361_v19  ;;  %v9364_v16 = vpop.f32.mrb[46].mxu0 }
 0xf1b   :  { %v9365_v30 = vpop.f32.mrb[47].mxu0 }
 0xf1c   :  { %v9366_v56 = vadd.f32 %v9365_v30, %v9364_v16  ;;  %7661 = vperm.xlu1 %10210, %v9363_v46  }
 0xf1e   :  { %v10171_v40 = vpack.c.bf16 %v9366_v56, %v9363_v46  ;;  %7666 = vperm.xlu0 %10209, %v9366_v56  }
 0xf20   :  { %10172 = vmatpush3.bf16.xpose.msra.mxu1 %v10171_v40 }
 0xf21   :  { %9698 = vmatprep.subr.bf16.mxu1 %v15387_v48 }
 0xf27   :  { %9696 = vmatmul.mubr.f32.vlgmr.msra.gmra.mrb[164].mxu1 %v7517_v21 }
 0xf28   :  { %9699 = vmatpush3.bf16.msra.mxu1 %v15387_v48 }
 0xf29   :  { %9700 = vmatprep.subr.bf16.mxu1 %v15391_v18 }
 0xf2c   :  { %9701 = vmatpush3.bf16.msra.mxu1 %v15391_v18 }
 0xf2d   :  { %9702 = vmatprep.subr.bf16.mxu1 %v15395_v55 }
 0xf30   :  { %9703 = vmatpush3.bf16.msra.mxu1 %v15395_v55 }
 0xf31   :  { %9704 = vmatprep.subr.bf16.mxu1 %v10159_v61 }
 0xf34   :  { %9705 = vmatpush3.bf16.msra.mxu1 %v10159_v61 }
 0xf35   :  { %9706 = vmatprep.subr.bf16.mxu1 %v10162_v53 }
 0xf38   :  { %9707 = vmatpush3.bf16.msra.mxu1 %v10162_v53 }
 0xf39   :  { %9708 = vmatprep.subr.bf16.mxu1 %v10165_v43 }
 0xf3c   :  { %9709 = vmatpush3.bf16.msra.mxu1 %v10165_v43 }
 0xf3d   :  { %9710 = vmatprep.subr.bf16.mxu1 %v10168_v38 }
 0xf3f   :  { %v9367_v34 = vpop.f32.mrb[48].mxu0 }
 0xf40   :  { %v9368_v47 = vpop.f32.mrb[49].mxu0  ;;  %9711 = vmatpush3.bf16.msra.mxu1 %v10168_v38 }
 0xf41   :  { %v9369_v22 = vadd.f32 %v9368_v47, %v9367_v34  ;;  %v9370_v14 = vpop.f32.mrb[50].mxu0  ;;  %9712 = vmatprep.subr.bf16.mxu1 %v10171_v40 }
 0xf42   :  { %v9371_v50 = vpop.f32.mrb[51].mxu0 }
 0xf43   :  { %v9372_v6 = vadd.f32 %v9371_v50, %v9370_v14  ;;  %8082 = vperm.xlu1 %10210, %v9369_v22  }
 0xf44   :  { %9713 = vmatpush3.bf16.msra.mxu1 %v10171_v40 }
 0xf45   :  { %v15412_v36 = vpack.c.bf16 %v9372_v6, %v9369_v22  ;;  %8087 = vperm.xlu0 %10209, %v9372_v6   ;;  %v17181_v22 = vld [vmem:[#allocation9_spill] sm:$0xff] }
 0xf47   :  { %v9373_v41 = vpop.f32.mrb[52].mxu0  ;;  %10175 = vmatpush3.bf16.xpose.msra.mxu0 %v15412_v36  ;;  %9765 = vmatprep.subr.bf16.mxu1 %v15412_v36 }
 0xf48   :  { %v9374_v3 = vpop.f32.mrb[53].mxu0  ;;  %10176 = vmatprep.subr.bf16.mxu0 %v17051_v23 }
 0xf49   :  { %v9375_v10 = vadd.f32 %v9374_v3, %v9373_v41  ;;  %v9376_v54 = vpop.f32.mrb[54].mxu0 }
 0xf4a   :  { %v9377_v48 = vpop.f32.mrb[55].mxu0 }
 0xf4b   :  { %v9378_v63 = vadd.f32 %v9377_v48, %v9376_v54  ;;  %8092 = vperm.xlu1 %10210, %v9375_v10  }
 0xf4d   :  { %v15417_v15 = vpack.c.bf16 %v9378_v63, %v9375_v10  ;;  %8097 = vperm.xlu0 %10209, %v9378_v63  }
 0xf4e   :  { %v7592_v6 = vpop.permute.xlu0 %7591 }
 0xf4f   :  { %v9379_v31 = vpop.f32.mrb[56].mxu0  ;;  %10178 = vmatpush3.bf16.xpose.msra.mxu0 %v15417_v15 }
 0xf50   :  { %v9380_v45 = vpop.f32.mrb[57].mxu0  ;;  %10179 = vmatprep.subr.bf16.mxu0 %v17051_v23  ;;  %v7597_v46 = vpop.permute.xlu1 %7596 }
 0xf51   :  { %v9381_v28 = vadd.f32 %v9380_v45, %v9379_v31  ;;  %v9382_v11 = vpop.f32.mrb[58].mxu0 }
 0xf52   :  { %v9383_v18 = vpop.f32.mrb[59].mxu0 }
 0xf53   :  { %v9384_v13 = vadd.f32 %v9383_v18, %v9382_v11  ;;  %8102 = vperm.xlu1 %10210, %v9381_v28  }
 0xf55   :  { %v15421_v7 = vpack.c.bf16 %v9384_v13, %v9381_v28  ;;  %8107 = vperm.xlu0 %10209, %v9384_v13  }
 0xf57   :  { %10181 = vmatpush3.bf16.xpose.msra.mxu0 %v15421_v7 }
 0xf58   :  { %10182 = vmatprep.subr.bf16.mxu0 %v17051_v23  ;;  %v7602_v16 = vpop.permute.xlu1 %7601 }
 0xf5c   :  { %v7607_v30 = vpop.permute.xlu1 %7606 }
 0xf60   :  { %v7612_v56 = vpop.permute.xlu1 %7611 }
 0xf64   :  { %v7617_v40 = vpop.permute.xlu1 %7616 }
 0xf68   :  { %v7622_v34 = vpop.permute.xlu1 %7621 }
 0xf6c   :  { %v9385_v62 = vpop.f32.mrb[60].mxu0  ;;  %v7627_v47 = vpop.permute.xlu1 %7626 }
 0xf6d   :  { %v9386_v44 = vpop.f32.mrb[61].mxu0 }
 0xf6e   :  { %v9387_v42 = vadd.f32 %v9386_v44, %v9385_v62  ;;  %v9388_v2 = vpop.f32.mrb[62].mxu0  ;;  %v17182_v62 = vld [vmem:[#allocation113_spill] sm:$0xff] }
 0xf6f   :  { %v9389_v55 = vpop.f32.mrb[63].mxu0 }
 0xf70   :  { %v9390_v8 = vadd.f32 %v9389_v55, %v9388_v2  ;;  %8112 = vperm.xlu1 %10210, %v9387_v42   ;;  %v7632_v28 = vpop.permute.xlu1 %7631 }
 0xf72   :  { %v15425_v20 = vpack.c.bf16 %v9390_v8, %v9387_v42  ;;  %8117 = vperm.xlu0 %10209, %v9390_v8   ;;  %v17183_v42 = vld [vmem:[#allocation110_spill] sm:$0xff] }
 0xf74   :  { %v9391_v52 = vpop.f32.mrb[64].mxu0  ;;  %10184 = vmatpush3.bf16.xpose.msra.mxu0 %v15425_v20 }
 0xf75   :  { %v9392_v33 = vpop.f32.mrb[65].mxu0  ;;  %10185 = vmatprep.subr.bf16.mxu0 %v17051_v23 }
 0xf76   :  { %v9393_v51 = vadd.f32 %v9392_v33, %v9391_v52  ;;  %v9394_v9 = vpop.f32.mrb[66].mxu0 }
 0xf77   :  { %v9395_v61 = vpop.f32.mrb[67].mxu0 }
 0xf78   :  { %v9396_v39 = vadd.f32 %v9395_v61, %v9394_v9  ;;  %8122 = vperm.xlu1 %10210, %v9393_v51   ;;  %v7642_v9 = vpop.permute.xlu1 %7641  ;;  %v17184_v61 = vld [vmem:[#allocation115_spill] sm:$0xff] }
 0xf7a   :  { %v15429_v17 = vpack.c.bf16 %v9396_v39, %v9393_v51  ;;  %8127 = vperm.xlu0 %10209, %v9396_v39  }
 0xf7c   :  { %v9397_v25 = vpop.f32.mrb[68].mxu0  ;;  %10187 = vmatpush3.bf16.xpose.msra.mxu0 %v15429_v17 }
 0xf7d   :  { %v9398_v35 = vpop.f32.mrb[69].mxu0  ;;  %10188 = vmatprep.subr.bf16.mxu0 %v17051_v23 }
 0xf7e   :  { %v9399_v1 = vadd.f32 %v9398_v35, %v9397_v25  ;;  %v9400_v26 = vpop.f32.mrb[70].mxu0  ;;  %v17185_v25 = vld [vmem:[#allocation118_spill] sm:$0xff] }
 0xf7f   :  { %v9401_v53 = vpop.f32.mrb[71].mxu0 }
 0xf80   :  { %v9402_v12 = vadd.f32 %v9401_v53, %v9400_v26  ;;  %8132 = vperm.xlu1 %10210, %v9399_v1  }
 0xf82   :  { %v15433_v4 = vpack.c.bf16 %v9402_v12, %v9399_v1  ;;  %8137 = vperm.xlu0 %10209, %v9402_v12  }
 0xf84   :  { %v9403_v37 = vpop.f32.mrb[72].mxu0  ;;  %10190 = vmatpush3.bf16.xpose.msra.mxu0 %v15433_v4 }
 0xf85   :  { %v9404_v5 = vpop.f32.mrb[73].mxu0  ;;  %10191 = vmatprep.subr.bf16.mxu0 %v17051_v23 }
 0xf86   :  { %v9405_v0 = vadd.f32 %v9404_v5, %v9403_v37  ;;  %v9406_v32 = vpop.f32.mrb[74].mxu0 }
 0xf87   :  { %v9407_v43 = vpop.f32.mrb[75].mxu0 }
 0xf88   :  { %v9408_v27 = vadd.f32 %v9407_v43, %v9406_v32  ;;  %8142 = vperm.xlu1 %10210, %v9405_v0   ;;  %v7652_v32 = vpop.permute.xlu1 %7651  ;;  %v17186_v43 = vld [vmem:[#allocation117_spill] sm:$0xff] }
 0xf8a   :  { %v15437_v29 = vpack.c.bf16 %v9408_v27, %v9405_v0  ;;  %8147 = vperm.xlu0 %10209, %v9408_v27   ;;  %v7637_v0 = vpop.permute.xlu0 %7636 }
 0xf8c   :  { %v9409_v60 = vpop.f32.mrb[76].mxu0  ;;  %10193 = vmatpush3.bf16.xpose.msra.mxu0 %v15437_v29 }
 0xf8d   :  { %v9410_v57 = vpop.f32.mrb[77].mxu0  ;;  %10194 = vmatprep.subr.bf16.mxu0 %v17051_v23 }
 0xf8e   :  { %v9411_v59 = vadd.f32 %v9410_v57, %v9409_v60  ;;  %v9412_v24 = vpop.f32.mrb[78].mxu0  ;;  %v17187_v60 = vld [vmem:[#allocation111_spill] sm:$0xff] }
 0xf8f   :  { %v9413_v38 = vpop.f32.mrb[79].mxu0 }
 0xf90   :  { %v9414_v19 = vadd.f32 %v9413_v38, %v9412_v24  ;;  %8152 = vperm.xlu1 %10210, %v9411_v59  }
 0xf92   :  { %v15441_v58 = vpack.c.bf16 %v9414_v19, %v9411_v59  ;;  %8157 = vperm.xlu0 %10209, %v9414_v19  }
 0xf94   :  { %10196 = vmatpush3.bf16.xpose.msra.mxu0 %v15441_v58 }
 0xf9b   :  { %9763 = vmatmul.mubr.f32.vlgmr.msra.gmra.mrb[14].mxu0 %v7517_v21 }
 0xffa   :  { %v7585_v23 = vpop.f32.mrb[164].mxu1 }
 0xffb   :  { %v15447_v14 = vrot.slane %v7585_v23, %v17181_v22  ;;  %v9697_v50 = vpop.f32.mrb[165].mxu1  ;;  %v17189_v23 = vld [vmem:[#allocation112_spill] sm:$0xff] }
 0xffd   :  { %v7674_v41 = vadd.f32 %v15447_v14, %v7597_v46  ;;  %v7673_v3 = vadd.f32 %v15447_v14, %v7592_v6  ;;  %v7675_v49 = vadd.f32 %v15447_v14, %v7602_v16  ;;  %v7677_v21 = vadd.f32 %v15447_v14, %v7612_v56 }
 0xffe   :  { %v7676_v10 = vadd.f32 %v15447_v14, %v7607_v30  ;;  %v7679_v54 = vadd.f32 %v15447_v14, %v7622_v34  ;;  %v7678_v13 = vadd.f32 %v15447_v14, %v7617_v40  ;;  %v7681_v33 = vadd.f32 %v15447_v14, %v7632_v28  ;;  %v17188_v30 = vld [vmem:[#allocation119_spill] sm:$0xff]  ;;  %v7647_v40 = vpop.permute.xlu0 %7646  ;;  %v7662_v34 = vpop.permute.xlu1 %7661 }
 0xfff   :  { %vm7690_vm0 = vcmp.gt.f32.partialorder %v7674_v41, 0.0  ;;  %v7706_v48 = vmul.f32 0.2, %v7674_v41  ;;  %vm7689_vm13 = vcmp.gt.f32.partialorder %v7673_v3, 0.0  ;;  %v7705_v63 = vmul.f32 0.2, %v7673_v3 }
0x1000   :  { %vm7691_vm14 = vcmp.gt.f32.partialorder %v7675_v49, 0.0  ;;  %v7707_v31 = vmul.f32 0.2, %v7675_v49  ;;  %vm7693_vm15 = vcmp.gt.f32.partialorder %v7677_v21, 0.0  ;;  %v7709_v45 = vmul.f32 0.2, %v7677_v21 }
0x1001   :  { %v7722_v11 = vsel %vm7690_vm0, %v7674_v41, %v7706_v48  ;;  %v7721_v18 = vsel %vm7689_vm13, %v7673_v3, %v7705_v63  ;;  %v7708_v8 = vmul.f32 0.2, %v7676_v10  ;;  %vm7692_vm1 = vcmp.gt.f32.partialorder %v7676_v10, 0.0  ;;  %v17191_v63 = vld [vmem:[#allocation114_spill] sm:$0xff] }
0x1002   :  { %v15457_v44 = vadd.f32 %v7722_v11, %v17182_v62  ;;  %v15460_v2 = vadd.f32 %v7721_v18, %v17183_v42  ;;  %v7723_v55 = vsel %vm7691_vm14, %v7675_v49, %v7707_v31  ;;  %v7725_v52 = vsel %vm7693_vm15, %v7677_v21, %v7709_v45  ;;  %v17192_v42 = vld [vmem:[#allocation121_spill] sm:$0xff] }
0x1003   :  { %vm7695_vm2 = vcmp.gt.f32.partialorder %v7679_v54, 0.0  ;;  %v7711_v51 = vmul.f32 0.2, %v7679_v54  ;;  %v15466_v39 = vadd.f32 %v7723_v55, %v17184_v61  ;;  %v15469_v35 = vadd.f32 %v7725_v52, %v17185_v25  ;;  %v17194_v25 = vld [vmem:[#allocation122_spill] sm:$0xff] }
0x1004   :  { %7755 = vmax.xlane.f32.xlu0 %v15457_v44  ;;  %7753 = vmax.xlane.f32.xlu1 %v15460_v2  ;;  %v7724_v1 = vsel %vm7692_vm1, %v7676_v10, %v7708_v8  ;;  %vm7694_vm3 = vcmp.gt.f32.partialorder %v7678_v13, 0.0  ;;  %v7710_v26 = vmul.f32 0.2, %v7678_v13  ;;  %v7713_v12 = vmul.f32 0.2, %v7681_v33  ;;  %v7657_v10 = vpop.permute.xlu0 %7656  ;;  %v17193_v8 = vld [vmem:[#allocation123_spill] sm:$0xff] }
0x1005   :  { %v7727_v53 = vsel %vm7695_vm2, %v7679_v54, %v7711_v51  ;;  %v7680_v37 = vadd.f32 %v15447_v14, %v7627_v47  ;;  %v7683_v5 = vadd.f32 %v15447_v14, %v7642_v9  ;;  %vm7697_vm4 = vcmp.gt.f32.partialorder %v7681_v33, 0.0  ;;  %v17190_v54 = vld [vmem:[#allocation120_spill] sm:$0xff] }
0x1006   :  { %v15476_v27 = vadd.f32 %v7724_v1, %v17186_v43  ;;  %v15479_v57 = vadd.f32 %v7727_v53, %v17187_v60  ;;  %v7726_v59 = vsel %vm7694_vm3, %v7678_v13, %v7710_v26  ;;  %v7682_v24 = vadd.f32 %v15447_v14, %v7637_v0  ;;  %v17195_v26 = vld [vmem:[#allocation24_spill] sm:$0xff]  ;;  %v8083_v60 = vpop.permute.xlu1 %8082 }
0x1007   :  { %v7685_v38 = vadd.f32 %v15447_v14, %v7652_v32  ;;  %v7729_v19 = vsel %vm7697_vm4, %v7681_v33, %v7713_v12  ;;  %v7712_v46 = vmul.f32 0.2, %v7680_v37  ;;  %v7715_v16 = vmul.f32 0.2, %v7683_v5  ;;  %v17197_v32 = vld [vmem:[#allocation124_spill] sm:$0xff] }
0x1008   :  { %7757 = vmax.xlane.f32.xlu0 %v15466_v39  ;;  %7761 = vmax.xlane.f32.xlu1 %v15469_v35  ;;  %vm7696_vm5 = vcmp.gt.f32.partialorder %v7680_v37, 0.0  ;;  %vm7699_vm6 = vcmp.gt.f32.partialorder %v7683_v5, 0.0  ;;  %v15486_v56 = vadd.f32 %v7726_v59, %v17188_v30  ;;  %v15489_v47 = vadd.f32 %v7729_v19, %v17189_v23  ;;  %v7667_v62 = vpop.permute.xlu0 %7666 }
0x1009   :  { %vm7698_vm7 = vcmp.gt.f32.partialorder %v7682_v24, 0.0  ;;  %v7714_v50 = vmul.f32 0.2, %v7682_v24  ;;  %v7717_v6 = vmul.f32 0.2, %v7685_v38  ;;  %v7728_v41 = vsel %vm7696_vm5, %v7680_v37, %v7712_v46 }
0x100a   :  { %v7731_v3 = vsel %vm7699_vm6, %v7683_v5, %v7715_v16  ;;  %v7684_v49 = vadd.f32 %v15447_v14, %v7647_v40  ;;  %v7687_v21 = vadd.f32 %v15447_v14, %v7662_v34  ;;  %vm7701_vm8 = vcmp.gt.f32.partialorder %v7685_v38, 0.0  ;;  %v17196_v5 = vld [vmem:[#allocation116_spill] sm:$0xff] }
0x100b   :  { %v15496_v48 = vadd.f32 %v7728_v41, %v17190_v54  ;;  %v15499_v31 = vadd.f32 %v7731_v3, %v17191_v63  ;;  %v7730_v45 = vsel %vm7698_vm7, %v7682_v24, %v7714_v50  ;;  %v7733_v28 = vsel %vm7701_vm8, %v7685_v38, %v7717_v6  ;;  %v8093_v24 = vpop.permute.xlu1 %8092 }
0x100c   :  { %7759 = vmax.xlane.f32.xlu0 %v15476_v27  ;;  %7765 = vmax.xlane.f32.xlu1 %v15479_v57  ;;  %v7716_v11 = vmul.f32 0.2, %v7684_v49  ;;  %v7719_v18 = vmul.f32 0.2, %v7687_v21  ;;  %v7686_v13 = vadd.f32 %v15447_v14, %v7657_v10  ;;  %vm7700_vm9 = vcmp.gt.f32.partialorder %v7684_v49, 0.0  ;;  %v8088_v59 = vpop.permute.xlu0 %8087 }
0x100d   :  { %vm7703_vm10 = vcmp.gt.f32.partialorder %v7687_v21, 0.0  ;;  %v15505_v55 = vadd.f32 %v7730_v45, %v17192_v42  ;;  %v15508_v52 = vadd.f32 %v7733_v28, %v17193_v8  ;;  %v7688_v61 = vadd.f32 %v15447_v14, %v7667_v62  ;;  %v17198_v62 = vld [vmem:[#allocation10_spill] sm:$0xff]  ;;  %v17199_v8 = vld [vmem:[#allocation125_spill] sm:$0xff] }
0x100e   :  { %v7732_v33 = vsel %vm7700_vm9, %v7684_v49, %v7716_v11  ;;  %v7735_v51 = vsel %vm7703_vm10, %v7687_v21, %v7719_v18  ;;  %v7718_v9 = vmul.f32 0.2, %v7686_v13  ;;  %vm7702_vm11 = vcmp.gt.f32.partialorder %v7686_v13, 0.0 }
0x100f   :  { %v15514_v1 = vadd.f32 %v7732_v33, %v17194_v25  ;;  %v15517_v53 = vadd.f32 %v7735_v51, %v17195_v26  ;;  %v7720_v37 = vmul.f32 0.2, %v7688_v61  ;;  %vm7704_vm12 = vcmp.gt.f32.partialorder %v7688_v61, 0.0  ;;  %v8103_v30 = vpop.permute.xlu1 %8102 }
0x1010   :  { %7763 = vmax.xlane.f32.xlu0 %v15486_v56  ;;  %7769 = vmax.xlane.f32.xlu1 %v15489_v47  ;;  %v7734_v12 = vsel %vm7702_vm11, %v7686_v13, %v7718_v9  ;;  %v8098_v38 = vpop.permute.xlu0 %8097 }
0x1011   :  { %v15522_v14 = vadd.f32 %v7734_v12, %v17196_v5  ;;  %v7736_v0 = vsel %vm7704_vm12, %v7688_v61, %v7720_v37  ;;  %v17200_v37 = vld [vmem:[#allocation11_spill] sm:$0xff] }
0x1012   :  { %v15526_v43 = vadd.f32 %v7736_v0, %v17197_v32  ;;  %v17201_v32 = vld [vmem:[#allocation16_spill] sm:$0xff] }
0x1013   :  { %v8113_v10 = vpop.permute.xlu1 %8112 }
0x1014   :  { %7767 = vmax.xlane.f32.xlu0 %v15496_v48  ;;  %7773 = vmax.xlane.f32.xlu1 %v15499_v31  ;;  %v8108_v40 = vpop.permute.xlu0 %8107 }
0x1017   :  { %v8123_v26 = vpop.permute.xlu1 %8122 }
0x1018   :  { %7771 = vmax.xlane.f32.xlu0 %v15505_v55  ;;  %7777 = vmax.xlane.f32.xlu1 %v15508_v52  ;;  %v8118_v54 = vpop.permute.xlu0 %8117 }
0x101c   :  { %7775 = vmax.xlane.f32.xlu0 %v15514_v1  ;;  %7781 = vmax.xlane.f32.xlu1 %v15517_v53  ;;  %v8128_v12 = vpop.permute.xlu0 %8127 }
0x1020   :  { %7779 = vmax.xlane.f32.xlu0 %v15522_v14 }
0x1024   :  { %7783 = vmax.xlane.f32.xlu0 %v15526_v43 }
0x106e   :  { %v8076_v19 = vpop.f32.mrb[14].mxu0 }
0x106f   :  { %v15530_v46 = vrot.slane %v8076_v19, %v17181_v22  ;;  %v9764_v16 = vpop.f32.mrb[15].mxu0 }
0x1071   :  { %v8165_v34 = vadd.f32 %v15530_v46, %v8088_v59  ;;  %v8164_v23 = vadd.f32 %v15530_v46, %v8083_v60  ;;  %v8167_v50 = vadd.f32 %v15530_v46, %v8098_v38  ;;  %v8166_v6 = vadd.f32 %v15530_v46, %v8093_v24 }
0x1072   :  { %v8169_v41 = vadd.f32 %v15530_v46, %v8108_v40  ;;  %v8168_v3 = vadd.f32 %v15530_v46, %v8103_v30  ;;  %v8171_v18 = vadd.f32 %v15530_v46, %v8118_v54  ;;  %v8170_v13 = vadd.f32 %v15530_v46, %v8113_v10  ;;  %v8133_v30 = vpop.permute.xlu1 %8132  ;;  %v8138_v40 = vpop.permute.xlu0 %8137 }
0x1073   :  { %vm8181_vm0 = vcmp.gt.f32.partialorder %v8165_v34, 0.0  ;;  %v8197_v49 = vmul.f32 0.2, %v8165_v34  ;;  %vm8180_vm13 = vcmp.gt.f32.partialorder %v8164_v23, 0.0  ;;  %v8196_v21 = vmul.f32 0.2, %v8164_v23 }
0x1074   :  { %vm8183_vm14 = vcmp.gt.f32.partialorder %v8167_v50, 0.0  ;;  %v8199_v63 = vmul.f32 0.2, %v8167_v50  ;;  %vm8182_vm15 = vcmp.gt.f32.partialorder %v8166_v6, 0.0  ;;  %v8198_v45 = vmul.f32 0.2, %v8166_v6 }
0x1075   :  { %v8213_v28 = vsel %vm8181_vm0, %v8165_v34, %v8197_v49  ;;  %v8212_v11 = vsel %vm8180_vm13, %v8164_v23, %v8196_v21  ;;  %v8201_v9 = vmul.f32 0.2, %v8169_v41  ;;  %vm8185_vm1 = vcmp.gt.f32.partialorder %v8169_v41, 0.0  ;;  %v17202_v34 = vld [vmem:[#allocation13_spill] sm:$0xff] }
0x1076   :  { %v15541_v42 = vadd.f32 %v8213_v28, %v17198_v62  ;;  %v15544_v33 = vadd.f32 %v8212_v11, %v17199_v8  ;;  %v8215_v51 = vsel %vm8183_vm14, %v8167_v50, %v8199_v63  ;;  %v8214_v61 = vsel %vm8182_vm15, %v8166_v6, %v8198_v45  ;;  %v17203_v6 = vld [vmem:[#allocation23_spill] sm:$0xff]  ;;  %v17204_v63 = vld [vmem:[#allocation14_spill] sm:$0xff]  ;;  %v17205_v28 = vld [vmem:[#allocation12_spill] sm:$0xff] }
0x1077   :  { %vm8184_vm2 = vcmp.gt.f32.partialorder %v8168_v3, 0.0  ;;  %v8200_v25 = vmul.f32 0.2, %v8168_v3  ;;  %v15549_v5 = vadd.f32 %v8215_v51, %v17200_v37  ;;  %v8203_v0 = vmul.f32 0.2, %v8171_v18  ;;  %v17206_v37 = vld [vmem:[#allocation33_spill] sm:$0xff] }
0x1078   :  { %8246 = vmax.xlane.f32.xlu0 %v15541_v42  ;;  %8244 = vmax.xlane.f32.xlu1 %v15544_v33  ;;  %v15552_v60 = vadd.f32 %v8214_v61, %v17201_v32  ;;  %v8217_v59 = vsel %vm8185_vm1, %v8169_v41, %v8201_v9  ;;  %vm8187_vm3 = vcmp.gt.f32.partialorder %v8171_v18, 0.0  ;;  %v8202_v24 = vmul.f32 0.2, %v8170_v13  ;;  %v17207_v32 = vld [vmem:[#allocation35_spill] sm:$0xff] }
0x1079   :  { %v8216_v38 = vsel %vm8184_vm2, %v8168_v3, %v8200_v25  ;;  %vm8186_vm4 = vcmp.gt.f32.partialorder %v8170_v13, 0.0  ;;  %v8173_v19 = vadd.f32 %v15530_v46, %v8128_v12  ;;  %v8172_v16 = vadd.f32 %v15530_v46, %v8123_v26 }
0x107a   :  { %v15559_v23 = vadd.f32 %v8217_v59, %v17202_v34  ;;  %v8219_v50 = vsel %vm8187_vm3, %v8171_v18, %v8203_v0  ;;  %v15562_v41 = vadd.f32 %v8216_v38, %v17203_v6  ;;  %v8218_v49 = vsel %vm8186_vm4, %v8170_v13, %v8202_v24  ;;  %v8143_v18 = vpop.permute.xlu1 %8142  ;;  %v8148_v13 = vpop.permute.xlu0 %8147  ;;  %v17208_v34 = vld [vmem:[#allocation39_spill] sm:$0xff]  ;;  %v17209_v6 = vld [vmem:[#allocation40_spill] sm:$0xff] }
0x107b   :  { %v8175_v3 = vadd.f32 %v15530_v46, %v8138_v40  ;;  %v8174_v21 = vadd.f32 %v15530_v46, %v8133_v30  ;;  %v8205_v10 = vmul.f32 0.2, %v8173_v19  ;;  %v8204_v54 = vmul.f32 0.2, %v8172_v16 }
0x107c   :  { %8250 = vmax.xlane.f32.xlu0 %v15549_v5  ;;  %8248 = vmax.xlane.f32.xlu1 %v15552_v60  ;;  %vm8189_vm5 = vcmp.gt.f32.partialorder %v8173_v19, 0.0  ;;  %vm8188_vm6 = vcmp.gt.f32.partialorder %v8172_v16, 0.0  ;;  %v15569_v45 = vadd.f32 %v8219_v50, %v17204_v63  ;;  %v15572_v11 = vadd.f32 %v8218_v49, %v17205_v28  ;;  %v17211_v28 = vld [vmem:[#allocation43_spill] sm:$0xff] }
0x107d   :  { %vm8191_vm7 = vcmp.gt.f32.partialorder %v8175_v3, 0.0  ;;  %v8207_v62 = vmul.f32 0.2, %v8175_v3  ;;  %vm8190_vm8 = vcmp.gt.f32.partialorder %v8174_v21, 0.0  ;;  %v8206_v8 = vmul.f32 0.2, %v8174_v21 }
0x107e   :  { %v8221_v51 = vsel %vm8189_vm5, %v8173_v19, %v8205_v10  ;;  %v8220_v9 = vsel %vm8188_vm6, %v8172_v16, %v8204_v54  ;;  %v8177_v61 = vadd.f32 %v15530_v46, %v8148_v13  ;;  %v8176_v25 = vadd.f32 %v15530_v46, %v8143_v18  ;;  %v8153_v26 = vpop.permute.xlu1 %8152  ;;  %v8158_v12 = vpop.permute.xlu0 %8157 }
0x107f   :  { %v15579_v0 = vadd.f32 %v8221_v51, %v17206_v37  ;;  %v15582_v59 = vadd.f32 %v8220_v9, %v17207_v32  ;;  %v8223_v24 = vsel %vm8191_vm7, %v8175_v3, %v8207_v62  ;;  %v8222_v38 = vsel %vm8190_vm8, %v8174_v21, %v8206_v8 }
0x1080   :  { %8254 = vmax.xlane.f32.xlu0 %v15559_v23  ;;  %8252 = vmax.xlane.f32.xlu1 %v15562_v41  ;;  %v8209_v19 = vmul.f32 0.2, %v8177_v61  ;;  %v8208_v16 = vmul.f32 0.2, %v8176_v25  ;;  %v8179_v30 = vadd.f32 %v15530_v46, %v8158_v12  ;;  %v8178_v40 = vadd.f32 %v15530_v46, %v8153_v26  ;;  %v17210_v46 = vld [vmem:[#allocation41_spill] sm:$0xff]  ;;  %v17213_v12 = vld [vmem:[#allocation48_spill] sm:$0xff] }
0x1081   :  { %vm8193_vm9 = vcmp.gt.f32.partialorder %v8177_v61, 0.0  ;;  %vm8192_vm10 = vcmp.gt.f32.partialorder %v8176_v25, 0.0  ;;  %v15589_v50 = vadd.f32 %v8223_v24, %v17208_v34  ;;  %v15592_v49 = vadd.f32 %v8222_v38, %v17209_v6 }
0x1082   :  { %v8225_v3 = vsel %vm8193_vm9, %v8177_v61, %v8209_v19  ;;  %v8224_v21 = vsel %vm8192_vm10, %v8176_v25, %v8208_v16  ;;  %v8211_v10 = vmul.f32 0.2, %v8179_v30  ;;  %v8210_v54 = vmul.f32 0.2, %v8178_v40  ;;  %v17212_v25 = vld [vmem:[#allocation47_spill] sm:$0xff] }
0x1083   :  { %vm8195_vm11 = vcmp.gt.f32.partialorder %v8179_v30, 0.0  ;;  %vm8194_vm12 = vcmp.gt.f32.partialorder %v8178_v40, 0.0  ;;  %v15597_v63 = vadd.f32 %v8225_v3, %v17210_v46  ;;  %v15600_v18 = vadd.f32 %v8224_v21, %v17211_v28 }
0x1084   :  { %8258 = vmax.xlane.f32.xlu0 %v15569_v45  ;;  %8256 = vmax.xlane.f32.xlu1 %v15572_v11  ;;  %v8227_v13 = vsel %vm8195_vm11, %v8179_v30, %v8211_v10  ;;  %v8226_v62 = vsel %vm8194_vm12, %v8178_v40, %v8210_v54 }
0x1085   :  { %v15607_v26 = vadd.f32 %v8227_v13, %v17212_v25  ;;  %v15610_v37 = vadd.f32 %v8226_v62, %v17213_v12 }
0x1088   :  { %8262 = vmax.xlane.f32.xlu0 %v15579_v0  ;;  %8260 = vmax.xlane.f32.xlu1 %v15582_v59 }
0x108c   :  { %8266 = vmax.xlane.f32.xlu0 %v15589_v50  ;;  %8264 = vmax.xlane.f32.xlu1 %v15592_v49 }
0x1090   :  { %8270 = vmax.xlane.f32.xlu0 %v15597_v63  ;;  %8268 = vmax.xlane.f32.xlu1 %v15600_v18 }
0x1091   :  { %v7756_v8 = vpop.xlane.xlu0 %7755  ;;  %v7754_v51 = vpop.xlane.xlu1 %7753 }
0x1092   :  { %v7786_v9 = vsub.f32 %v15457_v44, %v7756_v8  ;;  %v7785_v61 = vsub.f32 %v15460_v2, %v7754_v51 }
0x1094   :  { %v7803_v32 = vmul.f32 1.442695, %v7786_v9  ;;  %v7801_v24 = vmul.f32 1.442695, %v7785_v61  ;;  %8274 = vmax.xlane.f32.xlu0 %v15607_v26  ;;  %8272 = vmax.xlane.f32.xlu1 %v15610_v37 }
0x1095   :  { %v7758_v38 = vpop.xlane.xlu0 %7757  ;;  %v7762_v19 = vpop.xlane.xlu1 %7761 }
0x1096   :  { %10805 = vpow2.f32 %v7803_v32  ;;  %v7787_v16 = vsub.f32 %v15466_v39, %v7758_v38  ;;  %v7789_v44 = vsub.f32 %v15469_v35, %v7762_v19 }
0x1097   :  { %10807 = vpow2.f32 %v7801_v24 }
0x1098   :  { %v7805_v2 = vmul.f32 1.442695, %v7787_v16  ;;  %v7809_v6 = vmul.f32 1.442695, %v7789_v44 }
0x1099   :  { %v7760_v30 = vpop.xlane.xlu0 %7759  ;;  %v7766_v40 = vpop.xlane.xlu1 %7765 }
0x109a   :  { %10809 = vpow2.f32 %v7805_v2  ;;  %v7788_v34 = vsub.f32 %v15476_v27, %v7760_v30  ;;  %v7791_v3 = vsub.f32 %v15479_v57, %v7766_v40 }
0x109c   :  { %v7807_v21 = vmul.f32 1.442695, %v7788_v34  ;;  %v7813_v39 = vmul.f32 1.442695, %v7791_v3 }
0x109d   :  { %v7764_v10 = vpop.xlane.xlu0 %7763  ;;  %v7770_v54 = vpop.xlane.xlu1 %7769 }
0x109e   :  { %10811 = vpow2.f32 %v7807_v21  ;;  %v7790_v46 = vsub.f32 %v15486_v56, %v7764_v10  ;;  %v7793_v28 = vsub.f32 %v15489_v47, %v7770_v54 }
0x109f   :  { %10813 = vpow2.f32 %v7809_v6 }
0x10a0   :  { %v15620_v35 = vpop.eup %10805  ;;  %v7811_v13 = vmul.f32 1.442695, %v7790_v46  ;;  %v7817_v56 = vmul.f32 1.442695, %v7793_v28 }
0x10a1   :  { %v15622_v62 = vpop.eup %10807  ;;  %7835 = vadd.xlane.f32.xlu0 %v15620_v35  ;;  %v7768_v27 = vpop.xlane.xlu0 %7767 }
0x10a2   :  { %v7774_v8 = vpop.xlane.xlu1 %7773  ;;  %10815 = vpow2.f32 %v7811_v13  ;;  %v7792_v57 = vsub.f32 %v15496_v48, %v7768_v27  ;;  %7833 = vadd.xlane.f32.xlu1 %v15622_v62 }
0x10a3   :  { %10817 = vpow2.f32 %v7813_v39  ;;  %v7795_v51 = vsub.f32 %v15499_v31, %v7774_v8 }
0x10a4   :  { %v15628_v9 = vpop.eup %10809  ;;  %v7815_v47 = vmul.f32 1.442695, %v7792_v57 }
0x10a5   :  { %v7772_v61 = vpop.xlane.xlu0 %7771  ;;  %v7821_v32 = vmul.f32 1.442695, %v7795_v51 }
0x10a6   :  { %v7778_v25 = vpop.xlane.xlu1 %7777  ;;  %10819 = vpow2.f32 %v7815_v47  ;;  %v7794_v12 = vsub.f32 %v15505_v55, %v7772_v61  ;;  %7837 = vadd.xlane.f32.xlu1 %v15628_v9 }
0x10a7   :  { %10821 = vpow2.f32 %v7817_v56  ;;  %v7797_v48 = vsub.f32 %v15508_v52, %v7778_v25 }
0x10a8   :  { %v15633_v24 = vpop.eup %10811  ;;  %v7819_v38 = vmul.f32 1.442695, %v7794_v12 }
0x10a9   :  { %v15635_v19 = vpop.eup %10813  ;;  %7839 = vadd.xlane.f32.xlu0 %v15633_v24  ;;  %v7776_v31 = vpop.xlane.xlu0 %7775  ;;  %v7825_v55 = vmul.f32 1.442695, %v7797_v48 }
0x10aa   :  { %v7782_v16 = vpop.xlane.xlu1 %7781  ;;  %10823 = vpow2.f32 %v7819_v38  ;;  %v7796_v44 = vsub.f32 %v15514_v1, %v7776_v31  ;;  %7841 = vadd.xlane.f32.xlu1 %v15635_v19 }
0x10ab   :  { %10825 = vpow2.f32 %v7821_v32  ;;  %v7799_v2 = vsub.f32 %v15517_v53, %v7782_v16 }
0x10ac   :  { %v15641_v30 = vpop.eup %10815  ;;  %v7823_v52 = vmul.f32 1.442695, %v7796_v44 }
0x10ad   :  { %v15643_v40 = vpop.eup %10817  ;;  %7843 = vadd.xlane.f32.xlu0 %v15641_v30  ;;  %v7780_v34 = vpop.xlane.xlu0 %7779  ;;  %v7829_v1 = vmul.f32 1.442695, %v7799_v2 }
0x10ae   :  { %10827 = vpow2.f32 %v7823_v52  ;;  %v7798_v6 = vsub.f32 %v15522_v14, %v7780_v34  ;;  %7845 = vadd.xlane.f32.xlu1 %v15643_v40 }
0x10af   :  { %10829 = vpow2.f32 %v7825_v55 }
0x10b0   :  { %v15648_v3 = vpop.eup %10819  ;;  %v7827_v21 = vmul.f32 1.442695, %v7798_v6 }
0x10b1   :  { %v15650_v10 = vpop.eup %10821  ;;  %7847 = vadd.xlane.f32.xlu0 %v15648_v3  ;;  %v7784_v53 = vpop.xlane.xlu0 %7783 }
0x10b2   :  { %10831 = vpow2.f32 %v7827_v21  ;;  %v7800_v54 = vsub.f32 %v15526_v43, %v7784_v53  ;;  %7849 = vadd.xlane.f32.xlu1 %v15650_v10 }
0x10b3   :  { %10833 = vpow2.f32 %v7829_v1 }
0x10b4   :  { %v15655_v46 = vpop.eup %10823  ;;  %v7831_v14 = vmul.f32 1.442695, %v7800_v54 }
0x10b5   :  { %v15657_v39 = vpop.eup %10825  ;;  %7851 = vadd.xlane.f32.xlu0 %v15655_v46 }
0x10b6   :  { %10835 = vpow2.f32 %v7831_v14  ;;  %7853 = vadd.xlane.f32.xlu1 %v15657_v39 }
0x10b8   :  { %v15661_v28 = vpop.eup %10827 }
0x10b9   :  { %v15663_v13 = vpop.eup %10829  ;;  %7855 = vadd.xlane.f32.xlu0 %v15661_v28 }
0x10ba   :  { %7857 = vadd.xlane.f32.xlu1 %v15663_v13 }
0x10bc   :  { %v15667_v43 = vpop.eup %10831 }
0x10bd   :  { %v15669_v27 = vpop.eup %10833  ;;  %7859 = vadd.xlane.f32.xlu0 %v15667_v43 }
0x10be   :  { %7861 = vadd.xlane.f32.xlu1 %v15669_v27 }
0x10c0   :  { %v15673_v8 = vpop.eup %10835 }
0x10c1   :  { %7863 = vadd.xlane.f32.xlu0 %v15673_v8 }
0x1105   :  { %v8247_v57 = vpop.xlane.xlu0 %8246  ;;  %v8245_v56 = vpop.xlane.xlu1 %8244 }
0x1106   :  { %v8277_v51 = vsub.f32 %v15541_v42, %v8247_v57  ;;  %v8276_v47 = vsub.f32 %v15544_v33, %v8245_v56 }
0x1108   :  { %v8294_v61 = vmul.f32 1.442695, %v8277_v51  ;;  %v8292_v25 = vmul.f32 1.442695, %v8276_v47 }
0x1109   :  { %v8251_v12 = vpop.xlane.xlu0 %8250  ;;  %v8249_v32 = vpop.xlane.xlu1 %8248 }
0x110a   :  { %10837 = vpow2.f32 %v8294_v61  ;;  %v8279_v48 = vsub.f32 %v15549_v5, %v8251_v12  ;;  %v8278_v38 = vsub.f32 %v15552_v60, %v8249_v32 }
0x110b   :  { %10839 = vpow2.f32 %v8292_v25 }
0x110c   :  { %v8298_v31 = vmul.f32 1.442695, %v8279_v48  ;;  %v8296_v16 = vmul.f32 1.442695, %v8278_v38 }
0x110d   :  { %v8255_v44 = vpop.xlane.xlu0 %8254  ;;  %v8253_v55 = vpop.xlane.xlu1 %8252 }
0x110e   :  { %10841 = vpow2.f32 %v8298_v31  ;;  %v8281_v2 = vsub.f32 %v15559_v23, %v8255_v44  ;;  %v8280_v42 = vsub.f32 %v15562_v41, %v8253_v55 }
0x110f   :  { %10843 = vpow2.f32 %v8296_v16 }
0x1110   :  { %v8302_v33 = vmul.f32 1.442695, %v8281_v2  ;;  %v8300_v52 = vmul.f32 1.442695, %v8280_v42 }
0x1111   :  { %v8259_v34 = vpop.xlane.xlu0 %8258  ;;  %v8257_v6 = vpop.xlane.xlu1 %8256 }
0x1112   :  { %10845 = vpow2.f32 %v8302_v33  ;;  %v8283_v5 = vsub.f32 %v15569_v45, %v8259_v34  ;;  %v8282_v60 = vsub.f32 %v15572_v11, %v8257_v6 }
0x1113   :  { %10847 = vpow2.f32 %v8300_v52 }
0x1114   :  { %v15684_v1 = vpop.eup %10837  ;;  %v8306_v21 = vmul.f32 1.442695, %v8283_v5  ;;  %v8304_v53 = vmul.f32 1.442695, %v8282_v60 }
0x1115   :  { %v15686_v54 = vpop.eup %10839  ;;  %8326 = vadd.xlane.f32.xlu0 %v15684_v1  ;;  %v8263_v23 = vpop.xlane.xlu0 %8262 }
0x1116   :  { %v8261_v41 = vpop.xlane.xlu1 %8260  ;;  %10849 = vpow2.f32 %v8306_v21  ;;  %v8285_v14 = vsub.f32 %v15579_v0, %v8263_v23  ;;  %8324 = vadd.xlane.f32.xlu1 %v15686_v54 }
0x1117   :  { %v8284_v45 = vsub.f32 %v15582_v59, %v8261_v41  ;;  %10851 = vpow2.f32 %v8304_v53 }
0x1118   :  { %v15692_v11 = vpop.eup %10841  ;;  %v8310_v57 = vmul.f32 1.442695, %v8285_v14 }
0x1119   :  { %v8308_v56 = vmul.f32 1.442695, %v8284_v45  ;;  %v15694_v51 = vpop.eup %10843  ;;  %8330 = vadd.xlane.f32.xlu0 %v15692_v11  ;;  %v8267_v47 = vpop.xlane.xlu0 %8266 }
0x111a   :  { %v8265_v61 = vpop.xlane.xlu1 %8264  ;;  %10853 = vpow2.f32 %v8310_v57  ;;  %v8287_v25 = vsub.f32 %v15589_v50, %v8267_v47  ;;  %8328 = vadd.xlane.f32.xlu1 %v15694_v51 }
0x111b   :  { %v8286_v0 = vsub.f32 %v15592_v49, %v8265_v61  ;;  %10855 = vpow2.f32 %v8308_v56 }
0x111c   :  { %v15700_v59 = vpop.eup %10845  ;;  %v8314_v12 = vmul.f32 1.442695, %v8287_v25 }
0x111d   :  { %v8312_v32 = vmul.f32 1.442695, %v8286_v0  ;;  %v15702_v48 = vpop.eup %10847  ;;  %8334 = vadd.xlane.f32.xlu0 %v15700_v59  ;;  %v8271_v38 = vpop.xlane.xlu0 %8270 }
0x111e   :  { %v8269_v31 = vpop.xlane.xlu1 %8268  ;;  %10857 = vpow2.f32 %v8314_v12  ;;  %v8289_v16 = vsub.f32 %v15597_v63, %v8271_v38  ;;  %8332 = vadd.xlane.f32.xlu1 %v15702_v48 }
0x111f   :  { %v8288_v50 = vsub.f32 %v15600_v18, %v8269_v31  ;;  %10859 = vpow2.f32 %v8312_v32 }
0x1120   :  { %v15708_v49 = vpop.eup %10849  ;;  %v8318_v44 = vmul.f32 1.442695, %v8289_v16 }
0x1121   :  { %v8316_v55 = vmul.f32 1.442695, %v8288_v50  ;;  %v15710_v2 = vpop.eup %10851  ;;  %8338 = vadd.xlane.f32.xlu0 %v15708_v49  ;;  %v8275_v42 = vpop.xlane.xlu0 %8274 }
0x1122   :  { %v8273_v33 = vpop.xlane.xlu1 %8272  ;;  %10861 = vpow2.f32 %v8318_v44  ;;  %v8291_v52 = vsub.f32 %v15607_v26, %v8275_v42  ;;  %8336 = vadd.xlane.f32.xlu1 %v15710_v2 }
0x1123   :  { %v8290_v63 = vsub.f32 %v15610_v37, %v8273_v33  ;;  %10863 = vpow2.f32 %v8316_v55 }
0x1124   :  { %v15716_v18 = vpop.eup %10853  ;;  %v8322_v34 = vmul.f32 1.442695, %v8291_v52 }
0x1125   :  { %v8320_v6 = vmul.f32 1.442695, %v8290_v63  ;;  %v15718_v5 = vpop.eup %10855  ;;  %8342 = vadd.xlane.f32.xlu0 %v15716_v18 }
0x1126   :  { %10865 = vpow2.f32 %v8322_v34  ;;  %8340 = vadd.xlane.f32.xlu1 %v15718_v5 }
0x1127   :  { %10867 = vpow2.f32 %v8320_v6 }
0x1128   :  { %v15722_v60 = vpop.eup %10857 }
0x1129   :  { %v15724_v26 = vpop.eup %10859  ;;  %8346 = vadd.xlane.f32.xlu0 %v15722_v60 }
0x112a   :  { %8344 = vadd.xlane.f32.xlu1 %v15724_v26 }
0x112c   :  { %v15728_v37 = vpop.eup %10861 }
0x112d   :  { %v15730_v21 = vpop.eup %10863  ;;  %8350 = vadd.xlane.f32.xlu0 %v15728_v37 }
0x112e   :  { %8348 = vadd.xlane.f32.xlu1 %v15730_v21  ;;  %v7836_v53 = vpop.xlane.xlu0 %7835 }
0x112f   :  { %10869 = vrcp.f32 %v7836_v53  ;;  %v7834_v23 = vpop.xlane.xlu1 %7833 }
0x1130   :  { %v15734_v41 = vpop.eup %10865  ;;  %10871 = vrcp.f32 %v7834_v23 }
0x1131   :  { %v15736_v14 = vpop.eup %10867  ;;  %8354 = vadd.xlane.f32.xlu0 %v15734_v41 }
0x1132   :  { %8352 = vadd.xlane.f32.xlu1 %v15736_v14 }
0x1133   :  { %v7838_v45 = vpop.xlane.xlu1 %7837 }
0x1134   :  { %10873 = vrcp.f32 %v7838_v45 }
0x1136   :  { %v7840_v57 = vpop.xlane.xlu0 %7839 }
0x1137   :  { %10875 = vrcp.f32 %v7840_v57  ;;  %v7842_v56 = vpop.xlane.xlu1 %7841 }
0x1138   :  { %10877 = vrcp.f32 %v7842_v56 }
0x1139   :  { %v10870_v47 = vpop.eup %10869 }
0x113a   :  { %v10872_v61 = vpop.eup %10871  ;;  %v7844_v25 = vpop.xlane.xlu0 %7843  ;;  %v7882_v0 = vmul.f32 %v10870_v47, %v15620_v35 }
0x113b   :  { %10879 = vrcp.f32 %v7844_v25  ;;  %v7846_v12 = vpop.xlane.xlu1 %7845  ;;  %v7881_v32 = vmul.f32 %v10872_v61, %v15622_v62 }
0x113c   :  { %10881 = vrcp.f32 %v7846_v12 }
0x113d   :  { %v7897_v38 = vpack.c.bf16 %v7882_v0, %v7881_v32 }
0x113e   :  { %v7848_v31 = vpop.xlane.xlu0 %7847  ;;  %v10874_v16 = vpop.eup %10873 }
0x113f   :  { %10883 = vrcp.f32 %v7848_v31  ;;  %9714 = vmatprep.mubr.bf16.mxu1 %v7897_v38  ;;  %v7850_v50 = vpop.xlane.xlu1 %7849  ;;  %v7883_v55 = vmul.f32 %v10874_v16, %v15628_v9 }
0x1140   :  { %10885 = vrcp.f32 %v7850_v50 }
0x1141   :  { %v10876_v44 = vpop.eup %10875 }
0x1142   :  { %v7884_v42 = vmul.f32 %v10876_v44, %v15633_v24  ;;  %v7852_v33 = vpop.xlane.xlu0 %7851  ;;  %v10878_v52 = vpop.eup %10877 }
0x1143   :  { %10887 = vrcp.f32 %v7852_v33  ;;  %v7854_v35 = vpop.xlane.xlu1 %7853  ;;  %v7885_v6 = vmul.f32 %v10878_v52, %v15635_v19 }
0x1144   :  { %v7898_v63 = vpack.c.bf16 %v7884_v42, %v7883_v55  ;;  %10889 = vrcp.f32 %v7854_v35 }
0x1145   :  { %v10880_v34 = vpop.eup %10879 }
0x1146   :  { %v7856_v62 = vpop.xlane.xlu0 %7855  ;;  %9715 = vmatmul.mubr.bf16.vlgmr.msra.gmra.mrb[168].mxu1 %v7898_v63  ;;  %v7886_v53 = vmul.f32 %v10880_v34, %v15641_v30  ;;  %v10882_v23 = vpop.eup %10881 }
0x1147   :  { %10891 = vrcp.f32 %v7856_v62  ;;  %9766 = vmatpush3.bf16.msra.mxu1 %v15412_v36  ;;  %v7858_v9 = vpop.xlane.xlu1 %7857  ;;  %v7887_v57 = vmul.f32 %v10882_v23, %v15643_v40 }
0x1148   :  { %9767 = vmatprep.subr.bf16.mxu1 %v15417_v15  ;;  %v7899_v24 = vpack.c.bf16 %v7886_v53, %v7885_v6  ;;  %10893 = vrcp.f32 %v7858_v9 }
0x1149   :  { %v10884_v45 = vpop.eup %10883 }
0x114a   :  { %v7888_v56 = vmul.f32 %v10884_v45, %v15648_v3  ;;  %v7860_v47 = vpop.xlane.xlu0 %7859  ;;  %9718 = vmatprep.mubr.bf16.mxu1 %v7899_v24  ;;  %v10886_v61 = vpop.eup %10885 }
0x114b   :  { %10895 = vrcp.f32 %v7860_v47  ;;  %9768 = vmatpush3.bf16.msra.mxu1 %v15417_v15  ;;  %v7862_v19 = vpop.xlane.xlu1 %7861  ;;  %v7889_v0 = vmul.f32 %v10886_v61, %v15650_v10 }
0x114c   :  { %v7900_v30 = vpack.c.bf16 %v7888_v56, %v7887_v57  ;;  %9769 = vmatprep.subr.bf16.mxu1 %v15421_v7  ;;  %10897 = vrcp.f32 %v7862_v19 }
0x114d   :  { %v10888_v36 = vpop.eup %10887 }
0x114e   :  { %v7864_v25 = vpop.xlane.xlu0 %7863  ;;  %9719 = vmatmul.mubr.bf16.gmra.mrb[172].mxu1 %v7900_v30  ;;  %v7890_v40 = vmul.f32 %v10888_v36, %v15655_v46  ;;  %v10890_v12 = vpop.eup %10889 }
0x114f   :  { %10899 = vrcp.f32 %v7864_v25  ;;  %9770 = vmatpush3.bf16.msra.mxu1 %v15421_v7  ;;  %v7891_v32 = vmul.f32 %v10890_v12, %v15657_v39 }
0x1150   :  { %9771 = vmatprep.subr.bf16.mxu1 %v15425_v20  ;;  %v7901_v3 = vpack.c.bf16 %v7890_v40, %v7889_v0 }
0x1151   :  { %v10892_v15 = vpop.eup %10891 }
0x1152   :  { %v7892_v38 = vmul.f32 %v10892_v15, %v15661_v28  ;;  %9722 = vmatprep.mubr.bf16.mxu1 %v7901_v3  ;;  %v10894_v31 = vpop.eup %10893 }
0x1153   :  { %9772 = vmatpush3.bf16.msra.mxu1 %v15425_v20  ;;  %v7893_v46 = vmul.f32 %v10894_v31, %v15663_v13 }
0x1154   :  { %v7902_v16 = vpack.c.bf16 %v7892_v38, %v7891_v32  ;;  %9773 = vmatprep.subr.bf16.mxu1 %v15429_v17 }
0x1155   :  { %v10896_v10 = vpop.eup %10895 }
0x1156   :  { %9723 = vmatmul.mubr.bf16.gmra.mrb[176].mxu1 %v7902_v16  ;;  %v7894_v7 = vmul.f32 %v10896_v10, %v15667_v43  ;;  %v10898_v50 = vpop.eup %10897 }
0x1157   :  { %9774 = vmatpush3.bf16.msra.mxu1 %v15429_v17  ;;  %v7895_v44 = vmul.f32 %v10898_v50, %v15669_v27 }
0x1158   :  { %9775 = vmatprep.subr.bf16.mxu1 %v15433_v4  ;;  %v7903_v39 = vpack.c.bf16 %v7894_v7, %v7893_v46 }
0x1159   :  { %v10900_v28 = vpop.eup %10899 }
0x115a   :  { %v7896_v20 = vmul.f32 %v10900_v28, %v15673_v8  ;;  %9726 = vmatprep.mubr.bf16.mxu1 %v7903_v39 }
0x115b   :  { %9776 = vmatpush3.bf16.msra.mxu1 %v15433_v4 }
0x115c   :  { %v7904_v55 = vpack.c.bf16 %v7896_v20, %v7895_v44  ;;  %9777 = vmatprep.subr.bf16.mxu1 %v15437_v29 }
0x115e   :  { %9727 = vmatmul.mubr.bf16.gmra.mrb[180].mxu1 %v7904_v55 }
0x115f   :  { %9778 = vmatpush3.bf16.msra.mxu1 %v15437_v29 }
0x1160   :  { %9779 = vmatprep.subr.bf16.mxu1 %v15441_v58 }
0x1163   :  { %9780 = vmatpush3.bf16.msra.mxu1 %v15441_v58 }
0x11a2   :  { %v8327_v17 = vpop.xlane.xlu0 %8326 }
0x11a3   :  { %10901 = vrcp.f32 %v8327_v17  ;;  %v8325_v13 = vpop.xlane.xlu1 %8324 }
0x11a4   :  { %10903 = vrcp.f32 %v8325_v13 }
0x11a6   :  { %v8331_v43 = vpop.xlane.xlu0 %8330 }
0x11a7   :  { %10905 = vrcp.f32 %v8331_v43  ;;  %v8329_v27 = vpop.xlane.xlu1 %8328 }
0x11a8   :  { %10907 = vrcp.f32 %v8329_v27 }
0x11aa   :  { %v8335_v8 = vpop.xlane.xlu0 %8334 }
0x11ab   :  { %10909 = vrcp.f32 %v8335_v8  ;;  %v8333_v4 = vpop.xlane.xlu1 %8332 }
0x11ac   :  { %10911 = vrcp.f32 %v8333_v4 }
0x11ad   :  { %v10902_v42 = vpop.eup %10901 }
0x11ae   :  { %v10904_v33 = vpop.eup %10903  ;;  %v8339_v52 = vpop.xlane.xlu0 %8338  ;;  %v8373_v29 = vmul.f32 %v10902_v42, %v15684_v1 }
0x11af   :  { %10913 = vrcp.f32 %v8339_v52  ;;  %v8337_v35 = vpop.xlane.xlu1 %8336  ;;  %v8372_v58 = vmul.f32 %v10904_v33, %v15686_v54 }
0x11b0   :  { %10915 = vrcp.f32 %v8337_v35 }
0x11b1   :  { %v10906_v63 = vpop.eup %10905  ;;  %v8388_v34 = vpack.c.bf16 %v8373_v29, %v8372_v58 }
0x11b2   :  { %v10908_v62 = vpop.eup %10907  ;;  %v8375_v6 = vmul.f32 %v10906_v63, %v15692_v11  ;;  %v8343_v53 = vpop.xlane.xlu0 %8342 }
0x11b3   :  { %v8374_v23 = vmul.f32 %v10908_v62, %v15694_v51  ;;  %10917 = vrcp.f32 %v8343_v53  ;;  %9781 = vmatprep.mubr.bf16.mxu1 %v8388_v34  ;;  %v8341_v9 = vpop.xlane.xlu1 %8340 }
0x11b4   :  { %10919 = vrcp.f32 %v8341_v9 }
0x11b5   :  { %v10910_v24 = vpop.eup %10909  ;;  %v8389_v45 = vpack.c.bf16 %v8375_v6, %v8374_v23 }
0x11b6   :  { %v10912_v1 = vpop.eup %10911  ;;  %v8347_v57 = vpop.xlane.xlu0 %8346  ;;  %v8377_v56 = vmul.f32 %v10910_v24, %v15700_v59 }
0x11b7   :  { %10921 = vrcp.f32 %v8347_v57  ;;  %9782 = vmatmul.mubr.bf16.vlgmr.msra.gmra.mrb[184].mxu1 %v8389_v45  ;;  %v8345_v54 = vpop.xlane.xlu1 %8344  ;;  %v8376_v47 = vmul.f32 %v10912_v1, %v15702_v48 }
0x11b8   :  { %10923 = vrcp.f32 %v8345_v54 }
0x11b9   :  { %v10914_v11 = vpop.eup %10913  ;;  %v8390_v61 = vpack.c.bf16 %v8377_v56, %v8376_v47 }
0x11ba   :  { %v10916_v19 = vpop.eup %10915  ;;  %v8379_v51 = vmul.f32 %v10914_v11, %v15708_v49  ;;  %v8351_v30 = vpop.xlane.xlu0 %8350 }
0x11bb   :  { %v8378_v36 = vmul.f32 %v10916_v19, %v15710_v2  ;;  %10925 = vrcp.f32 %v8351_v30  ;;  %9785 = vmatprep.mubr.bf16.mxu1 %v8390_v61  ;;  %v8349_v25 = vpop.xlane.xlu1 %8348 }
0x11bc   :  { %10927 = vrcp.f32 %v8349_v25 }
0x11bd   :  { %v10918_v0 = vpop.eup %10917  ;;  %v8391_v59 = vpack.c.bf16 %v8379_v51, %v8378_v36 }
0x11be   :  { %v10920_v40 = vpop.eup %10919  ;;  %v8355_v12 = vpop.xlane.xlu0 %8354  ;;  %v8381_v3 = vmul.f32 %v10918_v0, %v15716_v18 }
0x11bf   :  { %10929 = vrcp.f32 %v8355_v12  ;;  %9786 = vmatmul.mubr.bf16.gmra.mrb[188].mxu1 %v8391_v59  ;;  %v8353_v48 = vpop.xlane.xlu1 %8352  ;;  %v8380_v15 = vmul.f32 %v10920_v40, %v15718_v5 }
0x11c0   :  { %10931 = vrcp.f32 %v8353_v48 }
0x11c1   :  { %v10922_v49 = vpop.eup %10921  ;;  %v8392_v32 = vpack.c.bf16 %v8381_v3, %v8380_v15 }
0x11c2   :  { %v10924_v38 = vpop.eup %10923  ;;  %v8383_v2 = vmul.f32 %v10922_v49, %v15722_v60 }
0x11c3   :  { %v8382_v31 = vmul.f32 %v10924_v38, %v15724_v26  ;;  %9789 = vmatprep.mubr.bf16.mxu1 %v8392_v32  ;;  %v60_v26 = vld [vmem:[%s15923_s2 + $0x10] sm:$0xff] }
0x11c4   :  { %v15791_v20 = vrot.slane %v60_v26, %v17181_v22 }
0x11c5   :  { %v10926_v16 = vpop.eup %10925  ;;  %v8393_v10 = vpack.c.bf16 %v8383_v2, %v8382_v31 }
0x11c6   :  { %v10928_v46 = vpop.eup %10927  ;;  %v8385_v7 = vmul.f32 %v10926_v16, %v15728_v37 }
0x11c7   :  { %9790 = vmatmul.mubr.bf16.gmra.mrb[192].mxu1 %v8393_v10  ;;  %v8384_v18 = vmul.f32 %v10928_v46, %v15730_v21 }
0x11c9   :  { %v10930_v50 = vpop.eup %10929  ;;  %v8394_v39 = vpack.c.bf16 %v8385_v7, %v8384_v18 }
0x11ca   :  { %v10932_v5 = vpop.eup %10931  ;;  %v8387_v28 = vmul.f32 %v10930_v50, %v15734_v41 }
0x11cb   :  { %v8386_v44 = vmul.f32 %v10932_v5, %v15736_v14  ;;  %9793 = vmatprep.mubr.bf16.mxu1 %v8394_v39 }
0x11cd   :  { %v8395_v60 = vpack.c.bf16 %v8387_v28, %v8386_v44 }
0x11cf   :  { %9794 = vmatmul.mubr.bf16.gmra.mrb[196].mxu1 %v8395_v60 }
0x1219   :  { %v9716_v37 = vpop.f32.mrb[168].mxu1 }
0x121a   :  { %v8507_v21 = vadd.f32 %v9716_v37, %v15791_v20  ;;  %v7947_v55 = vpop.f32.mrb[169].mxu1 }
0x121b   :  { %v8505_v17 = vadd.f32 %v15791_v20, %v7947_v55  ;;  %v9717_v13 = vpop.f32.mrb[170].mxu1 }
0x121c   :  { %8539 = vst [vmem:[%s15929_s8 + $0x10] sm:$0xff] %v8507_v21  ;;  %v8508_v41 = vadd.f32 %v9717_v13, %v15791_v20  ;;  %v7950_v14 = vpop.f32.mrb[171].mxu1 }
0x121d   :  { %8537 = vst [vmem:[%s15929_s8] sm:$0xff] %v8505_v17  ;;  %v8506_v22 = vadd.f32 %v15791_v20, %v7950_v14 }
0x121e   :  { %8540 = vst [vmem:[%s15929_s8 + $0x18] sm:$0xff] %v8508_v41 }
0x121f   :  { %8538 = vst [vmem:[%s15929_s8 + $0x8] sm:$0xff] %v8506_v22 }
0x1221   :  { %v9720_v43 = vpop.f32.mrb[172].mxu1 }
0x1222   :  { %v8511_v27 = vadd.f32 %v9720_v43, %v15791_v20  ;;  %v7963_v8 = vpop.f32.mrb[173].mxu1 }
0x1223   :  { %v8509_v4 = vadd.f32 %v15791_v20, %v7963_v8  ;;  %v9721_v42 = vpop.f32.mrb[174].mxu1 }
0x1224   :  { %8543 = vst [vmem:[%s15929_s8 + $0x30] sm:$0xff] %v8511_v27  ;;  %v8512_v33 = vadd.f32 %v9721_v42, %v15791_v20  ;;  %v7966_v52 = vpop.f32.mrb[175].mxu1 }
0x1225   :  { %8541 = vst [vmem:[%s15929_s8 + $0x20] sm:$0xff] %v8509_v4  ;;  %v8510_v29 = vadd.f32 %v15791_v20, %v7966_v52 }
0x1226   :  { %8544 = vst [vmem:[%s15929_s8 + $0x38] sm:$0xff] %v8512_v33 }
0x1227   :  { %8542 = vst [vmem:[%s15929_s8 + $0x28] sm:$0xff] %v8510_v29 }
0x1229   :  { %v9724_v35 = vpop.f32.mrb[176].mxu1 }
0x122a   :  { %v8515_v58 = vadd.f32 %v9724_v35, %v15791_v20  ;;  %v7979_v63 = vpop.f32.mrb[177].mxu1 }
0x122b   :  { %v8513_v34 = vadd.f32 %v15791_v20, %v7979_v63  ;;  %v9725_v62 = vpop.f32.mrb[178].mxu1 }
0x122c   :  { %8547 = vst [vmem:[%s15929_s8 + $0x50] sm:$0xff] %v8515_v58  ;;  %v8516_v6 = vadd.f32 %v9725_v62, %v15791_v20  ;;  %v7982_v53 = vpop.f32.mrb[179].mxu1 }
0x122d   :  { %8545 = vst [vmem:[%s15929_s8 + $0x40] sm:$0xff] %v8513_v34  ;;  %v8514_v23 = vadd.f32 %v15791_v20, %v7982_v53 }
0x122e   :  { %8548 = vst [vmem:[%s15929_s8 + $0x58] sm:$0xff] %v8516_v6 }
0x122f   :  { %8546 = vst [vmem:[%s15929_s8 + $0x48] sm:$0xff] %v8514_v23 }
0x1231   :  { %v9728_v9 = vpop.f32.mrb[180].mxu1 }
0x1232   :  { %v8519_v24 = vadd.f32 %v9728_v9, %v15791_v20  ;;  %v7995_v45 = vpop.f32.mrb[181].mxu1 }
0x1233   :  { %v8517_v1 = vadd.f32 %v15791_v20, %v7995_v45  ;;  %v9729_v57 = vpop.f32.mrb[182].mxu1 }
0x1234   :  { %8551 = vst [vmem:[%s15929_s8 + $0x70] sm:$0xff] %v8519_v24  ;;  %v8520_v56 = vadd.f32 %v9729_v57, %v15791_v20  ;;  %v7998_v54 = vpop.f32.mrb[183].mxu1 }
0x1235   :  { %8549 = vst [vmem:[%s15929_s8 + $0x60] sm:$0xff] %v8517_v1  ;;  %v8518_v47 = vadd.f32 %v15791_v20, %v7998_v54 }
0x1236   :  { %8552 = vst [vmem:[%s15929_s8 + $0x78] sm:$0xff] %v8520_v56 }
0x1237   :  { %8550 = vst [vmem:[%s15929_s8 + $0x68] sm:$0xff] %v8518_v47 }
0x128a   :  { %v9783_v11 = vpop.f32.mrb[184].mxu1 }
0x128b   :  { %v8523_v61 = vadd.f32 %v9783_v11, %v15791_v20  ;;  %v8438_v19 = vpop.f32.mrb[185].mxu1 }
0x128c   :  { %v8521_v51 = vadd.f32 %v15791_v20, %v8438_v19  ;;  %v9784_v30 = vpop.f32.mrb[186].mxu1 }
0x128d   :  { %8855 = vst [vmem:[%s15929_s8 + $0x90] sm:$0xff] %v8523_v61  ;;  %v8524_v36 = vadd.f32 %v9784_v30, %v15791_v20  ;;  %v8441_v25 = vpop.f32.mrb[187].mxu1 }
0x128e   :  { %8853 = vst [vmem:[%s15929_s8 + $0x80] sm:$0xff] %v8521_v51  ;;  %v8522_v0 = vadd.f32 %v15791_v20, %v8441_v25 }
0x128f   :  { %8856 = vst [vmem:[%s15929_s8 + $0x98] sm:$0xff] %v8524_v36 }
0x1290   :  { %8854 = vst [vmem:[%s15929_s8 + $0x88] sm:$0xff] %v8522_v0 }
0x1292   :  { %v9787_v59 = vpop.f32.mrb[188].mxu1 }
0x1293   :  { %v8527_v40 = vadd.f32 %v9787_v59, %v15791_v20  ;;  %v8454_v12 = vpop.f32.mrb[189].mxu1 }
0x1294   :  { %v8525_v3 = vadd.f32 %v15791_v20, %v8454_v12  ;;  %v9788_v48 = vpop.f32.mrb[190].mxu1 }
0x1295   :  { %8859 = vst [vmem:[%s15929_s8 + $0xb0] sm:$0xff] %v8527_v40  ;;  %v8528_v15 = vadd.f32 %v9788_v48, %v15791_v20  ;;  %v8457_v49 = vpop.f32.mrb[191].mxu1 }
0x1296   :  { %8857 = vst [vmem:[%s15929_s8 + $0xa0] sm:$0xff] %v8525_v3  ;;  %v8526_v32 = vadd.f32 %v15791_v20, %v8457_v49 }
0x1297   :  { %8860 = vst [vmem:[%s15929_s8 + $0xb8] sm:$0xff] %v8528_v15 }
0x1298   :  { %8858 = vst [vmem:[%s15929_s8 + $0xa8] sm:$0xff] %v8526_v32 }
0x129a   :  { %v9791_v38 = vpop.f32.mrb[192].mxu1 }
0x129b   :  { %v8531_v2 = vadd.f32 %v9791_v38, %v15791_v20  ;;  %v8470_v31 = vpop.f32.mrb[193].mxu1 }
0x129c   :  { %v8529_v16 = vadd.f32 %v15791_v20, %v8470_v31  ;;  %v9792_v10 = vpop.f32.mrb[194].mxu1 }
0x129d   :  { %8863 = vst [vmem:[%s15929_s8 + $0xd0] sm:$0xff] %v8531_v2  ;;  %v8532_v46 = vadd.f32 %v9792_v10, %v15791_v20  ;;  %v8473_v7 = vpop.f32.mrb[195].mxu1 }
0x129e   :  { %8861 = vst [vmem:[%s15929_s8 + $0xc0] sm:$0xff] %v8529_v16  ;;  %v8530_v18 = vadd.f32 %v15791_v20, %v8473_v7 }
0x129f   :  { %8864 = vst [vmem:[%s15929_s8 + $0xd8] sm:$0xff] %v8532_v46 }
0x12a0   :  { %8862 = vst [vmem:[%s15929_s8 + $0xc8] sm:$0xff] %v8530_v18 }
0x12a2   :  { %v9795_v50 = vpop.f32.mrb[196].mxu1 }
0x12a3   :  { %v8535_v39 = vadd.f32 %v9795_v50, %v15791_v20  ;;  %v8486_v5 = vpop.f32.mrb[197].mxu1 }
0x12a4   :  { %v8533_v28 = vadd.f32 %v15791_v20, %v8486_v5  ;;  %v9796_v44 = vpop.f32.mrb[198].mxu1 }
0x12a5   :  { %8867 = vst [vmem:[%s15929_s8 + $0xf0] sm:$0xff] %v8535_v39  ;;  %v8536_v60 = vadd.f32 %v9796_v44, %v15791_v20  ;;  %v8489_v26 = vpop.f32.mrb[199].mxu1 }
0x12a6   :  { %8865 = vst [vmem:[%s15929_s8 + $0xe0] sm:$0xff] %v8533_v28  ;;  %v8534_v37 = vadd.f32 %v15791_v20, %v8489_v26 }
0x12a7   :  { %8868 = vst [vmem:[%s15929_s8 + $0xf8] sm:$0xff] %v8536_v60 }
0x12a8   :  { %8866 = vst [vmem:[%s15929_s8 + $0xe8] sm:$0xff] %v8534_v37 }
0x12a9   :  { %8574 = vsyncpa [#allocation3], 1 }
0x12aa   :  { %8575 = vsyncpa [#allocation5], 1 }

</bundles_post_ra>
